<compile_context>
chip_gen: v6e
topology: v6e:2x2x1
jax: 0.10.0
libtpu: 0.0.40
codegen_flags: <defaults>
</compile_context>

<pallas_src>
import math
import jax
import jax.numpy as jnp
from jax.experimental import pallas as pl
from jax.experimental.pallas import tpu as pltpu

EPS = 1e-5
CPAD = 128                      # lane-dense channel count carried between layers
VMEM_LIMIT = 32 * 1024 * 1024   # explicit scoped-VMEM budget (safe on v5e/v6e/v7x)
WHOLE = pl.BlockSpec(memory_space=pltpu.MemorySpace.VMEM)   # whole-array VMEM block


# ---------------------------------------------------------------------------
# helpers
# ---------------------------------------------------------------------------
def pick_tile(m, target=512):
    """Row tile that exactly divides m: m itself if small, else a multiple of 8."""
    if m <= target:
        return m
    t = target - target % 8
    while t >= 8:
        if m % t == 0:
            return t
        t -= 8
    return m


def cparams(grid_rank):
    if grid_rank == 0:
        return pltpu.CompilerParams(vmem_limit_bytes=VMEM_LIMIT)
    return pltpu.CompilerParams(
        dimension_semantics=("parallel",) * grid_rank,
        vmem_limit_bytes=VMEM_LIMIT)


# ---------------------------------------------------------------------------
# Pallas kernels
# ---------------------------------------------------------------------------
def matmul_stats_kernel(p_ref, w_ref, y_ref, st_ref):
    """[TM, K] @ [K, C] (bf16 -> f32) + per-tile BN partial stats (sum, sum(y^2))."""
    y = jnp.dot(p_ref[...], w_ref[...], preferred_element_type=jnp.float32)
    y_ref[...] = y
    s1 = jnp.sum(y, axis=0, keepdims=True)
    s2 = jnp.sum(y * y, axis=0, keepdims=True)
    st_ref[0] = jnp.concatenate([s1, s2], axis=0)


def make_conv3x3s1_kernel(Ho, Wo, Cout):
    """Direct 3x3 stride-1 conv for one (pre-padded) NHWC sample; emits partial stats."""

    def kernel(x_ref, w_ref, y_ref, st_ref):
        # x_ref: (1, Ho+2, Wo+2, Cin) f32, w_ref: (9, Cin, Cout) bf16
        s1 = jnp.zeros((1, Cout), jnp.float32)
        s2 = jnp.zeros((1, Cout), jnp.float32)
        for ho in range(Ho):
            acc = jnp.zeros((Wo, Cout), jnp.float32)
            for di in range(3):
                for dj in range(3):
                    win = x_ref[0, ho + di, pl.ds(dj, Wo), :].astype(jnp.bfloat16)
                    acc = acc + jnp.dot(win, w_ref[di * 3 + dj],
                                        preferred_element_type=jnp.float32)
            y_ref[0, ho] = acc
            s1 = s1 + jnp.sum(acc, axis=0, keepdims=True)
            s2 = s2 + jnp.sum(acc * acc, axis=0, keepdims=True)
        st_ref[0] = jnp.concatenate([s1, s2], axis=0)

    return kernel


def make_bn_kernel(m_total, relu, has_residual):
    """BatchNorm(batch stats) [+ residual] [+ ReLU] on one row tile.

    Reduces the (small) partial-statistics array in-kernel; single-pass
    variance E[y^2] - mean^2, clamped at 0 for safety.
    """
    inv_m = 1.0 / float(m_total)

    def kernel(*refs):
        if has_residual:
            y_ref, st_ref, g_ref, b_ref, r_ref, o_ref = refs
        else:
            y_ref, st_ref, g_ref, b_ref, o_ref = refs
        s = jnp.sum(st_ref[...], axis=0)                       # (2, C)
        mean = s[0:1, :] * inv_m                               # (1, C)
        var = jnp.maximum(s[1:2, :] * inv_m - mean * mean, 0.0)
        scale = g_ref[...] * jax.lax.rsqrt(var + EPS)
        shift = b_ref[...] - mean * scale
        y = y_ref[...] * scale + shift
        if has_residual:
            y = y + r_ref[...]
        if relu:
            y = jnp.maximum(y, 0.0)
        o_ref[...] = y

    return kernel


def make_maxpool_kernel(Ho, Wo):
    """3x3 stride-2 maxpool on one sample, given even/odd column phases of the
    zero-padded input (post-ReLU, so 0-padding == -inf padding)."""

    def kernel(xe_ref, xo_ref, o_ref):
        for ho in range(Ho):
            m = None
            for di in range(3):
                r = 2 * ho + di
                a = xe_ref[0, r, pl.ds(0, Wo), :]   # input col 2*wo
                b = xo_ref[0, r, pl.ds(0, Wo), :]   # input col 2*wo + 1
                c = xe_ref[0, r, pl.ds(1, Wo), :]   # input col 2*wo + 2
                cand = jnp.maximum(jnp.maximum(a, b), c)
                m = cand if m is None else jnp.maximum(m, cand)
            o_ref[0, ho] = m

    return kernel


def make_head_kernel(hw):
    """Adaptive avg-pool over HW + Linear(C, 1) as a VPU reduction (no 1-col MXU pass)."""
    inv = 1.0 / float(hw)

    def kernel(x_ref, w_ref, b_ref, o_ref):
        pooled = jnp.sum(x_ref[...], axis=1) * inv             # (N, C)
        o_ref[...] = jnp.sum(pooled * w_ref[...], axis=-1, keepdims=True) + b_ref[...]

    return kernel


# ---------------------------------------------------------------------------
# pallas_call wrappers
# ---------------------------------------------------------------------------
def conv_matmul_stats(patches, w_mat):
    """M-tiled, pipelined matmul over im2col patches; returns (y, partial_stats)."""
    M, K = patches.shape
    C = w_mat.shape[1]
    TM = pick_tile(M)
    nt = M // TM
    return pl.pallas_call(
        matmul_stats_kernel,
        grid=(nt,),
        in_specs=[pl.BlockSpec((TM, K), lambda i: (i, 0)),
                  pl.BlockSpec((K, C), lambda i: (0, 0))],       # weights resident
        out_specs=(pl.BlockSpec((TM, C), lambda i: (i, 0)),
                   pl.BlockSpec((1, 2, C), lambda i: (i, 0, 0))),
        out_shape=(jax.ShapeDtypeStruct((M, C), jnp.float32),
                   jax.ShapeDtypeStruct((nt, 2, C), jnp.float32)),
        compiler_params=cparams(1),
    )(patches, w_mat)


def conv3x3_s1_stats(x, w_taps):
    """Direct 3x3 stride-1 pad-1 conv on NHWC x (no im2col HBM materialization)."""
    N, H, W, Cin = x.shape
    Cout = w_taps.shape[-1]
    xp = jnp.pad(x, ((0, 0), (1, 1), (1, 1), (0, 0)))            # cheap 1-px halo
    Hp, Wp = H + 2, W + 2
    return pl.pallas_call(
        make_conv3x3s1_kernel(H, W, Cout),
        grid=(N,),
        in_specs=[pl.BlockSpec((1, Hp, Wp, Cin), lambda n: (n, 0, 0, 0)),
                  pl.BlockSpec((9, Cin, Cout), lambda n: (0, 0, 0))],
        out_specs=(pl.BlockSpec((1, H, W, Cout), lambda n: (n, 0, 0, 0)),
                   pl.BlockSpec((1, 2, Cout), lambda n: (n, 0, 0))),
        out_shape=(jax.ShapeDtypeStruct((N, H, W, Cout), jnp.float32),
                   jax.ShapeDtypeStruct((N, 2, Cout), jnp.float32)),
        compiler_params=cparams(1),
    )(xp, w_taps)


def bn_act(y_flat, stats, gamma, beta, relu, residual=None):
    """Row-tiled BN(batch stats) [+residual] [+ReLU]; stats reduced in-kernel."""
    M, C = y_flat.shape
    P = stats.shape[0]
    TM = pick_tile(M)
    nt = M // TM
    inputs = [y_flat, stats, gamma, beta]
    in_specs = [pl.BlockSpec((TM, C), lambda i: (i, 0)),
                pl.BlockSpec((P, 2, C), lambda i: (0, 0, 0)),
                pl.BlockSpec((1, C), lambda i: (0, 0)),
                pl.BlockSpec((1, C), lambda i: (0, 0))]
    if residual is not None:
        inputs.append(residual)
        in_specs.append(pl.BlockSpec((TM, C), lambda i: (i, 0)))
    return pl.pallas_call(
        make_bn_kernel(M, relu, residual is not None),
        grid=(nt,),
        in_specs=in_specs,
        out_specs=pl.BlockSpec((TM, C), lambda i: (i, 0)),
        out_shape=jax.ShapeDtypeStruct((M, C), jnp.float32),
        compiler_params=cparams(1),
    )(*inputs)


def maxpool_3x3_s2_p1(x):
    """MaxPool2d(3, 2, 1).  Column phase split (one copy total, not 9x stacking)."""
    N, H, W, C = x.shape
    # post-ReLU activations are >= 0, so 0-padding is equivalent to -inf padding
    xp = jnp.pad(x, ((0, 0), (1, 1), (1, 1), (0, 0)))
    Hp = H + 2
    xe = xp[:, :, 0::2, :]
    xo = xp[:, :, 1::2, :]
    We, Wod = xe.shape[2], xo.shape[2]
    Ho = (H + 2 - 3) // 2 + 1
    Wo = (W + 2 - 3) // 2 + 1
    return pl.pallas_call(
        make_maxpool_kernel(Ho, Wo),
        grid=(N,),
        in_specs=[pl.BlockSpec((1, Hp, We, C), lambda n: (n, 0, 0, 0)),
                  pl.BlockSpec((1, Hp, Wod, C), lambda n: (n, 0, 0, 0))],
        out_specs=pl.BlockSpec((1, Ho, Wo, C), lambda n: (n, 0, 0, 0)),
        out_shape=jax.ShapeDtypeStruct((N, Ho, Wo, C), jnp.float32),
        compiler_params=cparams(1),
    )(xe, xo)


def im2col(x, k, stride, pad):
    """NHWC -> bf16 patches [N*Ho*Wo, k*k*C] (tap-major (di,dj,c) order).

    Only used for the strided convs (stem 7x7 s2, 3x3 s2, 1x1 s2)."""
    N, H, W, C = x.shape
    xp = jnp.pad(x, ((0, 0), (pad, pad), (pad, pad), (0, 0)))
    Ho = (H + 2 * pad - k) // stride + 1
    Wo = (W + 2 * pad - k) // stride + 1
    cols = []
    for di in range(k):
        for dj in range(k):
            cols.append(xp[:, di:di + stride * Ho:stride,
                           dj:dj + stride * Wo:stride, :])
    patches = jnp.stack(cols, axis=3).reshape(N * Ho * Wo, k * k * C)
    return patches.astype(jnp.bfloat16), Ho, Wo


# ---------------------------------------------------------------------------
# network structure
# ---------------------------------------------------------------------------
def basic_block_s1(x, bp):
    """BasicBlock, stride 1, identity shortcut (layer1 blocks, layer2 block 2)."""
    N, H, W, C = x.shape
    M = N * H * W
    y1, st1 = conv3x3_s1_stats(x, bp["w1"])
    a1 = bn_act(y1.reshape(M, C), st1, bp["g1"], bp["b1"], relu=True)
    a1 = a1.reshape(N, H, W, C)
    y2, st2 = conv3x3_s1_stats(a1, bp["w2"])
    out = bn_act(y2.reshape(M, C), st2, bp["g2"], bp["b2"], relu=True,
                 residual=x.reshape(M, C))
    return out.reshape(N, H, W, C)


def basic_block_down(x, bp, ds):
    """BasicBlock with stride-2 conv1 and 1x1 stride-2 downsample (layer2 block 1)."""
    N, H, W, C = x.shape
    # conv1: 3x3 stride 2 (im2col + tiled matmul)
    p1, Ho, Wo = im2col(x, 3, 2, 1)
    y1, st1 = conv_matmul_stats(p1, bp["w1"])
    a1 = bn_act(y1, st1, bp["g1"], bp["b1"], relu=True).reshape(N, Ho, Wo, C)
    # downsample shortcut: 1x1 stride 2 conv + BN (k=1 -> no patch duplication)
    pd, _, _ = im2col(x, 1, 2, 0)
    yd, std = conv_matmul_stats(pd, ds["w"])
    ident = bn_act(yd, std, ds["g"], ds["b"], relu=False)        # (N*Ho*Wo, C)
    # conv2: 3x3 stride 1 (direct)
    y2, st2 = conv3x3_s1_stats(a1, bp["w2"])
    out = bn_act(y2.reshape(N * Ho * Wo, C), st2, bp["g2"], bp["b2"],
                 relu=True, residual=ident)
    return out.reshape(N, Ho, Wo, C)


def resnet_forward(x_nchw, params):
    N = x_nchw.shape[0]
    x = jnp.transpose(x_nchw, (0, 2, 3, 1))                      # NCHW -> NHWC
    x = jnp.pad(x, ((0, 0), (0, 0), (0, 0), (0, 8 - x.shape[-1])))  # 5 -> 8 chans (K align)

    # stem: conv7x7 s2 p3 -> BN -> ReLU -> maxpool3x3 s2 p1
    p, Ho, Wo = im2col(x, 7, 2, 3)
    y, st = conv_matmul_stats(p, params["conv1_w"])
    a = bn_act(y, st, params["bn1_g"], params["bn1_b"], relu=True)
    a = a.reshape(N, Ho, Wo, CPAD)
    a = maxpool_3x3_s2_p1(a)

    # layer1: 64 -> 64 (carried as 128 padded lanes), stride 1, 2 blocks
    a = basic_block_s1(a, params["l1b1"])
    a = basic_block_s1(a, params["l1b2"])

    # layer2: 64 -> 128, stride 2, 2 blocks (first has downsample)
    a = basic_block_down(a, params["l2b1"], params["l2b1_ds"])
    a = basic_block_s1(a, params["l2b2"])

    # head: adaptive avg pool (1,1) -> view(-1, 1, 128) -> Linear(128, 1)
    Nb, Hb, Wb, Cb = a.shape
    yf = a.reshape(Nb, Hb * Wb, Cb)
    out = pl.pallas_call(
        make_head_kernel(Hb * Wb),
        out_shape=jax.ShapeDtypeStruct((Nb, 1), jnp.float32),
        in_specs=[WHOLE, WHOLE, WHOLE],
        out_specs=WHOLE,
        compiler_params=cparams(0),
    )(yf, params["fc_w"], params["fc_b"])
    return out.reshape(Nb, 1, 1)


# ---------------------------------------------------------------------------
# Deterministic parameter init (matches PyTorch init *distributions*)
# ---------------------------------------------------------------------------
def init_params(key):
    keys = iter(jax.random.split(key, 16))

    def conv_w(k, cin_real, cout_real, cin_pad, cout_pad):
        # kaiming_normal_(mode='fan_out', relu): std = sqrt(2 / (cout_real*k*k))
        std = math.sqrt(2.0 / (cout_real * k * k))
        w = std * jax.random.normal(next(keys), (k, k, cin_real, cout_real), jnp.float32)
        wp = jnp.zeros((k, k, cin_pad, cout_pad), jnp.float32)
        return wp.at[:, :, :cin_real, :cout_real].set(w)

    def mat(w):          # (k,k,cin,cout) -> im2col matrix [(di,dj,c), cout], bf16
        k, _, cin, cout = w.shape
        return w.reshape(k * k * cin, cout).astype(jnp.bfloat16)

    def taps(w):         # (k,k,cin,cout) -> per-tap weights (k*k, cin, cout), bf16
        k, _, cin, cout = w.shape
        return w.reshape(k * k, cin, cout).astype(jnp.bfloat16)

    def bn(c=CPAD):
        return jnp.ones((1, c), jnp.float32), jnp.zeros((1, c), jnp.float32)

    p = {}
    p["conv1_w"] = mat(conv_w(7, 5, 64, 8, CPAD))                # stem 7x7, 5->64
    p["bn1_g"], p["bn1_b"] = bn()

    def block_s1(cin_real, cout_real):
        g1, b1 = bn()
        g2, b2 = bn()
        return dict(w1=taps(conv_w(3, cin_real, cout_real, CPAD, CPAD)), g1=g1, b1=b1,
                    w2=taps(conv_w(3, cout_real, cout_real, CPAD, CPAD)), g2=g2, b2=b2)

    p["l1b1"] = block_s1(64, 64)
    p["l1b2"] = block_s1(64, 64)

    g1, b1 = bn()
    g2, b2 = bn()
    gd, bd = bn()
    p["l2b1"] = dict(w1=mat(conv_w(3, 64, 128, CPAD, CPAD)), g1=g1, b1=b1,
                     w2=taps(conv_w(3, 128, 128, CPAD, CPAD)), g2=g2, b2=b2)
    p["l2b1_ds"] = dict(w=mat(conv_w(1, 64, 128, CPAD, CPAD)), g=gd, b=bd)
    p["l2b2"] = block_s1(128, 128)

    bound = 1.0 / math.sqrt(128.0)                               # nn.Linear default init
    p["fc_w"] = jax.random.uniform(next(keys), (1, 128), jnp.float32, -bound, bound)
    p["fc_b"] = jax.random.uniform(next(keys), (1, 1), jnp.float32, -bound, bound)
    return p


if __name__ == "__main__":
    key = jax.random.PRNGKey(0)
    kp, kx = jax.random.split(key)
    params = init_params(kp)
    x = jax.random.normal(kx, (2, 5, 16, 16), jnp.float32)       # NCHW, 5 channels

    out = jax.jit(resnet_forward)(x, params)
    out = jax.block_until_ready(out)
    assert out.shape == (2, 1, 1), out.shape
    assert jnp.all(jnp.isfinite(out))
    print("KERNEL_OK")
</pallas_src>

<mosaic_0001>
module attributes {stable_mosaic.version = 11 : i64} {
  func.func @matmul_stats_kernel(%arg0: i32, %arg1: memref<128x392xbf16, #tpu.memory_space<vmem>>, %arg2: memref<392x128xbf16, #tpu.memory_space<vmem>>, %arg3: memref<128x128xf32, #tpu.memory_space<vmem>>, %arg4: memref<1x2x128xf32, #tpu.memory_space<vmem>>) attributes {dimension_semantics = [#tpu.dimension_semantics<parallel>], iteration_bounds = array<i64: 1>, scalar_prefetch = 0 : i64, scratch_operands = 0 : i64, tpu.core_type = #tpu.core_type<tc>, window_params = [{transform_indices = @transform_0, window_bounds = array<i64: 128, 392>}, {pipeline_mode = #tpu.pipeline_mode<synchronous>, transform_indices = @transform_1, window_bounds = array<i64: 392, 128>}, {transform_indices = @transform_2, window_bounds = array<i64: 128, 128>}, {transform_indices = @transform_3, window_bounds = array<i64: 1, 2, 128>}]} {
    %c0 = arith.constant 0 : index
    %c0_0 = arith.constant 0 : index
    %0 = vector.load %arg1[%c0, %c0_0] : memref<128x392xbf16, #tpu.memory_space<vmem>>, vector<128x392xbf16>
    %c0_1 = arith.constant 0 : index
    %c0_2 = arith.constant 0 : index
    %1 = vector.load %arg2[%c0_1, %c0_2] : memref<392x128xbf16, #tpu.memory_space<vmem>>, vector<392x128xbf16>
    %cst = arith.constant dense<0.000000e+00> : vector<128x128xf32>
    %2 = tpu.matmul %0, %1, %cst {dimension_numbers = #tpu.dot_dimension_numbers<[1], [0], [0], [1], [0, 0, 1, 1], [], []>} : vector<128x392xbf16>, vector<392x128xbf16>, vector<128x128xf32> -> vector<128x128xf32>
    %c0_3 = arith.constant 0 : index
    %c0_4 = arith.constant 0 : index
    %3 = vector.load %arg3[%c0_3, %c0_4] : memref<128x128xf32, #tpu.memory_space<vmem>>, vector<128x128xf32>
    tpu.vector_store %arg3[%c0_3, %c0_4], %2 {strides = array<i32>} : memref<128x128xf32, #tpu.memory_space<vmem>>, vector<128x128xf32>,
    %cst_5 = arith.constant dense<0.000000e+00> : vector<128xf32>
    %4 = vector.multi_reduction <add>, %2, %cst_5 [0] : vector<128x128xf32> to vector<128xf32>
    %5 = vector.shape_cast %4 : vector<128xf32> to vector<1x128xf32>
    %6 = arith.mulf %2, %2 : vector<128x128xf32>
    %cst_6 = arith.constant dense<0.000000e+00> : vector<128xf32>
    %7 = vector.multi_reduction <add>, %6, %cst_6 [0] : vector<128x128xf32> to vector<128xf32>
    %8 = vector.shape_cast %7 : vector<128xf32> to vector<1x128xf32>
    %9 = tpu.concatenate %5, %8 in 0 : vector<1x128xf32>, vector<1x128xf32> -> vector<2x128xf32>
    %c0_7 = arith.constant 0 : index
    %c0_8 = arith.constant 0 : index
    %c0_9 = arith.constant 0 : index
    %10 = vector.load %arg4[%c0_7, %c0_8, %c0_9] : memref<1x2x128xf32, #tpu.memory_space<vmem>>, vector<1x2x128xf32>
    %11 = vector.shape_cast %10 : vector<1x2x128xf32> to vector<2x128xf32>
    %12 = vector.shape_cast %9 : vector<2x128xf32> to vector<1x2x128xf32>
    tpu.vector_store %arg4[%c0_7, %c0_8, %c0_9], %12 {strides = array<i32>} : memref<1x2x128xf32, #tpu.memory_space<vmem>>, vector<1x2x128xf32>,
    return
  }
  func.func @transform_0(%arg0: i32) -> (i32, i32) {
    %c0_i32 = arith.constant 0 : i32
    %c0_i32_0 = arith.constant 0 : i32
    return %arg0, %c0_i32 : i32, i32
  }
  func.func @transform_1(%arg0: i32) -> (i32, i32) {
    %c0_i32 = arith.constant 0 : i32
    %c0_i32_0 = arith.constant 0 : i32
    %c0_i32_1 = arith.constant 0 : i32
    return %c0_i32, %c0_i32_0 : i32, i32
  }
  func.func @transform_2(%arg0: i32) -> (i32, i32) {
    %c0_i32 = arith.constant 0 : i32
    %c0_i32_0 = arith.constant 0 : i32
    return %arg0, %c0_i32 : i32, i32
  }
  func.func @transform_3(%arg0: i32) -> (i32, i32, i32) {
    %c0_i32 = arith.constant 0 : i32
    %c0_i32_0 = arith.constant 0 : i32
    %c0_i32_1 = arith.constant 0 : i32
    return %arg0, %c0_i32, %c0_i32_0 : i32, i32, i32
  }
}

module attributes {stable_mosaic.version = 11 : i64} {
  func.func @kernel(%arg0: i32, %arg1: memref<128x128xf32, #tpu.memory_space<vmem>>, %arg2: memref<1x2x128xf32, #tpu.memory_space<vmem>>, %arg3: memref<1x128xf32, #tpu.memory_space<vmem>>, %arg4: memref<1x128xf32, #tpu.memory_space<vmem>>, %arg5: memref<128x128xf32, #tpu.memory_space<vmem>>) attributes {dimension_semantics = [#tpu.dimension_semantics<parallel>], iteration_bounds = array<i64: 1>, scalar_prefetch = 0 : i64, scratch_operands = 0 : i64, tpu.core_type = #tpu.core_type<tc>, window_params = [{transform_indices = @transform_0, window_bounds = array<i64: 128, 128>}, {pipeline_mode = #tpu.pipeline_mode<synchronous>, transform_indices = @transform_1, window_bounds = array<i64: 1, 2, 128>}, {pipeline_mode = #tpu.pipeline_mode<synchronous>, transform_indices = @transform_2, window_bounds = array<i64: 1, 128>}, {pipeline_mode = #tpu.pipeline_mode<synchronous>, transform_indices = @transform_3, window_bounds = array<i64: 1, 128>}, {transform_indices = @transform_4, window_bounds = array<i64: 128, 128>}]} {
    %c0 = arith.constant 0 : index
    %c0_0 = arith.constant 0 : index
    %c0_1 = arith.constant 0 : index
    %0 = vector.load %arg2[%c0, %c0_0, %c0_1] : memref<1x2x128xf32, #tpu.memory_space<vmem>>, vector<1x2x128xf32>
    %cst = arith.constant dense<0.000000e+00> : vector<2x128xf32>
    %1 = vector.multi_reduction <add>, %0, %cst [0] : vector<1x2x128xf32> to vector<2x128xf32>
    %2 = vector.extract_strided_slice %1 {offsets = [0, 0], sizes = [1, 128], strides = [1, 1]} : vector<2x128xf32> to vector<1x128xf32>
    %cst_2 = arith.constant 7.812500e-03 : f32
    %3 = vector.broadcast %cst_2 : f32 to vector<1x128xf32>
    %4 = arith.mulf %2, %3 : vector<1x128xf32>
    %5 = vector.extract_strided_slice %1 {offsets = [1, 0], sizes = [1, 128], strides = [1, 1]} : vector<2x128xf32> to vector<1x128xf32>
    %cst_3 = arith.constant 7.812500e-03 : f32
    %6 = vector.broadcast %cst_3 : f32 to vector<1x128xf32>
    %7 = arith.mulf %5, %6 : vector<1x128xf32>
    %8 = arith.mulf %4, %4 : vector<1x128xf32>
    %9 = arith.subf %7, %8 : vector<1x128xf32>
    %cst_4 = arith.constant 0.000000e+00 : f32
    %10 = vector.broadcast %cst_4 : f32 to vector<1x128xf32>
    %11 = arith.maximumf %9, %10 : vector<1x128xf32>
    %c0_5 = arith.constant 0 : index
    %c0_6 = arith.constant 0 : index
    %12 = vector.load %arg3[%c0_5, %c0_6] : memref<1x128xf32, #tpu.memory_space<vmem>>, vector<1x128xf32>
    %cst_7 = arith.constant 9.99999974E-6 : f32
    %13 = vector.broadcast %cst_7 : f32 to vector<1x128xf32>
    %14 = arith.addf %11, %13 : vector<1x128xf32>
    %15 = math.rsqrt %14 : vector<1x128xf32>
    %16 = arith.mulf %12, %15 : vector<1x128xf32>
    %c0_8 = arith.constant 0 : index
    %c0_9 = arith.constant 0 : index
    %17 = vector.load %arg4[%c0_8, %c0_9] : memref<1x128xf32, #tpu.memory_space<vmem>>, vector<1x128xf32>
    %18 = arith.mulf %4, %16 : vector<1x128xf32>
    %19 = arith.subf %17, %18 : vector<1x128xf32>
    %c0_10 = arith.constant 0 : index
    %c0_11 = arith.constant 0 : index
    %20 = vector.load %arg1[%c0_10, %c0_11] : memref<128x128xf32, #tpu.memory_space<vmem>>, vector<128x128xf32>
    %21 = vector.broadcast %16 : vector<1x128xf32> to vector<128x128xf32>
    %22 = arith.mulf %20, %21 : vector<128x128xf32>
    %23 = vector.broadcast %19 : vector<1x128xf32> to vector<128x128xf32>
    %24 = arith.addf %22, %23 : vector<128x128xf32>
    %cst_12 = arith.constant 0.000000e+00 : f32
    %25 = vector.broadcast %cst_12 : f32 to vector<128x128xf32>
    %26 = arith.maximumf %24, %25 : vector<128x128xf32>
    %c0_13 = arith.constant 0 : index
    %c0_14 = arith.constant 0 : index
    %27 = vector.load %arg5[%c0_13, %c0_14] : memref<128x128xf32, #tpu.memory_space<vmem>>, vector<128x128xf32>
    tpu.vector_store %arg5[%c0_13, %c0_14], %26 {strides = array<i32>} : memref<128x128xf32, #tpu.memory_space<vmem>>, vector<128x128xf32>,
    return
  }
  func.func @transform_0(%arg0: i32) -> (i32, i32) {
    %c0_i32 = arith.constant 0 : i32
    %c0_i32_0 = arith.constant 0 : i32
    return %arg0, %c0_i32 : i32, i32
  }
  func.func @transform_1(%arg0: i32) -> (i32, i32, i32) {
    %c0_i32 = arith.constant 0 : i32
    %c0_i32_0 = arith.constant 0 : i32
    %c0_i32_1 = arith.constant 0 : i32
    %c0_i32_2 = arith.constant 0 : i32
    return %c0_i32, %c0_i32_0, %c0_i32_1 : i32, i32, i32
  }
  func.func @transform_2(%arg0: i32) -> (i32, i32) {
    %c0_i32 = arith.constant 0 : i32
    %c0_i32_0 = arith.constant 0 : i32
    %c0_i32_1 = arith.constant 0 : i32
    return %c0_i32, %c0_i32_0 : i32, i32
  }
  func.func @transform_3(%arg0: i32) -> (i32, i32) {
    %c0_i32 = arith.constant 0 : i32
    %c0_i32_0 = arith.constant 0 : i32
    %c0_i32_1 = arith.constant 0 : i32
    return %c0_i32, %c0_i32_0 : i32, i32
  }
  func.func @transform_4(%arg0: i32) -> (i32, i32) {
    %c0_i32 = arith.constant 0 : i32
    %c0_i32_0 = arith.constant 0 : i32
    return %arg0, %c0_i32 : i32, i32
  }
}

module attributes {stable_mosaic.version = 11 : i64} {
  func.func @kernel(%arg0: i32, %arg1: memref<1x10x5x128xf32, #tpu.memory_space<vmem>>, %arg2: memref<1x10x5x128xf32, #tpu.memory_space<vmem>>, %arg3: memref<1x4x4x128xf32, #tpu.memory_space<vmem>>) attributes {dimension_semantics = [#tpu.dimension_semantics<parallel>], iteration_bounds = array<i64: 2>, scalar_prefetch = 0 : i64, scratch_operands = 0 : i64, tpu.core_type = #tpu.core_type<tc>, window_params = [{transform_indices = @transform_0, window_bounds = array<i64: 1, 10, 5, 128>}, {transform_indices = @transform_1, window_bounds = array<i64: 1, 10, 5, 128>}, {transform_indices = @transform_2, window_bounds = array<i64: 1, 4, 4, 128>}]} {
    %c0 = arith.constant 0 : index
    %c0_0 = arith.constant 0 : index
    %c0_1 = arith.constant 0 : index
    %c0_2 = arith.constant 0 : index
    %0 = vector.load %arg1[%c0, %c0_0, %c0_1, %c0_2] : memref<1x10x5x128xf32, #tpu.memory_space<vmem>>, vector<1x1x4x128xf32>
    %1 = vector.shape_cast %0 : vector<1x1x4x128xf32> to vector<4x128xf32>
    %c0_3 = arith.constant 0 : index
    %c0_4 = arith.constant 0 : index
    %c0_5 = arith.constant 0 : index
    %c0_6 = arith.constant 0 : index
    %2 = vector.load %arg2[%c0_3, %c0_4, %c0_5, %c0_6] : memref<1x10x5x128xf32, #tpu.memory_space<vmem>>, vector<1x1x4x128xf32>
    %3 = vector.shape_cast %2 : vector<1x1x4x128xf32> to vector<4x128xf32>
    %c0_7 = arith.constant 0 : index
    %c0_8 = arith.constant 0 : index
    %c1 = arith.constant 1 : index
    %c0_9 = arith.constant 0 : index
    %4 = vector.load %arg1[%c0_7, %c0_8, %c1, %c0_9] : memref<1x10x5x128xf32, #tpu.memory_space<vmem>>, vector<1x1x4x128xf32>
    %5 = vector.shape_cast %4 : vector<1x1x4x128xf32> to vector<4x128xf32>
    %6 = arith.maximumf %1, %3 : vector<4x128xf32>
    %7 = arith.maximumf %6, %5 : vector<4x128xf32>
    %c0_10 = arith.constant 0 : index
    %c1_11 = arith.constant 1 : index
    %c0_12 = arith.constant 0 : index
    %c0_13 = arith.constant 0 : index
    %8 = vector.load %arg1[%c0_10, %c1_11, %c0_12, %c0_13] : memref<1x10x5x128xf32, #tpu.memory_space<vmem>>, vector<1x1x4x128xf32>
    %9 = vector.shape_cast %8 : vector<1x1x4x128xf32> to vector<4x128xf32>
    %c0_14 = arith.constant 0 : index
    %c1_15 = arith.constant 1 : index
    %c0_16 = arith.constant 0 : index
    %c0_17 = arith.constant 0 : index
    %10 = vector.load %arg2[%c0_14, %c1_15, %c0_16, %c0_17] : memref<1x10x5x128xf32, #tpu.memory_space<vmem>>, vector<1x1x4x128xf32>
    %11 = vector.shape_cast %10 : vector<1x1x4x128xf32> to vector<4x128xf32>
    %c0_18 = arith.constant 0 : index
    %c1_19 = arith.constant 1 : index
    %c1_20 = arith.constant 1 : index
    %c0_21 = arith.constant 0 : index
    %12 = vector.load %arg1[%c0_18, %c1_19, %c1_20, %c0_21] : memref<1x10x5x128xf32, #tpu.memory_space<vmem>>, vector<1x1x4x128xf32>
    %13 = vector.shape_cast %12 : vector<1x1x4x128xf32> to vector<4x128xf32>
    %14 = arith.maximumf %9, %11 : vector<4x128xf32>
    %15 = arith.maximumf %14, %13 : vector<4x128xf32>
    %16 = arith.maximumf %7, %15 : vector<4x128xf32>
    %c0_22 = arith.constant 0 : index
    %c2 = arith.constant 2 : index
    %c0_23 = arith.constant 0 : index
    %c0_24 = arith.constant 0 : index
    %17 = vector.load %arg1[%c0_22, %c2, %c0_23, %c0_24] : memref<1x10x5x128xf32, #tpu.memory_space<vmem>>, vector<1x1x4x128xf32>
    %18 = vector.shape_cast %17 : vector<1x1x4x128xf32> to vector<4x128xf32>
    %c0_25 = arith.constant 0 : index
    %c2_26 = arith.constant 2 : index
    %c0_27 = arith.constant 0 : index
    %c0_28 = arith.constant 0 : index
    %19 = vector.load %arg2[%c0_25, %c2_26, %c0_27, %c0_28] : memref<1x10x5x128xf32, #tpu.memory_space<vmem>>, vector<1x1x4x128xf32>
    %20 = vector.shape_cast %19 : vector<1x1x4x128xf32> to vector<4x128xf32>
    %c0_29 = arith.constant 0 : index
    %c2_30 = arith.constant 2 : index
    %c1_31 = arith.constant 1 : index
    %c0_32 = arith.constant 0 : index
    %21 = vector.load %arg1[%c0_29, %c2_30, %c1_31, %c0_32] : memref<1x10x5x128xf32, #tpu.memory_space<vmem>>, vector<1x1x4x128xf32>
    %22 = vector.shape_cast %21 : vector<1x1x4x128xf32> to vector<4x128xf32>
    %23 = arith.maximumf %18, %20 : vector<4x128xf32>
    %24 = arith.maximumf %23, %22 : vector<4x128xf32>
    %25 = arith.maximumf %16, %24 : vector<4x128xf32>
    %c0_33 = arith.constant 0 : index
    %c0_34 = arith.constant 0 : index
    %c0_35 = arith.constant 0 : index
    %c0_36 = arith.constant 0 : index
    %26 = vector.load %arg3[%c0_33, %c0_34, %c0_35, %c0_36] : memref<1x4x4x128xf32, #tpu.memory_space<vmem>>, vector<1x1x4x128xf32>
    %27 = vector.shape_cast %26 : vector<1x1x4x128xf32> to vector<4x128xf32>
    %28 = vector.shape_cast %25 : vector<4x128xf32> to vector<1x1x4x128xf32>
    tpu.vector_store %arg3[%c0_33, %c0_34, %c0_35, %c0_36], %28 {strides = array<i32>} : memref<1x4x4x128xf32, #tpu.memory_space<vmem>>, vector<1x1x4x128xf32>,
    %c0_37 = arith.constant 0 : index
    %c2_38 = arith.constant 2 : index
    %c0_39 = arith.constant 0 : index
    %c0_40 = arith.constant 0 : index
    %29 = vector.load %arg1[%c0_37, %c2_38, %c0_39, %c0_40] : memref<1x10x5x128xf32, #tpu.memory_space<vmem>>, vector<1x1x4x128xf32>
    %30 = vector.shape_cast %29 : vector<1x1x4x128xf32> to vector<4x128xf32>
    %c0_41 = arith.constant 0 : index
    %c2_42 = arith.constant 2 : index
    %c0_43 = arith.constant 0 : index
    %c0_44 = arith.constant 0 : index
    %31 = vector.load %arg2[%c0_41, %c2_42, %c0_43, %c0_44] : memref<1x10x5x128xf32, #tpu.memory_space<vmem>>, vector<1x1x4x128xf32>
    %32 = vector.shape_cast %31 : vector<1x1x4x128xf32> to vector<4x128xf32>
    %c0_45 = arith.constant 0 : index
    %c2_46 = arith.constant 2 : index
    %c1_47 = arith.constant 1 : index
    %c0_48 = arith.constant 0 : index
    %33 = vector.load %arg1[%c0_45, %c2_46, %c1_47, %c0_48] : memref<1x10x5x128xf32, #tpu.memory_space<vmem>>, vector<1x1x4x128xf32>
    %34 = vector.shape_cast %33 : vector<1x1x4x128xf32> to vector<4x128xf32>
    %35 = arith.maximumf %30, %32 : vector<4x128xf32>
    %36 = arith.maximumf %35, %34 : vector<4x128xf32>
    %c0_49 = arith.constant 0 : index
    %c3 = arith.constant 3 : index
    %c0_50 = arith.constant 0 : index
    %c0_51 = arith.constant 0 : index
    %37 = vector.load %arg1[%c0_49, %c3, %c0_50, %c0_51] : memref<1x10x5x128xf32, #tpu.memory_space<vmem>>, vector<1x1x4x128xf32>
    %38 = vector.shape_cast %37 : vector<1x1x4x128xf32> to vector<4x128xf32>
    %c0_52 = arith.constant 0 : index
    %c3_53 = arith.constant 3 : index
    %c0_54 = arith.constant 0 : index
    %c0_55 = arith.constant 0 : index
    %39 = vector.load %arg2[%c0_52, %c3_53, %c0_54, %c0_55] : memref<1x10x5x128xf32, #tpu.memory_space<vmem>>, vector<1x1x4x128xf32>
    %40 = vector.shape_cast %39 : vector<1x1x4x128xf32> to vector<4x128xf32>
    %c0_56 = arith.constant 0 : index
    %c3_57 = arith.constant 3 : index
    %c1_58 = arith.constant 1 : index
    %c0_59 = arith.constant 0 : index
    %41 = vector.load %arg1[%c0_56, %c3_57, %c1_58, %c0_59] : memref<1x10x5x128xf32, #tpu.memory_space<vmem>>, vector<1x1x4x128xf32>
    %42 = vector.shape_cast %41 : vector<1x1x4x128xf32> to vector<4x128xf32>
    %43 = arith.maximumf %38, %40 : vector<4x128xf32>
    %44 = arith.maximumf %43, %42 : vector<4x128xf32>
    %45 = arith.maximumf %36, %44 : vector<4x128xf32>
    %c0_60 = arith.constant 0 : index
    %c4 = arith.constant 4 : index
    %c0_61 = arith.constant 0 : index
    %c0_62 = arith.constant 0 : index
    %46 = vector.load %arg1[%c0_60, %c4, %c0_61, %c0_62] : memref<1x10x5x128xf32, #tpu.memory_space<vmem>>, vector<1x1x4x128xf32>
    %47 = vector.shape_cast %46 : vector<1x1x4x128xf32> to vector<4x128xf32>
    %c0_63 = arith.constant 0 : index
    %c4_64 = arith.constant 4 : index
    %c0_65 = arith.constant 0 : index
    %c0_66 = arith.constant 0 : index
    %48 = vector.load %arg2[%c0_63, %c4_64, %c0_65, %c0_66] : memref<1x10x5x128xf32, #tpu.memory_space<vmem>>, vector<1x1x4x128xf32>
    %49 = vector.shape_cast %48 : vector<1x1x4x128xf32> to vector<4x128xf32>
    %c0_67 = arith.constant 0 : index
    %c4_68 = arith.constant 4 : index
    %c1_69 = arith.constant 1 : index
    %c0_70 = arith.constant 0 : index
    %50 = vector.load %arg1[%c0_67, %c4_68, %c1_69, %c0_70] : memref<1x10x5x128xf32, #tpu.memory_space<vmem>>, vector<1x1x4x128xf32>
    %51 = vector.shape_cast %50 : vector<1x1x4x128xf32> to vector<4x128xf32>
    %52 = arith.maximumf %47, %49 : vector<4x128xf32>
    %53 = arith.maximumf %52, %51 : vector<4x128xf32>
    %54 = arith.maximumf %45, %53 : vector<4x128xf32>
    %c0_71 = arith.constant 0 : index
    %c1_72 = arith.constant 1 : index
    %c0_73 = arith.constant 0 : index
    %c0_74 = arith.constant 0 : index
    %55 = vector.load %arg3[%c0_71, %c1_72, %c0_73, %c0_74] : memref<1x4x4x128xf32, #tpu.memory_space<vmem>>, vector<1x1x4x128xf32>
    %56 = vector.shape_cast %55 : vector<1x1x4x128xf32> to vector<4x128xf32>
    %57 = vector.shape_cast %54 : vector<4x128xf32> to vector<1x1x4x128xf32>
    tpu.vector_store %arg3[%c0_71, %c1_72, %c0_73, %c0_74], %57 {strides = array<i32>} : memref<1x4x4x128xf32, #tpu.memory_space<vmem>>, vector<1x1x4x128xf32>,
    %c0_75 = arith.constant 0 : index
    %c4_76 = arith.constant 4 : index
    %c0_77 = arith.constant 0 : index
    %c0_78 = arith.constant 0 : index
    %58 = vector.load %arg1[%c0_75, %c4_76, %c0_77, %c0_78] : memref<1x10x5x128xf32, #tpu.memory_space<vmem>>, vector<1x1x4x128xf32>
    %59 = vector.shape_cast %58 : vector<1x1x4x128xf32> to vector<4x128xf32>
    %c0_79 = arith.constant 0 : index
    %c4_80 = arith.constant 4 : index
    %c0_81 = arith.constant 0 : index
    %c0_82 = arith.constant 0 : index
    %60 = vector.load %arg2[%c0_79, %c4_80, %c0_81, %c0_82] : memref<1x10x5x128xf32, #tpu.memory_space<vmem>>, vector<1x1x4x128xf32>
    %61 = vector.shape_cast %60 : vector<1x1x4x128xf32> to vector<4x128xf32>
    %c0_83 = arith.constant 0 : index
    %c4_84 = arith.constant 4 : index
    %c1_85 = arith.constant 1 : index
    %c0_86 = arith.constant 0 : index
    %62 = vector.load %arg1[%c0_83, %c4_84, %c1_85, %c0_86] : memref<1x10x5x128xf32, #tpu.memory_space<vmem>>, vector<1x1x4x128xf32>
    %63 = vector.shape_cast %62 : vector<1x1x4x128xf32> to vector<4x128xf32>
    %64 = arith.maximumf %59, %61 : vector<4x128xf32>
    %65 = arith.maximumf %64, %63 : vector<4x128xf32>
    %c0_87 = arith.constant 0 : index
    %c5 = arith.constant 5 : index
    %c0_88 = arith.constant 0 : index
    %c0_89 = arith.constant 0 : index
    %66 = vector.load %arg1[%c0_87, %c5, %c0_88, %c0_89] : memref<1x10x5x128xf32, #tpu.memory_space<vmem>>, vector<1x1x4x128xf32>
    %67 = vector.shape_cast %66 : vector<1x1x4x128xf32> to vector<4x128xf32>
    %c0_90 = arith.constant 0 : index
    %c5_91 = arith.constant 5 : index
    %c0_92 = arith.constant 0 : index
    %c0_93 = arith.constant 0 : index
    %68 = vector.load %arg2[%c0_90, %c5_91, %c0_92, %c0_93] : memref<1x10x5x128xf32, #tpu.memory_space<vmem>>, vector<1x1x4x128xf32>
    %69 = vector.shape_cast %68 : vector<1x1x4x128xf32> to vector<4x128xf32>
    %c0_94 = arith.constant 0 : index
    %c5_95 = arith.constant 5 : index
    %c1_96 = arith.constant 1 : index
    %c0_97 = arith.constant 0 : index
    %70 = vector.load %arg1[%c0_94, %c5_95, %c1_96, %c0_97] : memref<1x10x5x128xf32, #tpu.memory_space<vmem>>, vector<1x1x4x128xf32>
    %71 = vector.shape_cast %70 : vector<1x1x4x128xf32> to vector<4x128xf32>
    %72 = arith.maximumf %67, %69 : vector<4x128xf32>
    %73 = arith.maximumf %72, %71 : vector<4x128xf32>
    %74 = arith.maximumf %65, %73 : vector<4x128xf32>
    %c0_98 = arith.constant 0 : index
    %c6 = arith.constant 6 : index
    %c0_99 = arith.constant 0 : index
    %c0_100 = arith.constant 0 : index
    %75 = vector.load %arg1[%c0_98, %c6, %c0_99, %c0_100] : memref<1x10x5x128xf32, #tpu.memory_space<vmem>>, vector<1x1x4x128xf32>
    %76 = vector.shape_cast %75 : vector<1x1x4x128xf32> to vector<4x128xf32>
    %c0_101 = arith.constant 0 : index
    %c6_102 = arith.constant 6 : index
    %c0_103 = arith.constant 0 : index
    %c0_104 = arith.constant 0 : index
    %77 = vector.load %arg2[%c0_101, %c6_102, %c0_103, %c0_104] : memref<1x10x5x128xf32, #tpu.memory_space<vmem>>, vector<1x1x4x128xf32>
    %78 = vector.shape_cast %77 : vector<1x1x4x128xf32> to vector<4x128xf32>
    %c0_105 = arith.constant 0 : index
    %c6_106 = arith.constant 6 : index
    %c1_107 = arith.constant 1 : index
    %c0_108 = arith.constant 0 : index
    %79 = vector.load %arg1[%c0_105, %c6_106, %c1_107, %c0_108] : memref<1x10x5x128xf32, #tpu.memory_space<vmem>>, vector<1x1x4x128xf32>
    %80 = vector.shape_cast %79 : vector<1x1x4x128xf32> to vector<4x128xf32>
    %81 = arith.maximumf %76, %78 : vector<4x128xf32>
    %82 = arith.maximumf %81, %80 : vector<4x128xf32>
    %83 = arith.maximumf %74, %82 : vector<4x128xf32>
    %c0_109 = arith.constant 0 : index
    %c2_110 = arith.constant 2 : index
    %c0_111 = arith.constant 0 : index
    %c0_112 = arith.constant 0 : index
    %84 = vector.load %arg3[%c0_109, %c2_110, %c0_111, %c0_112] : memref<1x4x4x128xf32, #tpu.memory_space<vmem>>, vector<1x1x4x128xf32>
    %85 = vector.shape_cast %84 : vector<1x1x4x128xf32> to vector<4x128xf32>
    %86 = vector.shape_cast %83 : vector<4x128xf32> to vector<1x1x4x128xf32>
    tpu.vector_store %arg3[%c0_109, %c2_110, %c0_111, %c0_112], %86 {strides = array<i32>} : memref<1x4x4x128xf32, #tpu.memory_space<vmem>>, vector<1x1x4x128xf32>,
    %c0_113 = arith.constant 0 : index
    %c6_114 = arith.constant 6 : index
    %c0_115 = arith.constant 0 : index
    %c0_116 = arith.constant 0 : index
    %87 = vector.load %arg1[%c0_113, %c6_114, %c0_115, %c0_116] : memref<1x10x5x128xf32, #tpu.memory_space<vmem>>, vector<1x1x4x128xf32>
    %88 = vector.shape_cast %87 : vector<1x1x4x128xf32> to vector<4x128xf32>
    %c0_117 = arith.constant 0 : index
    %c6_118 = arith.constant 6 : index
    %c0_119 = arith.constant 0 : index
    %c0_120 = arith.constant 0 : index
    %89 = vector.load %arg2[%c0_117, %c6_118, %c0_119, %c0_120] : memref<1x10x5x128xf32, #tpu.memory_space<vmem>>, vector<1x1x4x128xf32>
    %90 = vector.shape_cast %89 : vector<1x1x4x128xf32> to vector<4x128xf32>
    %c0_121 = arith.constant 0 : index
    %c6_122 = arith.constant 6 : index
    %c1_123 = arith.constant 1 : index
    %c0_124 = arith.constant 0 : index
    %91 = vector.load %arg1[%c0_121, %c6_122, %c1_123, %c0_124] : memref<1x10x5x128xf32, #tpu.memory_space<vmem>>, vector<1x1x4x128xf32>
    %92 = vector.shape_cast %91 : vector<1x1x4x128xf32> to vector<4x128xf32>
    %93 = arith.maximumf %88, %90 : vector<4x128xf32>
    %94 = arith.maximumf %93, %92 : vector<4x128xf32>
    %c0_125 = arith.constant 0 : index
    %c7 = arith.constant 7 : index
    %c0_126 = arith.constant 0 : index
    %c0_127 = arith.constant 0 : index
    %95 = vector.load %arg1[%c0_125, %c7, %c0_126, %c0_127] : memref<1x10x5x128xf32, #tpu.memory_space<vmem>>, vector<1x1x4x128xf32>
    %96 = vector.shape_cast %95 : vector<1x1x4x128xf32> to vector<4x128xf32>
    %c0_128 = arith.constant 0 : index
    %c7_129 = arith.constant 7 : index
    %c0_130 = arith.constant 0 : index
    %c0_131 = arith.constant 0 : index
    %97 = vector.load %arg2[%c0_128, %c7_129, %c0_130, %c0_131] : memref<1x10x5x128xf32, #tpu.memory_space<vmem>>, vector<1x1x4x128xf32>
    %98 = vector.shape_cast %97 : vector<1x1x4x128xf32> to vector<4x128xf32>
    %c0_132 = arith.constant 0 : index
    %c7_133 = arith.constant 7 : index
    %c1_134 = arith.constant 1 : index
    %c0_135 = arith.constant 0 : index
    %99 = vector.load %arg1[%c0_132, %c7_133, %c1_134, %c0_135] : memref<1x10x5x128xf32, #tpu.memory_space<vmem>>, vector<1x1x4x128xf32>
    %100 = vector.shape_cast %99 : vector<1x1x4x128xf32> to vector<4x128xf32>
    %101 = arith.maximumf %96, %98 : vector<4x128xf32>
    %102 = arith.maximumf %101, %100 : vector<4x128xf32>
    %103 = arith.maximumf %94, %102 : vector<4x128xf32>
    %c0_136 = arith.constant 0 : index
    %c8 = arith.constant 8 : index
    %c0_137 = arith.constant 0 : index
    %c0_138 = arith.constant 0 : index
    %104 = vector.load %arg1[%c0_136, %c8, %c0_137, %c0_138] : memref<1x10x5x128xf32, #tpu.memory_space<vmem>>, vector<1x1x4x128xf32>
    %105 = vector.shape_cast %104 : vector<1x1x4x128xf32> to vector<4x128xf32>
    %c0_139 = arith.constant 0 : index
    %c8_140 = arith.constant 8 : index
    %c0_141 = arith.constant 0 : index
    %c0_142 = arith.constant 0 : index
    %106 = vector.load %arg2[%c0_139, %c8_140, %c0_141, %c0_142] : memref<1x10x5x128xf32, #tpu.memory_space<vmem>>, vector<1x1x4x128xf32>
    %107 = vector.shape_cast %106 : vector<1x1x4x128xf32> to vector<4x128xf32>
    %c0_143 = arith.constant 0 : index
    %c8_144 = arith.constant 8 : index
    %c1_145 = arith.constant 1 : index
    %c0_146 = arith.constant 0 : index
    %108 = vector.load %arg1[%c0_143, %c8_144, %c1_145, %c0_146] : memref<1x10x5x128xf32, #tpu.memory_space<vmem>>, vector<1x1x4x128xf32>
    %109 = vector.shape_cast %108 : vector<1x1x4x128xf32> to vector<4x128xf32>
    %110 = arith.maximumf %105, %107 : vector<4x128xf32>
    %111 = arith.maximumf %110, %109 : vector<4x128xf32>
    %112 = arith.maximumf %103, %111 : vector<4x128xf32>
    %c0_147 = arith.constant 0 : index
    %c3_148 = arith.constant 3 : index
    %c0_149 = arith.constant 0 : index
    %c0_150 = arith.constant 0 : index
    %113 = vector.load %arg3[%c0_147, %c3_148, %c0_149, %c0_150] : memref<1x4x4x128xf32, #tpu.memory_space<vmem>>, vector<1x1x4x128xf32>
    %114 = vector.shape_cast %113 : vector<1x1x4x128xf32> to vector<4x128xf32>
    %115 = vector.shape_cast %112 : vector<4x128xf32> to vector<1x1x4x128xf32>
    tpu.vector_store %arg3[%c0_147, %c3_148, %c0_149, %c0_150], %115 {strides = array<i32>} : memref<1x4x4x128xf32, #tpu.memory_space<vmem>>, vector<1x1x4x128xf32>,
    return
  }
  func.func @transform_0(%arg0: i32) -> (i32, i32, i32, i32) {
    %c0_i32 = arith.constant 0 : i32
    %c0_i32_0 = arith.constant 0 : i32
    %c0_i32_1 = arith.constant 0 : i32
    %c0_i32_2 = arith.constant 0 : i32
    return %arg0, %c0_i32, %c0_i32_0, %c0_i32_1 : i32, i32, i32, i32
  }
  func.func @transform_1(%arg0: i32) -> (i32, i32, i32, i32) {
    %c0_i32 = arith.constant 0 : i32
    %c0_i32_0 = arith.constant 0 : i32
    %c0_i32_1 = arith.constant 0 : i32
    %c0_i32_2 = arith.constant 0 : i32
    return %arg0, %c0_i32, %c0_i32_0, %c0_i32_1 : i32, i32, i32, i32
  }
  func.func @transform_2(%arg0: i32) -> (i32, i32, i32, i32) {
    %c0_i32 = arith.constant 0 : i32
    %c0_i32_0 = arith.constant 0 : i32
    %c0_i32_1 = arith.constant 0 : i32
    %c0_i32_2 = arith.constant 0 : i32
    return %arg0, %c0_i32, %c0_i32_0, %c0_i32_1 : i32, i32, i32, i32
  }
}

module attributes {stable_mosaic.version = 11 : i64} {
  func.func @kernel(%arg0: i32, %arg1: memref<1x6x6x128xf32, #tpu.memory_space<vmem>>, %arg2: memref<9x128x128xbf16, #tpu.memory_space<vmem>>, %arg3: memref<1x4x4x128xf32, #tpu.memory_space<vmem>>, %arg4: memref<1x2x128xf32, #tpu.memory_space<vmem>>) attributes {dimension_semantics = [#tpu.dimension_semantics<parallel>], iteration_bounds = array<i64: 2>, scalar_prefetch = 0 : i64, scratch_operands = 0 : i64, tpu.core_type = #tpu.core_type<tc>, window_params = [{transform_indices = @transform_0, window_bounds = array<i64: 1, 6, 6, 128>}, {pipeline_mode = #tpu.pipeline_mode<synchronous>, transform_indices = @transform_1, window_bounds = array<i64: 9, 128, 128>}, {transform_indices = @transform_2, window_bounds = array<i64: 1, 4, 4, 128>}, {transform_indices = @transform_3, window_bounds = array<i64: 1, 2, 128>}]} {
    %cst = arith.constant 0.000000e+00 : f32
    %0 = vector.broadcast %cst : f32 to vector<1x128xf32>
    %cst_0 = arith.constant 0.000000e+00 : f32
    %1 = vector.broadcast %cst_0 : f32 to vector<1x128xf32>
    %cst_1 = arith.constant 0.000000e+00 : f32
    %2 = vector.broadcast %cst_1 : f32 to vector<4x128xf32>
    %c0 = arith.constant 0 : index
    %c0_2 = arith.constant 0 : index
    %c0_3 = arith.constant 0 : index
    %c0_4 = arith.constant 0 : index
    %3 = vector.load %arg1[%c0, %c0_2, %c0_3, %c0_4] : memref<1x6x6x128xf32, #tpu.memory_space<vmem>>, vector<1x1x4x128xf32>
    %4 = vector.shape_cast %3 : vector<1x1x4x128xf32> to vector<4x128xf32>
    %5 = arith.truncf %4 : vector<4x128xf32> to vector<4x128xbf16>
    %c0_5 = arith.constant 0 : index
    %c0_6 = arith.constant 0 : index
    %c0_7 = arith.constant 0 : index
    %6 = vector.load %arg2[%c0_5, %c0_6, %c0_7] : memref<9x128x128xbf16, #tpu.memory_space<vmem>>, vector<1x128x128xbf16>
    %7 = vector.shape_cast %6 : vector<1x128x128xbf16> to vector<128x128xbf16>
    %cst_8 = arith.constant dense<0.000000e+00> : vector<4x128xf32>
    %8 = tpu.matmul %5, %7, %cst_8 {dimension_numbers = #tpu.dot_dimension_numbers<[1], [0], [0], [1], [0, 0, 1, 1], [], []>} : vector<4x128xbf16>, vector<128x128xbf16>, vector<4x128xf32> -> vector<4x128xf32>
    %9 = arith.addf %2, %8 : vector<4x128xf32>
    %c0_9 = arith.constant 0 : index
    %c0_10 = arith.constant 0 : index
    %c1 = arith.constant 1 : index
    %c0_11 = arith.constant 0 : index
    %10 = vector.load %arg1[%c0_9, %c0_10, %c1, %c0_11] : memref<1x6x6x128xf32, #tpu.memory_space<vmem>>, vector<1x1x4x128xf32>
    %11 = vector.shape_cast %10 : vector<1x1x4x128xf32> to vector<4x128xf32>
    %12 = arith.truncf %11 : vector<4x128xf32> to vector<4x128xbf16>
    %c1_12 = arith.constant 1 : index
    %c0_13 = arith.constant 0 : index
    %c0_14 = arith.constant 0 : index
    %13 = vector.load %arg2[%c1_12, %c0_13, %c0_14] : memref<9x128x128xbf16, #tpu.memory_space<vmem>>, vector<1x128x128xbf16>
    %14 = vector.shape_cast %13 : vector<1x128x128xbf16> to vector<128x128xbf16>
    %cst_15 = arith.constant dense<0.000000e+00> : vector<4x128xf32>
    %15 = tpu.matmul %12, %14, %cst_15 {dimension_numbers = #tpu.dot_dimension_numbers<[1], [0], [0], [1], [0, 0, 1, 1], [], []>} : vector<4x128xbf16>, vector<128x128xbf16>, vector<4x128xf32> -> vector<4x128xf32>
    %16 = arith.addf %9, %15 : vector<4x128xf32>
    %c0_16 = arith.constant 0 : index
    %c0_17 = arith.constant 0 : index
    %c2 = arith.constant 2 : index
    %c0_18 = arith.constant 0 : index
    %17 = vector.load %arg1[%c0_16, %c0_17, %c2, %c0_18] : memref<1x6x6x128xf32, #tpu.memory_space<vmem>>, vector<1x1x4x128xf32>
    %18 = vector.shape_cast %17 : vector<1x1x4x128xf32> to vector<4x128xf32>
    %19 = arith.truncf %18 : vector<4x128xf32> to vector<4x128xbf16>
    %c2_19 = arith.constant 2 : index
    %c0_20 = arith.constant 0 : index
    %c0_21 = arith.constant 0 : index
    %20 = vector.load %arg2[%c2_19, %c0_20, %c0_21] : memref<9x128x128xbf16, #tpu.memory_space<vmem>>, vector<1x128x128xbf16>
    %21 = vector.shape_cast %20 : vector<1x128x128xbf16> to vector<128x128xbf16>
    %cst_22 = arith.constant dense<0.000000e+00> : vector<4x128xf32>
    %22 = tpu.matmul %19, %21, %cst_22 {dimension_numbers = #tpu.dot_dimension_numbers<[1], [0], [0], [1], [0, 0, 1, 1], [], []>} : vector<4x128xbf16>, vector<128x128xbf16>, vector<4x128xf32> -> vector<4x128xf32>
    %23 = arith.addf %16, %22 : vector<4x128xf32>
    %c0_23 = arith.constant 0 : index
    %c1_24 = arith.constant 1 : index
    %c0_25 = arith.constant 0 : index
    %c0_26 = arith.constant 0 : index
    %24 = vector.load %arg1[%c0_23, %c1_24, %c0_25, %c0_26] : memref<1x6x6x128xf32, #tpu.memory_space<vmem>>, vector<1x1x4x128xf32>
    %25 = vector.shape_cast %24 : vector<1x1x4x128xf32> to vector<4x128xf32>
    %26 = arith.truncf %25 : vector<4x128xf32> to vector<4x128xbf16>
    %c3 = arith.constant 3 : index
    %c0_27 = arith.constant 0 : index
    %c0_28 = arith.constant 0 : index
    %27 = vector.load %arg2[%c3, %c0_27, %c0_28] : memref<9x128x128xbf16, #tpu.memory_space<vmem>>, vector<1x128x128xbf16>
    %28 = vector.shape_cast %27 : vector<1x128x128xbf16> to vector<128x128xbf16>
    %cst_29 = arith.constant dense<0.000000e+00> : vector<4x128xf32>
    %29 = tpu.matmul %26, %28, %cst_29 {dimension_numbers = #tpu.dot_dimension_numbers<[1], [0], [0], [1], [0, 0, 1, 1], [], []>} : vector<4x128xbf16>, vector<128x128xbf16>, vector<4x128xf32> -> vector<4x128xf32>
    %30 = arith.addf %23, %29 : vector<4x128xf32>
    %c0_30 = arith.constant 0 : index
    %c1_31 = arith.constant 1 : index
    %c1_32 = arith.constant 1 : index
    %c0_33 = arith.constant 0 : index
    %31 = vector.load %arg1[%c0_30, %c1_31, %c1_32, %c0_33] : memref<1x6x6x128xf32, #tpu.memory_space<vmem>>, vector<1x1x4x128xf32>
    %32 = vector.shape_cast %31 : vector<1x1x4x128xf32> to vector<4x128xf32>
    %33 = arith.truncf %32 : vector<4x128xf32> to vector<4x128xbf16>
    %c4 = arith.constant 4 : index
    %c0_34 = arith.constant 0 : index
    %c0_35 = arith.constant 0 : index
    %34 = vector.load %arg2[%c4, %c0_34, %c0_35] : memref<9x128x128xbf16, #tpu.memory_space<vmem>>, vector<1x128x128xbf16>
    %35 = vector.shape_cast %34 : vector<1x128x128xbf16> to vector<128x128xbf16>
    %cst_36 = arith.constant dense<0.000000e+00> : vector<4x128xf32>
    %36 = tpu.matmul %33, %35, %cst_36 {dimension_numbers = #tpu.dot_dimension_numbers<[1], [0], [0], [1], [0, 0, 1, 1], [], []>} : vector<4x128xbf16>, vector<128x128xbf16>, vector<4x128xf32> -> vector<4x128xf32>
    %37 = arith.addf %30, %36 : vector<4x128xf32>
    %c0_37 = arith.constant 0 : index
    %c1_38 = arith.constant 1 : index
    %c2_39 = arith.constant 2 : index
    %c0_40 = arith.constant 0 : index
    %38 = vector.load %arg1[%c0_37, %c1_38, %c2_39, %c0_40] : memref<1x6x6x128xf32, #tpu.memory_space<vmem>>, vector<1x1x4x128xf32>
    %39 = vector.shape_cast %38 : vector<1x1x4x128xf32> to vector<4x128xf32>
    %40 = arith.truncf %39 : vector<4x128xf32> to vector<4x128xbf16>
    %c5 = arith.constant 5 : index
    %c0_41 = arith.constant 0 : index
    %c0_42 = arith.constant 0 : index
    %41 = vector.load %arg2[%c5, %c0_41, %c0_42] : memref<9x128x128xbf16, #tpu.memory_space<vmem>>, vector<1x128x128xbf16>
    %42 = vector.shape_cast %41 : vector<1x128x128xbf16> to vector<128x128xbf16>
    %cst_43 = arith.constant dense<0.000000e+00> : vector<4x128xf32>
    %43 = tpu.matmul %40, %42, %cst_43 {dimension_numbers = #tpu.dot_dimension_numbers<[1], [0], [0], [1], [0, 0, 1, 1], [], []>} : vector<4x128xbf16>, vector<128x128xbf16>, vector<4x128xf32> -> vector<4x128xf32>
    %44 = arith.addf %37, %43 : vector<4x128xf32>
    %c0_44 = arith.constant 0 : index
    %c2_45 = arith.constant 2 : index
    %c0_46 = arith.constant 0 : index
    %c0_47 = arith.constant 0 : index
    %45 = vector.load %arg1[%c0_44, %c2_45, %c0_46, %c0_47] : memref<1x6x6x128xf32, #tpu.memory_space<vmem>>, vector<1x1x4x128xf32>
    %46 = vector.shape_cast %45 : vector<1x1x4x128xf32> to vector<4x128xf32>
    %47 = arith.truncf %46 : vector<4x128xf32> to vector<4x128xbf16>
    %c6 = arith.constant 6 : index
    %c0_48 = arith.constant 0 : index
    %c0_49 = arith.constant 0 : index
    %48 = vector.load %arg2[%c6, %c0_48, %c0_49] : memref<9x128x128xbf16, #tpu.memory_space<vmem>>, vector<1x128x128xbf16>
    %49 = vector.shape_cast %48 : vector<1x128x128xbf16> to vector<128x128xbf16>
    %cst_50 = arith.constant dense<0.000000e+00> : vector<4x128xf32>
    %50 = tpu.matmul %47, %49, %cst_50 {dimension_numbers = #tpu.dot_dimension_numbers<[1], [0], [0], [1], [0, 0, 1, 1], [], []>} : vector<4x128xbf16>, vector<128x128xbf16>, vector<4x128xf32> -> vector<4x128xf32>
    %51 = arith.addf %44, %50 : vector<4x128xf32>
    %c0_51 = arith.constant 0 : index
    %c2_52 = arith.constant 2 : index
    %c1_53 = arith.constant 1 : index
    %c0_54 = arith.constant 0 : index
    %52 = vector.load %arg1[%c0_51, %c2_52, %c1_53, %c0_54] : memref<1x6x6x128xf32, #tpu.memory_space<vmem>>, vector<1x1x4x128xf32>
    %53 = vector.shape_cast %52 : vector<1x1x4x128xf32> to vector<4x128xf32>
    %54 = arith.truncf %53 : vector<4x128xf32> to vector<4x128xbf16>
    %c7 = arith.constant 7 : index
    %c0_55 = arith.constant 0 : index
    %c0_56 = arith.constant 0 : index
    %55 = vector.load %arg2[%c7, %c0_55, %c0_56] : memref<9x128x128xbf16, #tpu.memory_space<vmem>>, vector<1x128x128xbf16>
    %56 = vector.shape_cast %55 : vector<1x128x128xbf16> to vector<128x128xbf16>
    %cst_57 = arith.constant dense<0.000000e+00> : vector<4x128xf32>
    %57 = tpu.matmul %54, %56, %cst_57 {dimension_numbers = #tpu.dot_dimension_numbers<[1], [0], [0], [1], [0, 0, 1, 1], [], []>} : vector<4x128xbf16>, vector<128x128xbf16>, vector<4x128xf32> -> vector<4x128xf32>
    %58 = arith.addf %51, %57 : vector<4x128xf32>
    %c0_58 = arith.constant 0 : index
    %c2_59 = arith.constant 2 : index
    %c2_60 = arith.constant 2 : index
    %c0_61 = arith.constant 0 : index
    %59 = vector.load %arg1[%c0_58, %c2_59, %c2_60, %c0_61] : memref<1x6x6x128xf32, #tpu.memory_space<vmem>>, vector<1x1x4x128xf32>
    %60 = vector.shape_cast %59 : vector<1x1x4x128xf32> to vector<4x128xf32>
    %61 = arith.truncf %60 : vector<4x128xf32> to vector<4x128xbf16>
    %c8 = arith.constant 8 : index
    %c0_62 = arith.constant 0 : index
    %c0_63 = arith.constant 0 : index
    %62 = vector.load %arg2[%c8, %c0_62, %c0_63] : memref<9x128x128xbf16, #tpu.memory_space<vmem>>, vector<1x128x128xbf16>
    %63 = vector.shape_cast %62 : vector<1x128x128xbf16> to vector<128x128xbf16>
    %cst_64 = arith.constant dense<0.000000e+00> : vector<4x128xf32>
    %64 = tpu.matmul %61, %63, %cst_64 {dimension_numbers = #tpu.dot_dimension_numbers<[1], [0], [0], [1], [0, 0, 1, 1], [], []>} : vector<4x128xbf16>, vector<128x128xbf16>, vector<4x128xf32> -> vector<4x128xf32>
    %65 = arith.addf %58, %64 : vector<4x128xf32>
    %c0_65 = arith.constant 0 : index
    %c0_66 = arith.constant 0 : index
    %c0_67 = arith.constant 0 : index
    %c0_68 = arith.constant 0 : index
    %66 = vector.load %arg3[%c0_65, %c0_66, %c0_67, %c0_68] : memref<1x4x4x128xf32, #tpu.memory_space<vmem>>, vector<1x1x4x128xf32>
    %67 = vector.shape_cast %66 : vector<1x1x4x128xf32> to vector<4x128xf32>
    %68 = vector.shape_cast %65 : vector<4x128xf32> to vector<1x1x4x128xf32>
    tpu.vector_store %arg3[%c0_65, %c0_66, %c0_67, %c0_68], %68 {strides = array<i32>} : memref<1x4x4x128xf32, #tpu.memory_space<vmem>>, vector<1x1x4x128xf32>,
    %cst_69 = arith.constant dense<0.000000e+00> : vector<128xf32>
    %69 = vector.multi_reduction <add>, %65, %cst_69 [0] : vector<4x128xf32> to vector<128xf32>
    %70 = vector.shape_cast %69 : vector<128xf32> to vector<1x128xf32>
    %71 = arith.addf %0, %70 : vector<1x128xf32>
    %72 = arith.mulf %65, %65 : vector<4x128xf32>
    %cst_70 = arith.constant dense<0.000000e+00> : vector<128xf32>
    %73 = vector.multi_reduction <add>, %72, %cst_70 [0] : vector<4x128xf32> to vector<128xf32>
    %74 = vector.shape_cast %73 : vector<128xf32> to vector<1x128xf32>
    %75 = arith.addf %1, %74 : vector<1x128xf32>
    %cst_71 = arith.constant 0.000000e+00 : f32
    %76 = vector.broadcast %cst_71 : f32 to vector<4x128xf32>
    %c0_72 = arith.constant 0 : index
    %c1_73 = arith.constant 1 : index
    %c0_74 = arith.constant 0 : index
    %c0_75 = arith.constant 0 : index
    %77 = vector.load %arg1[%c0_72, %c1_73, %c0_74, %c0_75] : memref<1x6x6x128xf32, #tpu.memory_space<vmem>>, vector<1x1x4x128xf32>
    %78 = vector.shape_cast %77 : vector<1x1x4x128xf32> to vector<4x128xf32>
    %79 = arith.truncf %78 : vector<4x128xf32> to vector<4x128xbf16>
    %c0_76 = arith.constant 0 : index
    %c0_77 = arith.constant 0 : index
    %c0_78 = arith.constant 0 : index
    %80 = vector.load %arg2[%c0_76, %c0_77, %c0_78] : memref<9x128x128xbf16, #tpu.memory_space<vmem>>, vector<1x128x128xbf16>
    %81 = vector.shape_cast %80 : vector<1x128x128xbf16> to vector<128x128xbf16>
    %cst_79 = arith.constant dense<0.000000e+00> : vector<4x128xf32>
    %82 = tpu.matmul %79, %81, %cst_79 {dimension_numbers = #tpu.dot_dimension_numbers<[1], [0], [0], [1], [0, 0, 1, 1], [], []>} : vector<4x128xbf16>, vector<128x128xbf16>, vector<4x128xf32> -> vector<4x128xf32>
    %83 = arith.addf %76, %82 : vector<4x128xf32>
    %c0_80 = arith.constant 0 : index
    %c1_81 = arith.constant 1 : index
    %c1_82 = arith.constant 1 : index
    %c0_83 = arith.constant 0 : index
    %84 = vector.load %arg1[%c0_80, %c1_81, %c1_82, %c0_83] : memref<1x6x6x128xf32, #tpu.memory_space<vmem>>, vector<1x1x4x128xf32>
    %85 = vector.shape_cast %84 : vector<1x1x4x128xf32> to vector<4x128xf32>
    %86 = arith.truncf %85 : vector<4x128xf32> to vector<4x128xbf16>
    %c1_84 = arith.constant 1 : index
    %c0_85 = arith.constant 0 : index
    %c0_86 = arith.constant 0 : index
    %87 = vector.load %arg2[%c1_84, %c0_85, %c0_86] : memref<9x128x128xbf16, #tpu.memory_space<vmem>>, vector<1x128x128xbf16>
    %88 = vector.shape_cast %87 : vector<1x128x128xbf16> to vector<128x128xbf16>
    %cst_87 = arith.constant dense<0.000000e+00> : vector<4x128xf32>
    %89 = tpu.matmul %86, %88, %cst_87 {dimension_numbers = #tpu.dot_dimension_numbers<[1], [0], [0], [1], [0, 0, 1, 1], [], []>} : vector<4x128xbf16>, vector<128x128xbf16>, vector<4x128xf32> -> vector<4x128xf32>
    %90 = arith.addf %83, %89 : vector<4x128xf32>
    %c0_88 = arith.constant 0 : index
    %c1_89 = arith.constant 1 : index
    %c2_90 = arith.constant 2 : index
    %c0_91 = arith.constant 0 : index
    %91 = vector.load %arg1[%c0_88, %c1_89, %c2_90, %c0_91] : memref<1x6x6x128xf32, #tpu.memory_space<vmem>>, vector<1x1x4x128xf32>
    %92 = vector.shape_cast %91 : vector<1x1x4x128xf32> to vector<4x128xf32>
    %93 = arith.truncf %92 : vector<4x128xf32> to vector<4x128xbf16>
    %c2_92 = arith.constant 2 : index
    %c0_93 = arith.constant 0 : index
    %c0_94 = arith.constant 0 : index
    %94 = vector.load %arg2[%c2_92, %c0_93, %c0_94] : memref<9x128x128xbf16, #tpu.memory_space<vmem>>, vector<1x128x128xbf16>
    %95 = vector.shape_cast %94 : vector<1x128x128xbf16> to vector<128x128xbf16>
    %cst_95 = arith.constant dense<0.000000e+00> : vector<4x128xf32>
    %96 = tpu.matmul %93, %95, %cst_95 {dimension_numbers = #tpu.dot_dimension_numbers<[1], [0], [0], [1], [0, 0, 1, 1], [], []>} : vector<4x128xbf16>, vector<128x128xbf16>, vector<4x128xf32> -> vector<4x128xf32>
    %97 = arith.addf %90, %96 : vector<4x128xf32>
    %c0_96 = arith.constant 0 : index
    %c2_97 = arith.constant 2 : index
    %c0_98 = arith.constant 0 : index
    %c0_99 = arith.constant 0 : index
    %98 = vector.load %arg1[%c0_96, %c2_97, %c0_98, %c0_99] : memref<1x6x6x128xf32, #tpu.memory_space<vmem>>, vector<1x1x4x128xf32>
    %99 = vector.shape_cast %98 : vector<1x1x4x128xf32> to vector<4x128xf32>
    %100 = arith.truncf %99 : vector<4x128xf32> to vector<4x128xbf16>
    %c3_100 = arith.constant 3 : index
    %c0_101 = arith.constant 0 : index
    %c0_102 = arith.constant 0 : index
    %101 = vector.load %arg2[%c3_100, %c0_101, %c0_102] : memref<9x128x128xbf16, #tpu.memory_space<vmem>>, vector<1x128x128xbf16>
    %102 = vector.shape_cast %101 : vector<1x128x128xbf16> to vector<128x128xbf16>
    %cst_103 = arith.constant dense<0.000000e+00> : vector<4x128xf32>
    %103 = tpu.matmul %100, %102, %cst_103 {dimension_numbers = #tpu.dot_dimension_numbers<[1], [0], [0], [1], [0, 0, 1, 1], [], []>} : vector<4x128xbf16>, vector<128x128xbf16>, vector<4x128xf32> -> vector<4x128xf32>
    %104 = arith.addf %97, %103 : vector<4x128xf32>
    %c0_104 = arith.constant 0 : index
    %c2_105 = arith.constant 2 : index
    %c1_106 = arith.constant 1 : index
    %c0_107 = arith.constant 0 : index
    %105 = vector.load %arg1[%c0_104, %c2_105, %c1_106, %c0_107] : memref<1x6x6x128xf32, #tpu.memory_space<vmem>>, vector<1x1x4x128xf32>
    %106 = vector.shape_cast %105 : vector<1x1x4x128xf32> to vector<4x128xf32>
    %107 = arith.truncf %106 : vector<4x128xf32> to vector<4x128xbf16>
    %c4_108 = arith.constant 4 : index
    %c0_109 = arith.constant 0 : index
    %c0_110 = arith.constant 0 : index
    %108 = vector.load %arg2[%c4_108, %c0_109, %c0_110] : memref<9x128x128xbf16, #tpu.memory_space<vmem>>, vector<1x128x128xbf16>
    %109 = vector.shape_cast %108 : vector<1x128x128xbf16> to vector<128x128xbf16>
    %cst_111 = arith.constant dense<0.000000e+00> : vector<4x128xf32>
    %110 = tpu.matmul %107, %109, %cst_111 {dimension_numbers = #tpu.dot_dimension_numbers<[1], [0], [0], [1], [0, 0, 1, 1], [], []>} : vector<4x128xbf16>, vector<128x128xbf16>, vector<4x128xf32> -> vector<4x128xf32>
    %111 = arith.addf %104, %110 : vector<4x128xf32>
    %c0_112 = arith.constant 0 : index
    %c2_113 = arith.constant 2 : index
    %c2_114 = arith.constant 2 : index
    %c0_115 = arith.constant 0 : index
    %112 = vector.load %arg1[%c0_112, %c2_113, %c2_114, %c0_115] : memref<1x6x6x128xf32, #tpu.memory_space<vmem>>, vector<1x1x4x128xf32>
    %113 = vector.shape_cast %112 : vector<1x1x4x128xf32> to vector<4x128xf32>
    %114 = arith.truncf %113 : vector<4x128xf32> to vector<4x128xbf16>
    %c5_116 = arith.constant 5 : index
    %c0_117 = arith.constant 0 : index
    %c0_118 = arith.constant 0 : index
    %115 = vector.load %arg2[%c5_116, %c0_117, %c0_118] : memref<9x128x128xbf16, #tpu.memory_space<vmem>>, vector<1x128x128xbf16>
    %116 = vector.shape_cast %115 : vector<1x128x128xbf16> to vector<128x128xbf16>
    %cst_119 = arith.constant dense<0.000000e+00> : vector<4x128xf32>
    %117 = tpu.matmul %114, %116, %cst_119 {dimension_numbers = #tpu.dot_dimension_numbers<[1], [0], [0], [1], [0, 0, 1, 1], [], []>} : vector<4x128xbf16>, vector<128x128xbf16>, vector<4x128xf32> -> vector<4x128xf32>
    %118 = arith.addf %111, %117 : vector<4x128xf32>
    %c0_120 = arith.constant 0 : index
    %c3_121 = arith.constant 3 : index
    %c0_122 = arith.constant 0 : index
    %c0_123 = arith.constant 0 : index
    %119 = vector.load %arg1[%c0_120, %c3_121, %c0_122, %c0_123] : memref<1x6x6x128xf32, #tpu.memory_space<vmem>>, vector<1x1x4x128xf32>
    %120 = vector.shape_cast %119 : vector<1x1x4x128xf32> to vector<4x128xf32>
    %121 = arith.truncf %120 : vector<4x128xf32> to vector<4x128xbf16>
    %c6_124 = arith.constant 6 : index
    %c0_125 = arith.constant 0 : index
    %c0_126 = arith.constant 0 : index
    %122 = vector.load %arg2[%c6_124, %c0_125, %c0_126] : memref<9x128x128xbf16, #tpu.memory_space<vmem>>, vector<1x128x128xbf16>
    %123 = vector.shape_cast %122 : vector<1x128x128xbf16> to vector<128x128xbf16>
    %cst_127 = arith.constant dense<0.000000e+00> : vector<4x128xf32>
    %124 = tpu.matmul %121, %123, %cst_127 {dimension_numbers = #tpu.dot_dimension_numbers<[1], [0], [0], [1], [0, 0, 1, 1], [], []>} : vector<4x128xbf16>, vector<128x128xbf16>, vector<4x128xf32> -> vector<4x128xf32>
    %125 = arith.addf %118, %124 : vector<4x128xf32>
    %c0_128 = arith.constant 0 : index
    %c3_129 = arith.constant 3 : index
    %c1_130 = arith.constant 1 : index
    %c0_131 = arith.constant 0 : index
    %126 = vector.load %arg1[%c0_128, %c3_129, %c1_130, %c0_131] : memref<1x6x6x128xf32, #tpu.memory_space<vmem>>, vector<1x1x4x128xf32>
    %127 = vector.shape_cast %126 : vector<1x1x4x128xf32> to vector<4x128xf32>
    %128 = arith.truncf %127 : vector<4x128xf32> to vector<4x128xbf16>
    %c7_132 = arith.constant 7 : index
    %c0_133 = arith.constant 0 : index
    %c0_134 = arith.constant 0 : index
    %129 = vector.load %arg2[%c7_132, %c0_133, %c0_134] : memref<9x128x128xbf16, #tpu.memory_space<vmem>>, vector<1x128x128xbf16>
    %130 = vector.shape_cast %129 : vector<1x128x128xbf16> to vector<128x128xbf16>
    %cst_135 = arith.constant dense<0.000000e+00> : vector<4x128xf32>
    %131 = tpu.matmul %128, %130, %cst_135 {dimension_numbers = #tpu.dot_dimension_numbers<[1], [0], [0], [1], [0, 0, 1, 1], [], []>} : vector<4x128xbf16>, vector<128x128xbf16>, vector<4x128xf32> -> vector<4x128xf32>
    %132 = arith.addf %125, %131 : vector<4x128xf32>
    %c0_136 = arith.constant 0 : index
    %c3_137 = arith.constant 3 : index
    %c2_138 = arith.constant 2 : index
    %c0_139 = arith.constant 0 : index
    %133 = vector.load %arg1[%c0_136, %c3_137, %c2_138, %c0_139] : memref<1x6x6x128xf32, #tpu.memory_space<vmem>>, vector<1x1x4x128xf32>
    %134 = vector.shape_cast %133 : vector<1x1x4x128xf32> to vector<4x128xf32>
    %135 = arith.truncf %134 : vector<4x128xf32> to vector<4x128xbf16>
    %c8_140 = arith.constant 8 : index
    %c0_141 = arith.constant 0 : index
    %c0_142 = arith.constant 0 : index
    %136 = vector.load %arg2[%c8_140, %c0_141, %c0_142] : memref<9x128x128xbf16, #tpu.memory_space<vmem>>, vector<1x128x128xbf16>
    %137 = vector.shape_cast %136 : vector<1x128x128xbf16> to vector<128x128xbf16>
    %cst_143 = arith.constant dense<0.000000e+00> : vector<4x128xf32>
    %138 = tpu.matmul %135, %137, %cst_143 {dimension_numbers = #tpu.dot_dimension_numbers<[1], [0], [0], [1], [0, 0, 1, 1], [], []>} : vector<4x128xbf16>, vector<128x128xbf16>, vector<4x128xf32> -> vector<4x128xf32>
    %139 = arith.addf %132, %138 : vector<4x128xf32>
    %c0_144 = arith.constant 0 : index
    %c1_145 = arith.constant 1 : index
    %c0_146 = arith.constant 0 : index
    %c0_147 = arith.constant 0 : index
    %140 = vector.load %arg3[%c0_144, %c1_145, %c0_146, %c0_147] : memref<1x4x4x128xf32, #tpu.memory_space<vmem>>, vector<1x1x4x128xf32>
    %141 = vector.shape_cast %140 : vector<1x1x4x128xf32> to vector<4x128xf32>
    %142 = vector.shape_cast %139 : vector<4x128xf32> to vector<1x1x4x128xf32>
    tpu.vector_store %arg3[%c0_144, %c1_145, %c0_146, %c0_147], %142 {strides = array<i32>} : memref<1x4x4x128xf32, #tpu.memory_space<vmem>>, vector<1x1x4x128xf32>,
    %cst_148 = arith.constant dense<0.000000e+00> : vector<128xf32>
    %143 = vector.multi_reduction <add>, %139, %cst_148 [0] : vector<4x128xf32> to vector<128xf32>
    %144 = vector.shape_cast %143 : vector<128xf32> to vector<1x128xf32>
    %145 = arith.addf %71, %144 : vector<1x128xf32>
    %146 = arith.mulf %139, %139 : vector<4x128xf32>
    %cst_149 = arith.constant dense<0.000000e+00> : vector<128xf32>
    %147 = vector.multi_reduction <add>, %146, %cst_149 [0] : vector<4x128xf32> to vector<128xf32>
    %148 = vector.shape_cast %147 : vector<128xf32> to vector<1x128xf32>
    %149 = arith.addf %75, %148 : vector<1x128xf32>
    %cst_150 = arith.constant 0.000000e+00 : f32
    %150 = vector.broadcast %cst_150 : f32 to vector<4x128xf32>
    %c0_151 = arith.constant 0 : index
    %c2_152 = arith.constant 2 : index
    %c0_153 = arith.constant 0 : index
    %c0_154 = arith.constant 0 : index
    %151 = vector.load %arg1[%c0_151, %c2_152, %c0_153, %c0_154] : memref<1x6x6x128xf32, #tpu.memory_space<vmem>>, vector<1x1x4x128xf32>
    %152 = vector.shape_cast %151 : vector<1x1x4x128xf32> to vector<4x128xf32>
    %153 = arith.truncf %152 : vector<4x128xf32> to vector<4x128xbf16>
    %c0_155 = arith.constant 0 : index
    %c0_156 = arith.constant 0 : index
    %c0_157 = arith.constant 0 : index
    %154 = vector.load %arg2[%c0_155, %c0_156, %c0_157] : memref<9x128x128xbf16, #tpu.memory_space<vmem>>, vector<1x128x128xbf16>
    %155 = vector.shape_cast %154 : vector<1x128x128xbf16> to vector<128x128xbf16>
    %cst_158 = arith.constant dense<0.000000e+00> : vector<4x128xf32>
    %156 = tpu.matmul %153, %155, %cst_158 {dimension_numbers = #tpu.dot_dimension_numbers<[1], [0], [0], [1], [0, 0, 1, 1], [], []>} : vector<4x128xbf16>, vector<128x128xbf16>, vector<4x128xf32> -> vector<4x128xf32>
    %157 = arith.addf %150, %156 : vector<4x128xf32>
    %c0_159 = arith.constant 0 : index
    %c2_160 = arith.constant 2 : index
    %c1_161 = arith.constant 1 : index
    %c0_162 = arith.constant 0 : index
    %158 = vector.load %arg1[%c0_159, %c2_160, %c1_161, %c0_162] : memref<1x6x6x128xf32, #tpu.memory_space<vmem>>, vector<1x1x4x128xf32>
    %159 = vector.shape_cast %158 : vector<1x1x4x128xf32> to vector<4x128xf32>
    %160 = arith.truncf %159 : vector<4x128xf32> to vector<4x128xbf16>
    %c1_163 = arith.constant 1 : index
    %c0_164 = arith.constant 0 : index
    %c0_165 = arith.constant 0 : index
    %161 = vector.load %arg2[%c1_163, %c0_164, %c0_165] : memref<9x128x128xbf16, #tpu.memory_space<vmem>>, vector<1x128x128xbf16>
    %162 = vector.shape_cast %161 : vector<1x128x128xbf16> to vector<128x128xbf16>
    %cst_166 = arith.constant dense<0.000000e+00> : vector<4x128xf32>
    %163 = tpu.matmul %160, %162, %cst_166 {dimension_numbers = #tpu.dot_dimension_numbers<[1], [0], [0], [1], [0, 0, 1, 1], [], []>} : vector<4x128xbf16>, vector<128x128xbf16>, vector<4x128xf32> -> vector<4x128xf32>
    %164 = arith.addf %157, %163 : vector<4x128xf32>
    %c0_167 = arith.constant 0 : index
    %c2_168 = arith.constant 2 : index
    %c2_169 = arith.constant 2 : index
    %c0_170 = arith.constant 0 : index
    %165 = vector.load %arg1[%c0_167, %c2_168, %c2_169, %c0_170] : memref<1x6x6x128xf32, #tpu.memory_space<vmem>>, vector<1x1x4x128xf32>
    %166 = vector.shape_cast %165 : vector<1x1x4x128xf32> to vector<4x128xf32>
    %167 = arith.truncf %166 : vector<4x128xf32> to vector<4x128xbf16>
    %c2_171 = arith.constant 2 : index
    %c0_172 = arith.constant 0 : index
    %c0_173 = arith.constant 0 : index
    %168 = vector.load %arg2[%c2_171, %c0_172, %c0_173] : memref<9x128x128xbf16, #tpu.memory_space<vmem>>, vector<1x128x128xbf16>
    %169 = vector.shape_cast %168 : vector<1x128x128xbf16> to vector<128x128xbf16>
    %cst_174 = arith.constant dense<0.000000e+00> : vector<4x128xf32>
    %170 = tpu.matmul %167, %169, %cst_174 {dimension_numbers = #tpu.dot_dimension_numbers<[1], [0], [0], [1], [0, 0, 1, 1], [], []>} : vector<4x128xbf16>, vector<128x128xbf16>, vector<4x128xf32> -> vector<4x128xf32>
    %171 = arith.addf %164, %170 : vector<4x128xf32>
    %c0_175 = arith.constant 0 : index
    %c3_176 = arith.constant 3 : index
    %c0_177 = arith.constant 0 : index
    %c0_178 = arith.constant 0 : index
    %172 = vector.load %arg1[%c0_175, %c3_176, %c0_177, %c0_178] : memref<1x6x6x128xf32, #tpu.memory_space<vmem>>, vector<1x1x4x128xf32>
    %173 = vector.shape_cast %172 : vector<1x1x4x128xf32> to vector<4x128xf32>
    %174 = arith.truncf %173 : vector<4x128xf32> to vector<4x128xbf16>
    %c3_179 = arith.constant 3 : index
    %c0_180 = arith.constant 0 : index
    %c0_181 = arith.constant 0 : index
    %175 = vector.load %arg2[%c3_179, %c0_180, %c0_181] : memref<9x128x128xbf16, #tpu.memory_space<vmem>>, vector<1x128x128xbf16>
    %176 = vector.shape_cast %175 : vector<1x128x128xbf16> to vector<128x128xbf16>
    %cst_182 = arith.constant dense<0.000000e+00> : vector<4x128xf32>
    %177 = tpu.matmul %174, %176, %cst_182 {dimension_numbers = #tpu.dot_dimension_numbers<[1], [0], [0], [1], [0, 0, 1, 1], [], []>} : vector<4x128xbf16>, vector<128x128xbf16>, vector<4x128xf32> -> vector<4x128xf32>
    %178 = arith.addf %171, %177 : vector<4x128xf32>
    %c0_183 = arith.constant 0 : index
    %c3_184 = arith.constant 3 : index
    %c1_185 = arith.constant 1 : index
    %c0_186 = arith.constant 0 : index
    %179 = vector.load %arg1[%c0_183, %c3_184, %c1_185, %c0_186] : memref<1x6x6x128xf32, #tpu.memory_space<vmem>>, vector<1x1x4x128xf32>
    %180 = vector.shape_cast %179 : vector<1x1x4x128xf32> to vector<4x128xf32>
    %181 = arith.truncf %180 : vector<4x128xf32> to vector<4x128xbf16>
    %c4_187 = arith.constant 4 : index
    %c0_188 = arith.constant 0 : index
    %c0_189 = arith.constant 0 : index
    %182 = vector.load %arg2[%c4_187, %c0_188, %c0_189] : memref<9x128x128xbf16, #tpu.memory_space<vmem>>, vector<1x128x128xbf16>
    %183 = vector.shape_cast %182 : vector<1x128x128xbf16> to vector<128x128xbf16>
    %cst_190 = arith.constant dense<0.000000e+00> : vector<4x128xf32>
    %184 = tpu.matmul %181, %183, %cst_190 {dimension_numbers = #tpu.dot_dimension_numbers<[1], [0], [0], [1], [0, 0, 1, 1], [], []>} : vector<4x128xbf16>, vector<128x128xbf16>, vector<4x128xf32> -> vector<4x128xf32>
    %185 = arith.addf %178, %184 : vector<4x128xf32>
    %c0_191 = arith.constant 0 : index
    %c3_192 = arith.constant 3 : index
    %c2_193 = arith.constant 2 : index
    %c0_194 = arith.constant 0 : index
    %186 = vector.load %arg1[%c0_191, %c3_192, %c2_193, %c0_194] : memref<1x6x6x128xf32, #tpu.memory_space<vmem>>, vector<1x1x4x128xf32>
    %187 = vector.shape_cast %186 : vector<1x1x4x128xf32> to vector<4x128xf32>
    %188 = arith.truncf %187 : vector<4x128xf32> to vector<4x128xbf16>
    %c5_195 = arith.constant 5 : index
    %c0_196 = arith.constant 0 : index
    %c0_197 = arith.constant 0 : index
    %189 = vector.load %arg2[%c5_195, %c0_196, %c0_197] : memref<9x128x128xbf16, #tpu.memory_space<vmem>>, vector<1x128x128xbf16>
    %190 = vector.shape_cast %189 : vector<1x128x128xbf16> to vector<128x128xbf16>
    %cst_198 = arith.constant dense<0.000000e+00> : vector<4x128xf32>
    %191 = tpu.matmul %188, %190, %cst_198 {dimension_numbers = #tpu.dot_dimension_numbers<[1], [0], [0], [1], [0, 0, 1, 1], [], []>} : vector<4x128xbf16>, vector<128x128xbf16>, vector<4x128xf32> -> vector<4x128xf32>
    %192 = arith.addf %185, %191 : vector<4x128xf32>
    %c0_199 = arith.constant 0 : index
    %c4_200 = arith.constant 4 : index
    %c0_201 = arith.constant 0 : index
    %c0_202 = arith.constant 0 : index
    %193 = vector.load %arg1[%c0_199, %c4_200, %c0_201, %c0_202] : memref<1x6x6x128xf32, #tpu.memory_space<vmem>>, vector<1x1x4x128xf32>
    %194 = vector.shape_cast %193 : vector<1x1x4x128xf32> to vector<4x128xf32>
    %195 = arith.truncf %194 : vector<4x128xf32> to vector<4x128xbf16>
    %c6_203 = arith.constant 6 : index
    %c0_204 = arith.constant 0 : index
    %c0_205 = arith.constant 0 : index
    %196 = vector.load %arg2[%c6_203, %c0_204, %c0_205] : memref<9x128x128xbf16, #tpu.memory_space<vmem>>, vector<1x128x128xbf16>
    %197 = vector.shape_cast %196 : vector<1x128x128xbf16> to vector<128x128xbf16>
    %cst_206 = arith.constant dense<0.000000e+00> : vector<4x128xf32>
    %198 = tpu.matmul %195, %197, %cst_206 {dimension_numbers = #tpu.dot_dimension_numbers<[1], [0], [0], [1], [0, 0, 1, 1], [], []>} : vector<4x128xbf16>, vector<128x128xbf16>, vector<4x128xf32> -> vector<4x128xf32>
    %199 = arith.addf %192, %198 : vector<4x128xf32>
    %c0_207 = arith.constant 0 : index
    %c4_208 = arith.constant 4 : index
    %c1_209 = arith.constant 1 : index
    %c0_210 = arith.constant 0 : index
    %200 = vector.load %arg1[%c0_207, %c4_208, %c1_209, %c0_210] : memref<1x6x6x128xf32, #tpu.memory_space<vmem>>, vector<1x1x4x128xf32>
    %201 = vector.shape_cast %200 : vector<1x1x4x128xf32> to vector<4x128xf32>
    %202 = arith.truncf %201 : vector<4x128xf32> to vector<4x128xbf16>
    %c7_211 = arith.constant 7 : index
    %c0_212 = arith.constant 0 : index
    %c0_213 = arith.constant 0 : index
    %203 = vector.load %arg2[%c7_211, %c0_212, %c0_213] : memref<9x128x128xbf16, #tpu.memory_space<vmem>>, vector<1x128x128xbf16>
    %204 = vector.shape_cast %203 : vector<1x128x128xbf16> to vector<128x128xbf16>
    %cst_214 = arith.constant dense<0.000000e+00> : vector<4x128xf32>
    %205 = tpu.matmul %202, %204, %cst_214 {dimension_numbers = #tpu.dot_dimension_numbers<[1], [0], [0], [1], [0, 0, 1, 1], [], []>} : vector<4x128xbf16>, vector<128x128xbf16>, vector<4x128xf32> -> vector<4x128xf32>
    %206 = arith.addf %199, %205 : vector<4x128xf32>
    %c0_215 = arith.constant 0 : index
    %c4_216 = arith.constant 4 : index
    %c2_217 = arith.constant 2 : index
    %c0_218 = arith.constant 0 : index
    %207 = vector.load %arg1[%c0_215, %c4_216, %c2_217, %c0_218] : memref<1x6x6x128xf32, #tpu.memory_space<vmem>>, vector<1x1x4x128xf32>
    %208 = vector.shape_cast %207 : vector<1x1x4x128xf32> to vector<4x128xf32>
    %209 = arith.truncf %208 : vector<4x128xf32> to vector<4x128xbf16>
    %c8_219 = arith.constant 8 : index
    %c0_220 = arith.constant 0 : index
    %c0_221 = arith.constant 0 : index
    %210 = vector.load %arg2[%c8_219, %c0_220, %c0_221] : memref<9x128x128xbf16, #tpu.memory_space<vmem>>, vector<1x128x128xbf16>
    %211 = vector.shape_cast %210 : vector<1x128x128xbf16> to vector<128x128xbf16>
    %cst_222 = arith.constant dense<0.000000e+00> : vector<4x128xf32>
    %212 = tpu.matmul %209, %211, %cst_222 {dimension_numbers = #tpu.dot_dimension_numbers<[1], [0], [0], [1], [0, 0, 1, 1], [], []>} : vector<4x128xbf16>, vector<128x128xbf16>, vector<4x128xf32> -> vector<4x128xf32>
    %213 = arith.addf %206, %212 : vector<4x128xf32>
    %c0_223 = arith.constant 0 : index
    %c2_224 = arith.constant 2 : index
    %c0_225 = arith.constant 0 : index
    %c0_226 = arith.constant 0 : index
    %214 = vector.load %arg3[%c0_223, %c2_224, %c0_225, %c0_226] : memref<1x4x4x128xf32, #tpu.memory_space<vmem>>, vector<1x1x4x128xf32>
    %215 = vector.shape_cast %214 : vector<1x1x4x128xf32> to vector<4x128xf32>
    %216 = vector.shape_cast %213 : vector<4x128xf32> to vector<1x1x4x128xf32>
    tpu.vector_store %arg3[%c0_223, %c2_224, %c0_225, %c0_226], %216 {strides = array<i32>} : memref<1x4x4x128xf32, #tpu.memory_space<vmem>>, vector<1x1x4x128xf32>,
    %cst_227 = arith.constant dense<0.000000e+00> : vector<128xf32>
    %217 = vector.multi_reduction <add>, %213, %cst_227 [0] : vector<4x128xf32> to vector<128xf32>
    %218 = vector.shape_cast %217 : vector<128xf32> to vector<1x128xf32>
    %219 = arith.addf %145, %218 : vector<1x128xf32>
    %220 = arith.mulf %213, %213 : vector<4x128xf32>
    %cst_228 = arith.constant dense<0.000000e+00> : vector<128xf32>
    %221 = vector.multi_reduction <add>, %220, %cst_228 [0] : vector<4x128xf32> to vector<128xf32>
    %222 = vector.shape_cast %221 : vector<128xf32> to vector<1x128xf32>
    %223 = arith.addf %149, %222 : vector<1x128xf32>
    %cst_229 = arith.constant 0.000000e+00 : f32
    %224 = vector.broadcast %cst_229 : f32 to vector<4x128xf32>
    %c0_230 = arith.constant 0 : index
    %c3_231 = arith.constant 3 : index
    %c0_232 = arith.constant 0 : index
    %c0_233 = arith.constant 0 : index
    %225 = vector.load %arg1[%c0_230, %c3_231, %c0_232, %c0_233] : memref<1x6x6x128xf32, #tpu.memory_space<vmem>>, vector<1x1x4x128xf32>
    %226 = vector.shape_cast %225 : vector<1x1x4x128xf32> to vector<4x128xf32>
    %227 = arith.truncf %226 : vector<4x128xf32> to vector<4x128xbf16>
    %c0_234 = arith.constant 0 : index
    %c0_235 = arith.constant 0 : index
    %c0_236 = arith.constant 0 : index
    %228 = vector.load %arg2[%c0_234, %c0_235, %c0_236] : memref<9x128x128xbf16, #tpu.memory_space<vmem>>, vector<1x128x128xbf16>
    %229 = vector.shape_cast %228 : vector<1x128x128xbf16> to vector<128x128xbf16>
    %cst_237 = arith.constant dense<0.000000e+00> : vector<4x128xf32>
    %230 = tpu.matmul %227, %229, %cst_237 {dimension_numbers = #tpu.dot_dimension_numbers<[1], [0], [0], [1], [0, 0, 1, 1], [], []>} : vector<4x128xbf16>, vector<128x128xbf16>, vector<4x128xf32> -> vector<4x128xf32>
    %231 = arith.addf %224, %230 : vector<4x128xf32>
    %c0_238 = arith.constant 0 : index
    %c3_239 = arith.constant 3 : index
    %c1_240 = arith.constant 1 : index
    %c0_241 = arith.constant 0 : index
    %232 = vector.load %arg1[%c0_238, %c3_239, %c1_240, %c0_241] : memref<1x6x6x128xf32, #tpu.memory_space<vmem>>, vector<1x1x4x128xf32>
    %233 = vector.shape_cast %232 : vector<1x1x4x128xf32> to vector<4x128xf32>
    %234 = arith.truncf %233 : vector<4x128xf32> to vector<4x128xbf16>
    %c1_242 = arith.constant 1 : index
    %c0_243 = arith.constant 0 : index
    %c0_244 = arith.constant 0 : index
    %235 = vector.load %arg2[%c1_242, %c0_243, %c0_244] : memref<9x128x128xbf16, #tpu.memory_space<vmem>>, vector<1x128x128xbf16>
    %236 = vector.shape_cast %235 : vector<1x128x128xbf16> to vector<128x128xbf16>
    %cst_245 = arith.constant dense<0.000000e+00> : vector<4x128xf32>
    %237 = tpu.matmul %234, %236, %cst_245 {dimension_numbers = #tpu.dot_dimension_numbers<[1], [0], [0], [1], [0, 0, 1, 1], [], []>} : vector<4x128xbf16>, vector<128x128xbf16>, vector<4x128xf32> -> vector<4x128xf32>
    %238 = arith.addf %231, %237 : vector<4x128xf32>
    %c0_246 = arith.constant 0 : index
    %c3_247 = arith.constant 3 : index
    %c2_248 = arith.constant 2 : index
    %c0_249 = arith.constant 0 : index
    %239 = vector.load %arg1[%c0_246, %c3_247, %c2_248, %c0_249] : memref<1x6x6x128xf32, #tpu.memory_space<vmem>>, vector<1x1x4x128xf32>
    %240 = vector.shape_cast %239 : vector<1x1x4x128xf32> to vector<4x128xf32>
    %241 = arith.truncf %240 : vector<4x128xf32> to vector<4x128xbf16>
    %c2_250 = arith.constant 2 : index
    %c0_251 = arith.constant 0 : index
    %c0_252 = arith.constant 0 : index
    %242 = vector.load %arg2[%c2_250, %c0_251, %c0_252] : memref<9x128x128xbf16, #tpu.memory_space<vmem>>, vector<1x128x128xbf16>
    %243 = vector.shape_cast %242 : vector<1x128x128xbf16> to vector<128x128xbf16>
    %cst_253 = arith.constant dense<0.000000e+00> : vector<4x128xf32>
    %244 = tpu.matmul %241, %243, %cst_253 {dimension_numbers = #tpu.dot_dimension_numbers<[1], [0], [0], [1], [0, 0, 1, 1], [], []>} : vector<4x128xbf16>, vector<128x128xbf16>, vector<4x128xf32> -> vector<4x128xf32>
    %245 = arith.addf %238, %244 : vector<4x128xf32>
    %c0_254 = arith.constant 0 : index
    %c4_255 = arith.constant 4 : index
    %c0_256 = arith.constant 0 : index
    %c0_257 = arith.constant 0 : index
    %246 = vector.load %arg1[%c0_254, %c4_255, %c0_256, %c0_257] : memref<1x6x6x128xf32, #tpu.memory_space<vmem>>, vector<1x1x4x128xf32>
    %247 = vector.shape_cast %246 : vector<1x1x4x128xf32> to vector<4x128xf32>
    %248 = arith.truncf %247 : vector<4x128xf32> to vector<4x128xbf16>
    %c3_258 = arith.constant 3 : index
    %c0_259 = arith.constant 0 : index
    %c0_260 = arith.constant 0 : index
    %249 = vector.load %arg2[%c3_258, %c0_259, %c0_260] : memref<9x128x128xbf16, #tpu.memory_space<vmem>>, vector<1x128x128xbf16>
    %250 = vector.shape_cast %249 : vector<1x128x128xbf16> to vector<128x128xbf16>
    %cst_261 = arith.constant dense<0.000000e+00> : vector<4x128xf32>
    %251 = tpu.matmul %248, %250, %cst_261 {dimension_numbers = #tpu.dot_dimension_numbers<[1], [0], [0], [1], [0, 0, 1, 1], [], []>} : vector<4x128xbf16>, vector<128x128xbf16>, vector<4x128xf32> -> vector<4x128xf32>
    %252 = arith.addf %245, %251 : vector<4x128xf32>
    %c0_262 = arith.constant 0 : index
    %c4_263 = arith.constant 4 : index
    %c1_264 = arith.constant 1 : index
    %c0_265 = arith.constant 0 : index
    %253 = vector.load %arg1[%c0_262, %c4_263, %c1_264, %c0_265] : memref<1x6x6x128xf32, #tpu.memory_space<vmem>>, vector<1x1x4x128xf32>
    %254 = vector.shape_cast %253 : vector<1x1x4x128xf32> to vector<4x128xf32>
    %255 = arith.truncf %254 : vector<4x128xf32> to vector<4x128xbf16>
    %c4_266 = arith.constant 4 : index
    %c0_267 = arith.constant 0 : index
    %c0_268 = arith.constant 0 : index
    %256 = vector.load %arg2[%c4_266, %c0_267, %c0_268] : memref<9x128x128xbf16, #tpu.memory_space<vmem>>, vector<1x128x128xbf16>
    %257 = vector.shape_cast %256 : vector<1x128x128xbf16> to vector<128x128xbf16>
    %cst_269 = arith.constant dense<0.000000e+00> : vector<4x128xf32>
    %258 = tpu.matmul %255, %257, %cst_269 {dimension_numbers = #tpu.dot_dimension_numbers<[1], [0], [0], [1], [0, 0, 1, 1], [], []>} : vector<4x128xbf16>, vector<128x128xbf16>, vector<4x128xf32> -> vector<4x128xf32>
    %259 = arith.addf %252, %258 : vector<4x128xf32>
    %c0_270 = arith.constant 0 : index
    %c4_271 = arith.constant 4 : index
    %c2_272 = arith.constant 2 : index
    %c0_273 = arith.constant 0 : index
    %260 = vector.load %arg1[%c0_270, %c4_271, %c2_272, %c0_273] : memref<1x6x6x128xf32, #tpu.memory_space<vmem>>, vector<1x1x4x128xf32>
    %261 = vector.shape_cast %260 : vector<1x1x4x128xf32> to vector<4x128xf32>
    %262 = arith.truncf %261 : vector<4x128xf32> to vector<4x128xbf16>
    %c5_274 = arith.constant 5 : index
    %c0_275 = arith.constant 0 : index
    %c0_276 = arith.constant 0 : index
    %263 = vector.load %arg2[%c5_274, %c0_275, %c0_276] : memref<9x128x128xbf16, #tpu.memory_space<vmem>>, vector<1x128x128xbf16>
    %264 = vector.shape_cast %263 : vector<1x128x128xbf16> to vector<128x128xbf16>
    %cst_277 = arith.constant dense<0.000000e+00> : vector<4x128xf32>
    %265 = tpu.matmul %262, %264, %cst_277 {dimension_numbers = #tpu.dot_dimension_numbers<[1], [0], [0], [1], [0, 0, 1, 1], [], []>} : vector<4x128xbf16>, vector<128x128xbf16>, vector<4x128xf32> -> vector<4x128xf32>
    %266 = arith.addf %259, %265 : vector<4x128xf32>
    %c0_278 = arith.constant 0 : index
    %c5_279 = arith.constant 5 : index
    %c0_280 = arith.constant 0 : index
    %c0_281 = arith.constant 0 : index
    %267 = vector.load %arg1[%c0_278, %c5_279, %c0_280, %c0_281] : memref<1x6x6x128xf32, #tpu.memory_space<vmem>>, vector<1x1x4x128xf32>
    %268 = vector.shape_cast %267 : vector<1x1x4x128xf32> to vector<4x128xf32>
    %269 = arith.truncf %268 : vector<4x128xf32> to vector<4x128xbf16>
    %c6_282 = arith.constant 6 : index
    %c0_283 = arith.constant 0 : index
    %c0_284 = arith.constant 0 : index
    %270 = vector.load %arg2[%c6_282, %c0_283, %c0_284] : memref<9x128x128xbf16, #tpu.memory_space<vmem>>, vector<1x128x128xbf16>
    %271 = vector.shape_cast %270 : vector<1x128x128xbf16> to vector<128x128xbf16>
    %cst_285 = arith.constant dense<0.000000e+00> : vector<4x128xf32>
    %272 = tpu.matmul %269, %271, %cst_285 {dimension_numbers = #tpu.dot_dimension_numbers<[1], [0], [0], [1], [0, 0, 1, 1], [], []>} : vector<4x128xbf16>, vector<128x128xbf16>, vector<4x128xf32> -> vector<4x128xf32>
    %273 = arith.addf %266, %272 : vector<4x128xf32>
    %c0_286 = arith.constant 0 : index
    %c5_287 = arith.constant 5 : index
    %c1_288 = arith.constant 1 : index
    %c0_289 = arith.constant 0 : index
    %274 = vector.load %arg1[%c0_286, %c5_287, %c1_288, %c0_289] : memref<1x6x6x128xf32, #tpu.memory_space<vmem>>, vector<1x1x4x128xf32>
    %275 = vector.shape_cast %274 : vector<1x1x4x128xf32> to vector<4x128xf32>
    %276 = arith.truncf %275 : vector<4x128xf32> to vector<4x128xbf16>
    %c7_290 = arith.constant 7 : index
    %c0_291 = arith.constant 0 : index
    %c0_292 = arith.constant 0 : index
    %277 = vector.load %arg2[%c7_290, %c0_291, %c0_292] : memref<9x128x128xbf16, #tpu.memory_space<vmem>>, vector<1x128x128xbf16>
    %278 = vector.shape_cast %277 : vector<1x128x128xbf16> to vector<128x128xbf16>
    %cst_293 = arith.constant dense<0.000000e+00> : vector<4x128xf32>
    %279 = tpu.matmul %276, %278, %cst_293 {dimension_numbers = #tpu.dot_dimension_numbers<[1], [0], [0], [1], [0, 0, 1, 1], [], []>} : vector<4x128xbf16>, vector<128x128xbf16>, vector<4x128xf32> -> vector<4x128xf32>
    %280 = arith.addf %273, %279 : vector<4x128xf32>
    %c0_294 = arith.constant 0 : index
    %c5_295 = arith.constant 5 : index
    %c2_296 = arith.constant 2 : index
    %c0_297 = arith.constant 0 : index
    %281 = vector.load %arg1[%c0_294, %c5_295, %c2_296, %c0_297] : memref<1x6x6x128xf32, #tpu.memory_space<vmem>>, vector<1x1x4x128xf32>
    %282 = vector.shape_cast %281 : vector<1x1x4x128xf32> to vector<4x128xf32>
    %283 = arith.truncf %282 : vector<4x128xf32> to vector<4x128xbf16>
    %c8_298 = arith.constant 8 : index
    %c0_299 = arith.constant 0 : index
    %c0_300 = arith.constant 0 : index
    %284 = vector.load %arg2[%c8_298, %c0_299, %c0_300] : memref<9x128x128xbf16, #tpu.memory_space<vmem>>, vector<1x128x128xbf16>
    %285 = vector.shape_cast %284 : vector<1x128x128xbf16> to vector<128x128xbf16>
    %cst_301 = arith.constant dense<0.000000e+00> : vector<4x128xf32>
    %286 = tpu.matmul %283, %285, %cst_301 {dimension_numbers = #tpu.dot_dimension_numbers<[1], [0], [0], [1], [0, 0, 1, 1], [], []>} : vector<4x128xbf16>, vector<128x128xbf16>, vector<4x128xf32> -> vector<4x128xf32>
    %287 = arith.addf %280, %286 : vector<4x128xf32>
    %c0_302 = arith.constant 0 : index
    %c3_303 = arith.constant 3 : index
    %c0_304 = arith.constant 0 : index
    %c0_305 = arith.constant 0 : index
    %288 = vector.load %arg3[%c0_302, %c3_303, %c0_304, %c0_305] : memref<1x4x4x128xf32, #tpu.memory_space<vmem>>, vector<1x1x4x128xf32>
    %289 = vector.shape_cast %288 : vector<1x1x4x128xf32> to vector<4x128xf32>
    %290 = vector.shape_cast %287 : vector<4x128xf32> to vector<1x1x4x128xf32>
    tpu.vector_store %arg3[%c0_302, %c3_303, %c0_304, %c0_305], %290 {strides = array<i32>} : memref<1x4x4x128xf32, #tpu.memory_space<vmem>>, vector<1x1x4x128xf32>,
    %cst_306 = arith.constant dense<0.000000e+00> : vector<128xf32>
    %291 = vector.multi_reduction <add>, %287, %cst_306 [0] : vector<4x128xf32> to vector<128xf32>
    %292 = vector.shape_cast %291 : vector<128xf32> to vector<1x128xf32>
    %293 = arith.addf %219, %292 : vector<1x128xf32>
    %294 = arith.mulf %287, %287 : vector<4x128xf32>
    %cst_307 = arith.constant dense<0.000000e+00> : vector<128xf32>
    %295 = vector.multi_reduction <add>, %294, %cst_307 [0] : vector<4x128xf32> to vector<128xf32>
    %296 = vector.shape_cast %295 : vector<128xf32> to vector<1x128xf32>
    %297 = arith.addf %223, %296 : vector<1x128xf32>
    %298 = tpu.concatenate %293, %297 in 0 : vector<1x128xf32>, vector<1x128xf32> -> vector<2x128xf32>
    %c0_308 = arith.constant 0 : index
    %c0_309 = arith.constant 0 : index
    %c0_310 = arith.constant 0 : index
    %299 = vector.load %arg4[%c0_308, %c0_309, %c0_310] : memref<1x2x128xf32, #tpu.memory_space<vmem>>, vector<1x2x128xf32>
    %300 = vector.shape_cast %299 : vector<1x2x128xf32> to vector<2x128xf32>
    %301 = vector.shape_cast %298 : vector<2x128xf32> to vector<1x2x128xf32>
    tpu.vector_store %arg4[%c0_308, %c0_309, %c0_310], %301 {strides = array<i32>} : memref<1x2x128xf32, #tpu.memory_space<vmem>>, vector<1x2x128xf32>,
    return
  }
  func.func @transform_0(%arg0: i32) -> (i32, i32, i32, i32) {
    %c0_i32 = arith.constant 0 : i32
    %c0_i32_0 = arith.constant 0 : i32
    %c0_i32_1 = arith.constant 0 : i32
    %c0_i32_2 = arith.constant 0 : i32
    return %arg0, %c0_i32, %c0_i32_0, %c0_i32_1 : i32, i32, i32, i32
  }
  func.func @transform_1(%arg0: i32) -> (i32, i32, i32) {
    %c0_i32 = arith.constant 0 : i32
    %c0_i32_0 = arith.constant 0 : i32
    %c0_i32_1 = arith.constant 0 : i32
    %c0_i32_2 = arith.constant 0 : i32
    return %c0_i32, %c0_i32_0, %c0_i32_1 : i32, i32, i32
  }
  func.func @transform_2(%arg0: i32) -> (i32, i32, i32, i32) {
    %c0_i32 = arith.constant 0 : i32
    %c0_i32_0 = arith.constant 0 : i32
    %c0_i32_1 = arith.constant 0 : i32
    %c0_i32_2 = arith.constant 0 : i32
    return %arg0, %c0_i32, %c0_i32_0, %c0_i32_1 : i32, i32, i32, i32
  }
  func.func @transform_3(%arg0: i32) -> (i32, i32, i32) {
    %c0_i32 = arith.constant 0 : i32
    %c0_i32_0 = arith.constant 0 : i32
    %c0_i32_1 = arith.constant 0 : i32
    return %arg0, %c0_i32, %c0_i32_0 : i32, i32, i32
  }
}

module attributes {stable_mosaic.version = 11 : i64} {
  func.func @kernel(%arg0: i32, %arg1: memref<32x128xf32, #tpu.memory_space<vmem>>, %arg2: memref<2x2x128xf32, #tpu.memory_space<vmem>>, %arg3: memref<1x128xf32, #tpu.memory_space<vmem>>, %arg4: memref<1x128xf32, #tpu.memory_space<vmem>>, %arg5: memref<32x128xf32, #tpu.memory_space<vmem>>) attributes {dimension_semantics = [#tpu.dimension_semantics<parallel>], iteration_bounds = array<i64: 1>, scalar_prefetch = 0 : i64, scratch_operands = 0 : i64, tpu.core_type = #tpu.core_type<tc>, window_params = [{transform_indices = @transform_0, window_bounds = array<i64: 32, 128>}, {pipeline_mode = #tpu.pipeline_mode<synchronous>, transform_indices = @transform_1, window_bounds = array<i64: 2, 2, 128>}, {pipeline_mode = #tpu.pipeline_mode<synchronous>, transform_indices = @transform_2, window_bounds = array<i64: 1, 128>}, {pipeline_mode = #tpu.pipeline_mode<synchronous>, transform_indices = @transform_3, window_bounds = array<i64: 1, 128>}, {transform_indices = @transform_4, window_bounds = array<i64: 32, 128>}]} {
    %c0 = arith.constant 0 : index
    %c0_0 = arith.constant 0 : index
    %c0_1 = arith.constant 0 : index
    %0 = vector.load %arg2[%c0, %c0_0, %c0_1] : memref<2x2x128xf32, #tpu.memory_space<vmem>>, vector<2x2x128xf32>
    %cst = arith.constant dense<0.000000e+00> : vector<2x128xf32>
    %1 = vector.multi_reduction <add>, %0, %cst [0] : vector<2x2x128xf32> to vector<2x128xf32>
    %2 = vector.extract_strided_slice %1 {offsets = [0, 0], sizes = [1, 128], strides = [1, 1]} : vector<2x128xf32> to vector<1x128xf32>
    %cst_2 = arith.constant 3.125000e-02 : f32
    %3 = vector.broadcast %cst_2 : f32 to vector<1x128xf32>
    %4 = arith.mulf %2, %3 : vector<1x128xf32>
    %5 = vector.extract_strided_slice %1 {offsets = [1, 0], sizes = [1, 128], strides = [1, 1]} : vector<2x128xf32> to vector<1x128xf32>
    %cst_3 = arith.constant 3.125000e-02 : f32
    %6 = vector.broadcast %cst_3 : f32 to vector<1x128xf32>
    %7 = arith.mulf %5, %6 : vector<1x128xf32>
    %8 = arith.mulf %4, %4 : vector<1x128xf32>
    %9 = arith.subf %7, %8 : vector<1x128xf32>
    %cst_4 = arith.constant 0.000000e+00 : f32
    %10 = vector.broadcast %cst_4 : f32 to vector<1x128xf32>
    %11 = arith.maximumf %9, %10 : vector<1x128xf32>
    %c0_5 = arith.constant 0 : index
    %c0_6 = arith.constant 0 : index
    %12 = vector.load %arg3[%c0_5, %c0_6] : memref<1x128xf32, #tpu.memory_space<vmem>>, vector<1x128xf32>
    %cst_7 = arith.constant 9.99999974E-6 : f32
    %13 = vector.broadcast %cst_7 : f32 to vector<1x128xf32>
    %14 = arith.addf %11, %13 : vector<1x128xf32>
    %15 = math.rsqrt %14 : vector<1x128xf32>
    %16 = arith.mulf %12, %15 : vector<1x128xf32>
    %c0_8 = arith.constant 0 : index
    %c0_9 = arith.constant 0 : index
    %17 = vector.load %arg4[%c0_8, %c0_9] : memref<1x128xf32, #tpu.memory_space<vmem>>, vector<1x128xf32>
    %18 = arith.mulf %4, %16 : vector<1x128xf32>
    %19 = arith.subf %17, %18 : vector<1x128xf32>
    %c0_10 = arith.constant 0 : index
    %c0_11 = arith.constant 0 : index
    %20 = vector.load %arg1[%c0_10, %c0_11] : memref<32x128xf32, #tpu.memory_space<vmem>>, vector<32x128xf32>
    %21 = vector.broadcast %16 : vector<1x128xf32> to vector<32x128xf32>
    %22 = arith.mulf %20, %21 : vector<32x128xf32>
    %23 = vector.broadcast %19 : vector<1x128xf32> to vector<32x128xf32>
    %24 = arith.addf %22, %23 : vector<32x128xf32>
    %cst_12 = arith.constant 0.000000e+00 : f32
    %25 = vector.broadcast %cst_12 : f32 to vector<32x128xf32>
    %26 = arith.maximumf %24, %25 : vector<32x128xf32>
    %c0_13 = arith.constant 0 : index
    %c0_14 = arith.constant 0 : index
    %27 = vector.load %arg5[%c0_13, %c0_14] : memref<32x128xf32, #tpu.memory_space<vmem>>, vector<32x128xf32>
    tpu.vector_store %arg5[%c0_13, %c0_14], %26 {strides = array<i32>} : memref<32x128xf32, #tpu.memory_space<vmem>>, vector<32x128xf32>,
    return
  }
  func.func @transform_0(%arg0: i32) -> (i32, i32) {
    %c0_i32 = arith.constant 0 : i32
    %c0_i32_0 = arith.constant 0 : i32
    return %arg0, %c0_i32 : i32, i32
  }
  func.func @transform_1(%arg0: i32) -> (i32, i32, i32) {
    %c0_i32 = arith.constant 0 : i32
    %c0_i32_0 = arith.constant 0 : i32
    %c0_i32_1 = arith.constant 0 : i32
    %c0_i32_2 = arith.constant 0 : i32
    return %c0_i32, %c0_i32_0, %c0_i32_1 : i32, i32, i32
  }
  func.func @transform_2(%arg0: i32) -> (i32, i32) {
    %c0_i32 = arith.constant 0 : i32
    %c0_i32_0 = arith.constant 0 : i32
    %c0_i32_1 = arith.constant 0 : i32
    return %c0_i32, %c0_i32_0 : i32, i32
  }
  func.func @transform_3(%arg0: i32) -> (i32, i32) {
    %c0_i32 = arith.constant 0 : i32
    %c0_i32_0 = arith.constant 0 : i32
    %c0_i32_1 = arith.constant 0 : i32
    return %c0_i32, %c0_i32_0 : i32, i32
  }
  func.func @transform_4(%arg0: i32) -> (i32, i32) {
    %c0_i32 = arith.constant 0 : i32
    %c0_i32_0 = arith.constant 0 : i32
    return %arg0, %c0_i32 : i32, i32
  }
}

module attributes {stable_mosaic.version = 11 : i64} {
  func.func @kernel(%arg0: i32, %arg1: memref<32x128xf32, #tpu.memory_space<vmem>>, %arg2: memref<2x2x128xf32, #tpu.memory_space<vmem>>, %arg3: memref<1x128xf32, #tpu.memory_space<vmem>>, %arg4: memref<1x128xf32, #tpu.memory_space<vmem>>, %arg5: memref<32x128xf32, #tpu.memory_space<vmem>>, %arg6: memref<32x128xf32, #tpu.memory_space<vmem>>) attributes {dimension_semantics = [#tpu.dimension_semantics<parallel>], iteration_bounds = array<i64: 1>, scalar_prefetch = 0 : i64, scratch_operands = 0 : i64, tpu.core_type = #tpu.core_type<tc>, window_params = [{transform_indices = @transform_0, window_bounds = array<i64: 32, 128>}, {pipeline_mode = #tpu.pipeline_mode<synchronous>, transform_indices = @transform_1, window_bounds = array<i64: 2, 2, 128>}, {pipeline_mode = #tpu.pipeline_mode<synchronous>, transform_indices = @transform_2, window_bounds = array<i64: 1, 128>}, {pipeline_mode = #tpu.pipeline_mode<synchronous>, transform_indices = @transform_3, window_bounds = array<i64: 1, 128>}, {transform_indices = @transform_4, window_bounds = array<i64: 32, 128>}, {transform_indices = @transform_5, window_bounds = array<i64: 32, 128>}]} {
    %c0 = arith.constant 0 : index
    %c0_0 = arith.constant 0 : index
    %c0_1 = arith.constant 0 : index
    %0 = vector.load %arg2[%c0, %c0_0, %c0_1] : memref<2x2x128xf32, #tpu.memory_space<vmem>>, vector<2x2x128xf32>
    %cst = arith.constant dense<0.000000e+00> : vector<2x128xf32>
    %1 = vector.multi_reduction <add>, %0, %cst [0] : vector<2x2x128xf32> to vector<2x128xf32>
    %2 = vector.extract_strided_slice %1 {offsets = [0, 0], sizes = [1, 128], strides = [1, 1]} : vector<2x128xf32> to vector<1x128xf32>
    %cst_2 = arith.constant 3.125000e-02 : f32
    %3 = vector.broadcast %cst_2 : f32 to vector<1x128xf32>
    %4 = arith.mulf %2, %3 : vector<1x128xf32>
    %5 = vector.extract_strided_slice %1 {offsets = [1, 0], sizes = [1, 128], strides = [1, 1]} : vector<2x128xf32> to vector<1x128xf32>
    %cst_3 = arith.constant 3.125000e-02 : f32
    %6 = vector.broadcast %cst_3 : f32 to vector<1x128xf32>
    %7 = arith.mulf %5, %6 : vector<1x128xf32>
    %8 = arith.mulf %4, %4 : vector<1x128xf32>
    %9 = arith.subf %7, %8 : vector<1x128xf32>
    %cst_4 = arith.constant 0.000000e+00 : f32
    %10 = vector.broadcast %cst_4 : f32 to vector<1x128xf32>
    %11 = arith.maximumf %9, %10 : vector<1x128xf32>
    %c0_5 = arith.constant 0 : index
    %c0_6 = arith.constant 0 : index
    %12 = vector.load %arg3[%c0_5, %c0_6] : memref<1x128xf32, #tpu.memory_space<vmem>>, vector<1x128xf32>
    %cst_7 = arith.constant 9.99999974E-6 : f32
    %13 = vector.broadcast %cst_7 : f32 to vector<1x128xf32>
    %14 = arith.addf %11, %13 : vector<1x128xf32>
    %15 = math.rsqrt %14 : vector<1x128xf32>
    %16 = arith.mulf %12, %15 : vector<1x128xf32>
    %c0_8 = arith.constant 0 : index
    %c0_9 = arith.constant 0 : index
    %17 = vector.load %arg4[%c0_8, %c0_9] : memref<1x128xf32, #tpu.memory_space<vmem>>, vector<1x128xf32>
    %18 = arith.mulf %4, %16 : vector<1x128xf32>
    %19 = arith.subf %17, %18 : vector<1x128xf32>
    %c0_10 = arith.constant 0 : index
    %c0_11 = arith.constant 0 : index
    %20 = vector.load %arg1[%c0_10, %c0_11] : memref<32x128xf32, #tpu.memory_space<vmem>>, vector<32x128xf32>
    %21 = vector.broadcast %16 : vector<1x128xf32> to vector<32x128xf32>
    %22 = arith.mulf %20, %21 : vector<32x128xf32>
    %23 = vector.broadcast %19 : vector<1x128xf32> to vector<32x128xf32>
    %24 = arith.addf %22, %23 : vector<32x128xf32>
    %c0_12 = arith.constant 0 : index
    %c0_13 = arith.constant 0 : index
    %25 = vector.load %arg5[%c0_12, %c0_13] : memref<32x128xf32, #tpu.memory_space<vmem>>, vector<32x128xf32>
    %26 = arith.addf %24, %25 : vector<32x128xf32>
    %cst_14 = arith.constant 0.000000e+00 : f32
    %27 = vector.broadcast %cst_14 : f32 to vector<32x128xf32>
    %28 = arith.maximumf %26, %27 : vector<32x128xf32>
    %c0_15 = arith.constant 0 : index
    %c0_16 = arith.constant 0 : index
    %29 = vector.load %arg6[%c0_15, %c0_16] : memref<32x128xf32, #tpu.memory_space<vmem>>, vector<32x128xf32>
    tpu.vector_store %arg6[%c0_15, %c0_16], %28 {strides = array<i32>} : memref<32x128xf32, #tpu.memory_space<vmem>>, vector<32x128xf32>,
    return
  }
  func.func @transform_0(%arg0: i32) -> (i32, i32) {
    %c0_i32 = arith.constant 0 : i32
    %c0_i32_0 = arith.constant 0 : i32
    return %arg0, %c0_i32 : i32, i32
  }
  func.func @transform_1(%arg0: i32) -> (i32, i32, i32) {
    %c0_i32 = arith.constant 0 : i32
    %c0_i32_0 = arith.constant 0 : i32
    %c0_i32_1 = arith.constant 0 : i32
    %c0_i32_2 = arith.constant 0 : i32
    return %c0_i32, %c0_i32_0, %c0_i32_1 : i32, i32, i32
  }
  func.func @transform_2(%arg0: i32) -> (i32, i32) {
    %c0_i32 = arith.constant 0 : i32
    %c0_i32_0 = arith.constant 0 : i32
    %c0_i32_1 = arith.constant 0 : i32
    return %c0_i32, %c0_i32_0 : i32, i32
  }
  func.func @transform_3(%arg0: i32) -> (i32, i32) {
    %c0_i32 = arith.constant 0 : i32
    %c0_i32_0 = arith.constant 0 : i32
    %c0_i32_1 = arith.constant 0 : i32
    return %c0_i32, %c0_i32_0 : i32, i32
  }
  func.func @transform_4(%arg0: i32) -> (i32, i32) {
    %c0_i32 = arith.constant 0 : i32
    %c0_i32_0 = arith.constant 0 : i32
    return %arg0, %c0_i32 : i32, i32
  }
  func.func @transform_5(%arg0: i32) -> (i32, i32) {
    %c0_i32 = arith.constant 0 : i32
    %c0_i32_0 = arith.constant 0 : i32
    return %arg0, %c0_i32 : i32, i32
  }
}

module attributes {stable_mosaic.version = 11 : i64} {
  func.func @matmul_stats_kernel(%arg0: i32, %arg1: memref<8x128xbf16, #tpu.memory_space<vmem>>, %arg2: memref<128x128xbf16, #tpu.memory_space<vmem>>, %arg3: memref<8x128xf32, #tpu.memory_space<vmem>>, %arg4: memref<1x2x128xf32, #tpu.memory_space<vmem>>) attributes {dimension_semantics = [#tpu.dimension_semantics<parallel>], iteration_bounds = array<i64: 1>, scalar_prefetch = 0 : i64, scratch_operands = 0 : i64, tpu.core_type = #tpu.core_type<tc>, window_params = [{transform_indices = @transform_0, window_bounds = array<i64: 8, 128>}, {pipeline_mode = #tpu.pipeline_mode<synchronous>, transform_indices = @transform_1, window_bounds = array<i64: 128, 128>}, {transform_indices = @transform_2, window_bounds = array<i64: 8, 128>}, {transform_indices = @transform_3, window_bounds = array<i64: 1, 2, 128>}]} {
    %c0 = arith.constant 0 : index
    %c0_0 = arith.constant 0 : index
    %0 = vector.load %arg1[%c0, %c0_0] : memref<8x128xbf16, #tpu.memory_space<vmem>>, vector<8x128xbf16>
    %c0_1 = arith.constant 0 : index
    %c0_2 = arith.constant 0 : index
    %1 = vector.load %arg2[%c0_1, %c0_2] : memref<128x128xbf16, #tpu.memory_space<vmem>>, vector<128x128xbf16>
    %cst = arith.constant dense<0.000000e+00> : vector<8x128xf32>
    %2 = tpu.matmul %0, %1, %cst {dimension_numbers = #tpu.dot_dimension_numbers<[1], [0], [0], [1], [0, 0, 1, 1], [], []>} : vector<8x128xbf16>, vector<128x128xbf16>, vector<8x128xf32> -> vector<8x128xf32>
    %c0_3 = arith.constant 0 : index
    %c0_4 = arith.constant 0 : index
    %3 = vector.load %arg3[%c0_3, %c0_4] : memref<8x128xf32, #tpu.memory_space<vmem>>, vector<8x128xf32>
    tpu.vector_store %arg3[%c0_3, %c0_4], %2 {strides = array<i32>} : memref<8x128xf32, #tpu.memory_space<vmem>>, vector<8x128xf32>,
    %cst_5 = arith.constant dense<0.000000e+00> : vector<128xf32>
    %4 = vector.multi_reduction <add>, %2, %cst_5 [0] : vector<8x128xf32> to vector<128xf32>
    %5 = vector.shape_cast %4 : vector<128xf32> to vector<1x128xf32>
    %6 = arith.mulf %2, %2 : vector<8x128xf32>
    %cst_6 = arith.constant dense<0.000000e+00> : vector<128xf32>
    %7 = vector.multi_reduction <add>, %6, %cst_6 [0] : vector<8x128xf32> to vector<128xf32>
    %8 = vector.shape_cast %7 : vector<128xf32> to vector<1x128xf32>
    %9 = tpu.concatenate %5, %8 in 0 : vector<1x128xf32>, vector<1x128xf32> -> vector<2x128xf32>
    %c0_7 = arith.constant 0 : index
    %c0_8 = arith.constant 0 : index
    %c0_9 = arith.constant 0 : index
    %10 = vector.load %arg4[%c0_7, %c0_8, %c0_9] : memref<1x2x128xf32, #tpu.memory_space<vmem>>, vector<1x2x128xf32>
    %11 = vector.shape_cast %10 : vector<1x2x128xf32> to vector<2x128xf32>
    %12 = vector.shape_cast %9 : vector<2x128xf32> to vector<1x2x128xf32>
    tpu.vector_store %arg4[%c0_7, %c0_8, %c0_9], %12 {strides = array<i32>} : memref<1x2x128xf32, #tpu.memory_space<vmem>>, vector<1x2x128xf32>,
    return
  }
  func.func @transform_0(%arg0: i32) -> (i32, i32) {
    %c0_i32 = arith.constant 0 : i32
    %c0_i32_0 = arith.constant 0 : i32
    return %arg0, %c0_i32 : i32, i32
  }
  func.func @transform_1(%arg0: i32) -> (i32, i32) {
    %c0_i32 = arith.constant 0 : i32
    %c0_i32_0 = arith.constant 0 : i32
    %c0_i32_1 = arith.constant 0 : i32
    return %c0_i32, %c0_i32_0 : i32, i32
  }
  func.func @transform_2(%arg0: i32) -> (i32, i32) {
    %c0_i32 = arith.constant 0 : i32
    %c0_i32_0 = arith.constant 0 : i32
    return %arg0, %c0_i32 : i32, i32
  }
  func.func @transform_3(%arg0: i32) -> (i32, i32, i32) {
    %c0_i32 = arith.constant 0 : i32
    %c0_i32_0 = arith.constant 0 : i32
    %c0_i32_1 = arith.constant 0 : i32
    return %arg0, %c0_i32, %c0_i32_0 : i32, i32, i32
  }
}

module attributes {stable_mosaic.version = 11 : i64} {
  func.func @kernel(%arg0: i32, %arg1: memref<8x128xf32, #tpu.memory_space<vmem>>, %arg2: memref<1x2x128xf32, #tpu.memory_space<vmem>>, %arg3: memref<1x128xf32, #tpu.memory_space<vmem>>, %arg4: memref<1x128xf32, #tpu.memory_space<vmem>>, %arg5: memref<8x128xf32, #tpu.memory_space<vmem>>) attributes {dimension_semantics = [#tpu.dimension_semantics<parallel>], iteration_bounds = array<i64: 1>, scalar_prefetch = 0 : i64, scratch_operands = 0 : i64, tpu.core_type = #tpu.core_type<tc>, window_params = [{transform_indices = @transform_0, window_bounds = array<i64: 8, 128>}, {pipeline_mode = #tpu.pipeline_mode<synchronous>, transform_indices = @transform_1, window_bounds = array<i64: 1, 2, 128>}, {pipeline_mode = #tpu.pipeline_mode<synchronous>, transform_indices = @transform_2, window_bounds = array<i64: 1, 128>}, {pipeline_mode = #tpu.pipeline_mode<synchronous>, transform_indices = @transform_3, window_bounds = array<i64: 1, 128>}, {transform_indices = @transform_4, window_bounds = array<i64: 8, 128>}]} {
    %c0 = arith.constant 0 : index
    %c0_0 = arith.constant 0 : index
    %c0_1 = arith.constant 0 : index
    %0 = vector.load %arg2[%c0, %c0_0, %c0_1] : memref<1x2x128xf32, #tpu.memory_space<vmem>>, vector<1x2x128xf32>
    %cst = arith.constant dense<0.000000e+00> : vector<2x128xf32>
    %1 = vector.multi_reduction <add>, %0, %cst [0] : vector<1x2x128xf32> to vector<2x128xf32>
    %2 = vector.extract_strided_slice %1 {offsets = [0, 0], sizes = [1, 128], strides = [1, 1]} : vector<2x128xf32> to vector<1x128xf32>
    %cst_2 = arith.constant 1.250000e-01 : f32
    %3 = vector.broadcast %cst_2 : f32 to vector<1x128xf32>
    %4 = arith.mulf %2, %3 : vector<1x128xf32>
    %5 = vector.extract_strided_slice %1 {offsets = [1, 0], sizes = [1, 128], strides = [1, 1]} : vector<2x128xf32> to vector<1x128xf32>
    %cst_3 = arith.constant 1.250000e-01 : f32
    %6 = vector.broadcast %cst_3 : f32 to vector<1x128xf32>
    %7 = arith.mulf %5, %6 : vector<1x128xf32>
    %8 = arith.mulf %4, %4 : vector<1x128xf32>
    %9 = arith.subf %7, %8 : vector<1x128xf32>
    %cst_4 = arith.constant 0.000000e+00 : f32
    %10 = vector.broadcast %cst_4 : f32 to vector<1x128xf32>
    %11 = arith.maximumf %9, %10 : vector<1x128xf32>
    %c0_5 = arith.constant 0 : index
    %c0_6 = arith.constant 0 : index
    %12 = vector.load %arg3[%c0_5, %c0_6] : memref<1x128xf32, #tpu.memory_space<vmem>>, vector<1x128xf32>
    %cst_7 = arith.constant 9.99999974E-6 : f32
    %13 = vector.broadcast %cst_7 : f32 to vector<1x128xf32>
    %14 = arith.addf %11, %13 : vector<1x128xf32>
    %15 = math.rsqrt %14 : vector<1x128xf32>
    %16 = arith.mulf %12, %15 : vector<1x128xf32>
    %c0_8 = arith.constant 0 : index
    %c0_9 = arith.constant 0 : index
    %17 = vector.load %arg4[%c0_8, %c0_9] : memref<1x128xf32, #tpu.memory_space<vmem>>, vector<1x128xf32>
    %18 = arith.mulf %4, %16 : vector<1x128xf32>
    %19 = arith.subf %17, %18 : vector<1x128xf32>
    %c0_10 = arith.constant 0 : index
    %c0_11 = arith.constant 0 : index
    %20 = vector.load %arg1[%c0_10, %c0_11] : memref<8x128xf32, #tpu.memory_space<vmem>>, vector<8x128xf32>
    %21 = vector.broadcast %16 : vector<1x128xf32> to vector<8x128xf32>
    %22 = arith.mulf %20, %21 : vector<8x128xf32>
    %23 = vector.broadcast %19 : vector<1x128xf32> to vector<8x128xf32>
    %24 = arith.addf %22, %23 : vector<8x128xf32>
    %c0_12 = arith.constant 0 : index
    %c0_13 = arith.constant 0 : index
    %25 = vector.load %arg5[%c0_12, %c0_13] : memref<8x128xf32, #tpu.memory_space<vmem>>, vector<8x128xf32>
    tpu.vector_store %arg5[%c0_12, %c0_13], %24 {strides = array<i32>} : memref<8x128xf32, #tpu.memory_space<vmem>>, vector<8x128xf32>,
    return
  }
  func.func @transform_0(%arg0: i32) -> (i32, i32) {
    %c0_i32 = arith.constant 0 : i32
    %c0_i32_0 = arith.constant 0 : i32
    return %arg0, %c0_i32 : i32, i32
  }
  func.func @transform_1(%arg0: i32) -> (i32, i32, i32) {
    %c0_i32 = arith.constant 0 : i32
    %c0_i32_0 = arith.constant 0 : i32
    %c0_i32_1 = arith.constant 0 : i32
    %c0_i32_2 = arith.constant 0 : i32
    return %c0_i32, %c0_i32_0, %c0_i32_1 : i32, i32, i32
  }
  func.func @transform_2(%arg0: i32) -> (i32, i32) {
    %c0_i32 = arith.constant 0 : i32
    %c0_i32_0 = arith.constant 0 : i32
    %c0_i32_1 = arith.constant 0 : i32
    return %c0_i32, %c0_i32_0 : i32, i32
  }
  func.func @transform_3(%arg0: i32) -> (i32, i32) {
    %c0_i32 = arith.constant 0 : i32
    %c0_i32_0 = arith.constant 0 : i32
    %c0_i32_1 = arith.constant 0 : i32
    return %c0_i32, %c0_i32_0 : i32, i32
  }
  func.func @transform_4(%arg0: i32) -> (i32, i32) {
    %c0_i32 = arith.constant 0 : i32
    %c0_i32_0 = arith.constant 0 : i32
    return %arg0, %c0_i32 : i32, i32
  }
}

module attributes {stable_mosaic.version = 11 : i64} {
  func.func @kernel(%arg0: i32, %arg1: memref<8x128xf32, #tpu.memory_space<vmem>>, %arg2: memref<1x2x128xf32, #tpu.memory_space<vmem>>, %arg3: memref<1x128xf32, #tpu.memory_space<vmem>>, %arg4: memref<1x128xf32, #tpu.memory_space<vmem>>, %arg5: memref<8x128xf32, #tpu.memory_space<vmem>>) attributes {dimension_semantics = [#tpu.dimension_semantics<parallel>], iteration_bounds = array<i64: 1>, scalar_prefetch = 0 : i64, scratch_operands = 0 : i64, tpu.core_type = #tpu.core_type<tc>, window_params = [{transform_indices = @transform_0, window_bounds = array<i64: 8, 128>}, {pipeline_mode = #tpu.pipeline_mode<synchronous>, transform_indices = @transform_1, window_bounds = array<i64: 1, 2, 128>}, {pipeline_mode = #tpu.pipeline_mode<synchronous>, transform_indices = @transform_2, window_bounds = array<i64: 1, 128>}, {pipeline_mode = #tpu.pipeline_mode<synchronous>, transform_indices = @transform_3, window_bounds = array<i64: 1, 128>}, {transform_indices = @transform_4, window_bounds = array<i64: 8, 128>}]} {
    %c0 = arith.constant 0 : index
    %c0_0 = arith.constant 0 : index
    %c0_1 = arith.constant 0 : index
    %0 = vector.load %arg2[%c0, %c0_0, %c0_1] : memref<1x2x128xf32, #tpu.memory_space<vmem>>, vector<1x2x128xf32>
    %cst = arith.constant dense<0.000000e+00> : vector<2x128xf32>
    %1 = vector.multi_reduction <add>, %0, %cst [0] : vector<1x2x128xf32> to vector<2x128xf32>
    %2 = vector.extract_strided_slice %1 {offsets = [0, 0], sizes = [1, 128], strides = [1, 1]} : vector<2x128xf32> to vector<1x128xf32>
    %cst_2 = arith.constant 1.250000e-01 : f32
    %3 = vector.broadcast %cst_2 : f32 to vector<1x128xf32>
    %4 = arith.mulf %2, %3 : vector<1x128xf32>
    %5 = vector.extract_strided_slice %1 {offsets = [1, 0], sizes = [1, 128], strides = [1, 1]} : vector<2x128xf32> to vector<1x128xf32>
    %cst_3 = arith.constant 1.250000e-01 : f32
    %6 = vector.broadcast %cst_3 : f32 to vector<1x128xf32>
    %7 = arith.mulf %5, %6 : vector<1x128xf32>
    %8 = arith.mulf %4, %4 : vector<1x128xf32>
    %9 = arith.subf %7, %8 : vector<1x128xf32>
    %cst_4 = arith.constant 0.000000e+00 : f32
    %10 = vector.broadcast %cst_4 : f32 to vector<1x128xf32>
    %11 = arith.maximumf %9, %10 : vector<1x128xf32>
    %c0_5 = arith.constant 0 : index
    %c0_6 = arith.constant 0 : index
    %12 = vector.load %arg3[%c0_5, %c0_6] : memref<1x128xf32, #tpu.memory_space<vmem>>, vector<1x128xf32>
    %cst_7 = arith.constant 9.99999974E-6 : f32
    %13 = vector.broadcast %cst_7 : f32 to vector<1x128xf32>
    %14 = arith.addf %11, %13 : vector<1x128xf32>
    %15 = math.rsqrt %14 : vector<1x128xf32>
    %16 = arith.mulf %12, %15 : vector<1x128xf32>
    %c0_8 = arith.constant 0 : index
    %c0_9 = arith.constant 0 : index
    %17 = vector.load %arg4[%c0_8, %c0_9] : memref<1x128xf32, #tpu.memory_space<vmem>>, vector<1x128xf32>
    %18 = arith.mulf %4, %16 : vector<1x128xf32>
    %19 = arith.subf %17, %18 : vector<1x128xf32>
    %c0_10 = arith.constant 0 : index
    %c0_11 = arith.constant 0 : index
    %20 = vector.load %arg1[%c0_10, %c0_11] : memref<8x128xf32, #tpu.memory_space<vmem>>, vector<8x128xf32>
    %21 = vector.broadcast %16 : vector<1x128xf32> to vector<8x128xf32>
    %22 = arith.mulf %20, %21 : vector<8x128xf32>
    %23 = vector.broadcast %19 : vector<1x128xf32> to vector<8x128xf32>
    %24 = arith.addf %22, %23 : vector<8x128xf32>
    %cst_12 = arith.constant 0.000000e+00 : f32
    %25 = vector.broadcast %cst_12 : f32 to vector<8x128xf32>
    %26 = arith.maximumf %24, %25 : vector<8x128xf32>
    %c0_13 = arith.constant 0 : index
    %c0_14 = arith.constant 0 : index
    %27 = vector.load %arg5[%c0_13, %c0_14] : memref<8x128xf32, #tpu.memory_space<vmem>>, vector<8x128xf32>
    tpu.vector_store %arg5[%c0_13, %c0_14], %26 {strides = array<i32>} : memref<8x128xf32, #tpu.memory_space<vmem>>, vector<8x128xf32>,
    return
  }
  func.func @transform_0(%arg0: i32) -> (i32, i32) {
    %c0_i32 = arith.constant 0 : i32
    %c0_i32_0 = arith.constant 0 : i32
    return %arg0, %c0_i32 : i32, i32
  }
  func.func @transform_1(%arg0: i32) -> (i32, i32, i32) {
    %c0_i32 = arith.constant 0 : i32
    %c0_i32_0 = arith.constant 0 : i32
    %c0_i32_1 = arith.constant 0 : i32
    %c0_i32_2 = arith.constant 0 : i32
    return %c0_i32, %c0_i32_0, %c0_i32_1 : i32, i32, i32
  }
  func.func @transform_2(%arg0: i32) -> (i32, i32) {
    %c0_i32 = arith.constant 0 : i32
    %c0_i32_0 = arith.constant 0 : i32
    %c0_i32_1 = arith.constant 0 : i32
    return %c0_i32, %c0_i32_0 : i32, i32
  }
  func.func @transform_3(%arg0: i32) -> (i32, i32) {
    %c0_i32 = arith.constant 0 : i32
    %c0_i32_0 = arith.constant 0 : i32
    %c0_i32_1 = arith.constant 0 : i32
    return %c0_i32, %c0_i32_0 : i32, i32
  }
  func.func @transform_4(%arg0: i32) -> (i32, i32) {
    %c0_i32 = arith.constant 0 : i32
    %c0_i32_0 = arith.constant 0 : i32
    return %arg0, %c0_i32 : i32, i32
  }
}

module attributes {stable_mosaic.version = 11 : i64} {
  func.func @matmul_stats_kernel(%arg0: i32, %arg1: memref<8x1152xbf16, #tpu.memory_space<vmem>>, %arg2: memref<1152x128xbf16, #tpu.memory_space<vmem>>, %arg3: memref<8x128xf32, #tpu.memory_space<vmem>>, %arg4: memref<1x2x128xf32, #tpu.memory_space<vmem>>) attributes {dimension_semantics = [#tpu.dimension_semantics<parallel>], iteration_bounds = array<i64: 1>, scalar_prefetch = 0 : i64, scratch_operands = 0 : i64, tpu.core_type = #tpu.core_type<tc>, window_params = [{transform_indices = @transform_0, window_bounds = array<i64: 8, 1152>}, {pipeline_mode = #tpu.pipeline_mode<synchronous>, transform_indices = @transform_1, window_bounds = array<i64: 1152, 128>}, {transform_indices = @transform_2, window_bounds = array<i64: 8, 128>}, {transform_indices = @transform_3, window_bounds = array<i64: 1, 2, 128>}]} {
    %c0 = arith.constant 0 : index
    %c0_0 = arith.constant 0 : index
    %0 = vector.load %arg1[%c0, %c0_0] : memref<8x1152xbf16, #tpu.memory_space<vmem>>, vector<8x1152xbf16>
    %c0_1 = arith.constant 0 : index
    %c0_2 = arith.constant 0 : index
    %1 = vector.load %arg2[%c0_1, %c0_2] : memref<1152x128xbf16, #tpu.memory_space<vmem>>, vector<1152x128xbf16>
    %cst = arith.constant dense<0.000000e+00> : vector<8x128xf32>
    %2 = tpu.matmul %0, %1, %cst {dimension_numbers = #tpu.dot_dimension_numbers<[1], [0], [0], [1], [0, 0, 1, 1], [], []>} : vector<8x1152xbf16>, vector<1152x128xbf16>, vector<8x128xf32> -> vector<8x128xf32>
    %c0_3 = arith.constant 0 : index
    %c0_4 = arith.constant 0 : index
    %3 = vector.load %arg3[%c0_3, %c0_4] : memref<8x128xf32, #tpu.memory_space<vmem>>, vector<8x128xf32>
    tpu.vector_store %arg3[%c0_3, %c0_4], %2 {strides = array<i32>} : memref<8x128xf32, #tpu.memory_space<vmem>>, vector<8x128xf32>,
    %cst_5 = arith.constant dense<0.000000e+00> : vector<128xf32>
    %4 = vector.multi_reduction <add>, %2, %cst_5 [0] : vector<8x128xf32> to vector<128xf32>
    %5 = vector.shape_cast %4 : vector<128xf32> to vector<1x128xf32>
    %6 = arith.mulf %2, %2 : vector<8x128xf32>
    %cst_6 = arith.constant dense<0.000000e+00> : vector<128xf32>
    %7 = vector.multi_reduction <add>, %6, %cst_6 [0] : vector<8x128xf32> to vector<128xf32>
    %8 = vector.shape_cast %7 : vector<128xf32> to vector<1x128xf32>
    %9 = tpu.concatenate %5, %8 in 0 : vector<1x128xf32>, vector<1x128xf32> -> vector<2x128xf32>
    %c0_7 = arith.constant 0 : index
    %c0_8 = arith.constant 0 : index
    %c0_9 = arith.constant 0 : index
    %10 = vector.load %arg4[%c0_7, %c0_8, %c0_9] : memref<1x2x128xf32, #tpu.memory_space<vmem>>, vector<1x2x128xf32>
    %11 = vector.shape_cast %10 : vector<1x2x128xf32> to vector<2x128xf32>
    %12 = vector.shape_cast %9 : vector<2x128xf32> to vector<1x2x128xf32>
    tpu.vector_store %arg4[%c0_7, %c0_8, %c0_9], %12 {strides = array<i32>} : memref<1x2x128xf32, #tpu.memory_space<vmem>>, vector<1x2x128xf32>,
    return
  }
  func.func @transform_0(%arg0: i32) -> (i32, i32) {
    %c0_i32 = arith.constant 0 : i32
    %c0_i32_0 = arith.constant 0 : i32
    return %arg0, %c0_i32 : i32, i32
  }
  func.func @transform_1(%arg0: i32) -> (i32, i32) {
    %c0_i32 = arith.constant 0 : i32
    %c0_i32_0 = arith.constant 0 : i32
    %c0_i32_1 = arith.constant 0 : i32
    return %c0_i32, %c0_i32_0 : i32, i32
  }
  func.func @transform_2(%arg0: i32) -> (i32, i32) {
    %c0_i32 = arith.constant 0 : i32
    %c0_i32_0 = arith.constant 0 : i32
    return %arg0, %c0_i32 : i32, i32
  }
  func.func @transform_3(%arg0: i32) -> (i32, i32, i32) {
    %c0_i32 = arith.constant 0 : i32
    %c0_i32_0 = arith.constant 0 : i32
    %c0_i32_1 = arith.constant 0 : i32
    return %arg0, %c0_i32, %c0_i32_0 : i32, i32, i32
  }
}

module attributes {stable_mosaic.version = 11 : i64} {
  func.func @kernel(%arg0: i32, %arg1: memref<1x4x4x128xf32, #tpu.memory_space<vmem>>, %arg2: memref<9x128x128xbf16, #tpu.memory_space<vmem>>, %arg3: memref<1x2x2x128xf32, #tpu.memory_space<vmem>>, %arg4: memref<1x2x128xf32, #tpu.memory_space<vmem>>) attributes {dimension_semantics = [#tpu.dimension_semantics<parallel>], iteration_bounds = array<i64: 2>, scalar_prefetch = 0 : i64, scratch_operands = 0 : i64, tpu.core_type = #tpu.core_type<tc>, window_params = [{transform_indices = @transform_0, window_bounds = array<i64: 1, 4, 4, 128>}, {pipeline_mode = #tpu.pipeline_mode<synchronous>, transform_indices = @transform_1, window_bounds = array<i64: 9, 128, 128>}, {transform_indices = @transform_2, window_bounds = array<i64: 1, 2, 2, 128>}, {transform_indices = @transform_3, window_bounds = array<i64: 1, 2, 128>}]} {
    %cst = arith.constant 0.000000e+00 : f32
    %0 = vector.broadcast %cst : f32 to vector<1x128xf32>
    %cst_0 = arith.constant 0.000000e+00 : f32
    %1 = vector.broadcast %cst_0 : f32 to vector<1x128xf32>
    %cst_1 = arith.constant 0.000000e+00 : f32
    %2 = vector.broadcast %cst_1 : f32 to vector<2x128xf32>
    %c0 = arith.constant 0 : index
    %c0_2 = arith.constant 0 : index
    %c0_3 = arith.constant 0 : index
    %c0_4 = arith.constant 0 : index
    %3 = vector.load %arg1[%c0, %c0_2, %c0_3, %c0_4] : memref<1x4x4x128xf32, #tpu.memory_space<vmem>>, vector<1x1x2x128xf32>
    %4 = vector.shape_cast %3 : vector<1x1x2x128xf32> to vector<2x128xf32>
    %5 = arith.truncf %4 : vector<2x128xf32> to vector<2x128xbf16>
    %c0_5 = arith.constant 0 : index
    %c0_6 = arith.constant 0 : index
    %c0_7 = arith.constant 0 : index
    %6 = vector.load %arg2[%c0_5, %c0_6, %c0_7] : memref<9x128x128xbf16, #tpu.memory_space<vmem>>, vector<1x128x128xbf16>
    %7 = vector.shape_cast %6 : vector<1x128x128xbf16> to vector<128x128xbf16>
    %cst_8 = arith.constant dense<0.000000e+00> : vector<2x128xf32>
    %8 = tpu.matmul %5, %7, %cst_8 {dimension_numbers = #tpu.dot_dimension_numbers<[1], [0], [0], [1], [0, 0, 1, 1], [], []>} : vector<2x128xbf16>, vector<128x128xbf16>, vector<2x128xf32> -> vector<2x128xf32>
    %9 = arith.addf %2, %8 : vector<2x128xf32>
    %c0_9 = arith.constant 0 : index
    %c0_10 = arith.constant 0 : index
    %c1 = arith.constant 1 : index
    %c0_11 = arith.constant 0 : index
    %10 = vector.load %arg1[%c0_9, %c0_10, %c1, %c0_11] : memref<1x4x4x128xf32, #tpu.memory_space<vmem>>, vector<1x1x2x128xf32>
    %11 = vector.shape_cast %10 : vector<1x1x2x128xf32> to vector<2x128xf32>
    %12 = arith.truncf %11 : vector<2x128xf32> to vector<2x128xbf16>
    %c1_12 = arith.constant 1 : index
    %c0_13 = arith.constant 0 : index
    %c0_14 = arith.constant 0 : index
    %13 = vector.load %arg2[%c1_12, %c0_13, %c0_14] : memref<9x128x128xbf16, #tpu.memory_space<vmem>>, vector<1x128x128xbf16>
    %14 = vector.shape_cast %13 : vector<1x128x128xbf16> to vector<128x128xbf16>
    %cst_15 = arith.constant dense<0.000000e+00> : vector<2x128xf32>
    %15 = tpu.matmul %12, %14, %cst_15 {dimension_numbers = #tpu.dot_dimension_numbers<[1], [0], [0], [1], [0, 0, 1, 1], [], []>} : vector<2x128xbf16>, vector<128x128xbf16>, vector<2x128xf32> -> vector<2x128xf32>
    %16 = arith.addf %9, %15 : vector<2x128xf32>
    %c0_16 = arith.constant 0 : index
    %c0_17 = arith.constant 0 : index
    %c2 = arith.constant 2 : index
    %c0_18 = arith.constant 0 : index
    %17 = vector.load %arg1[%c0_16, %c0_17, %c2, %c0_18] : memref<1x4x4x128xf32, #tpu.memory_space<vmem>>, vector<1x1x2x128xf32>
    %18 = vector.shape_cast %17 : vector<1x1x2x128xf32> to vector<2x128xf32>
    %19 = arith.truncf %18 : vector<2x128xf32> to vector<2x128xbf16>
    %c2_19 = arith.constant 2 : index
    %c0_20 = arith.constant 0 : index
    %c0_21 = arith.constant 0 : index
    %20 = vector.load %arg2[%c2_19, %c0_20, %c0_21] : memref<9x128x128xbf16, #tpu.memory_space<vmem>>, vector<1x128x128xbf16>
    %21 = vector.shape_cast %20 : vector<1x128x128xbf16> to vector<128x128xbf16>
    %cst_22 = arith.constant dense<0.000000e+00> : vector<2x128xf32>
    %22 = tpu.matmul %19, %21, %cst_22 {dimension_numbers = #tpu.dot_dimension_numbers<[1], [0], [0], [1], [0, 0, 1, 1], [], []>} : vector<2x128xbf16>, vector<128x128xbf16>, vector<2x128xf32> -> vector<2x128xf32>
    %23 = arith.addf %16, %22 : vector<2x128xf32>
    %c0_23 = arith.constant 0 : index
    %c1_24 = arith.constant 1 : index
    %c0_25 = arith.constant 0 : index
    %c0_26 = arith.constant 0 : index
    %24 = vector.load %arg1[%c0_23, %c1_24, %c0_25, %c0_26] : memref<1x4x4x128xf32, #tpu.memory_space<vmem>>, vector<1x1x2x128xf32>
    %25 = vector.shape_cast %24 : vector<1x1x2x128xf32> to vector<2x128xf32>
    %26 = arith.truncf %25 : vector<2x128xf32> to vector<2x128xbf16>
    %c3 = arith.constant 3 : index
    %c0_27 = arith.constant 0 : index
    %c0_28 = arith.constant 0 : index
    %27 = vector.load %arg2[%c3, %c0_27, %c0_28] : memref<9x128x128xbf16, #tpu.memory_space<vmem>>, vector<1x128x128xbf16>
    %28 = vector.shape_cast %27 : vector<1x128x128xbf16> to vector<128x128xbf16>
    %cst_29 = arith.constant dense<0.000000e+00> : vector<2x128xf32>
    %29 = tpu.matmul %26, %28, %cst_29 {dimension_numbers = #tpu.dot_dimension_numbers<[1], [0], [0], [1], [0, 0, 1, 1], [], []>} : vector<2x128xbf16>, vector<128x128xbf16>, vector<2x128xf32> -> vector<2x128xf32>
    %30 = arith.addf %23, %29 : vector<2x128xf32>
    %c0_30 = arith.constant 0 : index
    %c1_31 = arith.constant 1 : index
    %c1_32 = arith.constant 1 : index
    %c0_33 = arith.constant 0 : index
    %31 = vector.load %arg1[%c0_30, %c1_31, %c1_32, %c0_33] : memref<1x4x4x128xf32, #tpu.memory_space<vmem>>, vector<1x1x2x128xf32>
    %32 = vector.shape_cast %31 : vector<1x1x2x128xf32> to vector<2x128xf32>
    %33 = arith.truncf %32 : vector<2x128xf32> to vector<2x128xbf16>
    %c4 = arith.constant 4 : index
    %c0_34 = arith.constant 0 : index
    %c0_35 = arith.constant 0 : index
    %34 = vector.load %arg2[%c4, %c0_34, %c0_35] : memref<9x128x128xbf16, #tpu.memory_space<vmem>>, vector<1x128x128xbf16>
    %35 = vector.shape_cast %34 : vector<1x128x128xbf16> to vector<128x128xbf16>
    %cst_36 = arith.constant dense<0.000000e+00> : vector<2x128xf32>
    %36 = tpu.matmul %33, %35, %cst_36 {dimension_numbers = #tpu.dot_dimension_numbers<[1], [0], [0], [1], [0, 0, 1, 1], [], []>} : vector<2x128xbf16>, vector<128x128xbf16>, vector<2x128xf32> -> vector<2x128xf32>
    %37 = arith.addf %30, %36 : vector<2x128xf32>
    %c0_37 = arith.constant 0 : index
    %c1_38 = arith.constant 1 : index
    %c2_39 = arith.constant 2 : index
    %c0_40 = arith.constant 0 : index
    %38 = vector.load %arg1[%c0_37, %c1_38, %c2_39, %c0_40] : memref<1x4x4x128xf32, #tpu.memory_space<vmem>>, vector<1x1x2x128xf32>
    %39 = vector.shape_cast %38 : vector<1x1x2x128xf32> to vector<2x128xf32>
    %40 = arith.truncf %39 : vector<2x128xf32> to vector<2x128xbf16>
    %c5 = arith.constant 5 : index
    %c0_41 = arith.constant 0 : index
    %c0_42 = arith.constant 0 : index
    %41 = vector.load %arg2[%c5, %c0_41, %c0_42] : memref<9x128x128xbf16, #tpu.memory_space<vmem>>, vector<1x128x128xbf16>
    %42 = vector.shape_cast %41 : vector<1x128x128xbf16> to vector<128x128xbf16>
    %cst_43 = arith.constant dense<0.000000e+00> : vector<2x128xf32>
    %43 = tpu.matmul %40, %42, %cst_43 {dimension_numbers = #tpu.dot_dimension_numbers<[1], [0], [0], [1], [0, 0, 1, 1], [], []>} : vector<2x128xbf16>, vector<128x128xbf16>, vector<2x128xf32> -> vector<2x128xf32>
    %44 = arith.addf %37, %43 : vector<2x128xf32>
    %c0_44 = arith.constant 0 : index
    %c2_45 = arith.constant 2 : index
    %c0_46 = arith.constant 0 : index
    %c0_47 = arith.constant 0 : index
    %45 = vector.load %arg1[%c0_44, %c2_45, %c0_46, %c0_47] : memref<1x4x4x128xf32, #tpu.memory_space<vmem>>, vector<1x1x2x128xf32>
    %46 = vector.shape_cast %45 : vector<1x1x2x128xf32> to vector<2x128xf32>
    %47 = arith.truncf %46 : vector<2x128xf32> to vector<2x128xbf16>
    %c6 = arith.constant 6 : index
    %c0_48 = arith.constant 0 : index
    %c0_49 = arith.constant 0 : index
    %48 = vector.load %arg2[%c6, %c0_48, %c0_49] : memref<9x128x128xbf16, #tpu.memory_space<vmem>>, vector<1x128x128xbf16>
    %49 = vector.shape_cast %48 : vector<1x128x128xbf16> to vector<128x128xbf16>
    %cst_50 = arith.constant dense<0.000000e+00> : vector<2x128xf32>
    %50 = tpu.matmul %47, %49, %cst_50 {dimension_numbers = #tpu.dot_dimension_numbers<[1], [0], [0], [1], [0, 0, 1, 1], [], []>} : vector<2x128xbf16>, vector<128x128xbf16>, vector<2x128xf32> -> vector<2x128xf32>
    %51 = arith.addf %44, %50 : vector<2x128xf32>
    %c0_51 = arith.constant 0 : index
    %c2_52 = arith.constant 2 : index
    %c1_53 = arith.constant 1 : index
    %c0_54 = arith.constant 0 : index
    %52 = vector.load %arg1[%c0_51, %c2_52, %c1_53, %c0_54] : memref<1x4x4x128xf32, #tpu.memory_space<vmem>>, vector<1x1x2x128xf32>
    %53 = vector.shape_cast %52 : vector<1x1x2x128xf32> to vector<2x128xf32>
    %54 = arith.truncf %53 : vector<2x128xf32> to vector<2x128xbf16>
    %c7 = arith.constant 7 : index
    %c0_55 = arith.constant 0 : index
    %c0_56 = arith.constant 0 : index
    %55 = vector.load %arg2[%c7, %c0_55, %c0_56] : memref<9x128x128xbf16, #tpu.memory_space<vmem>>, vector<1x128x128xbf16>
    %56 = vector.shape_cast %55 : vector<1x128x128xbf16> to vector<128x128xbf16>
    %cst_57 = arith.constant dense<0.000000e+00> : vector<2x128xf32>
    %57 = tpu.matmul %54, %56, %cst_57 {dimension_numbers = #tpu.dot_dimension_numbers<[1], [0], [0], [1], [0, 0, 1, 1], [], []>} : vector<2x128xbf16>, vector<128x128xbf16>, vector<2x128xf32> -> vector<2x128xf32>
    %58 = arith.addf %51, %57 : vector<2x128xf32>
    %c0_58 = arith.constant 0 : index
    %c2_59 = arith.constant 2 : index
    %c2_60 = arith.constant 2 : index
    %c0_61 = arith.constant 0 : index
    %59 = vector.load %arg1[%c0_58, %c2_59, %c2_60, %c0_61] : memref<1x4x4x128xf32, #tpu.memory_space<vmem>>, vector<1x1x2x128xf32>
    %60 = vector.shape_cast %59 : vector<1x1x2x128xf32> to vector<2x128xf32>
    %61 = arith.truncf %60 : vector<2x128xf32> to vector<2x128xbf16>
    %c8 = arith.constant 8 : index
    %c0_62 = arith.constant 0 : index
    %c0_63 = arith.constant 0 : index
    %62 = vector.load %arg2[%c8, %c0_62, %c0_63] : memref<9x128x128xbf16, #tpu.memory_space<vmem>>, vector<1x128x128xbf16>
    %63 = vector.shape_cast %62 : vector<1x128x128xbf16> to vector<128x128xbf16>
    %cst_64 = arith.constant dense<0.000000e+00> : vector<2x128xf32>
    %64 = tpu.matmul %61, %63, %cst_64 {dimension_numbers = #tpu.dot_dimension_numbers<[1], [0], [0], [1], [0, 0, 1, 1], [], []>} : vector<2x128xbf16>, vector<128x128xbf16>, vector<2x128xf32> -> vector<2x128xf32>
    %65 = arith.addf %58, %64 : vector<2x128xf32>
    %c0_65 = arith.constant 0 : index
    %c0_66 = arith.constant 0 : index
    %c0_67 = arith.constant 0 : index
    %c0_68 = arith.constant 0 : index
    %66 = vector.load %arg3[%c0_65, %c0_66, %c0_67, %c0_68] : memref<1x2x2x128xf32, #tpu.memory_space<vmem>>, vector<1x1x2x128xf32>
    %67 = vector.shape_cast %66 : vector<1x1x2x128xf32> to vector<2x128xf32>
    %68 = vector.shape_cast %65 : vector<2x128xf32> to vector<1x1x2x128xf32>
    tpu.vector_store %arg3[%c0_65, %c0_66, %c0_67, %c0_68], %68 {strides = array<i32>} : memref<1x2x2x128xf32, #tpu.memory_space<vmem>>, vector<1x1x2x128xf32>,
    %cst_69 = arith.constant dense<0.000000e+00> : vector<128xf32>
    %69 = vector.multi_reduction <add>, %65, %cst_69 [0] : vector<2x128xf32> to vector<128xf32>
    %70 = vector.shape_cast %69 : vector<128xf32> to vector<1x128xf32>
    %71 = arith.addf %0, %70 : vector<1x128xf32>
    %72 = arith.mulf %65, %65 : vector<2x128xf32>
    %cst_70 = arith.constant dense<0.000000e+00> : vector<128xf32>
    %73 = vector.multi_reduction <add>, %72, %cst_70 [0] : vector<2x128xf32> to vector<128xf32>
    %74 = vector.shape_cast %73 : vector<128xf32> to vector<1x128xf32>
    %75 = arith.addf %1, %74 : vector<1x128xf32>
    %cst_71 = arith.constant 0.000000e+00 : f32
    %76 = vector.broadcast %cst_71 : f32 to vector<2x128xf32>
    %c0_72 = arith.constant 0 : index
    %c1_73 = arith.constant 1 : index
    %c0_74 = arith.constant 0 : index
    %c0_75 = arith.constant 0 : index
    %77 = vector.load %arg1[%c0_72, %c1_73, %c0_74, %c0_75] : memref<1x4x4x128xf32, #tpu.memory_space<vmem>>, vector<1x1x2x128xf32>
    %78 = vector.shape_cast %77 : vector<1x1x2x128xf32> to vector<2x128xf32>
    %79 = arith.truncf %78 : vector<2x128xf32> to vector<2x128xbf16>
    %c0_76 = arith.constant 0 : index
    %c0_77 = arith.constant 0 : index
    %c0_78 = arith.constant 0 : index
    %80 = vector.load %arg2[%c0_76, %c0_77, %c0_78] : memref<9x128x128xbf16, #tpu.memory_space<vmem>>, vector<1x128x128xbf16>
    %81 = vector.shape_cast %80 : vector<1x128x128xbf16> to vector<128x128xbf16>
    %cst_79 = arith.constant dense<0.000000e+00> : vector<2x128xf32>
    %82 = tpu.matmul %79, %81, %cst_79 {dimension_numbers = #tpu.dot_dimension_numbers<[1], [0], [0], [1], [0, 0, 1, 1], [], []>} : vector<2x128xbf16>, vector<128x128xbf16>, vector<2x128xf32> -> vector<2x128xf32>
    %83 = arith.addf %76, %82 : vector<2x128xf32>
    %c0_80 = arith.constant 0 : index
    %c1_81 = arith.constant 1 : index
    %c1_82 = arith.constant 1 : index
    %c0_83 = arith.constant 0 : index
    %84 = vector.load %arg1[%c0_80, %c1_81, %c1_82, %c0_83] : memref<1x4x4x128xf32, #tpu.memory_space<vmem>>, vector<1x1x2x128xf32>
    %85 = vector.shape_cast %84 : vector<1x1x2x128xf32> to vector<2x128xf32>
    %86 = arith.truncf %85 : vector<2x128xf32> to vector<2x128xbf16>
    %c1_84 = arith.constant 1 : index
    %c0_85 = arith.constant 0 : index
    %c0_86 = arith.constant 0 : index
    %87 = vector.load %arg2[%c1_84, %c0_85, %c0_86] : memref<9x128x128xbf16, #tpu.memory_space<vmem>>, vector<1x128x128xbf16>
    %88 = vector.shape_cast %87 : vector<1x128x128xbf16> to vector<128x128xbf16>
    %cst_87 = arith.constant dense<0.000000e+00> : vector<2x128xf32>
    %89 = tpu.matmul %86, %88, %cst_87 {dimension_numbers = #tpu.dot_dimension_numbers<[1], [0], [0], [1], [0, 0, 1, 1], [], []>} : vector<2x128xbf16>, vector<128x128xbf16>, vector<2x128xf32> -> vector<2x128xf32>
    %90 = arith.addf %83, %89 : vector<2x128xf32>
    %c0_88 = arith.constant 0 : index
    %c1_89 = arith.constant 1 : index
    %c2_90 = arith.constant 2 : index
    %c0_91 = arith.constant 0 : index
    %91 = vector.load %arg1[%c0_88, %c1_89, %c2_90, %c0_91] : memref<1x4x4x128xf32, #tpu.memory_space<vmem>>, vector<1x1x2x128xf32>
    %92 = vector.shape_cast %91 : vector<1x1x2x128xf32> to vector<2x128xf32>
    %93 = arith.truncf %92 : vector<2x128xf32> to vector<2x128xbf16>
    %c2_92 = arith.constant 2 : index
    %c0_93 = arith.constant 0 : index
    %c0_94 = arith.constant 0 : index
    %94 = vector.load %arg2[%c2_92, %c0_93, %c0_94] : memref<9x128x128xbf16, #tpu.memory_space<vmem>>, vector<1x128x128xbf16>
    %95 = vector.shape_cast %94 : vector<1x128x128xbf16> to vector<128x128xbf16>
    %cst_95 = arith.constant dense<0.000000e+00> : vector<2x128xf32>
    %96 = tpu.matmul %93, %95, %cst_95 {dimension_numbers = #tpu.dot_dimension_numbers<[1], [0], [0], [1], [0, 0, 1, 1], [], []>} : vector<2x128xbf16>, vector<128x128xbf16>, vector<2x128xf32> -> vector<2x128xf32>
    %97 = arith.addf %90, %96 : vector<2x128xf32>
    %c0_96 = arith.constant 0 : index
    %c2_97 = arith.constant 2 : index
    %c0_98 = arith.constant 0 : index
    %c0_99 = arith.constant 0 : index
    %98 = vector.load %arg1[%c0_96, %c2_97, %c0_98, %c0_99] : memref<1x4x4x128xf32, #tpu.memory_space<vmem>>, vector<1x1x2x128xf32>
    %99 = vector.shape_cast %98 : vector<1x1x2x128xf32> to vector<2x128xf32>
    %100 = arith.truncf %99 : vector<2x128xf32> to vector<2x128xbf16>
    %c3_100 = arith.constant 3 : index
    %c0_101 = arith.constant 0 : index
    %c0_102 = arith.constant 0 : index
    %101 = vector.load %arg2[%c3_100, %c0_101, %c0_102] : memref<9x128x128xbf16, #tpu.memory_space<vmem>>, vector<1x128x128xbf16>
    %102 = vector.shape_cast %101 : vector<1x128x128xbf16> to vector<128x128xbf16>
    %cst_103 = arith.constant dense<0.000000e+00> : vector<2x128xf32>
    %103 = tpu.matmul %100, %102, %cst_103 {dimension_numbers = #tpu.dot_dimension_numbers<[1], [0], [0], [1], [0, 0, 1, 1], [], []>} : vector<2x128xbf16>, vector<128x128xbf16>, vector<2x128xf32> -> vector<2x128xf32>
    %104 = arith.addf %97, %103 : vector<2x128xf32>
    %c0_104 = arith.constant 0 : index
    %c2_105 = arith.constant 2 : index
    %c1_106 = arith.constant 1 : index
    %c0_107 = arith.constant 0 : index
    %105 = vector.load %arg1[%c0_104, %c2_105, %c1_106, %c0_107] : memref<1x4x4x128xf32, #tpu.memory_space<vmem>>, vector<1x1x2x128xf32>
    %106 = vector.shape_cast %105 : vector<1x1x2x128xf32> to vector<2x128xf32>
    %107 = arith.truncf %106 : vector<2x128xf32> to vector<2x128xbf16>
    %c4_108 = arith.constant 4 : index
    %c0_109 = arith.constant 0 : index
    %c0_110 = arith.constant 0 : index
    %108 = vector.load %arg2[%c4_108, %c0_109, %c0_110] : memref<9x128x128xbf16, #tpu.memory_space<vmem>>, vector<1x128x128xbf16>
    %109 = vector.shape_cast %108 : vector<1x128x128xbf16> to vector<128x128xbf16>
    %cst_111 = arith.constant dense<0.000000e+00> : vector<2x128xf32>
    %110 = tpu.matmul %107, %109, %cst_111 {dimension_numbers = #tpu.dot_dimension_numbers<[1], [0], [0], [1], [0, 0, 1, 1], [], []>} : vector<2x128xbf16>, vector<128x128xbf16>, vector<2x128xf32> -> vector<2x128xf32>
    %111 = arith.addf %104, %110 : vector<2x128xf32>
    %c0_112 = arith.constant 0 : index
    %c2_113 = arith.constant 2 : index
    %c2_114 = arith.constant 2 : index
    %c0_115 = arith.constant 0 : index
    %112 = vector.load %arg1[%c0_112, %c2_113, %c2_114, %c0_115] : memref<1x4x4x128xf32, #tpu.memory_space<vmem>>, vector<1x1x2x128xf32>
    %113 = vector.shape_cast %112 : vector<1x1x2x128xf32> to vector<2x128xf32>
    %114 = arith.truncf %113 : vector<2x128xf32> to vector<2x128xbf16>
    %c5_116 = arith.constant 5 : index
    %c0_117 = arith.constant 0 : index
    %c0_118 = arith.constant 0 : index
    %115 = vector.load %arg2[%c5_116, %c0_117, %c0_118] : memref<9x128x128xbf16, #tpu.memory_space<vmem>>, vector<1x128x128xbf16>
    %116 = vector.shape_cast %115 : vector<1x128x128xbf16> to vector<128x128xbf16>
    %cst_119 = arith.constant dense<0.000000e+00> : vector<2x128xf32>
    %117 = tpu.matmul %114, %116, %cst_119 {dimension_numbers = #tpu.dot_dimension_numbers<[1], [0], [0], [1], [0, 0, 1, 1], [], []>} : vector<2x128xbf16>, vector<128x128xbf16>, vector<2x128xf32> -> vector<2x128xf32>
    %118 = arith.addf %111, %117 : vector<2x128xf32>
    %c0_120 = arith.constant 0 : index
    %c3_121 = arith.constant 3 : index
    %c0_122 = arith.constant 0 : index
    %c0_123 = arith.constant 0 : index
    %119 = vector.load %arg1[%c0_120, %c3_121, %c0_122, %c0_123] : memref<1x4x4x128xf32, #tpu.memory_space<vmem>>, vector<1x1x2x128xf32>
    %120 = vector.shape_cast %119 : vector<1x1x2x128xf32> to vector<2x128xf32>
    %121 = arith.truncf %120 : vector<2x128xf32> to vector<2x128xbf16>
    %c6_124 = arith.constant 6 : index
    %c0_125 = arith.constant 0 : index
    %c0_126 = arith.constant 0 : index
    %122 = vector.load %arg2[%c6_124, %c0_125, %c0_126] : memref<9x128x128xbf16, #tpu.memory_space<vmem>>, vector<1x128x128xbf16>
    %123 = vector.shape_cast %122 : vector<1x128x128xbf16> to vector<128x128xbf16>
    %cst_127 = arith.constant dense<0.000000e+00> : vector<2x128xf32>
    %124 = tpu.matmul %121, %123, %cst_127 {dimension_numbers = #tpu.dot_dimension_numbers<[1], [0], [0], [1], [0, 0, 1, 1], [], []>} : vector<2x128xbf16>, vector<128x128xbf16>, vector<2x128xf32> -> vector<2x128xf32>
    %125 = arith.addf %118, %124 : vector<2x128xf32>
    %c0_128 = arith.constant 0 : index
    %c3_129 = arith.constant 3 : index
    %c1_130 = arith.constant 1 : index
    %c0_131 = arith.constant 0 : index
    %126 = vector.load %arg1[%c0_128, %c3_129, %c1_130, %c0_131] : memref<1x4x4x128xf32, #tpu.memory_space<vmem>>, vector<1x1x2x128xf32>
    %127 = vector.shape_cast %126 : vector<1x1x2x128xf32> to vector<2x128xf32>
    %128 = arith.truncf %127 : vector<2x128xf32> to vector<2x128xbf16>
    %c7_132 = arith.constant 7 : index
    %c0_133 = arith.constant 0 : index
    %c0_134 = arith.constant 0 : index
    %129 = vector.load %arg2[%c7_132, %c0_133, %c0_134] : memref<9x128x128xbf16, #tpu.memory_space<vmem>>, vector<1x128x128xbf16>
    %130 = vector.shape_cast %129 : vector<1x128x128xbf16> to vector<128x128xbf16>
    %cst_135 = arith.constant dense<0.000000e+00> : vector<2x128xf32>
    %131 = tpu.matmul %128, %130, %cst_135 {dimension_numbers = #tpu.dot_dimension_numbers<[1], [0], [0], [1], [0, 0, 1, 1], [], []>} : vector<2x128xbf16>, vector<128x128xbf16>, vector<2x128xf32> -> vector<2x128xf32>
    %132 = arith.addf %125, %131 : vector<2x128xf32>
    %c0_136 = arith.constant 0 : index
    %c3_137 = arith.constant 3 : index
    %c2_138 = arith.constant 2 : index
    %c0_139 = arith.constant 0 : index
    %133 = vector.load %arg1[%c0_136, %c3_137, %c2_138, %c0_139] : memref<1x4x4x128xf32, #tpu.memory_space<vmem>>, vector<1x1x2x128xf32>
    %134 = vector.shape_cast %133 : vector<1x1x2x128xf32> to vector<2x128xf32>
    %135 = arith.truncf %134 : vector<2x128xf32> to vector<2x128xbf16>
    %c8_140 = arith.constant 8 : index
    %c0_141 = arith.constant 0 : index
    %c0_142 = arith.constant 0 : index
    %136 = vector.load %arg2[%c8_140, %c0_141, %c0_142] : memref<9x128x128xbf16, #tpu.memory_space<vmem>>, vector<1x128x128xbf16>
    %137 = vector.shape_cast %136 : vector<1x128x128xbf16> to vector<128x128xbf16>
    %cst_143 = arith.constant dense<0.000000e+00> : vector<2x128xf32>
    %138 = tpu.matmul %135, %137, %cst_143 {dimension_numbers = #tpu.dot_dimension_numbers<[1], [0], [0], [1], [0, 0, 1, 1], [], []>} : vector<2x128xbf16>, vector<128x128xbf16>, vector<2x128xf32> -> vector<2x128xf32>
    %139 = arith.addf %132, %138 : vector<2x128xf32>
    %c0_144 = arith.constant 0 : index
    %c1_145 = arith.constant 1 : index
    %c0_146 = arith.constant 0 : index
    %c0_147 = arith.constant 0 : index
    %140 = vector.load %arg3[%c0_144, %c1_145, %c0_146, %c0_147] : memref<1x2x2x128xf32, #tpu.memory_space<vmem>>, vector<1x1x2x128xf32>
    %141 = vector.shape_cast %140 : vector<1x1x2x128xf32> to vector<2x128xf32>
    %142 = vector.shape_cast %139 : vector<2x128xf32> to vector<1x1x2x128xf32>
    tpu.vector_store %arg3[%c0_144, %c1_145, %c0_146, %c0_147], %142 {strides = array<i32>} : memref<1x2x2x128xf32, #tpu.memory_space<vmem>>, vector<1x1x2x128xf32>,
    %cst_148 = arith.constant dense<0.000000e+00> : vector<128xf32>
    %143 = vector.multi_reduction <add>, %139, %cst_148 [0] : vector<2x128xf32> to vector<128xf32>
    %144 = vector.shape_cast %143 : vector<128xf32> to vector<1x128xf32>
    %145 = arith.addf %71, %144 : vector<1x128xf32>
    %146 = arith.mulf %139, %139 : vector<2x128xf32>
    %cst_149 = arith.constant dense<0.000000e+00> : vector<128xf32>
    %147 = vector.multi_reduction <add>, %146, %cst_149 [0] : vector<2x128xf32> to vector<128xf32>
    %148 = vector.shape_cast %147 : vector<128xf32> to vector<1x128xf32>
    %149 = arith.addf %75, %148 : vector<1x128xf32>
    %150 = tpu.concatenate %145, %149 in 0 : vector<1x128xf32>, vector<1x128xf32> -> vector<2x128xf32>
    %c0_150 = arith.constant 0 : index
    %c0_151 = arith.constant 0 : index
    %c0_152 = arith.constant 0 : index
    %151 = vector.load %arg4[%c0_150, %c0_151, %c0_152] : memref<1x2x128xf32, #tpu.memory_space<vmem>>, vector<1x2x128xf32>
    %152 = vector.shape_cast %151 : vector<1x2x128xf32> to vector<2x128xf32>
    %153 = vector.shape_cast %150 : vector<2x128xf32> to vector<1x2x128xf32>
    tpu.vector_store %arg4[%c0_150, %c0_151, %c0_152], %153 {strides = array<i32>} : memref<1x2x128xf32, #tpu.memory_space<vmem>>, vector<1x2x128xf32>,
    return
  }
  func.func @transform_0(%arg0: i32) -> (i32, i32, i32, i32) {
    %c0_i32 = arith.constant 0 : i32
    %c0_i32_0 = arith.constant 0 : i32
    %c0_i32_1 = arith.constant 0 : i32
    %c0_i32_2 = arith.constant 0 : i32
    return %arg0, %c0_i32, %c0_i32_0, %c0_i32_1 : i32, i32, i32, i32
  }
  func.func @transform_1(%arg0: i32) -> (i32, i32, i32) {
    %c0_i32 = arith.constant 0 : i32
    %c0_i32_0 = arith.constant 0 : i32
    %c0_i32_1 = arith.constant 0 : i32
    %c0_i32_2 = arith.constant 0 : i32
    return %c0_i32, %c0_i32_0, %c0_i32_1 : i32, i32, i32
  }
  func.func @transform_2(%arg0: i32) -> (i32, i32, i32, i32) {
    %c0_i32 = arith.constant 0 : i32
    %c0_i32_0 = arith.constant 0 : i32
    %c0_i32_1 = arith.constant 0 : i32
    %c0_i32_2 = arith.constant 0 : i32
    return %arg0, %c0_i32, %c0_i32_0, %c0_i32_1 : i32, i32, i32, i32
  }
  func.func @transform_3(%arg0: i32) -> (i32, i32, i32) {
    %c0_i32 = arith.constant 0 : i32
    %c0_i32_0 = arith.constant 0 : i32
    %c0_i32_1 = arith.constant 0 : i32
    return %arg0, %c0_i32, %c0_i32_0 : i32, i32, i32
  }
}

module attributes {stable_mosaic.version = 11 : i64} {
  func.func @kernel(%arg0: i32, %arg1: memref<8x128xf32, #tpu.memory_space<vmem>>, %arg2: memref<2x2x128xf32, #tpu.memory_space<vmem>>, %arg3: memref<1x128xf32, #tpu.memory_space<vmem>>, %arg4: memref<1x128xf32, #tpu.memory_space<vmem>>, %arg5: memref<8x128xf32, #tpu.memory_space<vmem>>, %arg6: memref<8x128xf32, #tpu.memory_space<vmem>>) attributes {dimension_semantics = [#tpu.dimension_semantics<parallel>], iteration_bounds = array<i64: 1>, scalar_prefetch = 0 : i64, scratch_operands = 0 : i64, tpu.core_type = #tpu.core_type<tc>, window_params = [{transform_indices = @transform_0, window_bounds = array<i64: 8, 128>}, {pipeline_mode = #tpu.pipeline_mode<synchronous>, transform_indices = @transform_1, window_bounds = array<i64: 2, 2, 128>}, {pipeline_mode = #tpu.pipeline_mode<synchronous>, transform_indices = @transform_2, window_bounds = array<i64: 1, 128>}, {pipeline_mode = #tpu.pipeline_mode<synchronous>, transform_indices = @transform_3, window_bounds = array<i64: 1, 128>}, {transform_indices = @transform_4, window_bounds = array<i64: 8, 128>}, {transform_indices = @transform_5, window_bounds = array<i64: 8, 128>}]} {
    %c0 = arith.constant 0 : index
    %c0_0 = arith.constant 0 : index
    %c0_1 = arith.constant 0 : index
    %0 = vector.load %arg2[%c0, %c0_0, %c0_1] : memref<2x2x128xf32, #tpu.memory_space<vmem>>, vector<2x2x128xf32>
    %cst = arith.constant dense<0.000000e+00> : vector<2x128xf32>
    %1 = vector.multi_reduction <add>, %0, %cst [0] : vector<2x2x128xf32> to vector<2x128xf32>
    %2 = vector.extract_strided_slice %1 {offsets = [0, 0], sizes = [1, 128], strides = [1, 1]} : vector<2x128xf32> to vector<1x128xf32>
    %cst_2 = arith.constant 1.250000e-01 : f32
    %3 = vector.broadcast %cst_2 : f32 to vector<1x128xf32>
    %4 = arith.mulf %2, %3 : vector<1x128xf32>
    %5 = vector.extract_strided_slice %1 {offsets = [1, 0], sizes = [1, 128], strides = [1, 1]} : vector<2x128xf32> to vector<1x128xf32>
    %cst_3 = arith.constant 1.250000e-01 : f32
    %6 = vector.broadcast %cst_3 : f32 to vector<1x128xf32>
    %7 = arith.mulf %5, %6 : vector<1x128xf32>
    %8 = arith.mulf %4, %4 : vector<1x128xf32>
    %9 = arith.subf %7, %8 : vector<1x128xf32>
    %cst_4 = arith.constant 0.000000e+00 : f32
    %10 = vector.broadcast %cst_4 : f32 to vector<1x128xf32>
    %11 = arith.maximumf %9, %10 : vector<1x128xf32>
    %c0_5 = arith.constant 0 : index
    %c0_6 = arith.constant 0 : index
    %12 = vector.load %arg3[%c0_5, %c0_6] : memref<1x128xf32, #tpu.memory_space<vmem>>, vector<1x128xf32>
    %cst_7 = arith.constant 9.99999974E-6 : f32
    %13 = vector.broadcast %cst_7 : f32 to vector<1x128xf32>
    %14 = arith.addf %11, %13 : vector<1x128xf32>
    %15 = math.rsqrt %14 : vector<1x128xf32>
    %16 = arith.mulf %12, %15 : vector<1x128xf32>
    %c0_8 = arith.constant 0 : index
    %c0_9 = arith.constant 0 : index
    %17 = vector.load %arg4[%c0_8, %c0_9] : memref<1x128xf32, #tpu.memory_space<vmem>>, vector<1x128xf32>
    %18 = arith.mulf %4, %16 : vector<1x128xf32>
    %19 = arith.subf %17, %18 : vector<1x128xf32>
    %c0_10 = arith.constant 0 : index
    %c0_11 = arith.constant 0 : index
    %20 = vector.load %arg1[%c0_10, %c0_11] : memref<8x128xf32, #tpu.memory_space<vmem>>, vector<8x128xf32>
    %21 = vector.broadcast %16 : vector<1x128xf32> to vector<8x128xf32>
    %22 = arith.mulf %20, %21 : vector<8x128xf32>
    %23 = vector.broadcast %19 : vector<1x128xf32> to vector<8x128xf32>
    %24 = arith.addf %22, %23 : vector<8x128xf32>
    %c0_12 = arith.constant 0 : index
    %c0_13 = arith.constant 0 : index
    %25 = vector.load %arg5[%c0_12, %c0_13] : memref<8x128xf32, #tpu.memory_space<vmem>>, vector<8x128xf32>
    %26 = arith.addf %24, %25 : vector<8x128xf32>
    %cst_14 = arith.constant 0.000000e+00 : f32
    %27 = vector.broadcast %cst_14 : f32 to vector<8x128xf32>
    %28 = arith.maximumf %26, %27 : vector<8x128xf32>
    %c0_15 = arith.constant 0 : index
    %c0_16 = arith.constant 0 : index
    %29 = vector.load %arg6[%c0_15, %c0_16] : memref<8x128xf32, #tpu.memory_space<vmem>>, vector<8x128xf32>
    tpu.vector_store %arg6[%c0_15, %c0_16], %28 {strides = array<i32>} : memref<8x128xf32, #tpu.memory_space<vmem>>, vector<8x128xf32>,
    return
  }
  func.func @transform_0(%arg0: i32) -> (i32, i32) {
    %c0_i32 = arith.constant 0 : i32
    %c0_i32_0 = arith.constant 0 : i32
    return %arg0, %c0_i32 : i32, i32
  }
  func.func @transform_1(%arg0: i32) -> (i32, i32, i32) {
    %c0_i32 = arith.constant 0 : i32
    %c0_i32_0 = arith.constant 0 : i32
    %c0_i32_1 = arith.constant 0 : i32
    %c0_i32_2 = arith.constant 0 : i32
    return %c0_i32, %c0_i32_0, %c0_i32_1 : i32, i32, i32
  }
  func.func @transform_2(%arg0: i32) -> (i32, i32) {
    %c0_i32 = arith.constant 0 : i32
    %c0_i32_0 = arith.constant 0 : i32
    %c0_i32_1 = arith.constant 0 : i32
    return %c0_i32, %c0_i32_0 : i32, i32
  }
  func.func @transform_3(%arg0: i32) -> (i32, i32) {
    %c0_i32 = arith.constant 0 : i32
    %c0_i32_0 = arith.constant 0 : i32
    %c0_i32_1 = arith.constant 0 : i32
    return %c0_i32, %c0_i32_0 : i32, i32
  }
  func.func @transform_4(%arg0: i32) -> (i32, i32) {
    %c0_i32 = arith.constant 0 : i32
    %c0_i32_0 = arith.constant 0 : i32
    return %arg0, %c0_i32 : i32, i32
  }
  func.func @transform_5(%arg0: i32) -> (i32, i32) {
    %c0_i32 = arith.constant 0 : i32
    %c0_i32_0 = arith.constant 0 : i32
    return %arg0, %c0_i32 : i32, i32
  }
}

module attributes {stable_mosaic.version = 11 : i64} {
  func.func @kernel(%arg0: i32, %arg1: memref<8x128xf32, #tpu.memory_space<vmem>>, %arg2: memref<2x2x128xf32, #tpu.memory_space<vmem>>, %arg3: memref<1x128xf32, #tpu.memory_space<vmem>>, %arg4: memref<1x128xf32, #tpu.memory_space<vmem>>, %arg5: memref<8x128xf32, #tpu.memory_space<vmem>>) attributes {dimension_semantics = [#tpu.dimension_semantics<parallel>], iteration_bounds = array<i64: 1>, scalar_prefetch = 0 : i64, scratch_operands = 0 : i64, tpu.core_type = #tpu.core_type<tc>, window_params = [{transform_indices = @transform_0, window_bounds = array<i64: 8, 128>}, {pipeline_mode = #tpu.pipeline_mode<synchronous>, transform_indices = @transform_1, window_bounds = array<i64: 2, 2, 128>}, {pipeline_mode = #tpu.pipeline_mode<synchronous>, transform_indices = @transform_2, window_bounds = array<i64: 1, 128>}, {pipeline_mode = #tpu.pipeline_mode<synchronous>, transform_indices = @transform_3, window_bounds = array<i64: 1, 128>}, {transform_indices = @transform_4, window_bounds = array<i64: 8, 128>}]} {
    %c0 = arith.constant 0 : index
    %c0_0 = arith.constant 0 : index
    %c0_1 = arith.constant 0 : index
    %0 = vector.load %arg2[%c0, %c0_0, %c0_1] : memref<2x2x128xf32, #tpu.memory_space<vmem>>, vector<2x2x128xf32>
    %cst = arith.constant dense<0.000000e+00> : vector<2x128xf32>
    %1 = vector.multi_reduction <add>, %0, %cst [0] : vector<2x2x128xf32> to vector<2x128xf32>
    %2 = vector.extract_strided_slice %1 {offsets = [0, 0], sizes = [1, 128], strides = [1, 1]} : vector<2x128xf32> to vector<1x128xf32>
    %cst_2 = arith.constant 1.250000e-01 : f32
    %3 = vector.broadcast %cst_2 : f32 to vector<1x128xf32>
    %4 = arith.mulf %2, %3 : vector<1x128xf32>
    %5 = vector.extract_strided_slice %1 {offsets = [1, 0], sizes = [1, 128], strides = [1, 1]} : vector<2x128xf32> to vector<1x128xf32>
    %cst_3 = arith.constant 1.250000e-01 : f32
    %6 = vector.broadcast %cst_3 : f32 to vector<1x128xf32>
    %7 = arith.mulf %5, %6 : vector<1x128xf32>
    %8 = arith.mulf %4, %4 : vector<1x128xf32>
    %9 = arith.subf %7, %8 : vector<1x128xf32>
    %cst_4 = arith.constant 0.000000e+00 : f32
    %10 = vector.broadcast %cst_4 : f32 to vector<1x128xf32>
    %11 = arith.maximumf %9, %10 : vector<1x128xf32>
    %c0_5 = arith.constant 0 : index
    %c0_6 = arith.constant 0 : index
    %12 = vector.load %arg3[%c0_5, %c0_6] : memref<1x128xf32, #tpu.memory_space<vmem>>, vector<1x128xf32>
    %cst_7 = arith.constant 9.99999974E-6 : f32
    %13 = vector.broadcast %cst_7 : f32 to vector<1x128xf32>
    %14 = arith.addf %11, %13 : vector<1x128xf32>
    %15 = math.rsqrt %14 : vector<1x128xf32>
    %16 = arith.mulf %12, %15 : vector<1x128xf32>
    %c0_8 = arith.constant 0 : index
    %c0_9 = arith.constant 0 : index
    %17 = vector.load %arg4[%c0_8, %c0_9] : memref<1x128xf32, #tpu.memory_space<vmem>>, vector<1x128xf32>
    %18 = arith.mulf %4, %16 : vector<1x128xf32>
    %19 = arith.subf %17, %18 : vector<1x128xf32>
    %c0_10 = arith.constant 0 : index
    %c0_11 = arith.constant 0 : index
    %20 = vector.load %arg1[%c0_10, %c0_11] : memref<8x128xf32, #tpu.memory_space<vmem>>, vector<8x128xf32>
    %21 = vector.broadcast %16 : vector<1x128xf32> to vector<8x128xf32>
    %22 = arith.mulf %20, %21 : vector<8x128xf32>
    %23 = vector.broadcast %19 : vector<1x128xf32> to vector<8x128xf32>
    %24 = arith.addf %22, %23 : vector<8x128xf32>
    %cst_12 = arith.constant 0.000000e+00 : f32
    %25 = vector.broadcast %cst_12 : f32 to vector<8x128xf32>
    %26 = arith.maximumf %24, %25 : vector<8x128xf32>
    %c0_13 = arith.constant 0 : index
    %c0_14 = arith.constant 0 : index
    %27 = vector.load %arg5[%c0_13, %c0_14] : memref<8x128xf32, #tpu.memory_space<vmem>>, vector<8x128xf32>
    tpu.vector_store %arg5[%c0_13, %c0_14], %26 {strides = array<i32>} : memref<8x128xf32, #tpu.memory_space<vmem>>, vector<8x128xf32>,
    return
  }
  func.func @transform_0(%arg0: i32) -> (i32, i32) {
    %c0_i32 = arith.constant 0 : i32
    %c0_i32_0 = arith.constant 0 : i32
    return %arg0, %c0_i32 : i32, i32
  }
  func.func @transform_1(%arg0: i32) -> (i32, i32, i32) {
    %c0_i32 = arith.constant 0 : i32
    %c0_i32_0 = arith.constant 0 : i32
    %c0_i32_1 = arith.constant 0 : i32
    %c0_i32_2 = arith.constant 0 : i32
    return %c0_i32, %c0_i32_0, %c0_i32_1 : i32, i32, i32
  }
  func.func @transform_2(%arg0: i32) -> (i32, i32) {
    %c0_i32 = arith.constant 0 : i32
    %c0_i32_0 = arith.constant 0 : i32
    %c0_i32_1 = arith.constant 0 : i32
    return %c0_i32, %c0_i32_0 : i32, i32
  }
  func.func @transform_3(%arg0: i32) -> (i32, i32) {
    %c0_i32 = arith.constant 0 : i32
    %c0_i32_0 = arith.constant 0 : i32
    %c0_i32_1 = arith.constant 0 : i32
    return %c0_i32, %c0_i32_0 : i32, i32
  }
  func.func @transform_4(%arg0: i32) -> (i32, i32) {
    %c0_i32 = arith.constant 0 : i32
    %c0_i32_0 = arith.constant 0 : i32
    return %arg0, %c0_i32 : i32, i32
  }
}

module attributes {stable_mosaic.version = 11 : i64} {
  func.func @kernel(%arg0: memref<2x4x128xf32, #tpu.memory_space<vmem>>, %arg1: memref<1x128xf32, #tpu.memory_space<vmem>>, %arg2: memref<1x1xf32, #tpu.memory_space<vmem>>, %arg3: memref<2x1xf32, #tpu.memory_space<vmem>>) attributes {dimension_semantics = [], scalar_prefetch = 0 : i64, scratch_operands = 0 : i64, tpu.core_type = #tpu.core_type<tc>} {
    %c0 = arith.constant 0 : index
    %c0_0 = arith.constant 0 : index
    %c0_1 = arith.constant 0 : index
    %0 = vector.load %arg0[%c0, %c0_0, %c0_1] : memref<2x4x128xf32, #tpu.memory_space<vmem>>, vector<2x4x128xf32>
    %cst = arith.constant dense<0.000000e+00> : vector<2x128xf32>
    %1 = vector.multi_reduction <add>, %0, %cst [1] : vector<2x4x128xf32> to vector<2x128xf32>
    %cst_2 = arith.constant 2.500000e-01 : f32
    %2 = vector.broadcast %cst_2 : f32 to vector<2x128xf32>
    %3 = arith.mulf %1, %2 : vector<2x128xf32>
    %c0_3 = arith.constant 0 : index
    %c0_4 = arith.constant 0 : index
    %4 = vector.load %arg1[%c0_3, %c0_4] : memref<1x128xf32, #tpu.memory_space<vmem>>, vector<1x128xf32>
    %5 = vector.broadcast %4 : vector<1x128xf32> to vector<2x128xf32>
    %6 = arith.mulf %3, %5 : vector<2x128xf32>
    %cst_5 = arith.constant dense<0.000000e+00> : vector<2xf32>
    %7 = vector.multi_reduction <add>, %6, %cst_5 [1] : vector<2x128xf32> to vector<2xf32>
    %8 = vector.shape_cast %7 : vector<2xf32> to vector<2x1xf32>
    %c0_6 = arith.constant 0 : index
    %c0_7 = arith.constant 0 : index
    %9 = vector.load %arg2[%c0_6, %c0_7] : memref<1x1xf32, #tpu.memory_space<vmem>>, vector<1x1xf32>
    %10 = vector.broadcast %9 : vector<1x1xf32> to vector<2x1xf32>
    %11 = arith.addf %8, %10 : vector<2x1xf32>
    %c0_8 = arith.constant 0 : index
    %c0_9 = arith.constant 0 : index
    %12 = vector.load %arg3[%c0_8, %c0_9] : memref<2x1xf32, #tpu.memory_space<vmem>>, vector<2x1xf32>
    tpu.vector_store %arg3[%c0_8, %c0_9], %11 {strides = array<i32>} : memref<2x1xf32, #tpu.memory_space<vmem>>, vector<2x1xf32>,
    return
  }
}

</mosaic_0001>

<bundles_post_ra>
// kernel: resnet_forward.23
= control target key start
LH: loop header
LB: loop body
LE: loop exit
PB: predicated region body
PF: predicated region fallthrough
CT: control target
= control target key end

     0   :  { %v149_v7 = vmov 1966171168   ;;  %v33_v9 = vlaneseq  ;;  %s280_s1 = inlined_call_operand.vmem [shape: f32[1,2,128], index: 1, kind: input, shape index: {}]   ;;  %s281_s2 = inlined_call_operand.vmem [shape: f32[1,128], index: 2, kind: input, shape index: {}]   ;;  %s282_s0 = inlined_call_operand.vmem [shape: f32[128,128], index: 0, kind: input, shape index: {}]   ;;  %s283_s3 = inlined_call_operand.vmem [shape: f32[1,128], index: 3, kind: input, shape index: {}]   ;;  %s284_s4 = inlined_call_operand.vmem [shape: f32[128,128], index: 4, kind: output, shape index: {}]  }
   0x1   :  { %v17_v0 = vld [vmem:[%s280_s1] sm:$0x3]  ;;  %v31_v8 = vunpack.c.l.s4 %v149_v7  ;;  %v51_v22 = vld [vmem:[%s282_s0 + $0x8] sm:$0xff]  ;;  %v52_v23 = vld [vmem:[%s282_s0 + $0x10] sm:$0xff] }
   0x2   :  { %v19_v1 = vmul.f32 0.0078125, %v17_v0  ;;  %v34_v11 = vshrl.u32 %v33_v9, 7  ;;  %v26_v16 = vld [vmem:[%s281_s2] sm:$0x1]  ;;  %v53_v24 = vld [vmem:[%s282_s0 + $0x18] sm:$0xff]  ;;  %v55_v28 = vld [vmem:[%s282_s0 + $0x28] sm:$0xff] }
   0x3   :  { %v32_v10 = vunpack.c.0.s8 %v31_v8  ;;  %v47_v20 = vld [vmem:[%s283_s3] sm:$0x1]  ;;  %v56_v29 = vld [vmem:[%s282_s0 + $0x30] sm:$0xff]  ;;  %v57_v30 = vld [vmem:[%s282_s0 + $0x38] sm:$0xff] }
   0x4   :  { %v20_v2 = vmul.f32 %v19_v1, %v19_v1  ;;  %v69_v18 = vsub.s32 0, %v34_v11  ;;  %v50_v21 = vld [vmem:[%s282_s0] sm:$0xff]  ;;  %v59_v32 = vld [vmem:[%s282_s0 + $0x48] sm:$0xff]  ;;  %v60_v33 = vld [vmem:[%s282_s0 + $0x50] sm:$0xff] }
   0x5   :  { %v35_v12 = vsub.s32 %v32_v10, %v34_v11  ;;  %v54_v25 = vld [vmem:[%s282_s0 + $0x20] sm:$0xff]  ;;  %v61_v38 = vld [vmem:[%s282_s0 + $0x58] sm:$0xff]  ;;  %v63_v40 = vld [vmem:[%s282_s0 + $0x68] sm:$0xff] }
   0x6   :  { %v22_v3 = vrot.slane %v20_v2, 7  ;;  %v58_v31 = vld [vmem:[%s282_s0 + $0x40] sm:$0xff]  ;;  %v65_v2 = vld [vmem:[%s282_s0 + $0x78] sm:$0xff] }
   0x7   :  { %v62_v39 = vld [vmem:[%s282_s0 + $0x60] sm:$0xff] }
   0x8   :  { %v24_v4 = vsub.f32 %v19_v1, %v22_v3 }
   0xa   :  { %v25_v5 = vmax.f32 %v24_v4, 0.0 }
   0xc   :  { %v27_v6 = vadd.f32 1e-05, %v25_v5 }
   0xe   :  { %147 = vrsqrt.f32 %v27_v6 }
  0x1b   :  { %v148_v13 = vpop.eup %147 }
  0x1c   :  { %v36_v14 = vrot.slane %v148_v13, %v35_v12 }
  0x1e   :  { %v37_v15 = vcombine.high %v36_v14, %v36_v14 }
  0x20   :  { %v44_v17 = vrot.slane %v37_v15, %v35_v12 }
  0x22   :  { %v46_v19 = vmul.f32 %v44_v17, %v26_v16 }
  0x24   :  { %v48_v26 = vmul.f32 %v46_v19, %v19_v1  ;;  %v70_v27 = vrot.slane %v46_v19, %v69_v18  ;;  %v64_v1 = vld [vmem:[%s282_s0 + $0x70] sm:$0xff] }
  0x26   :  { %v49_v34 = vsub.f32 %v47_v20, %v48_v26  ;;  %v72_v35 = vmul.f32 %v70_v27, %v50_v21  ;;  %v73_v36 = vmul.f32 %v70_v27, %v51_v22  ;;  %v74_v37 = vmul.f32 %v70_v27, %v52_v23 }
  0x27   :  { %v75_v41 = vmul.f32 %v70_v27, %v53_v24  ;;  %v76_v42 = vmul.f32 %v70_v27, %v54_v25  ;;  %v77_v43 = vmul.f32 %v70_v27, %v55_v28  ;;  %v78_v44 = vmul.f32 %v70_v27, %v56_v29 }
  0x28   :  { %v92_v45 = vrot.slane %v49_v34, %v69_v18  ;;  %v79_v46 = vmul.f32 %v70_v27, %v57_v30  ;;  %v80_v47 = vmul.f32 %v70_v27, %v58_v31  ;;  %v81_v48 = vmul.f32 %v70_v27, %v59_v32 }
  0x29   :  { %v82_v49 = vmul.f32 %v70_v27, %v60_v33  ;;  %v83_v50 = vmul.f32 %v70_v27, %v61_v38  ;;  %v84_v51 = vmul.f32 %v70_v27, %v62_v39  ;;  %v85_v52 = vmul.f32 %v70_v27, %v63_v40 }
  0x2a   :  { %v94_v53 = vadd.f32 %v92_v45, %v72_v35  ;;  %v95_v54 = vadd.f32 %v92_v45, %v73_v36  ;;  %v96_v55 = vadd.f32 %v92_v45, %v74_v37  ;;  %v97_v56 = vadd.f32 %v92_v45, %v75_v41 }
  0x2b   :  { %v98_v57 = vadd.f32 %v92_v45, %v76_v42  ;;  %v99_v58 = vadd.f32 %v92_v45, %v77_v43  ;;  %v100_v59 = vadd.f32 %v92_v45, %v78_v44  ;;  %v101_v60 = vadd.f32 %v92_v45, %v79_v46 }
  0x2c   :  { %v110_v61 = vmax.f32 %v94_v53, 0.0  ;;  %v111_v62 = vmax.f32 %v95_v54, 0.0  ;;  %v112_v63 = vmax.f32 %v96_v55, 0.0  ;;  %v113_v0 = vmax.f32 %v97_v56, 0.0 }
  0x2d   :  { %v114_v3 = vmax.f32 %v98_v57, 0.0  ;;  %v115_v4 = vmax.f32 %v99_v58, 0.0  ;;  %v116_v5 = vmax.f32 %v100_v59, 0.0  ;;  %v117_v6 = vmax.f32 %v101_v60, 0.0 }
  0x2e   :  { %126 = vst [vmem:[%s284_s4] sm:$0xff] %v110_v61  ;;  %127 = vst [vmem:[%s284_s4 + $0x8] sm:$0xff] %v111_v62  ;;  %v102_v7 = vadd.f32 %v92_v45, %v80_v47  ;;  %v103_v8 = vadd.f32 %v92_v45, %v81_v48  ;;  %v104_v9 = vadd.f32 %v92_v45, %v82_v49 }
  0x2f   :  { %128 = vst [vmem:[%s284_s4 + $0x10] sm:$0xff] %v112_v63  ;;  %129 = vst [vmem:[%s284_s4 + $0x18] sm:$0xff] %v113_v0  ;;  %v105_v10 = vadd.f32 %v92_v45, %v83_v50  ;;  %v106_v11 = vadd.f32 %v92_v45, %v84_v51  ;;  %v107_v12 = vadd.f32 %v92_v45, %v85_v52 }
  0x30   :  { %130 = vst [vmem:[%s284_s4 + $0x20] sm:$0xff] %v114_v3  ;;  %131 = vst [vmem:[%s284_s4 + $0x28] sm:$0xff] %v115_v4  ;;  %v86_v13 = vmul.f32 %v70_v27, %v64_v1  ;;  %v87_v14 = vmul.f32 %v70_v27, %v65_v2  ;;  %v118_v15 = vmax.f32 %v102_v7, 0.0  ;;  %v119_v16 = vmax.f32 %v103_v8, 0.0 }
  0x31   :  { %132 = vst [vmem:[%s284_s4 + $0x30] sm:$0xff] %v116_v5  ;;  %133 = vst [vmem:[%s284_s4 + $0x38] sm:$0xff] %v117_v6  ;;  %v120_v17 = vmax.f32 %v104_v9, 0.0  ;;  %v121_v18 = vmax.f32 %v105_v10, 0.0  ;;  %v122_v19 = vmax.f32 %v106_v11, 0.0  ;;  %v123_v20 = vmax.f32 %v107_v12, 0.0 }
  0x32   :  { %v108_v21 = vadd.f32 %v92_v45, %v86_v13  ;;  %v109_v22 = vadd.f32 %v92_v45, %v87_v14  ;;  %134 = vst [vmem:[%s284_s4 + $0x40] sm:$0xff] %v118_v15  ;;  %135 = vst [vmem:[%s284_s4 + $0x48] sm:$0xff] %v119_v16 }
  0x33   :  { %136 = vst [vmem:[%s284_s4 + $0x50] sm:$0xff] %v120_v17  ;;  %137 = vst [vmem:[%s284_s4 + $0x58] sm:$0xff] %v121_v18 }
  0x34   :  { %138 = vst [vmem:[%s284_s4 + $0x60] sm:$0xff] %v122_v19  ;;  %139 = vst [vmem:[%s284_s4 + $0x68] sm:$0xff] %v123_v20  ;;  %v124_v23 = vmax.f32 %v108_v21, 0.0  ;;  %v125_v24 = vmax.f32 %v109_v22, 0.0 }
  0x36   :  { %140 = vst [vmem:[%s284_s4 + $0x70] sm:$0xff] %v124_v23  ;;  %141 = vst [vmem:[%s284_s4 + $0x78] sm:$0xff] %v125_v24 }

// kernel: resnet_forward.22
= control target key start
LH: loop header
LB: loop body
LE: loop exit
PB: predicated region body
PF: predicated region fallthrough
CT: control target
= control target key end

     0   :  { %v905_v0 = vmov 0   ;;  %vm394_vm0 = vcmask 64512   ;;  %vm419_vm1 = vcmask 1043456   ;;  %vm691_vm2 = vcmask 1040384   ;;  %s1165_s1 = inlined_call_operand.vmem [shape: bf16[392,128], index: 1, kind: input, shape index: {}]   ;;  %s1166_s0 = inlined_call_operand.vmem [shape: bf16[128,392], index: 0, kind: input, shape index: {}]   ;;  %s1167_s2 = inlined_call_operand.vmem [shape: f32[128,128], index: 2, kind: output, shape index: {0}]   ;;  %s1168_s3 = inlined_call_operand.vmem [shape: f32[1,2,128], index: 3, kind: output, shape index: {1}]  }
   0x1   :  { %520 = vmatprep.subr.bf16.mxu1 %v905_v0  ;;  %v832_v1 = vld [vmem:[%s1165_s1 + $0x78] sm:$0xff]   ;;  %v835_v4 = vld [vmem:[%s1165_s1 + $0x70] sm:$0xff]   ;;  %v838_v7 = vld [vmem:[%s1165_s1 + $0x68] sm:$0xff]  }
   0x2   :  { %v833_v2 = vld [vmem:[%s1165_s1 + $0xb8] sm:$0xff]   ;;  %767 = vmatprep.subr.bf16.mxu0 %v832_v1  ;;  %v836_v5 = vld [vmem:[%s1165_s1 + $0xb0] sm:$0xff]   ;;  %v839_v8 = vld [vmem:[%s1165_s1 + $0xa8] sm:$0xff]  }
   0x3   :  { %v834_v3 = vld [vmem:[%s1165_s1 + $0x38] sm:$0xff]   ;;  %521 = vmatpush1.bf16.msra.mxu1 %v833_v2  ;;  %v837_v6 = vld [vmem:[%s1165_s1 + $0x30] sm:$0xff]   ;;  %v840_v9 = vld [vmem:[%s1165_s1 + $0x28] sm:$0xff]  }
   0x4   :  { %768 = vmatpush3.bf16.msra.mxu0 %v834_v3  ;;  %522 = vmatprep.subr.bf16.mxu1 %v905_v0  ;;  %v841_v10 = vld [vmem:[%s1165_s1 + $0x60] sm:$0xff]   ;;  %v844_v13 = vld [vmem:[%s1165_s1 + $0x58] sm:$0xff]   ;;  %v847_v16 = vld [vmem:[%s1165_s1 + $0x50] sm:$0xff]  }
   0x5   :  { %769 = vmatprep.subr.bf16.mxu0 %v835_v4  ;;  %v842_v11 = vld [vmem:[%s1165_s1 + $0xa0] sm:$0xff]   ;;  %v845_v14 = vld [vmem:[%s1165_s1 + $0x98] sm:$0xff]   ;;  %v848_v17 = vld [vmem:[%s1165_s1 + $0x90] sm:$0xff]  }
   0x6   :  { %v843_v12 = vld [vmem:[%s1165_s1 + $0x20] sm:$0xff]   ;;  %v846_v15 = vld [vmem:[%s1165_s1 + $0x18] sm:$0xff]   ;;  %v849_v18 = vld [vmem:[%s1165_s1 + $0x10] sm:$0xff]  }
   0x7   :  { %523 = vmatpush1.bf16.msra.mxu1 %v836_v5  ;;  %v850_v19 = vld [vmem:[%s1165_s1 + $0x48] sm:$0xff]   ;;  %v853_v22 = vld [vmem:[%s1165_s1 + $0x40] sm:$0xff]  }
   0x8   :  { %770 = vmatpush3.bf16.msra.mxu0 %v837_v6  ;;  %524 = vmatprep.subr.bf16.mxu1 %v905_v0  ;;  %v851_v20 = vld [vmem:[%s1165_s1 + $0x88] sm:$0xff]   ;;  %v858_v23 = vld [vmem:[%s1166_s0 + $0x4] ss:$16 sps:$4 sm:$0xff]   ;;  %v859_v27 = vld [vmem:[%s1165_s1 + $0xc0] ss:$0 sps:$4 sm:$0xff]  }
   0x9   :  { %771 = vmatprep.subr.bf16.mxu0 %v838_v7  ;;  %v852_v21 = vld [vmem:[%s1165_s1 + $0x8] sm:$0xff]   ;;  %v854_v24 = vld [vmem:[%s1165_s1 + $0x80] sm:$0xff]   ;;  %455 = vmatprep.mubr.bf16.mxu0 %v858_v23  ;;  %v421_v29 = vsel %vm419_vm1, %v859_v27, 0 }
   0xa   :  { %v862_v25 = vld [vmem:[%s1166_s0 + $0xc] ss:$16 sps:$4 sm:$0xff]   ;;  %v855_v26 = vld [vmem:[%s1165_s1] sm:$0xff]   ;;  %v860_v31 = vld [vmem:[%s1166_s0 + $0x8] ss:$16 sps:$4 sm:$0xff]  }
   0xb   :  { %525 = vmatpush1.bf16.msra.mxu1 %v839_v8  ;;  %759 = vmatprep.mubr.msk.bf16.mxu1 %vm394_vm0, %v862_v25  ;;  %v856_v28 = vld [vmem:[%s1166_s0] ss:$16 sps:$4 sm:$0xff]   ;;  %v863_v30 = vld [vmem:[%s1166_s0 + $0x24] ss:$16 sps:$4 sm:$0xff]   ;;  %v866_v32 = vld [vmem:[%s1166_s0 + $0x2c] ss:$16 sps:$4 sm:$0xff]  }
   0xc   :  { %772 = vmatpush3.bf16.msra.mxu0 %v840_v9  ;;  %526 = vmatprep.subr.bf16.mxu1 %v905_v0  ;;  %v865_v33 = vld [vmem:[%s1166_s0 + $0x20] ss:$16 sps:$4 sm:$0xff]   ;;  %v869_v34 = vld [vmem:[%s1166_s0 + $0x44] ss:$16 sps:$4 sm:$0xff]   ;;  %v868_v35 = vld [vmem:[%s1166_s0 + $0x28] ss:$16 sps:$4 sm:$0xff]  }
   0xd   :  { %773 = vmatprep.subr.bf16.mxu0 %v841_v10  ;;  %v872_v36 = vld [vmem:[%s1166_s0 + $0x4c] ss:$16 sps:$4 sm:$0xff]   ;;  %v871_v37 = vld [vmem:[%s1166_s0 + $0x40] ss:$16 sps:$4 sm:$0xff]   ;;  %v875_v38 = vld [vmem:[%s1166_s0 + $0x64] ss:$16 sps:$4 sm:$0xff]  }
   0xe   :  { %v874_v39 = vld [vmem:[%s1166_s0 + $0x48] ss:$16 sps:$4 sm:$0xff]   ;;  %v878_v40 = vld [vmem:[%s1166_s0 + $0x6c] ss:$16 sps:$4 sm:$0xff]   ;;  %v877_v41 = vld [vmem:[%s1166_s0 + $0x60] ss:$16 sps:$4 sm:$0xff]  }
   0xf   :  { %527 = vmatpush1.bf16.msra.mxu1 %v842_v11  ;;  %v881_v42 = vld [vmem:[%s1166_s0 + $0x84] ss:$16 sps:$4 sm:$0xff]   ;;  %v880_v43 = vld [vmem:[%s1166_s0 + $0x68] ss:$16 sps:$4 sm:$0xff]   ;;  %v884_v44 = vld [vmem:[%s1166_s0 + $0x8c] ss:$16 sps:$4 sm:$0xff]  }
  0x10   :  { %774 = vmatpush3.bf16.msra.mxu0 %v843_v12  ;;  %528 = vmatprep.subr.bf16.mxu1 %v905_v0  ;;  %v883_v45 = vld [vmem:[%s1166_s0 + $0x80] ss:$16 sps:$4 sm:$0xff]   ;;  %v887_v46 = vld [vmem:[%s1166_s0 + $0xa4] ss:$16 sps:$4 sm:$0xff]   ;;  %v886_v47 = vld [vmem:[%s1166_s0 + $0x88] ss:$16 sps:$4 sm:$0xff]  }
  0x11   :  { %775 = vmatprep.subr.bf16.mxu0 %v844_v13  ;;  %v890_v48 = vld [vmem:[%s1166_s0 + $0xac] ss:$16 sps:$4 sm:$0xff]   ;;  %v889_v49 = vld [vmem:[%s1166_s0 + $0xa0] ss:$16 sps:$4 sm:$0xff]   ;;  %v893_v50 = vld [vmem:[%s1166_s0 + $0xc4] ss:$16 sps:$4 sm:$0xff]  }
  0x12   :  { %v892_v51 = vld [vmem:[%s1166_s0 + $0xa8] ss:$16 sps:$4 sm:$0xff]   ;;  %v896_v52 = vld [vmem:[%s1166_s0 + $0xcc] ss:$16 sps:$4 sm:$0xff]   ;;  %v895_v53 = vld [vmem:[%s1166_s0 + $0xc0] ss:$16 sps:$4 sm:$0xff]  }
  0x13   :  { %529 = vmatpush1.bf16.msra.mxu1 %v845_v14  ;;  %v899_v54 = vld [vmem:[%s1166_s0 + $0xe4] ss:$16 sps:$4 sm:$0xff]   ;;  %v898_v55 = vld [vmem:[%s1166_s0 + $0xc8] ss:$16 sps:$4 sm:$0xff]   ;;  %v902_v56 = vld [vmem:[%s1166_s0 + $0xec] ss:$16 sps:$4 sm:$0xff]  }
  0x14   :  { %776 = vmatpush3.bf16.msra.mxu0 %v846_v15  ;;  %530 = vmatprep.subr.bf16.mxu1 %v905_v0  ;;  %v901_v57 = vld [vmem:[%s1166_s0 + $0xe0] ss:$16 sps:$4 sm:$0xff]   ;;  %v904_v58 = vld [vmem:[%s1166_s0 + $0xe8] ss:$16 sps:$4 sm:$0xff]  }
  0x15   :  { %777 = vmatprep.subr.bf16.mxu0 %v847_v16 }
  0x17   :  { %531 = vmatpush1.bf16.msra.mxu1 %v848_v17 }
  0x18   :  { %778 = vmatpush3.bf16.msra.mxu0 %v849_v18  ;;  %532 = vmatprep.subr.bf16.mxu1 %v905_v0 }
  0x19   :  { %779 = vmatprep.subr.bf16.mxu0 %v850_v19 }
  0x1b   :  { %533 = vmatpush1.bf16.msra.mxu1 %v851_v20 }
  0x1c   :  { %780 = vmatpush3.bf16.msra.mxu0 %v852_v21  ;;  %534 = vmatprep.subr.bf16.mxu1 %v905_v0 }
  0x1d   :  { %781 = vmatprep.subr.bf16.mxu0 %v853_v22 }
  0x1f   :  { %535 = vmatpush1.bf16.msra.mxu1 %v854_v24 }
  0x20   :  { %782 = vmatpush3.bf16.msra.mxu0 %v855_v26  ;;  %550 = vmatprep.subr.bf16.mxu1 %v905_v0 }
  0x23   :  { %456 = vmatmul.mubr.bf16.vlgmr.msra.gmra.mxu0 %v856_v28  ;;  %551 = vmatpush2.bf16.msra.mxu1 %v421_v29 }
  0x24   :  { %463 = vmatprep.mubr.bf16.mxu0 %v863_v30 }
  0x26   :  { %553 = vmatmul.mubr.bf16.vlgmr.msra.gmra.mxu1 %v860_v31 }
  0x27   :  { %760 = vmatprep.mubr.msk.bf16.mxu1 %vm394_vm0, %v866_v32 }
  0x2b   :  { %464 = vmatmul.mubr.bf16.gmra.mxu0 %v865_v33 }
  0x2c   :  { %471 = vmatprep.mubr.bf16.mxu0 %v869_v34 }
  0x2e   :  { %561 = vmatmul.mubr.bf16.gmra.mxu1 %v868_v35 }
  0x2f   :  { %761 = vmatprep.mubr.msk.bf16.mxu1 %vm394_vm0, %v872_v36 }
  0x33   :  { %472 = vmatmul.mubr.bf16.gmra.mxu0 %v871_v37 }
  0x34   :  { %479 = vmatprep.mubr.bf16.mxu0 %v875_v38 }
  0x36   :  { %569 = vmatmul.mubr.bf16.gmra.mxu1 %v874_v39 }
  0x37   :  { %762 = vmatprep.mubr.msk.bf16.mxu1 %vm394_vm0, %v878_v40 }
  0x3b   :  { %480 = vmatmul.mubr.bf16.gmra.mxu0 %v877_v41 }
  0x3c   :  { %487 = vmatprep.mubr.bf16.mxu0 %v881_v42 }
  0x3e   :  { %577 = vmatmul.mubr.bf16.gmra.mxu1 %v880_v43 }
  0x3f   :  { %763 = vmatprep.mubr.msk.bf16.mxu1 %vm394_vm0, %v884_v44 }
  0x43   :  { %488 = vmatmul.mubr.bf16.gmra.mxu0 %v883_v45 }
  0x44   :  { %495 = vmatprep.mubr.bf16.mxu0 %v887_v46 }
  0x46   :  { %585 = vmatmul.mubr.bf16.gmra.mxu1 %v886_v47 }
  0x47   :  { %764 = vmatprep.mubr.msk.bf16.mxu1 %vm394_vm0, %v890_v48 }
  0x4b   :  { %496 = vmatmul.mubr.bf16.gmra.mxu0 %v889_v49 }
  0x4c   :  { %503 = vmatprep.mubr.bf16.mxu0 %v893_v50 }
  0x4e   :  { %593 = vmatmul.mubr.bf16.gmra.mxu1 %v892_v51 }
  0x4f   :  { %765 = vmatprep.mubr.msk.bf16.mxu1 %vm394_vm0, %v896_v52 }
  0x53   :  { %504 = vmatmul.mubr.bf16.gmra.mxu0 %v895_v53 }
  0x54   :  { %511 = vmatprep.mubr.bf16.mxu0 %v899_v54 }
  0x56   :  { %601 = vmatmul.mubr.bf16.gmra.mxu1 %v898_v55 }
  0x57   :  { %766 = vmatprep.mubr.msk.bf16.mxu1 %vm394_vm0, %v902_v56 }
  0x5b   :  { %512 = vmatmul.mubr.bf16.gmra.mxu0 %v901_v57 }
  0x5e   :  { %609 = vmatmul.mubr.bf16.gmra.mxu1 %v904_v58 }
  0xe3   :  { %v783_v59 = vpop.f32.mrf.mxu0 }
  0xe5   :  { %v784_v60 = vpop.f32.mrf.mxu0 }
  0xe6   :  { %v785_v61 = vadd.f32 %v784_v60, %v783_v59  ;;  %v554_v62 = vpop.f32.mrf.mxu1 }
  0xe7   :  { %v786_v63 = vpop.f32.mrf.mxu0 }
  0xe8   :  { %v555_v0 = vadd.f32 %v785_v61, %v554_v62  ;;  %v556_v1 = vpop.f32.mrf.mxu1 }
  0xe9   :  { %v787_v2 = vpop.f32.mrf.mxu0 }
  0xea   :  { %617 = vst [vmem:[%s1167_s2] sm:$0xff] %v555_v0  ;;  %v788_v3 = vadd.f32 %v787_v2, %v786_v63  ;;  %v557_v4 = vpop.f32.mrf.mxu1  ;;  %v654_v52 = vmul.f32 %v555_v0, %v555_v0 }
  0xeb   :  { %v789_v5 = vpop.f32.mrf.mxu0 }
  0xec   :  { %v558_v6 = vadd.f32 %v788_v3, %v557_v4  ;;  %v559_v7 = vpop.f32.mrf.mxu1 }
  0xed   :  { %v790_v8 = vpop.f32.mrf.mxu0 }
  0xee   :  { %618 = vst [vmem:[%s1167_s2 + $0x8] sm:$0xff] %v558_v6  ;;  %v791_v9 = vadd.f32 %v790_v8, %v789_v5  ;;  %v562_v10 = vpop.f32.mrf.mxu1  ;;  %v655_v48 = vmul.f32 %v558_v6, %v558_v6  ;;  %v633_v53 = vadd.f32 %v558_v6, %v555_v0 }
  0xef   :  { %v792_v11 = vpop.f32.mrf.mxu0 }
  0xf0   :  { %v563_v12 = vadd.f32 %v791_v9, %v562_v10  ;;  %v564_v13 = vpop.f32.mrf.mxu1  ;;  %v670_v58 = vadd.f32 %v655_v48, %v654_v52 }
  0xf1   :  { %v793_v14 = vpop.f32.mrf.mxu0 }
  0xf2   :  { %619 = vst [vmem:[%s1167_s2 + $0x10] sm:$0xff] %v563_v12  ;;  %v794_v15 = vadd.f32 %v793_v14, %v792_v11  ;;  %v565_v16 = vpop.f32.mrf.mxu1  ;;  %v656_v54 = vmul.f32 %v563_v12, %v563_v12  ;;  %v634_v59 = vadd.f32 %v633_v53, %v563_v12 }
  0xf3   :  { %v795_v17 = vpop.f32.mrf.mxu0 }
  0xf4   :  { %v566_v18 = vadd.f32 %v794_v15, %v565_v16  ;;  %v567_v19 = vpop.f32.mrf.mxu1  ;;  %v671_v1 = vadd.f32 %v670_v58, %v656_v54 }
  0xf5   :  { %v796_v20 = vpop.f32.mrf.mxu0 }
  0xf6   :  { %620 = vst [vmem:[%s1167_s2 + $0x18] sm:$0xff] %v566_v18  ;;  %v797_v21 = vadd.f32 %v796_v20, %v795_v17  ;;  %v570_v22 = vpop.f32.mrf.mxu1  ;;  %v657_v60 = vmul.f32 %v566_v18, %v566_v18  ;;  %v635_v2 = vadd.f32 %v634_v59, %v566_v18 }
  0xf7   :  { %v798_v23 = vpop.f32.mrf.mxu0 }
  0xf8   :  { %v571_v24 = vadd.f32 %v797_v21, %v570_v22  ;;  %v572_v25 = vpop.f32.mrf.mxu1  ;;  %v672_v6 = vadd.f32 %v671_v1, %v657_v60 }
  0xf9   :  { %v799_v26 = vpop.f32.mrf.mxu0 }
  0xfa   :  { %621 = vst [vmem:[%s1167_s2 + $0x20] sm:$0xff] %v571_v24  ;;  %v800_v27 = vadd.f32 %v799_v26, %v798_v23  ;;  %v573_v28 = vpop.f32.mrf.mxu1  ;;  %v658_v3 = vmul.f32 %v571_v24, %v571_v24  ;;  %v636_v7 = vadd.f32 %v635_v2, %v571_v24 }
  0xfb   :  { %v801_v29 = vpop.f32.mrf.mxu0 }
  0xfc   :  { %v574_v30 = vadd.f32 %v800_v27, %v573_v28  ;;  %v575_v31 = vpop.f32.mrf.mxu1  ;;  %v673_v12 = vadd.f32 %v672_v6, %v658_v3 }
  0xfd   :  { %v802_v32 = vpop.f32.mrf.mxu0 }
  0xfe   :  { %622 = vst [vmem:[%s1167_s2 + $0x28] sm:$0xff] %v574_v30  ;;  %v803_v33 = vadd.f32 %v802_v32, %v801_v29  ;;  %v578_v34 = vpop.f32.mrf.mxu1  ;;  %v659_v8 = vmul.f32 %v574_v30, %v574_v30  ;;  %v637_v13 = vadd.f32 %v636_v7, %v574_v30 }
  0xff   :  { %v804_v35 = vpop.f32.mrf.mxu0 }
 0x100   :  { %v579_v36 = vadd.f32 %v803_v33, %v578_v34  ;;  %v580_v37 = vpop.f32.mrf.mxu1  ;;  %v674_v18 = vadd.f32 %v673_v12, %v659_v8 }
 0x101   :  { %v805_v38 = vpop.f32.mrf.mxu0 }
 0x102   :  { %623 = vst [vmem:[%s1167_s2 + $0x30] sm:$0xff] %v579_v36  ;;  %v806_v39 = vadd.f32 %v805_v38, %v804_v35  ;;  %v581_v40 = vpop.f32.mrf.mxu1  ;;  %v660_v14 = vmul.f32 %v579_v36, %v579_v36  ;;  %v638_v19 = vadd.f32 %v637_v13, %v579_v36 }
 0x103   :  { %v807_v41 = vpop.f32.mrf.mxu0 }
 0x104   :  { %v582_v42 = vadd.f32 %v806_v39, %v581_v40  ;;  %v583_v43 = vpop.f32.mrf.mxu1  ;;  %v675_v24 = vadd.f32 %v674_v18, %v660_v14 }
 0x105   :  { %v808_v44 = vpop.f32.mrf.mxu0 }
 0x106   :  { %624 = vst [vmem:[%s1167_s2 + $0x38] sm:$0xff] %v582_v42  ;;  %v809_v45 = vadd.f32 %v808_v44, %v807_v41  ;;  %v586_v46 = vpop.f32.mrf.mxu1  ;;  %v661_v20 = vmul.f32 %v582_v42, %v582_v42  ;;  %v639_v25 = vadd.f32 %v638_v19, %v582_v42 }
 0x107   :  { %v810_v47 = vpop.f32.mrf.mxu0 }
 0x108   :  { %v587_v49 = vadd.f32 %v809_v45, %v586_v46  ;;  %v588_v50 = vpop.f32.mrf.mxu1  ;;  %v676_v30 = vadd.f32 %v675_v24, %v661_v20 }
 0x109   :  { %v811_v51 = vpop.f32.mrf.mxu0 }
 0x10a   :  { %625 = vst [vmem:[%s1167_s2 + $0x40] sm:$0xff] %v587_v49  ;;  %v812_v55 = vadd.f32 %v811_v51, %v810_v47  ;;  %v589_v56 = vpop.f32.mrf.mxu1  ;;  %v662_v26 = vmul.f32 %v587_v49, %v587_v49  ;;  %v640_v31 = vadd.f32 %v639_v25, %v587_v49 }
 0x10b   :  { %v813_v57 = vpop.f32.mrf.mxu0 }
 0x10c   :  { %v590_v61 = vadd.f32 %v812_v55, %v589_v56  ;;  %v591_v62 = vpop.f32.mrf.mxu1  ;;  %v677_v36 = vadd.f32 %v676_v30, %v662_v26 }
 0x10d   :  { %v814_v63 = vpop.f32.mrf.mxu0 }
 0x10e   :  { %626 = vst [vmem:[%s1167_s2 + $0x48] sm:$0xff] %v590_v61  ;;  %v815_v0 = vadd.f32 %v814_v63, %v813_v57  ;;  %v594_v4 = vpop.f32.mrf.mxu1  ;;  %v663_v32 = vmul.f32 %v590_v61, %v590_v61  ;;  %v641_v37 = vadd.f32 %v640_v31, %v590_v61 }
 0x10f   :  { %v816_v5 = vpop.f32.mrf.mxu0 }
 0x110   :  { %v595_v9 = vadd.f32 %v815_v0, %v594_v4  ;;  %v596_v10 = vpop.f32.mrf.mxu1  ;;  %v678_v42 = vadd.f32 %v677_v36, %v663_v32 }
 0x111   :  { %v817_v11 = vpop.f32.mrf.mxu0 }
 0x112   :  { %627 = vst [vmem:[%s1167_s2 + $0x50] sm:$0xff] %v595_v9  ;;  %v818_v15 = vadd.f32 %v817_v11, %v816_v5  ;;  %v597_v16 = vpop.f32.mrf.mxu1  ;;  %v664_v38 = vmul.f32 %v595_v9, %v595_v9  ;;  %v642_v43 = vadd.f32 %v641_v37, %v595_v9 }
 0x113   :  { %v819_v17 = vpop.f32.mrf.mxu0 }
 0x114   :  { %v598_v21 = vadd.f32 %v818_v15, %v597_v16  ;;  %v599_v22 = vpop.f32.mrf.mxu1  ;;  %v679_v48 = vadd.f32 %v678_v42, %v664_v38 }
 0x115   :  { %v820_v23 = vpop.f32.mrf.mxu0 }
 0x116   :  { %628 = vst [vmem:[%s1167_s2 + $0x58] sm:$0xff] %v598_v21  ;;  %v821_v27 = vadd.f32 %v820_v23, %v819_v17  ;;  %v602_v28 = vpop.f32.mrf.mxu1  ;;  %v665_v44 = vmul.f32 %v598_v21, %v598_v21  ;;  %v643_v49 = vadd.f32 %v642_v43, %v598_v21 }
 0x117   :  { %v822_v29 = vpop.f32.mrf.mxu0 }
 0x118   :  { %v603_v33 = vadd.f32 %v821_v27, %v602_v28  ;;  %v604_v34 = vpop.f32.mrf.mxu1  ;;  %v680_v54 = vadd.f32 %v679_v48, %v665_v44 }
 0x119   :  { %v823_v35 = vpop.f32.mrf.mxu0 }
 0x11a   :  { %629 = vst [vmem:[%s1167_s2 + $0x60] sm:$0xff] %v603_v33  ;;  %v824_v39 = vadd.f32 %v823_v35, %v822_v29  ;;  %v605_v40 = vpop.f32.mrf.mxu1  ;;  %v666_v50 = vmul.f32 %v603_v33, %v603_v33  ;;  %v644_v55 = vadd.f32 %v643_v49, %v603_v33 }
 0x11b   :  { %v825_v41 = vpop.f32.mrf.mxu0 }
 0x11c   :  { %v606_v45 = vadd.f32 %v824_v39, %v605_v40  ;;  %v607_v46 = vpop.f32.mrf.mxu1  ;;  %v681_v60 = vadd.f32 %v680_v54, %v666_v50 }
 0x11d   :  { %v826_v47 = vpop.f32.mrf.mxu0 }
 0x11e   :  { %630 = vst [vmem:[%s1167_s2 + $0x68] sm:$0xff] %v606_v45  ;;  %v827_v51 = vadd.f32 %v826_v47, %v825_v41  ;;  %v610_v52 = vpop.f32.mrf.mxu1  ;;  %v667_v56 = vmul.f32 %v606_v45, %v606_v45  ;;  %v645_v61 = vadd.f32 %v644_v55, %v606_v45 }
 0x11f   :  { %v828_v53 = vpop.f32.mrf.mxu0 }
 0x120   :  { %v611_v57 = vadd.f32 %v827_v51, %v610_v52  ;;  %v612_v58 = vpop.f32.mrf.mxu1  ;;  %v682_v2 = vadd.f32 %v681_v60, %v667_v56 }
 0x121   :  { %v829_v59 = vpop.f32.mrf.mxu0 }
 0x122   :  { %631 = vst [vmem:[%s1167_s2 + $0x70] sm:$0xff] %v611_v57  ;;  %v668_v62 = vmul.f32 %v611_v57, %v611_v57  ;;  %v830_v63 = vadd.f32 %v829_v59, %v828_v53  ;;  %v613_v1 = vpop.f32.mrf.mxu1  ;;  %v646_v3 = vadd.f32 %v645_v61, %v611_v57 }
 0x124   :  { %v614_v0 = vadd.f32 %v830_v63, %v613_v1  ;;  %v615_v4 = vpop.f32.mrf.mxu1  ;;  %v683_v5 = vadd.f32 %v682_v2, %v668_v62 }
 0x126   :  { %632 = vst [vmem:[%s1167_s2 + $0x78] sm:$0xff] %v614_v0  ;;  %v647_v6 = vadd.f32 %v646_v3, %v614_v0  ;;  %v669_v7 = vmul.f32 %v614_v0, %v614_v0 }
 0x128   :  { %v648_v8 = vrot.slane %v647_v6, 4  ;;  %v684_v9 = vadd.f32 %v683_v5, %v669_v7 }
 0x12a   :  { %v649_v10 = vadd.f32 %v648_v8, %v647_v6  ;;  %v685_v11 = vrot.slane %v684_v9, 4 }
 0x12c   :  { %v650_v12 = vrot.slane %v649_v10, 2  ;;  %v686_v13 = vadd.f32 %v685_v11, %v684_v9 }
 0x12e   :  { %v651_v14 = vadd.f32 %v650_v12, %v649_v10  ;;  %v687_v15 = vrot.slane %v686_v13, 2 }
 0x130   :  { %v652_v16 = vrot.slane %v651_v14, 1  ;;  %v688_v17 = vadd.f32 %v687_v15, %v686_v13 }
 0x132   :  { %v689_v18 = vrot.slane %v688_v17, 1  ;;  %v653_v19 = vadd.f32 %v652_v16, %v651_v14 }
 0x134   :  { %v690_v20 = vadd.f32 %v689_v18, %v688_v17 }
 0x136   :  { %v692_v21 = vsel %vm691_vm2, %v653_v19, %v690_v20 }
 0x137   :  { %693 = vst [vmem:[%s1168_s3] sm:$0x3] %v692_v21 }

// kernel: resnet_forward.24
= control target key start
LH: loop header
LB: loop body
LE: loop exit
PB: predicated region body
PF: predicated region fallthrough
CT: control target
= control target key end

     0   :  { %s402_s9 = smov 0   ;;  %s474_s0 = inlined_call_operand.vmem [shape: f32[2,10,5,128], index: 0, kind: input, shape index: {}]   ;;  %s475_s1 = inlined_call_operand.vmem [shape: f32[2,10,5,128], index: 1, kind: input, shape index: {}]   ;;  %s476_s2 = inlined_call_operand.vmem [shape: f32[2,4,4,128], index: 2, kind: output, shape index: {}]  }
   0x1 LB: > { %s322_s10 = sadd.s32 4294967295, %s385_s9   ;;  %p326_p0 = scmp.ge.s32.totalorder %s385_s9, 1  ;;  %s385_s9 = sphi %s402_s9, %s12_s9  }
   0x2   : > { %p122_p1 = scmp.lt.s32.totalorder %s385_s9, 3 }
   0x4   : > { %p123_p2 = pnand %p326_p0, %p122_p1 }
   0x5   : > { %p149_p3 = scmp.lt.s32.totalorder (!%p123_p2), %s322_s10, 1 }
   0x6   : > { %126 = sbr.rel (%p123_p2) target bundleno = 35 (0x23), region = 28 }
   0xb   : > { %s478_s10 = smov (!%p149_p3, %s322_s10), 1 }
   0xc   : > { %s370_s11 = smul.u32 80, %s478_s10  ;;  %s369_s12 = sshll.u32 %s478_s10, 4 }
   0xd   : > { %s450_s21 = scalar_lea.vmem %s476_s2, %s369_s12 }
   0xe   : > { %s417_s15 = scalar_lea.vmem %s474_s0, %s370_s11  ;;  %s422_s18 = scalar_lea.vmem %s475_s1, %s370_s11 }
   0xf   : > { %v164_v0 = vld [vmem:[%s417_s15] sm:$0xf]  ;;  %v331_v4 = vld [vmem:[%s417_s15 + $0x8] sm:$0xf]  ;;  %v334_v8 = vld [vmem:[%s417_s15 + $0x10] sm:$0xf] }
  0x10   : > { %v165_v1 = vld [vmem:[%s422_s18] sm:$0xf]  ;;  %v332_v5 = vld [vmem:[%s422_s18 + $0x8] sm:$0xf]  ;;  %v335_v9 = vld [vmem:[%s422_s18 + $0x10] sm:$0xf] }
  0x11   : > { %v166_v2 = vld [vmem:[%s417_s15 + $0x1] sm:$0xf]  ;;  %v167_v3 = vmax.f32 %v164_v0, %v165_v1  ;;  %v333_v6 = vld [vmem:[%s417_s15 + $0x9] sm:$0xf]  ;;  %v174_v7 = vmax.f32 %v331_v4, %v332_v5  ;;  %v336_v10 = vld [vmem:[%s417_s15 + $0x11] sm:$0xf]  ;;  %v182_v12 = vmax.f32 %v334_v8, %v335_v9 }
  0x12   : > { %v337_v13 = vld [vmem:[%s417_s15 + $0x10] sm:$0xf]  ;;  %v340_v18 = vld [vmem:[%s417_s15 + $0x18] sm:$0xf]  ;;  %v343_v23 = vld [vmem:[%s417_s15 + $0x20] sm:$0xf] }
  0x13   : > { %v168_v11 = vmax.f32 %v167_v3, %v166_v2  ;;  %v338_v14 = vld [vmem:[%s422_s18 + $0x10] sm:$0xf]  ;;  %v175_v16 = vmax.f32 %v174_v7, %v333_v6  ;;  %v341_v19 = vld [vmem:[%s422_s18 + $0x18] sm:$0xf]  ;;  %v183_v21 = vmax.f32 %v182_v12, %v336_v10  ;;  %v344_v24 = vld [vmem:[%s422_s18 + $0x20] sm:$0xf] }
  0x14   : > { %v339_v15 = vld [vmem:[%s417_s15 + $0x11] sm:$0xf]  ;;  %v189_v17 = vmax.f32 %v337_v13, %v338_v14  ;;  %v342_v20 = vld [vmem:[%s417_s15 + $0x19] sm:$0xf]  ;;  %v196_v22 = vmax.f32 %v340_v18, %v341_v19  ;;  %v345_v25 = vld [vmem:[%s417_s15 + $0x21] sm:$0xf]  ;;  %v204_v28 = vmax.f32 %v343_v23, %v344_v24 }
  0x15   : > { %v176_v26 = vmax.f32 %v168_v11, %v175_v16  ;;  %v347_v29 = vld [vmem:[%s417_s15 + $0x20] sm:$0xf]  ;;  %v350_v34 = vld [vmem:[%s417_s15 + $0x28] sm:$0xf]  ;;  %v353_v40 = vld [vmem:[%s417_s15 + $0x30] sm:$0xf] }
  0x16   : > { %v190_v27 = vmax.f32 %v189_v17, %v339_v15  ;;  %v348_v30 = vld [vmem:[%s422_s18 + $0x20] sm:$0xf]  ;;  %v197_v32 = vmax.f32 %v196_v22, %v342_v20  ;;  %v351_v35 = vld [vmem:[%s422_s18 + $0x28] sm:$0xf]  ;;  %v205_v38 = vmax.f32 %v204_v28, %v345_v25  ;;  %v354_v41 = vld [vmem:[%s422_s18 + $0x30] sm:$0xf] }
  0x17   : > { %v349_v31 = vld [vmem:[%s417_s15 + $0x21] sm:$0xf]  ;;  %v212_v33 = vmax.f32 %v347_v29, %v348_v30  ;;  %v352_v36 = vld [vmem:[%s417_s15 + $0x29] sm:$0xf]  ;;  %v184_v37 = vmax.f32 %v176_v26, %v183_v21  ;;  %v219_v39 = vmax.f32 %v350_v34, %v351_v35  ;;  %v355_v42 = vld [vmem:[%s417_s15 + $0x31] sm:$0xf]  ;;  %v227_v45 = vmax.f32 %v353_v40, %v354_v41 }
  0x18   : > { %v198_v43 = vmax.f32 %v190_v27, %v197_v32  ;;  %v357_v46 = vld [vmem:[%s417_s15 + $0x30] sm:$0xf]  ;;  %v360_v51 = vld [vmem:[%s417_s15 + $0x38] sm:$0xf]  ;;  %v363_v57 = vld [vmem:[%s417_s15 + $0x40] sm:$0xf] }
  0x19   : > { %v213_v44 = vmax.f32 %v212_v33, %v349_v31  ;;  %v358_v47 = vld [vmem:[%s422_s18 + $0x30] sm:$0xf]  ;;  %185 = vst [vmem:[%s450_s21] sm:$0xf] %v184_v37  ;;  %v220_v49 = vmax.f32 %v219_v39, %v352_v36  ;;  %v361_v52 = vld [vmem:[%s422_s18 + $0x38] sm:$0xf]  ;;  %v228_v55 = vmax.f32 %v227_v45, %v355_v42 }
  0x1a   : > { %v359_v48 = vld [vmem:[%s417_s15 + $0x31] sm:$0xf]  ;;  %v235_v50 = vmax.f32 %v357_v46, %v358_v47  ;;  %v362_v53 = vld [vmem:[%s417_s15 + $0x39] sm:$0xf]  ;;  %v206_v54 = vmax.f32 %v198_v43, %v205_v38  ;;  %v242_v56 = vmax.f32 %v360_v51, %v361_v52  ;;  %v364_v58 = vld [vmem:[%s422_s18 + $0x40] sm:$0xf] }
  0x1b   : > { %v365_v59 = vld [vmem:[%s417_s15 + $0x41] sm:$0xf]  ;;  %v221_v60 = vmax.f32 %v213_v44, %v220_v49  ;;  %v250_v62 = vmax.f32 %v363_v57, %v364_v58 }
  0x1c   : > { %v236_v61 = vmax.f32 %v235_v50, %v359_v48  ;;  %346 = vst [vmem:[%s450_s21 + $0x4] sm:$0xf] %v206_v54  ;;  %v243_v63 = vmax.f32 %v242_v56, %v362_v53 }
  0x1d   : > { %v229_v0 = vmax.f32 %v221_v60, %v228_v55  ;;  %v251_v1 = vmax.f32 %v250_v62, %v365_v59 }
  0x1e   : > { %v244_v2 = vmax.f32 %v236_v61, %v243_v63 }
  0x1f   : > { %356 = vst [vmem:[%s450_s21 + $0x8] sm:$0xf] %v229_v0 }
  0x20   : > { %v252_v3 = vmax.f32 %v244_v2, %v251_v1 }
  0x22   : > { %366 = vst [vmem:[%s450_s21 + $0xc] sm:$0xf] %v252_v3 }
  0x23 PF: > { %s12_s9 = sadd.s32 1, %s385_s9  }
  0x24   : > { %p9_p4 = scmp.ge.s32.totalorder %s12_s9, 4  }
  0x26   :  { %11 = sbr.rel (!%p9_p4) target bundleno = 1 (0x1), region = 80 }

// kernel: resnet_forward.26
= control target key start
LH: loop header
LB: loop body
LE: loop exit
PB: predicated region body
PF: predicated region fallthrough
CT: control target
= control target key end

     0   :  { %vm19_vm0 = vcmask 1041408   ;;  %v93_v11 = vmov 1966171168   ;;  %v37_v13 = vlaneseq  ;;  %s155_s1 = inlined_call_operand.vmem [shape: f32[2,2,128], index: 1, kind: input, shape index: {}]   ;;  %s156_s2 = inlined_call_operand.vmem [shape: f32[1,128], index: 2, kind: input, shape index: {}]   ;;  %s157_s3 = inlined_call_operand.vmem [shape: f32[1,128], index: 3, kind: input, shape index: {}]   ;;  %s158_s0 = inlined_call_operand.vmem [shape: f32[32,128], index: 0, kind: input, shape index: {}]   ;;  %s159_s4 = inlined_call_operand.vmem [shape: f32[32,128], index: 4, kind: output, shape index: {}]  }
   0x1   :  { %v17_v0 = vld [vmem:[%s155_s1] sm:$0x3]  ;;  %v18_v1 = vld [vmem:[%s155_s1 + $0x2] sm:$0x3]  ;;  %v35_v12 = vunpack.c.l.s4 %v93_v11  ;;  %v55_v26 = vld [vmem:[%s158_s0 + $0x8] sm:$0xff] }
   0x2   :  { %v20_v2 = vsel %vm19_vm0, %v17_v0, 0.0  ;;  %v21_v3 = vsel %vm19_vm0, %v18_v1, 0.0  ;;  %v38_v15 = vshrl.u32 %v37_v13, 7  ;;  %v30_v20 = vld [vmem:[%s156_s2] sm:$0x1]  ;;  %v56_v27 = vld [vmem:[%s158_s0 + $0x10] sm:$0xff] }
   0x3   :  { %v22_v4 = vadd.f32 %v21_v3, %v20_v2  ;;  %v36_v14 = vunpack.c.0.s8 %v35_v12  ;;  %v51_v24 = vld [vmem:[%s157_s3] sm:$0x1]  ;;  %v57_v30 = vld [vmem:[%s158_s0 + $0x18] sm:$0xff] }
   0x4   :  { %v61_v22 = vsub.s32 0, %v38_v15  ;;  %v54_v25 = vld [vmem:[%s158_s0] sm:$0xff] }
   0x5   :  { %v23_v5 = vmul.f32 0.03125, %v22_v4  ;;  %v39_v16 = vsub.s32 %v36_v14, %v38_v15 }
   0x7   :  { %v24_v6 = vmul.f32 %v23_v5, %v23_v5 }
   0x9   :  { %v26_v7 = vrot.slane %v24_v6, 7 }
   0xb   :  { %v28_v8 = vsub.f32 %v23_v5, %v26_v7 }
   0xd   :  { %v29_v9 = vmax.f32 %v28_v8, 0.0 }
   0xf   :  { %v31_v10 = vadd.f32 1e-05, %v29_v9 }
  0x11   :  { %91 = vrsqrt.f32 %v31_v10 }
  0x1e   :  { %v92_v17 = vpop.eup %91 }
  0x1f   :  { %v40_v18 = vrot.slane %v92_v17, %v39_v16 }
  0x21   :  { %v41_v19 = vcombine.high %v40_v18, %v40_v18 }
  0x23   :  { %v48_v21 = vrot.slane %v41_v19, %v39_v16 }
  0x25   :  { %v50_v23 = vmul.f32 %v48_v21, %v30_v20 }
  0x27   :  { %v52_v28 = vmul.f32 %v50_v23, %v23_v5  ;;  %v62_v29 = vrot.slane %v50_v23, %v61_v22 }
  0x29   :  { %v53_v31 = vsub.f32 %v51_v24, %v52_v28  ;;  %v64_v32 = vmul.f32 %v62_v29, %v54_v25  ;;  %v65_v33 = vmul.f32 %v62_v29, %v55_v26  ;;  %v66_v34 = vmul.f32 %v62_v29, %v56_v27 }
  0x2a   :  { %v67_v35 = vmul.f32 %v62_v29, %v57_v30 }
  0x2b   :  { %v72_v36 = vrot.slane %v53_v31, %v61_v22 }
  0x2d   :  { %v74_v37 = vadd.f32 %v72_v36, %v64_v32  ;;  %v75_v38 = vadd.f32 %v72_v36, %v65_v33  ;;  %v76_v39 = vadd.f32 %v72_v36, %v66_v34  ;;  %v77_v40 = vadd.f32 %v72_v36, %v67_v35 }
  0x2f   :  { %v78_v41 = vmax.f32 %v74_v37, 0.0  ;;  %v79_v42 = vmax.f32 %v75_v38, 0.0  ;;  %v80_v43 = vmax.f32 %v76_v39, 0.0  ;;  %v81_v44 = vmax.f32 %v77_v40, 0.0 }
  0x31   :  { %82 = vst [vmem:[%s159_s4] sm:$0xff] %v78_v41  ;;  %83 = vst [vmem:[%s159_s4 + $0x8] sm:$0xff] %v79_v42 }
  0x32   :  { %84 = vst [vmem:[%s159_s4 + $0x10] sm:$0xff] %v80_v43  ;;  %85 = vst [vmem:[%s159_s4 + $0x18] sm:$0xff] %v81_v44 }

// kernel: resnet_forward.28
= control target key start
LH: loop header
LB: loop body
LE: loop exit
PB: predicated region body
PF: predicated region fallthrough
CT: control target
= control target key end

     0   :  { %vm22_vm0 = vcmask 1041408   ;;  %v104_v11 = vmov 1966171168   ;;  %v40_v13 = vlaneseq  ;;  %s183_s1 = inlined_call_operand.vmem [shape: f32[2,2,128], index: 1, kind: input, shape index: {}]   ;;  %s184_s2 = inlined_call_operand.vmem [shape: f32[1,128], index: 2, kind: input, shape index: {}]   ;;  %s185_s3 = inlined_call_operand.vmem [shape: f32[1,128], index: 3, kind: input, shape index: {}]   ;;  %s186_s0 = inlined_call_operand.vmem [shape: f32[32,128], index: 0, kind: input, shape index: {}]   ;;  %s187_s4 = inlined_call_operand.vmem [shape: f32[32,128], index: 4, kind: input, shape index: {}]   ;;  %s188_s5 = inlined_call_operand.vmem [shape: f32[32,128], index: 5, kind: output, shape index: {}]  }
   0x1   :  { %v20_v0 = vld [vmem:[%s183_s1] sm:$0x3]  ;;  %v21_v1 = vld [vmem:[%s183_s1 + $0x2] sm:$0x3]  ;;  %v38_v12 = vunpack.c.l.s4 %v104_v11  ;;  %v58_v26 = vld [vmem:[%s186_s0 + $0x8] sm:$0xff] }
   0x2   :  { %v23_v2 = vsel %vm22_vm0, %v20_v0, 0.0  ;;  %v24_v3 = vsel %vm22_vm0, %v21_v1, 0.0  ;;  %v41_v15 = vshrl.u32 %v40_v13, 7  ;;  %v33_v20 = vld [vmem:[%s184_s2] sm:$0x1]  ;;  %v59_v27 = vld [vmem:[%s186_s0 + $0x10] sm:$0xff] }
   0x3   :  { %v25_v4 = vadd.f32 %v24_v3, %v23_v2  ;;  %v39_v14 = vunpack.c.0.s8 %v38_v12  ;;  %v54_v24 = vld [vmem:[%s185_s3] sm:$0x1]  ;;  %v60_v30 = vld [vmem:[%s186_s0 + $0x18] sm:$0xff]  ;;  %v82_v38 = vld [vmem:[%s187_s4 + $0x8] sm:$0xff] }
   0x4   :  { %v64_v22 = vsub.s32 0, %v41_v15  ;;  %v57_v25 = vld [vmem:[%s186_s0] sm:$0xff]  ;;  %v83_v39 = vld [vmem:[%s187_s4 + $0x10] sm:$0xff]  ;;  %v84_v40 = vld [vmem:[%s187_s4 + $0x18] sm:$0xff] }
   0x5   :  { %v26_v5 = vmul.f32 0.03125, %v25_v4  ;;  %v42_v16 = vsub.s32 %v39_v14, %v41_v15  ;;  %v81_v37 = vld [vmem:[%s187_s4] sm:$0xff] }
   0x7   :  { %v27_v6 = vmul.f32 %v26_v5, %v26_v5 }
   0x9   :  { %v29_v7 = vrot.slane %v27_v6, 7 }
   0xb   :  { %v31_v8 = vsub.f32 %v26_v5, %v29_v7 }
   0xd   :  { %v32_v9 = vmax.f32 %v31_v8, 0.0 }
   0xf   :  { %v34_v10 = vadd.f32 1e-05, %v32_v9 }
  0x11   :  { %102 = vrsqrt.f32 %v34_v10 }
  0x1e   :  { %v103_v17 = vpop.eup %102 }
  0x1f   :  { %v43_v18 = vrot.slane %v103_v17, %v42_v16 }
  0x21   :  { %v44_v19 = vcombine.high %v43_v18, %v43_v18 }
  0x23   :  { %v51_v21 = vrot.slane %v44_v19, %v42_v16 }
  0x25   :  { %v53_v23 = vmul.f32 %v51_v21, %v33_v20 }
  0x27   :  { %v55_v28 = vmul.f32 %v53_v23, %v26_v5  ;;  %v65_v29 = vrot.slane %v53_v23, %v64_v22 }
  0x29   :  { %v56_v31 = vsub.f32 %v54_v24, %v55_v28  ;;  %v67_v32 = vmul.f32 %v65_v29, %v57_v25  ;;  %v68_v33 = vmul.f32 %v65_v29, %v58_v26  ;;  %v69_v34 = vmul.f32 %v65_v29, %v59_v27 }
  0x2a   :  { %v70_v35 = vmul.f32 %v65_v29, %v60_v30 }
  0x2b   :  { %v75_v36 = vrot.slane %v56_v31, %v64_v22 }
  0x2d   :  { %v77_v41 = vadd.f32 %v75_v36, %v67_v32  ;;  %v78_v42 = vadd.f32 %v75_v36, %v68_v33  ;;  %v79_v43 = vadd.f32 %v75_v36, %v69_v34  ;;  %v80_v44 = vadd.f32 %v75_v36, %v70_v35 }
  0x2f   :  { %v85_v45 = vadd.f32 %v81_v37, %v77_v41  ;;  %v86_v46 = vadd.f32 %v82_v38, %v78_v42  ;;  %v87_v47 = vadd.f32 %v83_v39, %v79_v43  ;;  %v88_v48 = vadd.f32 %v84_v40, %v80_v44 }
  0x31   :  { %v89_v49 = vmax.f32 %v85_v45, 0.0  ;;  %v90_v50 = vmax.f32 %v86_v46, 0.0  ;;  %v91_v51 = vmax.f32 %v87_v47, 0.0  ;;  %v92_v52 = vmax.f32 %v88_v48, 0.0 }
  0x33   :  { %93 = vst [vmem:[%s188_s5] sm:$0xff] %v89_v49  ;;  %94 = vst [vmem:[%s188_s5 + $0x8] sm:$0xff] %v90_v50 }
  0x34   :  { %95 = vst [vmem:[%s188_s5 + $0x10] sm:$0xff] %v91_v51  ;;  %96 = vst [vmem:[%s188_s5 + $0x18] sm:$0xff] %v92_v52 }

// kernel: resnet_forward.35
= control target key start
LH: loop header
LB: loop body
LE: loop exit
PB: predicated region body
PF: predicated region fallthrough
CT: control target
= control target key end

     0   :  { %v191_v0 = vmov 0.0   ;;  %vm192_vm0 = vmmov 0   ;;  %vm133_vm1 = vcmask 1040384   ;;  %s246_s1 = inlined_call_operand.vmem [shape: bf16[128,128], index: 1, kind: input, shape index: {}]   ;;  %s247_s0 = inlined_call_operand.vmem [shape: bf16[8,128], index: 0, kind: input, shape index: {}]   ;;  %s248_s2 = inlined_call_operand.vmem [shape: f32[8,128], index: 2, kind: output, shape index: {0}]   ;;  %s249_s3 = inlined_call_operand.vmem [shape: f32[1,2,128], index: 3, kind: output, shape index: {1}]  }
   0x1   :  { %161 = vmatprep.subr.bf16.mxu0 %v191_v0  ;;  %v183_v1 = vld [vmem:[%s246_s1 + $0x38] sm:$0xff]   ;;  %177 = vmatprep.mubr.msk.bf16.mxu0 %vm192_vm0, %v191_v0  ;;  %v184_v2 = vld [vmem:[%s246_s1 + $0x30] sm:$0xff]   ;;  %v185_v3 = vld [vmem:[%s246_s1 + $0x28] sm:$0xff]  }
   0x2   :  { %162 = vmatpush3.bf16.msra.mxu0 %v183_v1  ;;  %v186_v4 = vld [vmem:[%s246_s1 + $0x20] sm:$0xff]   ;;  %v187_v5 = vld [vmem:[%s246_s1 + $0x18] sm:$0xff]   ;;  %v188_v6 = vld [vmem:[%s246_s1 + $0x10] sm:$0xff]  }
   0x3   :  { %163 = vmatprep.subr.bf16.mxu0 %v191_v0  ;;  %v189_v7 = vld [vmem:[%s246_s1 + $0x8] sm:$0xff]   ;;  %v190_v8 = vld [vmem:[%s246_s1] sm:$0xff]  }
   0x4   :  { %v14_v9 = vld [vmem:[%s247_s0] sm:$0xf] }
   0x6   :  { %164 = vmatpush3.bf16.msra.mxu0 %v184_v2 }
   0x7   :  { %165 = vmatprep.subr.bf16.mxu0 %v191_v0 }
   0xa   :  { %166 = vmatpush3.bf16.msra.mxu0 %v185_v3 }
   0xb   :  { %167 = vmatprep.subr.bf16.mxu0 %v191_v0 }
   0xe   :  { %168 = vmatpush3.bf16.msra.mxu0 %v186_v4 }
   0xf   :  { %169 = vmatprep.subr.bf16.mxu0 %v191_v0 }
  0x12   :  { %170 = vmatpush3.bf16.msra.mxu0 %v187_v5 }
  0x13   :  { %171 = vmatprep.subr.bf16.mxu0 %v191_v0 }
  0x16   :  { %172 = vmatpush3.bf16.msra.mxu0 %v188_v6 }
  0x17   :  { %173 = vmatprep.subr.bf16.mxu0 %v191_v0 }
  0x1a   :  { %174 = vmatpush3.bf16.msra.mxu0 %v189_v7 }
  0x1b   :  { %175 = vmatprep.subr.bf16.mxu0 %v191_v0 }
  0x1e   :  { %176 = vmatpush3.bf16.msra.mxu0 %v190_v8 }
  0x21   :  { %178 = vmatmul.mubr.bf16.vlgmr.msra.gmra.mxu0 %v14_v9 }
  0xe1   :  { %v113_v10 = vpop.f32.mrf.mxu0 }
  0xe2   :  { %119 = vst [vmem:[%s248_s2] sm:$0xff] %v113_v10  ;;  %v120_v11 = vrot.slane %v113_v10, 4  ;;  %v126_v12 = vmul.f32 %v113_v10, %v113_v10 }
  0xe3   :  { %v179_v13 = vpop.f32.mrf.mxu0 }
  0xe4   :  { %v121_v14 = vadd.f32 %v120_v11, %v113_v10  ;;  %v127_v15 = vrot.slane %v126_v12, 4 }
  0xe5   :  { %v116_v16 = vpop.f32.mrf.mxu0 }
  0xe6   :  { %v122_v17 = vrot.slane %v121_v14, 2  ;;  %v128_v18 = vadd.f32 %v127_v15, %v126_v12 }
  0xe7   :  { %v180_v19 = vpop.f32.mrf.mxu0 }
  0xe8   :  { %v123_v20 = vadd.f32 %v122_v17, %v121_v14  ;;  %v129_v21 = vrot.slane %v128_v18, 2 }
  0xea   :  { %v124_v22 = vrot.slane %v123_v20, 1  ;;  %v130_v23 = vadd.f32 %v129_v21, %v128_v18 }
  0xec   :  { %v131_v24 = vrot.slane %v130_v23, 1  ;;  %v125_v25 = vadd.f32 %v124_v22, %v123_v20 }
  0xee   :  { %v132_v26 = vadd.f32 %v131_v24, %v130_v23 }
  0xf0   :  { %v134_v27 = vsel %vm133_vm1, %v125_v25, %v132_v26 }
  0xf1   :  { %135 = vst [vmem:[%s249_s3] sm:$0x3] %v134_v27 }

// kernel: resnet_forward.25
= control target key start
LH: loop header
LB: loop body
LE: loop exit
PB: predicated region body
PF: predicated region fallthrough
CT: control target
= control target key end

     0   :  { %s6426_s12 = smov 0   ;;  %s7773_s0 = inlined_call_operand.vmem [shape: f32[2,6,6,128], index: 0, kind: input, shape index: {}]   ;;  %s7774_s1 = inlined_call_operand.vmem [shape: bf16[9,128,128], index: 1, kind: input, shape index: {}]   ;;  %s7775_s2 = inlined_call_operand.vmem [shape: f32[2,4,4,128], index: 2, kind: output, shape index: {0}]   ;;  %s7776_s3 = inlined_call_operand.vmem [shape: f32[2,2,128], index: 3, kind: output, shape index: {1}]  }
   0x1 LB: > { %s4205_s13 = sadd.s32 4294967295, %s6402_s12   ;;  %p4209_p0 = scmp.ge.s32.totalorder %s6402_s12, 1  ;;  %s6402_s12 = sphi %s6426_s12, %s14_s12  }
   0x2   : > { %p140_p1 = scmp.lt.s32.totalorder %s6402_s12, 3 }
   0x4   : > { %p141_p2 = pnand %p4209_p0, %p140_p1 }
   0x5   : > { %p168_p3 = scmp.lt.s32.totalorder (!%p141_p2), %s4205_s13, 1 }
   0x6   : > { %144 = sbr.rel (%p141_p2) target bundleno = 804 (0x324), region = 28 }
   0xb   : > { %v6108_v0 = vld [vmem:[%s7774_s1 + $0x78] sm:$0xff]   ;;  %v6404_v1 = vmov 0.0   ;;  %v6110_v3 = vld [vmem:[%s7774_s1 + $0x70] sm:$0xff]   ;;  %vm6405_vm0 = vmmov 0   ;;  %v6112_v5 = vld [vmem:[%s7774_s1 + $0x68] sm:$0xff]   ;;  %s7778_s13 = smov (!%p168_p3, %s4205_s13), 1 }
   0xc   : > { %5377 = vmatprep.subr.bf16.mxu0 %v6404_v1  ;;  %5397 = vmatprep.subr.bf16.mxu1 %v6404_v1  ;;  %v6109_v2 = vld [vmem:[%s7774_s1 + $0x38] sm:$0xff]   ;;  %v6111_v4 = vld [vmem:[%s7774_s1 + $0x30] sm:$0xff]   ;;  %v6113_v6 = vld [vmem:[%s7774_s1 + $0x28] sm:$0xff]   ;;  %s6097_s11 = smul.u32 48, %s7778_s13  ;;  %s5052_s6 = sshll.u32 %s7778_s13, 4  ;;  %vm1155_vm1 = vcmask 1043456  }
   0xd   : > { %5378 = vmatpush3.bf16.msra.mxu0 %v6108_v0  ;;  %5393 = vmatprep.mubr.msk.bf16.mxu0 %vm6405_vm0, %v6404_v1  ;;  %v6114_v7 = vld [vmem:[%s7774_s1 + $0x60] sm:$0xff]   ;;  %v6116_v9 = vld [vmem:[%s7774_s1 + $0x58] sm:$0xff]   ;;  %v6118_v11 = vld [vmem:[%s7774_s1 + $0x50] sm:$0xff]   ;;  %s7240_s15 = scalar_lea.vmem %s7775_s2, %s5052_s6  ;;  %vm4116_vm2 = vcmask 1040384  }
   0xe   : > { %5398 = vmatpush3.bf16.msra.mxu1 %v6109_v2  ;;  %5379 = vmatprep.subr.bf16.mxu0 %v6404_v1  ;;  %v6115_v8 = vld [vmem:[%s7774_s1 + $0x20] sm:$0xff]   ;;  %v6117_v10 = vld [vmem:[%s7774_s1 + $0x18] sm:$0xff]   ;;  %v6119_v12 = vld [vmem:[%s7774_s1 + $0x10] sm:$0xff]   ;;  %s6503_s20 = scalar_lea.vmem %s7773_s0, %s6097_s11 }
   0xf   : > { %5399 = vmatprep.subr.bf16.mxu1 %v6404_v1  ;;  %5413 = vmatprep.mubr.msk.bf16.mxu1 %vm6405_vm0, %v6404_v1  ;;  %v6120_v13 = vld [vmem:[%s7774_s1 + $0x48] sm:$0xff]   ;;  %v6122_v15 = vld [vmem:[%s7774_s1 + $0x40] sm:$0xff]   ;;  %v6124_v21 = vld [vmem:[%s7774_s1 + $0xb8] sm:$0xff]  }
  0x10   : > { %v6121_v14 = vld [vmem:[%s7774_s1 + $0x8] sm:$0xff]   ;;  %v6123_v16 = vld [vmem:[%s7774_s1] sm:$0xff]   ;;  %v6125_v22 = vld [vmem:[%s7774_s1 + $0xf8] sm:$0xff]  }
  0x11   : > { %5380 = vmatpush3.bf16.msra.mxu0 %v6110_v3  ;;  %v201_v17 = vld [vmem:[%s6503_s20 + $0x1] sm:$0xf]  ;;  %v6126_v23 = vld [vmem:[%s7774_s1 + $0xb0] sm:$0xff]   ;;  %v6128_v25 = vld [vmem:[%s7774_s1 + $0xa8] sm:$0xff]  }
  0x12   : > { %5400 = vmatpush3.bf16.msra.mxu1 %v6111_v4  ;;  %5381 = vmatprep.subr.bf16.mxu0 %v6404_v1  ;;  %v183_v18 = vld [vmem:[%s6503_s20] sm:$0xf]  ;;  %v202_v19 = vpack.c.bf16 %v201_v17, %v201_v17  ;;  %v6127_v24 = vld [vmem:[%s7774_s1 + $0xf0] sm:$0xff]   ;;  %v6129_v26 = vld [vmem:[%s7774_s1 + $0xe8] sm:$0xff]  }
  0x13   : > { %5401 = vmatprep.subr.bf16.mxu1 %v6404_v1  ;;  %v184_v20 = vpack.c.bf16 %v183_v18, %v183_v18  ;;  %v6130_v27 = vld [vmem:[%s7774_s1 + $0xa0] sm:$0xff]   ;;  %v6132_v29 = vld [vmem:[%s7774_s1 + $0x98] sm:$0xff]   ;;  %v6134_v31 = vld [vmem:[%s7774_s1 + $0x90] sm:$0xff]  }
  0x14   : > { %v6131_v28 = vld [vmem:[%s7774_s1 + $0xe0] sm:$0xff]   ;;  %v6133_v30 = vld [vmem:[%s7774_s1 + $0xd8] sm:$0xff]   ;;  %v6135_v32 = vld [vmem:[%s7774_s1 + $0xd0] sm:$0xff]  }
  0x15   : > { %5382 = vmatpush3.bf16.msra.mxu0 %v6112_v5  ;;  %v6136_v33 = vld [vmem:[%s7774_s1 + $0x88] sm:$0xff]   ;;  %v6138_v35 = vld [vmem:[%s7774_s1 + $0x80] sm:$0xff]   ;;  %v6140_v41 = vld [vmem:[%s7774_s1 + $0x138] sm:$0xff]  }
  0x16   : > { %5402 = vmatpush3.bf16.msra.mxu1 %v6113_v6  ;;  %5383 = vmatprep.subr.bf16.mxu0 %v6404_v1  ;;  %v6137_v34 = vld [vmem:[%s7774_s1 + $0xc8] sm:$0xff]   ;;  %v6139_v36 = vld [vmem:[%s7774_s1 + $0xc0] sm:$0xff]   ;;  %v6141_v42 = vld [vmem:[%s7774_s1 + $0x178] sm:$0xff]  }
  0x17   : > { %5403 = vmatprep.subr.bf16.mxu1 %v6404_v1  ;;  %v396_v37 = vld [vmem:[%s6503_s20 + $0x2] sm:$0xf]  ;;  %v4270_v38 = vld [vmem:[%s6503_s20 + $0x8] sm:$0xf]  ;;  %v6142_v43 = vld [vmem:[%s7774_s1 + $0x130] sm:$0xff]  }
  0x18   : > { %v397_v39 = vpack.c.bf16 %v396_v37, %v396_v37  ;;  %v506_v40 = vpack.c.bf16 %v4270_v38, %v4270_v38  ;;  %v6143_v44 = vld [vmem:[%s7774_s1 + $0x170] sm:$0xff]   ;;  %v6144_v45 = vld [vmem:[%s7774_s1 + $0x128] sm:$0xff]   ;;  %v6146_v47 = vld [vmem:[%s7774_s1 + $0x120] sm:$0xff]  }
  0x19   : > { %5384 = vmatpush3.bf16.msra.mxu0 %v6114_v7  ;;  %v6145_v46 = vld [vmem:[%s7774_s1 + $0x168] sm:$0xff]   ;;  %v6147_v48 = vld [vmem:[%s7774_s1 + $0x160] sm:$0xff]   ;;  %v6148_v49 = vld [vmem:[%s7774_s1 + $0x118] sm:$0xff]  }
  0x1a   : > { %5404 = vmatpush3.bf16.msra.mxu1 %v6115_v8  ;;  %5385 = vmatprep.subr.bf16.mxu0 %v6404_v1  ;;  %v6149_v50 = vld [vmem:[%s7774_s1 + $0x158] sm:$0xff]   ;;  %v6150_v51 = vld [vmem:[%s7774_s1 + $0x110] sm:$0xff]   ;;  %v6152_v53 = vld [vmem:[%s7774_s1 + $0x108] sm:$0xff]  }
  0x1b   : > { %5405 = vmatprep.subr.bf16.mxu1 %v6404_v1  ;;  %v6151_v52 = vld [vmem:[%s7774_s1 + $0x150] sm:$0xff]   ;;  %v6153_v54 = vld [vmem:[%s7774_s1 + $0x148] sm:$0xff]   ;;  %v6154_v55 = vld [vmem:[%s7774_s1 + $0x100] sm:$0xff]  }
  0x1c   : > { %v6155_v56 = vld [vmem:[%s7774_s1 + $0x140] sm:$0xff]   ;;  %v4295_v57 = vld [vmem:[%s6503_s20 + $0x9] sm:$0xf]  ;;  %v6156_v61 = vld [vmem:[%s7774_s1 + $0x1b8] sm:$0xff]  }
  0x1d   : > { %5386 = vmatpush3.bf16.msra.mxu0 %v6116_v9  ;;  %v4320_v58 = vld [vmem:[%s6503_s20 + $0xa] sm:$0xf]  ;;  %v614_v59 = vpack.c.bf16 %v4295_v57, %v4295_v57  ;;  %v6157_v62 = vld [vmem:[%s7774_s1 + $0x1f8] sm:$0xff]   ;;  %v6158_v63 = vld [vmem:[%s7774_s1 + $0x1b0] sm:$0xff]  }
  0x1e   : > { %5406 = vmatpush3.bf16.msra.mxu1 %v6117_v10  ;;  %5387 = vmatprep.subr.bf16.mxu0 %v6404_v1  ;;  %v722_v60 = vpack.c.bf16 %v4320_v58, %v4320_v58  ;;  %v6159_v0 = vld [vmem:[%s7774_s1 + $0x1f0] sm:$0xff]   ;;  %v6160_v2 = vld [vmem:[%s7774_s1 + $0x1a8] sm:$0xff]   ;;  %v6162_v4 = vld [vmem:[%s7774_s1 + $0x1a0] sm:$0xff]  }
  0x1f   : > { %5407 = vmatprep.subr.bf16.mxu1 %v6404_v1  ;;  %v6161_v3 = vld [vmem:[%s7774_s1 + $0x1e8] sm:$0xff]   ;;  %v6163_v5 = vld [vmem:[%s7774_s1 + $0x1e0] sm:$0xff]   ;;  %v6164_v6 = vld [vmem:[%s7774_s1 + $0x198] sm:$0xff]  }
  0x20   : > { %v6165_v7 = vld [vmem:[%s7774_s1 + $0x1d8] sm:$0xff]   ;;  %v6166_v8 = vld [vmem:[%s7774_s1 + $0x190] sm:$0xff]   ;;  %v6168_v10 = vld [vmem:[%s7774_s1 + $0x188] sm:$0xff]  }
  0x21   : > { %5388 = vmatpush3.bf16.msra.mxu0 %v6118_v11  ;;  %v6167_v9 = vld [vmem:[%s7774_s1 + $0x1d0] sm:$0xff]   ;;  %v6169_v11 = vld [vmem:[%s7774_s1 + $0x1c8] sm:$0xff]   ;;  %v6172_v18 = vld [vmem:[%s7774_s1 + $0x238] sm:$0xff]  }
  0x22   : > { %5408 = vmatpush3.bf16.msra.mxu1 %v6119_v12  ;;  %5389 = vmatprep.subr.bf16.mxu0 %v6404_v1  ;;  %v6170_v12 = vld [vmem:[%s7774_s1 + $0x180] sm:$0xff]   ;;  %v6188_v37 = vld [vmem:[%s7774_s1 + $0x38] sm:$0xff]  }
  0x23   : > { %5409 = vmatprep.subr.bf16.mxu1 %v6404_v1  ;;  %v6204_v57 = vld [vmem:[%s7774_s1 + $0xf8] sm:$0xff]  }
  0x25   : > { %5390 = vmatpush3.bf16.msra.mxu0 %v6120_v13  ;;  %v6171_v13 = vld [vmem:[%s7774_s1 + $0x1c0] sm:$0xff]  }
  0x26   : > { %5410 = vmatpush3.bf16.msra.mxu1 %v6121_v14  ;;  %5391 = vmatprep.subr.bf16.mxu0 %v6404_v1  ;;  %v4345_v14 = vld [vmem:[%s6503_s20 + $0x10] sm:$0xf] }
  0x27   : > { %5411 = vmatprep.subr.bf16.mxu1 %v6404_v1 }
  0x29   : > { %5392 = vmatpush3.bf16.msra.mxu0 %v6122_v15  ;;  %v4370_v15 = vld [vmem:[%s6503_s20 + $0x11] sm:$0xf] }
  0x2a   : > { %5412 = vmatpush3.bf16.msra.mxu1 %v6123_v16  ;;  %5417 = vmatprep.subr.bf16.mxu0 %v6404_v1  ;;  %v831_v16 = vpack.c.bf16 %v4345_v14, %v4345_v14  ;;  %v939_v17 = vpack.c.bf16 %v4370_v15, %v4370_v15  ;;  %v6220_v14 = vld [vmem:[%s7774_s1 + $0x178] sm:$0xff]  }
  0x2b   : > { %5437 = vmatprep.subr.bf16.mxu1 %v6404_v1 }
  0x2c   : > { %5394 = vmatmul.mubr.bf16.vlgmr.msra.gmra.mxu0 %v202_v19  ;;  %v6173_v19 = vld [vmem:[%s7774_s1 + $0x78] sm:$0xff]  }
  0x2d   : > { %5414 = vmatmul.mubr.bf16.vlgmr.msra.gmra.mxu1 %v184_v20  ;;  %5418 = vmatpush3.bf16.msra.mxu0 %v6124_v21  ;;  %v6174_v20 = vld [vmem:[%s7774_s1 + $0x230] sm:$0xff]  }
  0x2e   : > { %5438 = vmatpush3.bf16.msra.mxu1 %v6125_v22  ;;  %5419 = vmatprep.subr.bf16.mxu0 %v6404_v1  ;;  %v6175_v21 = vld [vmem:[%s7774_s1 + $0x70] sm:$0xff]   ;;  %v6176_v22 = vld [vmem:[%s7774_s1 + $0x228] sm:$0xff]  }
  0x2f   : > { %5439 = vmatprep.subr.bf16.mxu1 %v6404_v1  ;;  %5433 = vmatprep.mubr.msk.bf16.mxu0 %vm6405_vm0, %v6404_v1 }
  0x30   : > { %5453 = vmatprep.mubr.msk.bf16.mxu1 %vm6405_vm0, %v6404_v1 }
  0x31   : > { %5420 = vmatpush3.bf16.msra.mxu0 %v6126_v23  ;;  %v6177_v23 = vld [vmem:[%s7774_s1 + $0x68] sm:$0xff]  }
  0x32   : > { %5440 = vmatpush3.bf16.msra.mxu1 %v6127_v24  ;;  %5421 = vmatprep.subr.bf16.mxu0 %v6404_v1  ;;  %v6178_v24 = vld [vmem:[%s7774_s1 + $0x220] sm:$0xff]  }
  0x33   : > { %5441 = vmatprep.subr.bf16.mxu1 %v6404_v1 }
  0x35   : > { %5422 = vmatpush3.bf16.msra.mxu0 %v6128_v25  ;;  %v6179_v25 = vld [vmem:[%s7774_s1 + $0x60] sm:$0xff]  }
  0x36   : > { %5442 = vmatpush3.bf16.msra.mxu1 %v6129_v26  ;;  %5423 = vmatprep.subr.bf16.mxu0 %v6404_v1  ;;  %v6180_v26 = vld [vmem:[%s7774_s1 + $0x218] sm:$0xff]  }
  0x37   : > { %5443 = vmatprep.subr.bf16.mxu1 %v6404_v1 }
  0x39   : > { %5424 = vmatpush3.bf16.msra.mxu0 %v6130_v27  ;;  %v6181_v27 = vld [vmem:[%s7774_s1 + $0x58] sm:$0xff]  }
  0x3a   : > { %5444 = vmatpush3.bf16.msra.mxu1 %v6131_v28  ;;  %5425 = vmatprep.subr.bf16.mxu0 %v6404_v1  ;;  %v6182_v28 = vld [vmem:[%s7774_s1 + $0x210] sm:$0xff]  }
  0x3b   : > { %5445 = vmatprep.subr.bf16.mxu1 %v6404_v1 }
  0x3d   : > { %5426 = vmatpush3.bf16.msra.mxu0 %v6132_v29  ;;  %v6183_v29 = vld [vmem:[%s7774_s1 + $0x50] sm:$0xff]  }
  0x3e   : > { %5446 = vmatpush3.bf16.msra.mxu1 %v6133_v30  ;;  %5427 = vmatprep.subr.bf16.mxu0 %v6404_v1  ;;  %v6184_v30 = vld [vmem:[%s7774_s1 + $0x208] sm:$0xff]  }
  0x3f   : > { %5447 = vmatprep.subr.bf16.mxu1 %v6404_v1 }
  0x41   : > { %5428 = vmatpush3.bf16.msra.mxu0 %v6134_v31  ;;  %v6185_v31 = vld [vmem:[%s7774_s1 + $0x48] sm:$0xff]  }
  0x42   : > { %5448 = vmatpush3.bf16.msra.mxu1 %v6135_v32  ;;  %5429 = vmatprep.subr.bf16.mxu0 %v6404_v1  ;;  %v6186_v32 = vld [vmem:[%s7774_s1 + $0x200] sm:$0xff]  }
  0x43   : > { %5449 = vmatprep.subr.bf16.mxu1 %v6404_v1 }
  0x45   : > { %5430 = vmatpush3.bf16.msra.mxu0 %v6136_v33  ;;  %v4395_v33 = vld [vmem:[%s6503_s20 + $0x12] sm:$0xf] }
  0x46   : > { %5450 = vmatpush3.bf16.msra.mxu1 %v6137_v34  ;;  %5431 = vmatprep.subr.bf16.mxu0 %v6404_v1  ;;  %v6187_v34 = vld [vmem:[%s7774_s1 + $0x40] sm:$0xff]  }
  0x47   : > { %5451 = vmatprep.subr.bf16.mxu1 %v6404_v1 }
  0x49   : > { %5432 = vmatpush3.bf16.msra.mxu0 %v6138_v35  ;;  %v4421_v35 = vld [vmem:[%s6503_s20 + $0x9] sm:$0xf] }
  0x4a   : > { %5452 = vmatpush3.bf16.msra.mxu1 %v6139_v36  ;;  %5457 = vmatprep.subr.bf16.mxu0 %v6404_v1  ;;  %v1047_v36 = vpack.c.bf16 %v4395_v33, %v4395_v33  ;;  %v1192_v38 = vpack.c.bf16 %v4421_v35, %v4421_v35  ;;  %v6229_v33 = vld [vmem:[%s7774_s1 + $0x198] sm:$0xff]   ;;  %v6231_v35 = vld [vmem:[%s7774_s1 + $0x190] sm:$0xff]  }
  0x4b   : > { %5477 = vmatprep.subr.bf16.mxu1 %v6404_v1 }
  0x4c   : > { %5434 = vmatmul.mubr.bf16.vlgmr.msra.gmra.mxu0 %v397_v39  ;;  %v6189_v39 = vld [vmem:[%s7774_s1 + $0xb8] sm:$0xff]  }
  0x4d   : > { %5454 = vmatmul.mubr.bf16.vlgmr.msra.gmra.mxu1 %v506_v40  ;;  %5458 = vmatpush3.bf16.msra.mxu0 %v6140_v41  ;;  %v6190_v40 = vld [vmem:[%s7774_s1 + $0x30] sm:$0xff]  }
  0x4e   : > { %5478 = vmatpush3.bf16.msra.mxu1 %v6141_v42  ;;  %5459 = vmatprep.subr.bf16.mxu0 %v6404_v1  ;;  %v6191_v41 = vld [vmem:[%s7774_s1 + $0xb0] sm:$0xff]   ;;  %v6192_v42 = vld [vmem:[%s7774_s1 + $0x28] sm:$0xff]  }
  0x4f   : > { %5479 = vmatprep.subr.bf16.mxu1 %v6404_v1  ;;  %5473 = vmatprep.mubr.msk.bf16.mxu0 %vm6405_vm0, %v6404_v1 }
  0x50   : > { %5493 = vmatprep.mubr.msk.bf16.mxu1 %vm6405_vm0, %v6404_v1 }
  0x51   : > { %5460 = vmatpush3.bf16.msra.mxu0 %v6142_v43  ;;  %v6193_v43 = vld [vmem:[%s7774_s1 + $0xa8] sm:$0xff]  }
  0x52   : > { %5480 = vmatpush3.bf16.msra.mxu1 %v6143_v44  ;;  %5461 = vmatprep.subr.bf16.mxu0 %v6404_v1  ;;  %v6194_v44 = vld [vmem:[%s7774_s1 + $0x20] sm:$0xff]  }
  0x53   : > { %5481 = vmatprep.subr.bf16.mxu1 %v6404_v1 }
  0x55   : > { %5462 = vmatpush3.bf16.msra.mxu0 %v6144_v45  ;;  %v6195_v45 = vld [vmem:[%s7774_s1 + $0xa0] sm:$0xff]  }
  0x56   : > { %5482 = vmatpush3.bf16.msra.mxu1 %v6145_v46  ;;  %5463 = vmatprep.subr.bf16.mxu0 %v6404_v1  ;;  %v6196_v46 = vld [vmem:[%s7774_s1 + $0x18] sm:$0xff]  }
  0x57   : > { %5483 = vmatprep.subr.bf16.mxu1 %v6404_v1 }
  0x59   : > { %5464 = vmatpush3.bf16.msra.mxu0 %v6146_v47  ;;  %v6197_v47 = vld [vmem:[%s7774_s1 + $0x98] sm:$0xff]  }
  0x5a   : > { %5484 = vmatpush3.bf16.msra.mxu1 %v6147_v48  ;;  %5465 = vmatprep.subr.bf16.mxu0 %v6404_v1  ;;  %v6198_v48 = vld [vmem:[%s7774_s1 + $0x10] sm:$0xff]  }
  0x5b   : > { %5485 = vmatprep.subr.bf16.mxu1 %v6404_v1 }
  0x5d   : > { %5466 = vmatpush3.bf16.msra.mxu0 %v6148_v49  ;;  %v6199_v49 = vld [vmem:[%s7774_s1 + $0x90] sm:$0xff]  }
  0x5e   : > { %5486 = vmatpush3.bf16.msra.mxu1 %v6149_v50  ;;  %5467 = vmatprep.subr.bf16.mxu0 %v6404_v1  ;;  %v6200_v50 = vld [vmem:[%s7774_s1 + $0x8] sm:$0xff]  }
  0x5f   : > { %5487 = vmatprep.subr.bf16.mxu1 %v6404_v1 }
  0x61   : > { %5468 = vmatpush3.bf16.msra.mxu0 %v6150_v51  ;;  %v6201_v51 = vld [vmem:[%s7774_s1 + $0x88] sm:$0xff]  }
  0x62   : > { %5488 = vmatpush3.bf16.msra.mxu1 %v6151_v52  ;;  %5469 = vmatprep.subr.bf16.mxu0 %v6404_v1  ;;  %v6202_v52 = vld [vmem:[%s7774_s1] sm:$0xff]  }
  0x63   : > { %5489 = vmatprep.subr.bf16.mxu1 %v6404_v1 }
  0x65   : > { %5470 = vmatpush3.bf16.msra.mxu0 %v6152_v53  ;;  %v4420_v53 = vld [vmem:[%s6503_s20 + $0x8] sm:$0xf] }
  0x66   : > { %5490 = vmatpush3.bf16.msra.mxu1 %v6153_v54  ;;  %5471 = vmatprep.subr.bf16.mxu0 %v6404_v1  ;;  %v6203_v54 = vld [vmem:[%s7774_s1 + $0x80] sm:$0xff]  }
  0x67   : > { %5491 = vmatprep.subr.bf16.mxu1 %v6404_v1 }
  0x69   : > { %5472 = vmatpush3.bf16.msra.mxu0 %v6154_v55  ;;  %v4454_v55 = vld [vmem:[%s6503_s20 + $0xa] sm:$0xf] }
  0x6a   : > { %5492 = vmatpush3.bf16.msra.mxu1 %v6155_v56  ;;  %5497 = vmatprep.subr.bf16.mxu0 %v6404_v1  ;;  %v1174_v56 = vpack.c.bf16 %v4420_v53, %v4420_v53  ;;  %v1386_v58 = vpack.c.bf16 %v4454_v55, %v4454_v55  ;;  %v6240_v55 = vld [vmem:[%s7774_s1 + $0x1e8] sm:$0xff]  }
  0x6b   : > { %5517 = vmatprep.subr.bf16.mxu1 %v6404_v1 }
  0x6c   : > { %5474 = vmatmul.mubr.bf16.vlgmr.msra.gmra.mxu0 %v614_v59  ;;  %v6205_v59 = vld [vmem:[%s7774_s1 + $0x138] sm:$0xff]  }
  0x6d   : > { %5494 = vmatmul.mubr.bf16.vlgmr.msra.gmra.mxu1 %v722_v60  ;;  %5498 = vmatpush3.bf16.msra.mxu0 %v6156_v61  ;;  %v6206_v60 = vld [vmem:[%s7774_s1 + $0xf0] sm:$0xff]  }
  0x6e   : > { %5518 = vmatpush3.bf16.msra.mxu1 %v6157_v62  ;;  %5499 = vmatprep.subr.bf16.mxu0 %v6404_v1  ;;  %v6207_v61 = vld [vmem:[%s7774_s1 + $0x130] sm:$0xff]   ;;  %v6208_v62 = vld [vmem:[%s7774_s1 + $0xe8] sm:$0xff]  }
  0x6f   : > { %5519 = vmatprep.subr.bf16.mxu1 %v6404_v1  ;;  %5513 = vmatprep.mubr.msk.bf16.mxu0 %vm6405_vm0, %v6404_v1 }
  0x70   : > { %5533 = vmatprep.mubr.msk.bf16.mxu1 %vm6405_vm0, %v6404_v1 }
  0x71   : > { %5500 = vmatpush3.bf16.msra.mxu0 %v6158_v63  ;;  %v6209_v63 = vld [vmem:[%s7774_s1 + $0x128] sm:$0xff]  }
  0x72   : > { %5520 = vmatpush3.bf16.msra.mxu1 %v6159_v0  ;;  %5501 = vmatprep.subr.bf16.mxu0 %v6404_v1  ;;  %v6210_v0 = vld [vmem:[%s7774_s1 + $0xe0] sm:$0xff]  }
  0x73   : > { %5521 = vmatprep.subr.bf16.mxu1 %v6404_v1 }
  0x75   : > { %5502 = vmatpush3.bf16.msra.mxu0 %v6160_v2  ;;  %v6211_v2 = vld [vmem:[%s7774_s1 + $0x120] sm:$0xff]  }
  0x76   : > { %5522 = vmatpush3.bf16.msra.mxu1 %v6161_v3  ;;  %5503 = vmatprep.subr.bf16.mxu0 %v6404_v1  ;;  %v6212_v3 = vld [vmem:[%s7774_s1 + $0xd8] sm:$0xff]  }
  0x77   : > { %5523 = vmatprep.subr.bf16.mxu1 %v6404_v1 }
  0x79   : > { %5504 = vmatpush3.bf16.msra.mxu0 %v6162_v4  ;;  %v6213_v4 = vld [vmem:[%s7774_s1 + $0x118] sm:$0xff]  }
  0x7a   : > { %5524 = vmatpush3.bf16.msra.mxu1 %v6163_v5  ;;  %5505 = vmatprep.subr.bf16.mxu0 %v6404_v1  ;;  %v6214_v5 = vld [vmem:[%s7774_s1 + $0xd0] sm:$0xff]  }
  0x7b   : > { %5525 = vmatprep.subr.bf16.mxu1 %v6404_v1 }
  0x7d   : > { %5506 = vmatpush3.bf16.msra.mxu0 %v6164_v6  ;;  %v6215_v6 = vld [vmem:[%s7774_s1 + $0x110] sm:$0xff]  }
  0x7e   : > { %5526 = vmatpush3.bf16.msra.mxu1 %v6165_v7  ;;  %5507 = vmatprep.subr.bf16.mxu0 %v6404_v1  ;;  %v6216_v7 = vld [vmem:[%s7774_s1 + $0xc8] sm:$0xff]  }
  0x7f   : > { %5527 = vmatprep.subr.bf16.mxu1 %v6404_v1 }
  0x81   : > { %5508 = vmatpush3.bf16.msra.mxu0 %v6166_v8  ;;  %v6217_v8 = vld [vmem:[%s7774_s1 + $0x108] sm:$0xff]  }
  0x82   : > { %5528 = vmatpush3.bf16.msra.mxu1 %v6167_v9  ;;  %5509 = vmatprep.subr.bf16.mxu0 %v6404_v1  ;;  %v6218_v9 = vld [vmem:[%s7774_s1 + $0xc0] sm:$0xff]  }
  0x83   : > { %5529 = vmatprep.subr.bf16.mxu1 %v6404_v1 }
  0x85   : > { %5510 = vmatpush3.bf16.msra.mxu0 %v6168_v10  ;;  %v4479_v10 = vld [vmem:[%s6503_s20 + $0x10] sm:$0xf] }
  0x86   : > { %5530 = vmatpush3.bf16.msra.mxu1 %v6169_v11  ;;  %5511 = vmatprep.subr.bf16.mxu0 %v6404_v1  ;;  %v6219_v11 = vld [vmem:[%s7774_s1 + $0x100] sm:$0xff]  }
  0x87   : > { %5531 = vmatprep.subr.bf16.mxu1 %v6404_v1 }
  0x89   : > { %5512 = vmatpush3.bf16.msra.mxu0 %v6170_v12  ;;  %v4504_v12 = vld [vmem:[%s6503_s20 + $0x11] sm:$0xf] }
  0x8a   : > { %5532 = vmatpush3.bf16.msra.mxu1 %v6171_v13  ;;  %5537 = vmatprep.subr.bf16.mxu0 %v6404_v1  ;;  %v1493_v13 = vpack.c.bf16 %v4479_v10, %v4479_v10  ;;  %v1600_v15 = vpack.c.bf16 %v4504_v12, %v4504_v12  ;;  %v6253_v12 = vld [vmem:[%s7774_s1 + $0x38] sm:$0xff]  }
  0x8b   : > { %5557 = vmatprep.subr.bf16.mxu1 %v6404_v1 }
  0x8c   : > { %5514 = vmatmul.mubr.bf16.vlgmr.msra.gmra.mxu0 %v831_v16  ;;  %v6221_v16 = vld [vmem:[%s7774_s1 + $0x1b8] sm:$0xff]  }
  0x8d   : > { %5534 = vmatmul.mubr.bf16.vlgmr.msra.gmra.mxu1 %v939_v17  ;;  %5538 = vmatpush3.bf16.msra.mxu0 %v6172_v18  ;;  %v6222_v18 = vld [vmem:[%s7774_s1 + $0x170] sm:$0xff]  }
  0x8e   : > { %5558 = vmatpush3.bf16.msra.mxu1 %v6173_v19  ;;  %5539 = vmatprep.subr.bf16.mxu0 %v6404_v1  ;;  %v6223_v19 = vld [vmem:[%s7774_s1 + $0x1b0] sm:$0xff]  }
  0x8f   : > { %5559 = vmatprep.subr.bf16.mxu1 %v6404_v1  ;;  %5553 = vmatprep.mubr.msk.bf16.mxu0 %vm6405_vm0, %v6404_v1 }
  0x90   : > { %5573 = vmatprep.mubr.msk.bf16.mxu1 %vm6405_vm0, %v6404_v1 }
  0x91   : > { %5540 = vmatpush3.bf16.msra.mxu0 %v6174_v20 }
  0x92   : > { %5560 = vmatpush3.bf16.msra.mxu1 %v6175_v21  ;;  %5541 = vmatprep.subr.bf16.mxu0 %v6404_v1 }
  0x93   : > { %5561 = vmatprep.subr.bf16.mxu1 %v6404_v1 }
  0x95   : > { %5542 = vmatpush3.bf16.msra.mxu0 %v6176_v22 }
  0x96   : > { %5562 = vmatpush3.bf16.msra.mxu1 %v6177_v23  ;;  %5543 = vmatprep.subr.bf16.mxu0 %v6404_v1 }
  0x97   : > { %5563 = vmatprep.subr.bf16.mxu1 %v6404_v1 }
  0x99   : > { %5544 = vmatpush3.bf16.msra.mxu0 %v6178_v24 }
  0x9a   : > { %5564 = vmatpush3.bf16.msra.mxu1 %v6179_v25  ;;  %5545 = vmatprep.subr.bf16.mxu0 %v6404_v1  ;;  %v6224_v25 = vld [vmem:[%s7774_s1 + $0x168] sm:$0xff]  }
  0x9b   : > { %5565 = vmatprep.subr.bf16.mxu1 %v6404_v1 }
  0x9d   : > { %5546 = vmatpush3.bf16.msra.mxu0 %v6180_v26  ;;  %v6225_v26 = vld [vmem:[%s7774_s1 + $0x1a8] sm:$0xff]  }
  0x9e   : > { %5566 = vmatpush3.bf16.msra.mxu1 %v6181_v27  ;;  %5547 = vmatprep.subr.bf16.mxu0 %v6404_v1 }
  0x9f   : > { %5567 = vmatprep.subr.bf16.mxu1 %v6404_v1 }
  0xa1   : > { %5548 = vmatpush3.bf16.msra.mxu0 %v6182_v28 }
  0xa2   : > { %5568 = vmatpush3.bf16.msra.mxu1 %v6183_v29  ;;  %5549 = vmatprep.subr.bf16.mxu0 %v6404_v1 }
  0xa3   : > { %5569 = vmatprep.subr.bf16.mxu1 %v6404_v1 }
  0xa5   : > { %5550 = vmatpush3.bf16.msra.mxu0 %v6184_v30  ;;  %v6226_v30 = vld [vmem:[%s7774_s1 + $0x160] sm:$0xff]  }
  0xa6   : > { %5570 = vmatpush3.bf16.msra.mxu1 %v6185_v31  ;;  %5551 = vmatprep.subr.bf16.mxu0 %v6404_v1  ;;  %v6227_v31 = vld [vmem:[%s7774_s1 + $0x1a0] sm:$0xff]  }
  0xa7   : > { %5571 = vmatprep.subr.bf16.mxu1 %v6404_v1 }
  0xa9   : > { %5552 = vmatpush3.bf16.msra.mxu0 %v6186_v32  ;;  %v6228_v32 = vld [vmem:[%s7774_s1 + $0x158] sm:$0xff]  }
  0xaa   : > { %5572 = vmatpush3.bf16.msra.mxu1 %v6187_v34  ;;  %5577 = vmatprep.subr.bf16.mxu0 %v6404_v1  ;;  %v6230_v34 = vld [vmem:[%s7774_s1 + $0x150] sm:$0xff]  }
  0xab   : > { %5597 = vmatprep.subr.bf16.mxu1 %v6404_v1 }
  0xac   : > { %5554 = vmatmul.mubr.bf16.vlgmr.msra.gmra.mxu0 %v1047_v36  ;;  %v6232_v36 = vld [vmem:[%s7774_s1 + $0x148] sm:$0xff]  }
  0xad   : > { %5574 = vmatmul.mubr.bf16.vlgmr.msra.gmra.mxu1 %v1192_v38  ;;  %5578 = vmatpush3.bf16.msra.mxu0 %v6188_v37  ;;  %v6233_v37 = vld [vmem:[%s7774_s1 + $0x188] sm:$0xff]   ;;  %v6234_v38 = vld [vmem:[%s7774_s1 + $0x140] sm:$0xff]  }
  0xae   : > { %5598 = vmatpush3.bf16.msra.mxu1 %v6189_v39  ;;  %5579 = vmatprep.subr.bf16.mxu0 %v6404_v1  ;;  %v4529_v39 = vld [vmem:[%s6503_s20 + $0x12] sm:$0xf] }
  0xaf   : > { %5599 = vmatprep.subr.bf16.mxu1 %v6404_v1  ;;  %5593 = vmatprep.mubr.msk.bf16.mxu0 %vm6405_vm0, %v6404_v1 }
  0xb0   : > { %5613 = vmatprep.mubr.msk.bf16.mxu1 %vm6405_vm0, %v6404_v1 }
  0xb1   : > { %5580 = vmatpush3.bf16.msra.mxu0 %v6190_v40  ;;  %v6235_v40 = vld [vmem:[%s7774_s1 + $0x180] sm:$0xff]  }
  0xb2   : > { %5600 = vmatpush3.bf16.msra.mxu1 %v6191_v41  ;;  %5581 = vmatprep.subr.bf16.mxu0 %v6404_v1  ;;  %v4554_v41 = vld [vmem:[%s6503_s20 + $0x18] sm:$0xf] }
  0xb3   : > { %5601 = vmatprep.subr.bf16.mxu1 %v6404_v1 }
  0xb5   : > { %5582 = vmatpush3.bf16.msra.mxu0 %v6192_v42  ;;  %v1707_v42 = vpack.c.bf16 %v4529_v39, %v4529_v39  ;;  %v6268_v39 = vld [vmem:[%s7774_s1 + $0xb8] sm:$0xff]  }
  0xb6   : > { %5602 = vmatpush3.bf16.msra.mxu1 %v6193_v43  ;;  %5583 = vmatprep.subr.bf16.mxu0 %v6404_v1  ;;  %v6236_v43 = vld [vmem:[%s7774_s1 + $0x1f8] sm:$0xff]  }
  0xb7   : > { %5603 = vmatprep.subr.bf16.mxu1 %v6404_v1 }
  0xb9   : > { %5584 = vmatpush3.bf16.msra.mxu0 %v6194_v44  ;;  %v1815_v44 = vpack.c.bf16 %v4554_v41, %v4554_v41 }
  0xba   : > { %5604 = vmatpush3.bf16.msra.mxu1 %v6195_v45  ;;  %5585 = vmatprep.subr.bf16.mxu0 %v6404_v1  ;;  %v6237_v45 = vld [vmem:[%s7774_s1 + $0x238] sm:$0xff]  }
  0xbb   : > { %5605 = vmatprep.subr.bf16.mxu1 %v6404_v1 }
  0xbd   : > { %5586 = vmatpush3.bf16.msra.mxu0 %v6196_v46 }
  0xbe   : > { %5606 = vmatpush3.bf16.msra.mxu1 %v6197_v47  ;;  %5587 = vmatprep.subr.bf16.mxu0 %v6404_v1  ;;  %v6238_v47 = vld [vmem:[%s7774_s1 + $0x1f0] sm:$0xff]  }
  0xbf   : > { %5607 = vmatprep.subr.bf16.mxu1 %v6404_v1 }
  0xc1   : > { %5588 = vmatpush3.bf16.msra.mxu0 %v6198_v48  ;;  %v6239_v48 = vld [vmem:[%s7774_s1 + $0x230] sm:$0xff]  }
  0xc2   : > { %5608 = vmatpush3.bf16.msra.mxu1 %v6199_v49  ;;  %5589 = vmatprep.subr.bf16.mxu0 %v6404_v1 }
  0xc3   : > { %5609 = vmatprep.subr.bf16.mxu1 %v6404_v1 }
  0xc5   : > { %5590 = vmatpush3.bf16.msra.mxu0 %v6200_v50 }
  0xc6   : > { %5610 = vmatpush3.bf16.msra.mxu1 %v6201_v51  ;;  %5591 = vmatprep.subr.bf16.mxu0 %v6404_v1 }
  0xc7   : > { %5611 = vmatprep.subr.bf16.mxu1 %v6404_v1 }
  0xc9   : > { %5592 = vmatpush3.bf16.msra.mxu0 %v6202_v52 }
  0xca   : > { %5612 = vmatpush3.bf16.msra.mxu1 %v6203_v54  ;;  %5617 = vmatprep.subr.bf16.mxu0 %v6404_v1 }
  0xcb   : > { %5637 = vmatprep.subr.bf16.mxu1 %v6404_v1 }
  0xcc   : > { %5594 = vmatmul.mubr.bf16.vlgmr.msra.gmra.mxu0 %v1174_v56  ;;  %v6241_v56 = vld [vmem:[%s7774_s1 + $0x228] sm:$0xff]  }
  0xcd   : > { %5614 = vmatmul.mubr.bf16.vlgmr.msra.gmra.mxu1 %v1386_v58  ;;  %5618 = vmatpush3.bf16.msra.mxu0 %v6204_v57 }
  0xce   : > { %5638 = vmatpush3.bf16.msra.mxu1 %v6205_v59  ;;  %5619 = vmatprep.subr.bf16.mxu0 %v6404_v1 }
  0xcf   : > { %5639 = vmatprep.subr.bf16.mxu1 %v6404_v1  ;;  %5633 = vmatprep.mubr.msk.bf16.mxu0 %vm6405_vm0, %v6404_v1 }
  0xd0   : > { %5653 = vmatprep.mubr.msk.bf16.mxu1 %vm6405_vm0, %v6404_v1 }
  0xd1   : > { %5620 = vmatpush3.bf16.msra.mxu0 %v6206_v60  ;;  %v6242_v60 = vld [vmem:[%s7774_s1 + $0x1e0] sm:$0xff]  }
  0xd2   : > { %5640 = vmatpush3.bf16.msra.mxu1 %v6207_v61  ;;  %5621 = vmatprep.subr.bf16.mxu0 %v6404_v1  ;;  %v6243_v61 = vld [vmem:[%s7774_s1 + $0x220] sm:$0xff]  }
  0xd3   : > { %5641 = vmatprep.subr.bf16.mxu1 %v6404_v1 }
  0xd5   : > { %5622 = vmatpush3.bf16.msra.mxu0 %v6208_v62  ;;  %v6244_v62 = vld [vmem:[%s7774_s1 + $0x1d8] sm:$0xff]  }
  0xd6   : > { %5642 = vmatpush3.bf16.msra.mxu1 %v6209_v63  ;;  %5623 = vmatprep.subr.bf16.mxu0 %v6404_v1  ;;  %v6245_v63 = vld [vmem:[%s7774_s1 + $0x218] sm:$0xff]  }
  0xd7   : > { %5643 = vmatprep.subr.bf16.mxu1 %v6404_v1 }
  0xd9   : > { %5624 = vmatpush3.bf16.msra.mxu0 %v6210_v0  ;;  %v6246_v0 = vld [vmem:[%s7774_s1 + $0x1d0] sm:$0xff]  }
  0xda   : > { %5644 = vmatpush3.bf16.msra.mxu1 %v6211_v2  ;;  %5625 = vmatprep.subr.bf16.mxu0 %v6404_v1  ;;  %v6247_v2 = vld [vmem:[%s7774_s1 + $0x210] sm:$0xff]  }
  0xdb   : > { %5645 = vmatprep.subr.bf16.mxu1 %v6404_v1 }
  0xdd   : > { %5626 = vmatpush3.bf16.msra.mxu0 %v6212_v3  ;;  %v6248_v3 = vld [vmem:[%s7774_s1 + $0x1c8] sm:$0xff]  }
  0xde   : > { %5646 = vmatpush3.bf16.msra.mxu1 %v6213_v4  ;;  %5627 = vmatprep.subr.bf16.mxu0 %v6404_v1  ;;  %v6249_v4 = vld [vmem:[%s7774_s1 + $0x208] sm:$0xff]  }
  0xdf   : > { %5647 = vmatprep.subr.bf16.mxu1 %v6404_v1 }
  0xe1   : > { %5628 = vmatpush3.bf16.msra.mxu0 %v6214_v5  ;;  %v6250_v5 = vld [vmem:[%s7774_s1 + $0x1c0] sm:$0xff]  }
  0xe2   : > { %5648 = vmatpush3.bf16.msra.mxu1 %v6215_v6  ;;  %5629 = vmatprep.subr.bf16.mxu0 %v6404_v1  ;;  %v4579_v6 = vld [vmem:[%s6503_s20 + $0x19] sm:$0xf] }
  0xe3   : > { %5649 = vmatprep.subr.bf16.mxu1 %v6404_v1 }
  0xe5   : > { %5630 = vmatpush3.bf16.msra.mxu0 %v6216_v7  ;;  %v6251_v7 = vld [vmem:[%s7774_s1 + $0x200] sm:$0xff]  }
  0xe6   : > { %5650 = vmatpush3.bf16.msra.mxu1 %v6217_v8  ;;  %5631 = vmatprep.subr.bf16.mxu0 %v6404_v1  ;;  %v4604_v8 = vld [vmem:[%s6503_s20 + $0x1a] sm:$0xf] }
  0xe7   : > { %5651 = vmatprep.subr.bf16.mxu1 %v6404_v1  ;;  %v2029_v10 = vpack.c.bf16 %v4604_v8, %v4604_v8  ;;  %v6285_v8 = vld [vmem:[%s7774_s1 + $0x178] sm:$0xff]  }
  0xe9   : > { %5632 = vmatpush3.bf16.msra.mxu0 %v6218_v9  ;;  %v1922_v9 = vpack.c.bf16 %v4579_v6, %v4579_v6 }
  0xea   : > { %5652 = vmatpush3.bf16.msra.mxu1 %v6219_v11  ;;  %5657 = vmatprep.subr.bf16.mxu0 %v6404_v1  ;;  %v6252_v11 = vld [vmem:[%s7774_s1 + $0x78] sm:$0xff]  }
  0xeb   : > { %5677 = vmatprep.subr.bf16.mxu1 %v6404_v1 }
  0xec   : > { %v302_v17 = vpop.f32.mrf.mxu0  ;;  %5634 = vmatmul.mubr.bf16.vlgmr.msra.gmra.mxu0 %v1493_v13 }
  0xed   : > { %v390_v20 = vpop.f32.mrf.mxu1  ;;  %5654 = vmatmul.mubr.bf16.vlgmr.msra.gmra.mxu1 %v1600_v15  ;;  %5658 = vmatpush3.bf16.msra.mxu0 %v6220_v14  ;;  %v6254_v15 = vld [vmem:[%s7774_s1 + $0x70] sm:$0xff]  }
  0xee   : > { %v391_v21 = vadd.f32 %v390_v20, %v302_v17  ;;  %5678 = vmatpush3.bf16.msra.mxu1 %v6221_v16  ;;  %v5395_v22 = vpop.f32.mrf.mxu0  ;;  %5659 = vmatprep.subr.bf16.mxu0 %v6404_v1  ;;  %v6255_v17 = vld [vmem:[%s7774_s1 + $0x30] sm:$0xff]  }
  0xef   : > { %v5415_v23 = vpop.f32.mrf.mxu1  ;;  %5679 = vmatprep.subr.bf16.mxu1 %v6404_v1  ;;  %5673 = vmatprep.mubr.msk.bf16.mxu0 %vm6405_vm0, %v6404_v1 }
  0xf0   : > { %v305_v24 = vpop.f32.mrf.mxu0  ;;  %5693 = vmatprep.mubr.msk.bf16.mxu1 %vm6405_vm0, %v6404_v1  ;;  %v6257_v23 = vld [vmem:[%s7774_s1 + $0x28] sm:$0xff]  }
  0xf1   : > { %v393_v27 = vpop.f32.mrf.mxu1  ;;  %5660 = vmatpush3.bf16.msra.mxu0 %v6222_v18 }
  0xf2   : > { %5680 = vmatpush3.bf16.msra.mxu1 %v6223_v19  ;;  %v5396_v28 = vpop.f32.mrf.mxu0  ;;  %5661 = vmatprep.subr.bf16.mxu0 %v6404_v1  ;;  %v6260_v27 = vld [vmem:[%s7774_s1 + $0x58] sm:$0xff]  }
  0xf3   : > { %v5416_v29 = vpop.f32.mrf.mxu1  ;;  %5681 = vmatprep.subr.bf16.mxu1 %v6404_v1  ;;  %v6261_v28 = vld [vmem:[%s7774_s1 + $0x18] sm:$0xff]  }
  0xf4   : > { %v6262_v29 = vld [vmem:[%s7774_s1 + $0x50] sm:$0xff]  }
  0xf5   : > { %5662 = vmatpush3.bf16.msra.mxu0 %v6224_v25  ;;  %v6258_v25 = vld [vmem:[%s7774_s1 + $0x60] sm:$0xff]  }
  0xf6   : > { %5682 = vmatpush3.bf16.msra.mxu1 %v6225_v26  ;;  %5663 = vmatprep.subr.bf16.mxu0 %v6404_v1  ;;  %v6259_v26 = vld [vmem:[%s7774_s1 + $0x20] sm:$0xff]  }
  0xf7   : > { %5683 = vmatprep.subr.bf16.mxu1 %v6404_v1 }
  0xf9   : > { %5664 = vmatpush3.bf16.msra.mxu0 %v6226_v30  ;;  %v6263_v30 = vld [vmem:[%s7774_s1 + $0x10] sm:$0xff]  }
  0xfa   : > { %5684 = vmatpush3.bf16.msra.mxu1 %v6227_v31  ;;  %5665 = vmatprep.subr.bf16.mxu0 %v6404_v1  ;;  %v6264_v31 = vld [vmem:[%s7774_s1 + $0x48] sm:$0xff]  }
  0xfb   : > { %5685 = vmatprep.subr.bf16.mxu1 %v6404_v1 }
  0xfd   : > { %5666 = vmatpush3.bf16.msra.mxu0 %v6228_v32  ;;  %v6265_v32 = vld [vmem:[%s7774_s1 + $0x8] sm:$0xff]  }
  0xfe   : > { %5686 = vmatpush3.bf16.msra.mxu1 %v6229_v33  ;;  %5667 = vmatprep.subr.bf16.mxu0 %v6404_v1  ;;  %v6266_v33 = vld [vmem:[%s7774_s1 + $0x40] sm:$0xff]  }
  0xff   : > { %5687 = vmatprep.subr.bf16.mxu1 %v6404_v1 }
 0x101   : > { %5668 = vmatpush3.bf16.msra.mxu0 %v6230_v34  ;;  %v4631_v34 = vld [vmem:[%s6503_s20 + $0x11] sm:$0xf] }
 0x102   : > { %5688 = vmatpush3.bf16.msra.mxu1 %v6231_v35  ;;  %5669 = vmatprep.subr.bf16.mxu0 %v6404_v1  ;;  %v6267_v35 = vld [vmem:[%s7774_s1] sm:$0xff]  }
 0x103   : > { %5689 = vmatprep.subr.bf16.mxu1 %v6404_v1 }
 0x105   : > { %5670 = vmatpush3.bf16.msra.mxu0 %v6232_v36  ;;  %v4630_v36 = vld [vmem:[%s6503_s20 + $0x10] sm:$0xf] }
 0x106   : > { %5690 = vmatpush3.bf16.msra.mxu1 %v6233_v37  ;;  %5671 = vmatprep.subr.bf16.mxu0 %v6404_v1  ;;  %v2173_v37 = vpack.c.bf16 %v4631_v34, %v4631_v34  ;;  %v4739_v34 = vld [vmem:[%s6503_s20 + $0x1a] sm:$0xf] }
 0x107   : > { %5691 = vmatprep.subr.bf16.mxu1 %v6404_v1 }
 0x109   : > { %5672 = vmatpush3.bf16.msra.mxu0 %v6234_v38  ;;  %v2155_v38 = vpack.c.bf16 %v4630_v36, %v4630_v36  ;;  %v2688_v36 = vpack.c.bf16 %v4739_v34, %v4739_v34  ;;  %v6333_v34 = vld [vmem:[%s7774_s1 + $0xb8] sm:$0xff]  }
 0x10a   : > { %5692 = vmatpush3.bf16.msra.mxu1 %v6235_v40  ;;  %5697 = vmatprep.subr.bf16.mxu0 %v6404_v1  ;;  %v6269_v40 = vld [vmem:[%s7774_s1 + $0xf8] sm:$0xff]  }
 0x10b   : > { %5717 = vmatprep.subr.bf16.mxu1 %v6404_v1 }
 0x10c   : > { %v497_v46 = vpop.f32.mrf.mxu0  ;;  %5674 = vmatmul.mubr.bf16.vlgmr.msra.gmra.mxu0 %v1707_v42 }
 0x10d   : > { %v503_v49 = vadd.f32 %v497_v46, %v391_v21  ;;  %v606_v50 = vpop.f32.mrf.mxu1  ;;  %5694 = vmatmul.mubr.bf16.vlgmr.msra.gmra.mxu1 %v1815_v44  ;;  %5698 = vmatpush3.bf16.msra.mxu0 %v6236_v43  ;;  %v6256_v21 = vld [vmem:[%s7774_s1 + $0x68] sm:$0xff]   ;;  %v6270_v43 = vld [vmem:[%s7774_s1 + $0xb0] sm:$0xff]  }
 0x10e   : > { %5718 = vmatpush3.bf16.msra.mxu1 %v6237_v45  ;;  %v5435_v51 = vpop.f32.mrf.mxu0  ;;  %5699 = vmatprep.subr.bf16.mxu0 %v6404_v1  ;;  %v6271_v45 = vld [vmem:[%s7774_s1 + $0xf0] sm:$0xff]  }
 0x10f   : > { %v7021_v52 = vadd.f32 %v606_v50, %v503_v49  ;;  %v5455_v53 = vpop.f32.mrf.mxu1  ;;  %5719 = vmatprep.subr.bf16.mxu1 %v6404_v1  ;;  %5713 = vmatprep.mubr.msk.bf16.mxu0 %vm6405_vm0, %v6404_v1  ;;  %v6272_v49 = vld [vmem:[%s7774_s1 + $0xa8] sm:$0xff]  }
 0x110   : > { %v500_v54 = vpop.f32.mrf.mxu0  ;;  %5733 = vmatprep.mubr.msk.bf16.mxu1 %vm6405_vm0, %v6404_v1  ;;  %v6273_v51 = vld [vmem:[%s7774_s1 + $0xe8] sm:$0xff]  }
 0x111   : > { %v609_v57 = vpop.f32.mrf.mxu1  ;;  %5700 = vmatpush3.bf16.msra.mxu0 %v6238_v47  ;;  %v6274_v54 = vld [vmem:[%s7774_s1 + $0xa0] sm:$0xff]  }
 0x112   : > { %5720 = vmatpush3.bf16.msra.mxu1 %v6239_v48  ;;  %v5436_v58 = vpop.f32.mrf.mxu0  ;;  %5701 = vmatprep.subr.bf16.mxu0 %v6404_v1  ;;  %v6277_v57 = vld [vmem:[%s7774_s1 + $0xd8] sm:$0xff]  }
 0x113   : > { %v5456_v59 = vpop.f32.mrf.mxu1  ;;  %5721 = vmatprep.subr.bf16.mxu1 %v6404_v1  ;;  %v6278_v58 = vld [vmem:[%s7774_s1 + $0x90] sm:$0xff]  }
 0x114   : > { %v6279_v59 = vld [vmem:[%s7774_s1 + $0xd0] sm:$0xff]  }
 0x115   : > { %5702 = vmatpush3.bf16.msra.mxu0 %v6240_v55  ;;  %v6275_v55 = vld [vmem:[%s7774_s1 + $0xe0] sm:$0xff]  }
 0x116   : > { %5722 = vmatpush3.bf16.msra.mxu1 %v6241_v56  ;;  %5703 = vmatprep.subr.bf16.mxu0 %v6404_v1  ;;  %v6276_v56 = vld [vmem:[%s7774_s1 + $0x98] sm:$0xff]  }
 0x117   : > { %5723 = vmatprep.subr.bf16.mxu1 %v6404_v1 }
 0x119   : > { %5704 = vmatpush3.bf16.msra.mxu0 %v6242_v60 }
 0x11a   : > { %5724 = vmatpush3.bf16.msra.mxu1 %v6243_v61  ;;  %5705 = vmatprep.subr.bf16.mxu0 %v6404_v1  ;;  %v6280_v61 = vld [vmem:[%s7774_s1 + $0x88] sm:$0xff]  }
 0x11b   : > { %5725 = vmatprep.subr.bf16.mxu1 %v6404_v1 }
 0x11d   : > { %5706 = vmatpush3.bf16.msra.mxu0 %v6244_v62  ;;  %v6281_v62 = vld [vmem:[%s7774_s1 + $0xc8] sm:$0xff]  }
 0x11e   : > { %5726 = vmatpush3.bf16.msra.mxu1 %v6245_v63  ;;  %5707 = vmatprep.subr.bf16.mxu0 %v6404_v1 }
 0x11f   : > { %5727 = vmatprep.subr.bf16.mxu1 %v6404_v1 }
 0x121   : > { %5708 = vmatpush3.bf16.msra.mxu0 %v6246_v0  ;;  %v4664_v0 = vld [vmem:[%s6503_s20 + $0x12] sm:$0xf] }
 0x122   : > { %5728 = vmatpush3.bf16.msra.mxu1 %v6247_v2  ;;  %5709 = vmatprep.subr.bf16.mxu0 %v6404_v1  ;;  %v6283_v2 = vld [vmem:[%s7774_s1 + $0xc0] sm:$0xff]  }
 0x123   : > { %5729 = vmatprep.subr.bf16.mxu1 %v6404_v1 }
 0x125   : > { %5710 = vmatpush3.bf16.msra.mxu0 %v6248_v3  ;;  %v4689_v3 = vld [vmem:[%s6503_s20 + $0x18] sm:$0xf] }
 0x126   : > { %5730 = vmatpush3.bf16.msra.mxu1 %v6249_v4  ;;  %5711 = vmatprep.subr.bf16.mxu0 %v6404_v1  ;;  %v2474_v6 = vpack.c.bf16 %v4689_v3, %v4689_v3 }
 0x127   : > { %5731 = vmatprep.subr.bf16.mxu1 %v6404_v1 }
 0x129   : > { %5712 = vmatpush3.bf16.msra.mxu0 %v6250_v5  ;;  %v2367_v5 = vpack.c.bf16 %v4664_v0, %v4664_v0  ;;  %v4789_v0 = vld [vmem:[%s6503_s20 + $0x21] sm:$0xf] }
 0x12a   : > { %5732 = vmatpush3.bf16.msra.mxu1 %v6251_v7  ;;  %5737 = vmatprep.subr.bf16.mxu0 %v6404_v1  ;;  %v6284_v7 = vld [vmem:[%s7774_s1 + $0x138] sm:$0xff]   ;;  %v2903_v3 = vpack.c.bf16 %v4789_v0, %v4789_v0 }
 0x12b   : > { %5757 = vmatprep.subr.bf16.mxu1 %v6404_v1 }
 0x12c   : > { %v7086_v13 = vpop.f32.mrf.mxu0  ;;  %5714 = vmatmul.mubr.bf16.vlgmr.msra.gmra.mxu0 %v1922_v9 }
 0x12d   : > { %v7088_v14 = vpop.f32.mrf.mxu1  ;;  %5734 = vmatmul.mubr.bf16.vlgmr.msra.gmra.mxu1 %v2029_v10  ;;  %5738 = vmatpush3.bf16.msra.mxu0 %v6252_v11  ;;  %v720_v60 = vadd.f32 %v7086_v13, %v7021_v52  ;;  %v6282_v52 = vld [vmem:[%s7774_s1 + $0x80] sm:$0xff]   ;;  %v6286_v13 = vld [vmem:[%s7774_s1 + $0x130] sm:$0xff]  }
 0x12e   : > { %5758 = vmatpush3.bf16.msra.mxu1 %v6253_v12  ;;  %v5475_v16 = vpop.f32.mrf.mxu0  ;;  %5739 = vmatprep.subr.bf16.mxu0 %v6404_v1 }
 0x12f   : > { %v5495_v18 = vpop.f32.mrf.mxu1  ;;  %5759 = vmatprep.subr.bf16.mxu1 %v6404_v1  ;;  %5753 = vmatprep.mubr.msk.bf16.mxu0 %vm6405_vm0, %v6404_v1  ;;  %v828_v63 = vadd.f32 %v7088_v14, %v720_v60  ;;  %v6312_v60 = vld [vmem:[%s7774_s1 + $0x188] sm:$0xff]  }
 0x130   : > { %v717_v19 = vpop.f32.mrf.mxu0  ;;  %5773 = vmatprep.mubr.msk.bf16.mxu1 %vm6405_vm0, %v6404_v1 }
 0x131   : > { %v825_v20 = vpop.f32.mrf.mxu1  ;;  %5740 = vmatpush3.bf16.msra.mxu0 %v6254_v15  ;;  %v6287_v15 = vld [vmem:[%s7774_s1 + $0x170] sm:$0xff]   ;;  %v6288_v19 = vld [vmem:[%s7774_s1 + $0x128] sm:$0xff]  }
 0x132   : > { %5760 = vmatpush3.bf16.msra.mxu1 %v6255_v17  ;;  %v5476_v22 = vpop.f32.mrf.mxu0  ;;  %5741 = vmatprep.subr.bf16.mxu0 %v6404_v1 }
 0x133   : > { %v5496_v24 = vpop.f32.mrf.mxu1  ;;  %5761 = vmatprep.subr.bf16.mxu1 %v6404_v1 }
 0x134   : > { %v6291_v24 = vld [vmem:[%s7774_s1 + $0x160] sm:$0xff]  }
 0x135   : > { %5742 = vmatpush3.bf16.msra.mxu0 %v6256_v21  ;;  %v6289_v21 = vld [vmem:[%s7774_s1 + $0x168] sm:$0xff]  }
 0x136   : > { %5762 = vmatpush3.bf16.msra.mxu1 %v6257_v23  ;;  %5743 = vmatprep.subr.bf16.mxu0 %v6404_v1  ;;  %v6290_v23 = vld [vmem:[%s7774_s1 + $0x120] sm:$0xff]  }
 0x137   : > { %5763 = vmatprep.subr.bf16.mxu1 %v6404_v1 }
 0x139   : > { %5744 = vmatpush3.bf16.msra.mxu0 %v6258_v25  ;;  %v6292_v25 = vld [vmem:[%s7774_s1 + $0x118] sm:$0xff]  }
 0x13a   : > { %5764 = vmatpush3.bf16.msra.mxu1 %v6259_v26  ;;  %5745 = vmatprep.subr.bf16.mxu0 %v6404_v1  ;;  %v6293_v26 = vld [vmem:[%s7774_s1 + $0x158] sm:$0xff]  }
 0x13b   : > { %5765 = vmatprep.subr.bf16.mxu1 %v6404_v1 }
 0x13d   : > { %5746 = vmatpush3.bf16.msra.mxu0 %v6260_v27  ;;  %v6294_v27 = vld [vmem:[%s7774_s1 + $0x110] sm:$0xff]  }
 0x13e   : > { %5766 = vmatpush3.bf16.msra.mxu1 %v6261_v28  ;;  %5747 = vmatprep.subr.bf16.mxu0 %v6404_v1  ;;  %v6295_v28 = vld [vmem:[%s7774_s1 + $0x150] sm:$0xff]  }
 0x13f   : > { %5767 = vmatprep.subr.bf16.mxu1 %v6404_v1 }
 0x141   : > { %5748 = vmatpush3.bf16.msra.mxu0 %v6262_v29  ;;  %v6296_v29 = vld [vmem:[%s7774_s1 + $0x108] sm:$0xff]  }
 0x142   : > { %5768 = vmatpush3.bf16.msra.mxu1 %v6263_v30  ;;  %5749 = vmatprep.subr.bf16.mxu0 %v6404_v1  ;;  %v6297_v30 = vld [vmem:[%s7774_s1 + $0x148] sm:$0xff]  }
 0x143   : > { %5769 = vmatprep.subr.bf16.mxu1 %v6404_v1 }
 0x145   : > { %5750 = vmatpush3.bf16.msra.mxu0 %v6264_v31  ;;  %v6298_v31 = vld [vmem:[%s7774_s1 + $0x100] sm:$0xff]  }
 0x146   : > { %5770 = vmatpush3.bf16.msra.mxu1 %v6265_v32  ;;  %5751 = vmatprep.subr.bf16.mxu0 %v6404_v1  ;;  %v4714_v32 = vld [vmem:[%s6503_s20 + $0x19] sm:$0xf] }
 0x147   : > { %5771 = vmatprep.subr.bf16.mxu1 %v6404_v1 }
 0x149   : > { %5752 = vmatpush3.bf16.msra.mxu0 %v6266_v33  ;;  %v6299_v33 = vld [vmem:[%s7774_s1 + $0x140] sm:$0xff]  }
 0x14a   : > { %5772 = vmatpush3.bf16.msra.mxu1 %v6267_v35  ;;  %5777 = vmatprep.subr.bf16.mxu0 %v6404_v1  ;;  %v2581_v35 = vpack.c.bf16 %v4714_v32, %v4714_v32 }
 0x14b   : > { %5797 = vmatprep.subr.bf16.mxu1 %v6404_v1 }
 0x14c   : > { %v931_v41 = vpop.f32.mrf.mxu0  ;;  %5754 = vmatmul.mubr.bf16.vlgmr.msra.gmra.mxu0 %v2173_v37  ;;  %v6300_v37 = vld [vmem:[%s7774_s1 + $0x1b8] sm:$0xff]  }
 0x14d   : > { %v7160_v42 = vpop.f32.mrf.mxu1  ;;  %5774 = vmatmul.mubr.bf16.vlgmr.msra.gmra.mxu1 %v2155_v38  ;;  %5778 = vmatpush3.bf16.msra.mxu0 %v6268_v39  ;;  %v937_v4 = vadd.f32 %v931_v41, %v828_v63  ;;  %v6301_v38 = vld [vmem:[%s7774_s1 + $0x1f8] sm:$0xff]   ;;  %v4764_v63 = vld [vmem:[%s6503_s20 + $0x20] sm:$0xf] }
 0x14e   : > { %5798 = vmatpush3.bf16.msra.mxu1 %v6269_v40  ;;  %v5515_v44 = vpop.f32.mrf.mxu0  ;;  %5779 = vmatprep.subr.bf16.mxu0 %v6404_v1 }
 0x14f   : > { %v5535_v46 = vpop.f32.mrf.mxu1  ;;  %5799 = vmatprep.subr.bf16.mxu1 %v6404_v1  ;;  %5793 = vmatprep.mubr.msk.bf16.mxu0 %vm6405_vm0, %v6404_v1  ;;  %v1045_v9 = vadd.f32 %v7160_v42, %v937_v4  ;;  %v6302_v42 = vld [vmem:[%s7774_s1 + $0x1b0] sm:$0xff]   ;;  %v6316_v4 = vld [vmem:[%s7774_s1 + $0x238] sm:$0xff]  }
 0x150   : > { %v934_v47 = vpop.f32.mrf.mxu0  ;;  %5813 = vmatprep.mubr.msk.bf16.mxu1 %vm6405_vm0, %v6404_v1  ;;  %v6303_v44 = vld [vmem:[%s7774_s1 + $0x1f0] sm:$0xff]  }
 0x151   : > { %v1042_v48 = vpop.f32.mrf.mxu1  ;;  %5780 = vmatpush3.bf16.msra.mxu0 %v6270_v43 }
 0x152   : > { %5800 = vmatpush3.bf16.msra.mxu1 %v6271_v45  ;;  %v5516_v50 = vpop.f32.mrf.mxu0  ;;  %5781 = vmatprep.subr.bf16.mxu0 %v6404_v1 }
 0x153   : > { %v5536_v53 = vpop.f32.mrf.mxu1  ;;  %5801 = vmatprep.subr.bf16.mxu1 %v6404_v1 }
 0x155   : > { %5782 = vmatpush3.bf16.msra.mxu0 %v6272_v49  ;;  %v6304_v49 = vld [vmem:[%s7774_s1 + $0x1a8] sm:$0xff]  }
 0x156   : > { %5802 = vmatpush3.bf16.msra.mxu1 %v6273_v51  ;;  %5783 = vmatprep.subr.bf16.mxu0 %v6404_v1  ;;  %v6305_v51 = vld [vmem:[%s7774_s1 + $0x1e8] sm:$0xff]  }
 0x157   : > { %5803 = vmatprep.subr.bf16.mxu1 %v6404_v1 }
 0x159   : > { %5784 = vmatpush3.bf16.msra.mxu0 %v6274_v54  ;;  %v6306_v54 = vld [vmem:[%s7774_s1 + $0x1a0] sm:$0xff]  }
 0x15a   : > { %5804 = vmatpush3.bf16.msra.mxu1 %v6275_v55  ;;  %5785 = vmatprep.subr.bf16.mxu0 %v6404_v1  ;;  %v6307_v55 = vld [vmem:[%s7774_s1 + $0x1e0] sm:$0xff]  }
 0x15b   : > { %5805 = vmatprep.subr.bf16.mxu1 %v6404_v1 }
 0x15d   : > { %5786 = vmatpush3.bf16.msra.mxu0 %v6276_v56  ;;  %v6308_v56 = vld [vmem:[%s7774_s1 + $0x198] sm:$0xff]  }
 0x15e   : > { %5806 = vmatpush3.bf16.msra.mxu1 %v6277_v57  ;;  %5787 = vmatprep.subr.bf16.mxu0 %v6404_v1  ;;  %v6309_v57 = vld [vmem:[%s7774_s1 + $0x1d8] sm:$0xff]  }
 0x15f   : > { %5807 = vmatprep.subr.bf16.mxu1 %v6404_v1 }
 0x161   : > { %5788 = vmatpush3.bf16.msra.mxu0 %v6278_v58  ;;  %v6310_v58 = vld [vmem:[%s7774_s1 + $0x190] sm:$0xff]  }
 0x162   : > { %5808 = vmatpush3.bf16.msra.mxu1 %v6279_v59  ;;  %5789 = vmatprep.subr.bf16.mxu0 %v6404_v1  ;;  %v6311_v59 = vld [vmem:[%s7774_s1 + $0x1d0] sm:$0xff]  }
 0x163   : > { %5809 = vmatprep.subr.bf16.mxu1 %v6404_v1 }
 0x165   : > { %5790 = vmatpush3.bf16.msra.mxu0 %v6280_v61  ;;  %v6313_v61 = vld [vmem:[%s7774_s1 + $0x1c8] sm:$0xff]  }
 0x166   : > { %5810 = vmatpush3.bf16.msra.mxu1 %v6281_v62  ;;  %5791 = vmatprep.subr.bf16.mxu0 %v6404_v1  ;;  %v6314_v62 = vld [vmem:[%s7774_s1 + $0x180] sm:$0xff]  }
 0x167   : > { %5811 = vmatprep.subr.bf16.mxu1 %v6404_v1 }
 0x169   : > { %5792 = vmatpush3.bf16.msra.mxu0 %v6282_v52  ;;  %v6315_v52 = vld [vmem:[%s7774_s1 + $0x1c0] sm:$0xff]  }
 0x16a   : > { %5812 = vmatpush3.bf16.msra.mxu1 %v6283_v2  ;;  %5817 = vmatprep.subr.bf16.mxu0 %v6404_v1  ;;  %v2796_v2 = vpack.c.bf16 %v4764_v63, %v4764_v63  ;;  %v4874_v63 = vld [vmem:[%s6503_s20 + $0x1a] sm:$0xf] }
 0x16b   : > { %5837 = vmatprep.subr.bf16.mxu1 %v6404_v1 }
 0x16c   : > { %v1147_v10 = vpop.f32.mrf.mxu0  ;;  %5794 = vmatmul.mubr.bf16.vlgmr.msra.gmra.mxu0 %v2367_v5  ;;  %v6317_v5 = vld [vmem:[%s7774_s1 + $0x78] sm:$0xff]  }
 0x16d   : > { %v7242_v11 = vadd.f32 %v1147_v10, %v1045_v9  ;;  %v7244_v12 = vpop.f32.mrf.mxu1  ;;  %5814 = vmatmul.mubr.bf16.vlgmr.msra.gmra.mxu1 %v2474_v6  ;;  %5818 = vmatpush3.bf16.msra.mxu0 %v6284_v7  ;;  %v6319_v10 = vld [vmem:[%s7774_s1 + $0x70] sm:$0xff]  }
 0x16e   : > { %5838 = vmatpush3.bf16.msra.mxu1 %v6285_v8  ;;  %v5555_v14 = vpop.f32.mrf.mxu0  ;;  %5819 = vmatprep.subr.bf16.mxu0 %v6404_v1  ;;  %v6318_v8 = vld [vmem:[%s7774_s1 + $0x230] sm:$0xff]  }
 0x16f   : > { %1154 = vst [vmem:[%s7240_s15] sm:$0xf] %v7242_v11  ;;  %v5575_v16 = vpop.f32.mrf.mxu1  ;;  %5839 = vmatprep.subr.bf16.mxu1 %v6404_v1  ;;  %5833 = vmatprep.mubr.msk.bf16.mxu0 %vm6405_vm0, %v6404_v1 }
 0x170   : > { %v1150_v17 = vpop.f32.mrf.mxu0  ;;  %5853 = vmatprep.mubr.msk.bf16.mxu1 %vm6405_vm0, %v6404_v1 }
 0x171   : > { %v1294_v18 = vpop.f32.mrf.mxu1  ;;  %5820 = vmatpush3.bf16.msra.mxu0 %v6286_v13  ;;  %v6321_v17 = vld [vmem:[%s7774_s1 + $0x68] sm:$0xff]  }
 0x172   : > { %5840 = vmatpush3.bf16.msra.mxu1 %v6287_v15  ;;  %v5556_v20 = vpop.f32.mrf.mxu0  ;;  %5821 = vmatprep.subr.bf16.mxu0 %v6404_v1  ;;  %v6320_v15 = vld [vmem:[%s7774_s1 + $0x228] sm:$0xff]  }
 0x173   : > { %v5576_v22 = vpop.f32.mrf.mxu1  ;;  %5841 = vmatprep.subr.bf16.mxu1 %v6404_v1  ;;  %v6323_v20 = vld [vmem:[%s7774_s1 + $0x60] sm:$0xff]  }
 0x174   : > { %v6325_v22 = vld [vmem:[%s7774_s1 + $0x58] sm:$0xff]  }
 0x175   : > { %5822 = vmatpush3.bf16.msra.mxu0 %v6288_v19  ;;  %v6322_v19 = vld [vmem:[%s7774_s1 + $0x220] sm:$0xff]  }
 0x176   : > { %5842 = vmatpush3.bf16.msra.mxu1 %v6289_v21  ;;  %5823 = vmatprep.subr.bf16.mxu0 %v6404_v1  ;;  %v6324_v21 = vld [vmem:[%s7774_s1 + $0x218] sm:$0xff]  }
 0x177   : > { %5843 = vmatprep.subr.bf16.mxu1 %v6404_v1 }
 0x179   : > { %5824 = vmatpush3.bf16.msra.mxu0 %v6290_v23  ;;  %v6326_v23 = vld [vmem:[%s7774_s1 + $0x210] sm:$0xff]  }
 0x17a   : > { %5844 = vmatpush3.bf16.msra.mxu1 %v6291_v24  ;;  %5825 = vmatprep.subr.bf16.mxu0 %v6404_v1  ;;  %v6327_v24 = vld [vmem:[%s7774_s1 + $0x50] sm:$0xff]  }
 0x17b   : > { %5845 = vmatprep.subr.bf16.mxu1 %v6404_v1 }
 0x17d   : > { %5826 = vmatpush3.bf16.msra.mxu0 %v6292_v25  ;;  %v6328_v25 = vld [vmem:[%s7774_s1 + $0x208] sm:$0xff]  }
 0x17e   : > { %5846 = vmatpush3.bf16.msra.mxu1 %v6293_v26  ;;  %5827 = vmatprep.subr.bf16.mxu0 %v6404_v1  ;;  %v6329_v26 = vld [vmem:[%s7774_s1 + $0x48] sm:$0xff]  }
 0x17f   : > { %5847 = vmatprep.subr.bf16.mxu1 %v6404_v1 }
 0x181   : > { %5828 = vmatpush3.bf16.msra.mxu0 %v6294_v27  ;;  %v6330_v27 = vld [vmem:[%s7774_s1 + $0x200] sm:$0xff]  }
 0x182   : > { %5848 = vmatpush3.bf16.msra.mxu1 %v6295_v28  ;;  %5829 = vmatprep.subr.bf16.mxu0 %v6404_v1  ;;  %v4814_v28 = vld [vmem:[%s6503_s20 + $0x22] sm:$0xf] }
 0x183   : > { %5849 = vmatprep.subr.bf16.mxu1 %v6404_v1 }
 0x185   : > { %5830 = vmatpush3.bf16.msra.mxu0 %v6296_v29  ;;  %v6331_v29 = vld [vmem:[%s7774_s1 + $0x40] sm:$0xff]  }
 0x186   : > { %5850 = vmatpush3.bf16.msra.mxu1 %v6297_v30  ;;  %5831 = vmatprep.subr.bf16.mxu0 %v6404_v1  ;;  %v4841_v30 = vld [vmem:[%s6503_s20 + $0x19] sm:$0xf] }
 0x187   : > { %5851 = vmatprep.subr.bf16.mxu1 %v6404_v1  ;;  %v3154_v32 = vpack.c.bf16 %v4841_v30, %v4841_v30 }
 0x189   : > { %5832 = vmatpush3.bf16.msra.mxu0 %v6298_v31  ;;  %v3010_v31 = vpack.c.bf16 %v4814_v28, %v4814_v28  ;;  %v6353_v28 = vld [vmem:[%s7774_s1 + $0x128] sm:$0xff]  }
 0x18a   : > { %5852 = vmatpush3.bf16.msra.mxu1 %v6299_v33  ;;  %5857 = vmatprep.subr.bf16.mxu0 %v6404_v1  ;;  %v6332_v33 = vld [vmem:[%s7774_s1 + $0x38] sm:$0xff]  }
 0x18b   : > { %5877 = vmatprep.subr.bf16.mxu1 %v6404_v1 }
 0x18c   : > { %v1379_v39 = vpop.f32.mrf.mxu0  ;;  %5834 = vmatmul.mubr.bf16.vlgmr.msra.gmra.mxu0 %v2581_v35 }
 0x18d   : > { %v1380_v40 = vadd.f32 %v1379_v39, %v7244_v12  ;;  %v1485_v41 = vpop.f32.mrf.mxu1  ;;  %5854 = vmatmul.mubr.bf16.vlgmr.msra.gmra.mxu1 %v2688_v36  ;;  %5858 = vmatpush3.bf16.msra.mxu0 %v6300_v37  ;;  %v6334_v37 = vld [vmem:[%s7774_s1 + $0x30] sm:$0xff]  }
 0x18e   : > { %5878 = vmatpush3.bf16.msra.mxu1 %v6301_v38  ;;  %v5595_v43 = vpop.f32.mrf.mxu0  ;;  %5859 = vmatprep.subr.bf16.mxu0 %v6404_v1  ;;  %v6335_v39 = vld [vmem:[%s7774_s1 + $0xb0] sm:$0xff]  }
 0x18f   : > { %v7326_v45 = vadd.f32 %v1485_v41, %v1380_v40  ;;  %v5615_v46 = vpop.f32.mrf.mxu1  ;;  %5879 = vmatprep.subr.bf16.mxu1 %v6404_v1  ;;  %5873 = vmatprep.mubr.msk.bf16.mxu0 %vm6405_vm0, %v6404_v1  ;;  %v6336_v43 = vld [vmem:[%s7774_s1 + $0x28] sm:$0xff]  }
 0x190   : > { %v1382_v47 = vpop.f32.mrf.mxu0  ;;  %5893 = vmatprep.mubr.msk.bf16.mxu1 %vm6405_vm0, %v6404_v1  ;;  %v6337_v46 = vld [vmem:[%s7774_s1 + $0xa8] sm:$0xff]  }
 0x191   : > { %v1488_v48 = vpop.f32.mrf.mxu1  ;;  %5860 = vmatpush3.bf16.msra.mxu0 %v6302_v42 }
 0x192   : > { %5880 = vmatpush3.bf16.msra.mxu1 %v6303_v44  ;;  %v5596_v50 = vpop.f32.mrf.mxu0  ;;  %5861 = vmatprep.subr.bf16.mxu0 %v6404_v1  ;;  %v6338_v48 = vld [vmem:[%s7774_s1 + $0x20] sm:$0xff]  }
 0x193   : > { %v5616_v53 = vpop.f32.mrf.mxu1  ;;  %5881 = vmatprep.subr.bf16.mxu1 %v6404_v1  ;;  %v6340_v50 = vld [vmem:[%s7774_s1 + $0x18] sm:$0xff]  }
 0x194   : > { %v6342_v53 = vld [vmem:[%s7774_s1 + $0x10] sm:$0xff]  }
 0x195   : > { %5862 = vmatpush3.bf16.msra.mxu0 %v6304_v49  ;;  %v6339_v49 = vld [vmem:[%s7774_s1 + $0xa0] sm:$0xff]  }
 0x196   : > { %5882 = vmatpush3.bf16.msra.mxu1 %v6305_v51  ;;  %5863 = vmatprep.subr.bf16.mxu0 %v6404_v1  ;;  %v6341_v51 = vld [vmem:[%s7774_s1 + $0x98] sm:$0xff]  }
 0x197   : > { %5883 = vmatprep.subr.bf16.mxu1 %v6404_v1 }
 0x199   : > { %5864 = vmatpush3.bf16.msra.mxu0 %v6306_v54  ;;  %v6343_v54 = vld [vmem:[%s7774_s1 + $0x90] sm:$0xff]  }
 0x19a   : > { %5884 = vmatpush3.bf16.msra.mxu1 %v6307_v55  ;;  %5865 = vmatprep.subr.bf16.mxu0 %v6404_v1 }
 0x19b   : > { %5885 = vmatprep.subr.bf16.mxu1 %v6404_v1 }
 0x19d   : > { %5866 = vmatpush3.bf16.msra.mxu0 %v6308_v56  ;;  %v6344_v56 = vld [vmem:[%s7774_s1 + $0x8] sm:$0xff]  }
 0x19e   : > { %5886 = vmatpush3.bf16.msra.mxu1 %v6309_v57  ;;  %5867 = vmatprep.subr.bf16.mxu0 %v6404_v1  ;;  %v6345_v57 = vld [vmem:[%s7774_s1 + $0x88] sm:$0xff]  }
 0x19f   : > { %5887 = vmatprep.subr.bf16.mxu1 %v6404_v1 }
 0x1a1   : > { %5868 = vmatpush3.bf16.msra.mxu0 %v6310_v58  ;;  %v1164_v58 = vmul.f32 %v7242_v11, %v7242_v11 }
 0x1a2   : > { %5888 = vmatpush3.bf16.msra.mxu1 %v6311_v59  ;;  %5869 = vmatprep.subr.bf16.mxu0 %v6404_v1 }
 0x1a3   : > { %5889 = vmatprep.subr.bf16.mxu1 %v6404_v1 }
 0x1a5   : > { %5870 = vmatpush3.bf16.msra.mxu0 %v6312_v60  ;;  %v6346_v60 = vld [vmem:[%s7774_s1] sm:$0xff]  }
 0x1a6   : > { %5890 = vmatpush3.bf16.msra.mxu1 %v6313_v61  ;;  %5871 = vmatprep.subr.bf16.mxu0 %v6404_v1  ;;  %v4840_v61 = vld [vmem:[%s6503_s20 + $0x18] sm:$0xf] }
 0x1a7   : > { %5891 = vmatprep.subr.bf16.mxu1 %v6404_v1 }
 0x1a9   : > { %5872 = vmatpush3.bf16.msra.mxu0 %v6314_v62  ;;  %v6347_v62 = vld [vmem:[%s7774_s1 + $0x80] sm:$0xff]  }
 0x1aa   : > { %5892 = vmatpush3.bf16.msra.mxu1 %v6315_v52  ;;  %5897 = vmatprep.subr.bf16.mxu0 %v6404_v1  ;;  %v1165_v52 = vsel %vm1155_vm1, %v1164_v58, 0.0  ;;  %v6360_v58 = vld [vmem:[%s7774_s1 + $0xc8] sm:$0xff]  }
 0x1ab   : > { %5917 = vmatprep.subr.bf16.mxu1 %v6404_v1 }
 0x1ac   : > { %v7391_v6 = vpop.f32.mrf.mxu0  ;;  %5874 = vmatmul.mubr.bf16.vlgmr.msra.gmra.mxu0 %v2796_v2  ;;  %v3136_v2 = vpack.c.bf16 %v4840_v61, %v4840_v61  ;;  %v6363_v61 = vld [vmem:[%s7774_s1 + $0x100] sm:$0xff]  }
 0x1ad   : > { %v7393_v7 = vpop.f32.mrf.mxu1  ;;  %5894 = vmatmul.mubr.bf16.vlgmr.msra.gmra.mxu1 %v2903_v3  ;;  %5898 = vmatpush3.bf16.msra.mxu0 %v6316_v4  ;;  %v1598_v55 = vadd.f32 %v7391_v6, %v7326_v45  ;;  %v1156_v45 = vsel %vm1155_vm1, %v7242_v11, 0.0  ;;  %v3348_v3 = vpack.c.bf16 %v4874_v63, %v4874_v63  ;;  %v6348_v4 = vld [vmem:[%s7774_s1 + $0xf8] sm:$0xff]  }
 0x1ae   : > { %5918 = vmatpush3.bf16.msra.mxu1 %v6317_v5  ;;  %v5635_v9 = vpop.f32.mrf.mxu0  ;;  %5899 = vmatprep.subr.bf16.mxu0 %v6404_v1  ;;  %v1157_v11 = vrot.slane %v1156_v45, 4  ;;  %v1166_v5 = vrot.slane %v1165_v52, 4  ;;  %v6349_v6 = vld [vmem:[%s7774_s1 + $0x138] sm:$0xff]  }
 0x1af   : > { %v5655_v12 = vpop.f32.mrf.mxu1  ;;  %5919 = vmatprep.subr.bf16.mxu1 %v6404_v1  ;;  %5913 = vmatprep.mubr.msk.bf16.mxu0 %vm6405_vm0, %v6404_v1  ;;  %v1705_v59 = vadd.f32 %v7393_v7, %v1598_v55 }
 0x1b0   : > { %v1595_v13 = vpop.f32.mrf.mxu0  ;;  %5933 = vmatprep.mubr.msk.bf16.mxu1 %vm6405_vm0, %v6404_v1 }
 0x1b1   : > { %v1702_v14 = vpop.f32.mrf.mxu1  ;;  %5900 = vmatpush3.bf16.msra.mxu0 %v6318_v8  ;;  %v1158_v8 = vadd.f32 %v1157_v11, %v1156_v45  ;;  %v6350_v13 = vld [vmem:[%s7774_s1 + $0xf0] sm:$0xff]   ;;  %v6361_v45 = vld [vmem:[%s7774_s1 + $0x108] sm:$0xff]   ;;  %v6365_v11 = vld [vmem:[%s7774_s1 + $0x1b8] sm:$0xff]  }
 0x1b2   : > { %5920 = vmatpush3.bf16.msra.mxu1 %v6319_v10  ;;  %v5636_v16 = vpop.f32.mrf.mxu0  ;;  %5901 = vmatprep.subr.bf16.mxu0 %v6404_v1  ;;  %v1167_v14 = vadd.f32 %v1166_v5, %v1165_v52 }
 0x1b3   : > { %v5656_v18 = vpop.f32.mrf.mxu1  ;;  %5921 = vmatprep.subr.bf16.mxu1 %v6404_v1  ;;  %v6351_v16 = vld [vmem:[%s7774_s1 + $0x130] sm:$0xff]  }
 0x1b5   : > { %5902 = vmatpush3.bf16.msra.mxu0 %v6320_v15 }
 0x1b6   : > { %5922 = vmatpush3.bf16.msra.mxu1 %v6321_v17  ;;  %5903 = vmatprep.subr.bf16.mxu0 %v6404_v1 }
 0x1b7   : > { %5923 = vmatprep.subr.bf16.mxu1 %v6404_v1 }
 0x1b9   : > { %5904 = vmatpush3.bf16.msra.mxu0 %v6322_v19  ;;  %v1159_v19 = vrot.slane %v1158_v8, 2 }
 0x1ba   : > { %5924 = vmatpush3.bf16.msra.mxu1 %v6323_v20  ;;  %5905 = vmatprep.subr.bf16.mxu0 %v6404_v1 }
 0x1bb   : > { %5925 = vmatprep.subr.bf16.mxu1 %v6404_v1 }
 0x1bd   : > { %5906 = vmatpush3.bf16.msra.mxu0 %v6324_v21 }
 0x1be   : > { %5926 = vmatpush3.bf16.msra.mxu1 %v6325_v22  ;;  %5907 = vmatprep.subr.bf16.mxu0 %v6404_v1 }
 0x1bf   : > { %5927 = vmatprep.subr.bf16.mxu1 %v6404_v1 }
 0x1c1   : > { %5908 = vmatpush3.bf16.msra.mxu0 %v6326_v23 }
 0x1c2   : > { %5928 = vmatpush3.bf16.msra.mxu1 %v6327_v24  ;;  %5909 = vmatprep.subr.bf16.mxu0 %v6404_v1  ;;  %v6352_v24 = vld [vmem:[%s7774_s1 + $0xe8] sm:$0xff]  }
 0x1c3   : > { %5929 = vmatprep.subr.bf16.mxu1 %v6404_v1 }
 0x1c5   : > { %5910 = vmatpush3.bf16.msra.mxu0 %v6328_v25  ;;  %v1168_v25 = vrot.slane %v1167_v14, 2 }
 0x1c6   : > { %5930 = vmatpush3.bf16.msra.mxu1 %v6329_v26  ;;  %5911 = vmatprep.subr.bf16.mxu0 %v6404_v1 }
 0x1c7   : > { %5931 = vmatprep.subr.bf16.mxu1 %v6404_v1 }
 0x1c9   : > { %5912 = vmatpush3.bf16.msra.mxu0 %v6330_v27 }
 0x1ca   : > { %5932 = vmatpush3.bf16.msra.mxu1 %v6331_v29  ;;  %5937 = vmatprep.subr.bf16.mxu0 %v6404_v1 }
 0x1cb   : > { %5957 = vmatprep.subr.bf16.mxu1 %v6404_v1 }
 0x1cc   : > { %v1806_v35 = vpop.f32.mrf.mxu0  ;;  %5914 = vmatmul.mubr.bf16.vlgmr.msra.gmra.mxu0 %v3010_v31  ;;  %v1160_v31 = vadd.f32 %v1159_v19, %v1158_v8  ;;  %v6373_v19 = vld [vmem:[%s7774_s1 + $0x198] sm:$0xff]  }
 0x1cd   : > { %v7465_v36 = vpop.f32.mrf.mxu1  ;;  %5934 = vmatmul.mubr.bf16.vlgmr.msra.gmra.mxu1 %v3154_v32  ;;  %5938 = vmatpush3.bf16.msra.mxu0 %v6332_v33  ;;  %v1812_v0 = vadd.f32 %v1806_v35, %v1705_v59  ;;  %v1169_v35 = vadd.f32 %v1168_v25, %v1167_v14  ;;  %v6362_v59 = vld [vmem:[%s7774_s1 + $0xc0] sm:$0xff]   ;;  %v6369_v14 = vld [vmem:[%s7774_s1 + $0x1a8] sm:$0xff]  }
 0x1ce   : > { %5958 = vmatpush3.bf16.msra.mxu1 %v6333_v34  ;;  %v5675_v38 = vpop.f32.mrf.mxu0  ;;  %5939 = vmatprep.subr.bf16.mxu0 %v6404_v1  ;;  %v6354_v34 = vld [vmem:[%s7774_s1 + $0xe0] sm:$0xff]  }
 0x1cf   : > { %v5695_v40 = vpop.f32.mrf.mxu1  ;;  %5959 = vmatprep.subr.bf16.mxu1 %v6404_v1  ;;  %5953 = vmatprep.mubr.msk.bf16.mxu0 %vm6405_vm0, %v6404_v1  ;;  %v1920_v7 = vadd.f32 %v7465_v36, %v1812_v0  ;;  %v6355_v38 = vld [vmem:[%s7774_s1 + $0x120] sm:$0xff]   ;;  %v6364_v0 = vld [vmem:[%s7774_s1 + $0x178] sm:$0xff]  }
 0x1d0   : > { %v1809_v41 = vpop.f32.mrf.mxu0  ;;  %5973 = vmatprep.mubr.msk.bf16.mxu1 %vm6405_vm0, %v6404_v1  ;;  %v4949_v25 = vld [vmem:[%s6503_s20 + $0x22] sm:$0xf] }
 0x1d1   : > { %v1917_v42 = vpop.f32.mrf.mxu1  ;;  %5940 = vmatpush3.bf16.msra.mxu0 %v6334_v37 }
 0x1d2   : > { %5960 = vmatpush3.bf16.msra.mxu1 %v6335_v39  ;;  %v5676_v44 = vpop.f32.mrf.mxu0  ;;  %5941 = vmatprep.subr.bf16.mxu0 %v6404_v1  ;;  %v1161_v39 = vrot.slane %v1160_v31, 1  ;;  %v6356_v42 = vld [vmem:[%s7774_s1 + $0xd8] sm:$0xff]  }
 0x1d3   : > { %v5696_v47 = vpop.f32.mrf.mxu1  ;;  %5961 = vmatprep.subr.bf16.mxu1 %v6404_v1 }
 0x1d4   : > { %v6357_v47 = vld [vmem:[%s7774_s1 + $0x118] sm:$0xff]  }
 0x1d5   : > { %5942 = vmatpush3.bf16.msra.mxu0 %v6336_v43  ;;  %v1170_v43 = vrot.slane %v1169_v35, 1 }
 0x1d6   : > { %5962 = vmatpush3.bf16.msra.mxu1 %v6337_v46  ;;  %5943 = vmatprep.subr.bf16.mxu0 %v6404_v1 }
 0x1d7   : > { %5963 = vmatprep.subr.bf16.mxu1 %v6404_v1 }
 0x1d9   : > { %5944 = vmatpush3.bf16.msra.mxu0 %v6338_v48  ;;  %v1162_v48 = vadd.f32 %v1161_v39, %v1160_v31  ;;  %v6381_v31 = vld [vmem:[%s7774_s1 + $0x238] sm:$0xff]  }
 0x1da   : > { %5964 = vmatpush3.bf16.msra.mxu1 %v6339_v49  ;;  %5945 = vmatprep.subr.bf16.mxu0 %v6404_v1 }
 0x1db   : > { %5965 = vmatprep.subr.bf16.mxu1 %v6404_v1 }
 0x1dd   : > { %5946 = vmatpush3.bf16.msra.mxu0 %v6340_v50 }
 0x1de   : > { %5966 = vmatpush3.bf16.msra.mxu1 %v6341_v51  ;;  %5947 = vmatprep.subr.bf16.mxu0 %v6404_v1  ;;  %v6358_v51 = vld [vmem:[%s7774_s1 + $0xd0] sm:$0xff]  }
 0x1df   : > { %5967 = vmatprep.subr.bf16.mxu1 %v6404_v1 }
 0x1e1   : > { %5948 = vmatpush3.bf16.msra.mxu0 %v6342_v53  ;;  %v1171_v53 = vadd.f32 %v1170_v43, %v1169_v35  ;;  %v6382_v35 = vld [vmem:[%s7774_s1 + $0x1f0] sm:$0xff]  }
 0x1e2   : > { %5968 = vmatpush3.bf16.msra.mxu1 %v6343_v54  ;;  %5949 = vmatprep.subr.bf16.mxu0 %v6404_v1 }
 0x1e3   : > { %5969 = vmatprep.subr.bf16.mxu1 %v6404_v1 }
 0x1e5   : > { %5950 = vmatpush3.bf16.msra.mxu0 %v6344_v56  ;;  %v6359_v56 = vld [vmem:[%s7774_s1 + $0x110] sm:$0xff]  }
 0x1e6   : > { %5970 = vmatpush3.bf16.msra.mxu1 %v6345_v57  ;;  %5951 = vmatprep.subr.bf16.mxu0 %v6404_v1 }
 0x1e7   : > { %5971 = vmatprep.subr.bf16.mxu1 %v6404_v1 }
 0x1e9   : > { %5952 = vmatpush3.bf16.msra.mxu0 %v6346_v60  ;;  %v4899_v60 = vld [vmem:[%s6503_s20 + $0x20] sm:$0xf] }
 0x1ea   : > { %5972 = vmatpush3.bf16.msra.mxu1 %v6347_v62  ;;  %5977 = vmatprep.subr.bf16.mxu0 %v6404_v1  ;;  %v4924_v62 = vld [vmem:[%s6503_s20 + $0x21] sm:$0xf]  ;;  %v3455_v63 = vpack.c.bf16 %v4899_v60, %v4899_v60  ;;  %v5024_v60 = vld [vmem:[%s6503_s20 + $0x2a] sm:$0xf] }
 0x1eb   : > { %5997 = vmatprep.subr.bf16.mxu1 %v6404_v1  ;;  %v3562_v52 = vpack.c.bf16 %v4924_v62, %v4924_v62  ;;  %v3991_v62 = vpack.c.bf16 %v5024_v60, %v5024_v60 }
 0x1ec   : > { %v2021_v9 = vpop.f32.mrf.mxu0  ;;  %5954 = vmatmul.mubr.bf16.vlgmr.msra.gmra.mxu0 %v3136_v2 }
 0x1ed   : > { %v2027_v10 = vadd.f32 %v2021_v9, %v1920_v7  ;;  %v2128_v12 = vpop.f32.mrf.mxu1  ;;  %5974 = vmatmul.mubr.bf16.vlgmr.msra.gmra.mxu1 %v3348_v3  ;;  %5978 = vmatpush3.bf16.msra.mxu0 %v6348_v4  ;;  %v6366_v4 = vld [vmem:[%s7774_s1 + $0x170] sm:$0xff]  }
 0x1ee   : > { %5998 = vmatpush3.bf16.msra.mxu1 %v6349_v6  ;;  %v5715_v15 = vpop.f32.mrf.mxu0  ;;  %5979 = vmatprep.subr.bf16.mxu0 %v6404_v1  ;;  %v6367_v7 = vld [vmem:[%s7774_s1 + $0x1b0] sm:$0xff]  }
 0x1ef   : > { %v2134_v17 = vadd.f32 %v2128_v12, %v2027_v10  ;;  %v5735_v18 = vpop.f32.mrf.mxu1  ;;  %5999 = vmatprep.subr.bf16.mxu1 %v6404_v1  ;;  %5993 = vmatprep.mubr.msk.bf16.mxu0 %vm6405_vm0, %v6404_v1  ;;  %v6368_v12 = vld [vmem:[%s7774_s1 + $0x168] sm:$0xff]  }
 0x1f0   : > { %v2024_v20 = vpop.f32.mrf.mxu0  ;;  %6013 = vmatprep.mubr.msk.bf16.mxu1 %vm6405_vm0, %v6404_v1  ;;  %v6372_v18 = vld [vmem:[%s7774_s1 + $0x158] sm:$0xff]  }
 0x1f1   : > { %4629 = vst [vmem:[%s7240_s15 + $0x4] sm:$0xf] %v2134_v17  ;;  %v2137_v21 = vsel %vm1155_vm1, %v2134_v17, 0.0  ;;  %v2145_v22 = vmul.f32 %v2134_v17, %v2134_v17  ;;  %v2131_v23 = vpop.f32.mrf.mxu1  ;;  %5980 = vmatpush3.bf16.msra.mxu0 %v6350_v13  ;;  %v6371_v17 = vld [vmem:[%s7774_s1 + $0x1a0] sm:$0xff]   ;;  %v6374_v20 = vld [vmem:[%s7774_s1 + $0x150] sm:$0xff]  }
 0x1f2   : > { %v2138_v26 = vrot.slane %v2137_v21, 4  ;;  %6000 = vmatpush3.bf16.msra.mxu1 %v6351_v16  ;;  %v5716_v27 = vpop.f32.mrf.mxu0  ;;  %5981 = vmatprep.subr.bf16.mxu0 %v6404_v1  ;;  %v6370_v16 = vld [vmem:[%s7774_s1 + $0x160] sm:$0xff]   ;;  %v6377_v23 = vld [vmem:[%s7774_s1 + $0x188] sm:$0xff]  }
 0x1f3   : > { %v2146_v29 = vsel %vm1155_vm1, %v2145_v22, 0.0  ;;  %v5736_v30 = vpop.f32.mrf.mxu1  ;;  %6001 = vmatprep.subr.bf16.mxu1 %v6404_v1  ;;  %v6376_v22 = vld [vmem:[%s7774_s1 + $0x148] sm:$0xff]  }
 0x1f4   : > { %v2139_v32 = vadd.f32 %v2138_v26, %v2137_v21  ;;  %v2147_v33 = vrot.slane %v2146_v29, 4  ;;  %v6375_v21 = vld [vmem:[%s7774_s1 + $0x190] sm:$0xff]   ;;  %v6379_v26 = vld [vmem:[%s7774_s1 + $0x180] sm:$0xff]   ;;  %v4974_v27 = vld [vmem:[%s6503_s20 + $0x28] sm:$0xf] }
 0x1f5   : > { %5982 = vmatpush3.bf16.msra.mxu0 %v6352_v24  ;;  %v6378_v24 = vld [vmem:[%s7774_s1 + $0x140] sm:$0xff]   ;;  %v6380_v30 = vld [vmem:[%s7774_s1 + $0x1f8] sm:$0xff]  }
 0x1f6   : > { %v2140_v36 = vrot.slane %v2139_v32, 2  ;;  %v2148_v37 = vadd.f32 %v2147_v33, %v2146_v29  ;;  %6002 = vmatpush3.bf16.msra.mxu1 %v6353_v28  ;;  %5983 = vmatprep.subr.bf16.mxu0 %v6404_v1  ;;  %v3669_v28 = vpack.c.bf16 %v4949_v25, %v4949_v25  ;;  %v3777_v29 = vpack.c.bf16 %v4974_v27, %v4974_v27 }
 0x1f7   : > { %6003 = vmatprep.subr.bf16.mxu1 %v6404_v1 }
 0x1f8   : > { %v2141_v40 = vadd.f32 %v2140_v36, %v2139_v32  ;;  %v2149_v41 = vrot.slane %v2148_v37, 2 }
 0x1f9   : > { %5984 = vmatpush3.bf16.msra.mxu0 %v6354_v34 }
 0x1fa   : > { %v2142_v44 = vrot.slane %v2141_v40, 1  ;;  %v2150_v46 = vadd.f32 %v2149_v41, %v2148_v37  ;;  %6004 = vmatpush3.bf16.msra.mxu1 %v6355_v38  ;;  %5985 = vmatprep.subr.bf16.mxu0 %v6404_v1  ;;  %v6383_v37 = vld [vmem:[%s7774_s1 + $0x230] sm:$0xff]  }
 0x1fb   : > { %6005 = vmatprep.subr.bf16.mxu1 %v6404_v1 }
 0x1fc   : > { %v2143_v49 = vadd.f32 %v2142_v44, %v2141_v40  ;;  %v2151_v50 = vrot.slane %v2150_v46, 1  ;;  %v6385_v44 = vld [vmem:[%s7774_s1 + $0x228] sm:$0xff]  }
 0x1fd   : > { %5986 = vmatpush3.bf16.msra.mxu0 %v6356_v42  ;;  %v6384_v42 = vld [vmem:[%s7774_s1 + $0x1e8] sm:$0xff]  }
 0x1fe   : > { %v7588_v54 = vadd.f32 %v2143_v49, %v1162_v48  ;;  %v2152_v55 = vadd.f32 %v2151_v50, %v2150_v46  ;;  %6006 = vmatpush3.bf16.msra.mxu1 %v6357_v47  ;;  %5987 = vmatprep.subr.bf16.mxu0 %v6404_v1  ;;  %v6386_v47 = vld [vmem:[%s7774_s1 + $0x1e0] sm:$0xff]   ;;  %v6388_v49 = vld [vmem:[%s7774_s1 + $0x1d8] sm:$0xff]  }
 0x1ff   : > { %6007 = vmatprep.subr.bf16.mxu1 %v6404_v1  ;;  %v6387_v48 = vld [vmem:[%s7774_s1 + $0x220] sm:$0xff]   ;;  %v6389_v50 = vld [vmem:[%s7774_s1 + $0x218] sm:$0xff]  }
 0x200   : > { %v7595_v57 = vadd.f32 %v2152_v55, %v1171_v53  ;;  %v6391_v53 = vld [vmem:[%s7774_s1 + $0x210] sm:$0xff]   ;;  %v6392_v55 = vld [vmem:[%s7774_s1 + $0x1c8] sm:$0xff]  }
 0x201   : > { %5988 = vmatpush3.bf16.msra.mxu0 %v6358_v51  ;;  %v6390_v51 = vld [vmem:[%s7774_s1 + $0x1d0] sm:$0xff]  }
 0x202   : > { %6008 = vmatpush3.bf16.msra.mxu1 %v6359_v56  ;;  %5989 = vmatprep.subr.bf16.mxu0 %v6404_v1  ;;  %v6393_v56 = vld [vmem:[%s7774_s1 + $0x208] sm:$0xff]  }
 0x203   : > { %6009 = vmatprep.subr.bf16.mxu1 %v6404_v1 }
 0x205   : > { %5990 = vmatpush3.bf16.msra.mxu0 %v6360_v58  ;;  %v6394_v58 = vld [vmem:[%s7774_s1 + $0x1c0] sm:$0xff]  }
 0x206   : > { %6010 = vmatpush3.bf16.msra.mxu1 %v6361_v45  ;;  %5991 = vmatprep.subr.bf16.mxu0 %v6404_v1  ;;  %v4999_v45 = vld [vmem:[%s6503_s20 + $0x29] sm:$0xf]  ;;  %s4213_s20 = sshll.u32 %s7778_s13, 1 }
 0x207   : > { %6011 = vmatprep.subr.bf16.mxu1 %v6404_v1  ;;  %s181_s4 = scalar_lea.vmem %s7776_s3, %s4213_s20 }
 0x209   : > { %5992 = vmatpush3.bf16.msra.mxu0 %v6362_v59  ;;  %v6395_v59 = vld [vmem:[%s7774_s1 + $0x200] sm:$0xff]  }
 0x20a   : > { %6012 = vmatpush3.bf16.msra.mxu1 %v6363_v61  ;;  %6017 = vmatprep.subr.bf16.mxu0 %v6404_v1  ;;  %v3884_v61 = vpack.c.bf16 %v4999_v45, %v4999_v45 }
 0x20b   : > { %6037 = vmatprep.subr.bf16.mxu1 %v6404_v1 }
 0x20c   : > { %v2272_v2 = vpop.f32.mrf.mxu0  ;;  %5994 = vmatmul.mubr.bf16.vlgmr.msra.gmra.mxu0 %v3455_v63 }
 0x20d   : > { %v2360_v3 = vpop.f32.mrf.mxu1  ;;  %6014 = vmatmul.mubr.bf16.vlgmr.msra.gmra.mxu1 %v3562_v52  ;;  %6018 = vmatpush3.bf16.msra.mxu0 %v6364_v0 }
 0x20e   : > { %v2361_v5 = vadd.f32 %v2360_v3, %v2272_v2  ;;  %6038 = vmatpush3.bf16.msra.mxu1 %v6365_v11  ;;  %v5755_v6 = vpop.f32.mrf.mxu0  ;;  %6019 = vmatprep.subr.bf16.mxu0 %v6404_v1 }
 0x20f   : > { %v5775_v8 = vpop.f32.mrf.mxu1  ;;  %6039 = vmatprep.subr.bf16.mxu1 %v6404_v1  ;;  %6033 = vmatprep.mubr.msk.bf16.mxu0 %vm6405_vm0, %v6404_v1 }
 0x210   : > { %v2275_v9 = vpop.f32.mrf.mxu0  ;;  %6053 = vmatprep.mubr.msk.bf16.mxu1 %vm6405_vm0, %v6404_v1 }
 0x211   : > { %v2363_v10 = vpop.f32.mrf.mxu1  ;;  %6020 = vmatpush3.bf16.msra.mxu0 %v6366_v4 }
 0x212   : > { %6040 = vmatpush3.bf16.msra.mxu1 %v6367_v7  ;;  %v5756_v13 = vpop.f32.mrf.mxu0  ;;  %6021 = vmatprep.subr.bf16.mxu0 %v6404_v1 }
 0x213   : > { %v5776_v15 = vpop.f32.mrf.mxu1  ;;  %6041 = vmatprep.subr.bf16.mxu1 %v6404_v1 }
 0x215   : > { %6022 = vmatpush3.bf16.msra.mxu0 %v6368_v12 }
 0x216   : > { %6042 = vmatpush3.bf16.msra.mxu1 %v6369_v14  ;;  %6023 = vmatprep.subr.bf16.mxu0 %v6404_v1 }
 0x217   : > { %6043 = vmatprep.subr.bf16.mxu1 %v6404_v1 }
 0x219   : > { %6024 = vmatpush3.bf16.msra.mxu0 %v6370_v16 }
 0x21a   : > { %6044 = vmatpush3.bf16.msra.mxu1 %v6371_v17  ;;  %6025 = vmatprep.subr.bf16.mxu0 %v6404_v1 }
 0x21b   : > { %6045 = vmatprep.subr.bf16.mxu1 %v6404_v1 }
 0x21d   : > { %6026 = vmatpush3.bf16.msra.mxu0 %v6372_v18 }
 0x21e   : > { %6046 = vmatpush3.bf16.msra.mxu1 %v6373_v19  ;;  %6027 = vmatprep.subr.bf16.mxu0 %v6404_v1 }
 0x21f   : > { %6047 = vmatprep.subr.bf16.mxu1 %v6404_v1 }
 0x221   : > { %6028 = vmatpush3.bf16.msra.mxu0 %v6374_v20 }
 0x222   : > { %6048 = vmatpush3.bf16.msra.mxu1 %v6375_v21  ;;  %6029 = vmatprep.subr.bf16.mxu0 %v6404_v1 }
 0x223   : > { %6049 = vmatprep.subr.bf16.mxu1 %v6404_v1 }
 0x225   : > { %6030 = vmatpush3.bf16.msra.mxu0 %v6376_v22 }
 0x226   : > { %6050 = vmatpush3.bf16.msra.mxu1 %v6377_v23  ;;  %6031 = vmatprep.subr.bf16.mxu0 %v6404_v1 }
 0x227   : > { %6051 = vmatprep.subr.bf16.mxu1 %v6404_v1 }
 0x229   : > { %6032 = vmatpush3.bf16.msra.mxu0 %v6378_v24 }
 0x22a   : > { %6052 = vmatpush3.bf16.msra.mxu1 %v6379_v26  ;;  %6057 = vmatprep.subr.bf16.mxu0 %v6404_v1 }
 0x22b   : > { %6077 = vmatprep.subr.bf16.mxu1 %v6404_v1 }
 0x22c   : > { %v2466_v32 = vpop.f32.mrf.mxu0  ;;  %6034 = vmatmul.mubr.bf16.vlgmr.msra.gmra.mxu0 %v3669_v28 }
 0x22d   : > { %v2472_v33 = vadd.f32 %v2466_v32, %v2361_v5  ;;  %v2573_v34 = vpop.f32.mrf.mxu1  ;;  %6054 = vmatmul.mubr.bf16.vlgmr.msra.gmra.mxu1 %v3777_v29  ;;  %6058 = vmatpush3.bf16.msra.mxu0 %v6380_v30 }
 0x22e   : > { %6078 = vmatpush3.bf16.msra.mxu1 %v6381_v31  ;;  %v5795_v36 = vpop.f32.mrf.mxu0  ;;  %6059 = vmatprep.subr.bf16.mxu0 %v6404_v1 }
 0x22f   : > { %v7700_v38 = vadd.f32 %v2573_v34, %v2472_v33  ;;  %v5815_v39 = vpop.f32.mrf.mxu1  ;;  %6079 = vmatprep.subr.bf16.mxu1 %v6404_v1  ;;  %6073 = vmatprep.mubr.msk.bf16.mxu0 %vm6405_vm0, %v6404_v1 }
 0x230   : > { %v2469_v40 = vpop.f32.mrf.mxu0  ;;  %6093 = vmatprep.mubr.msk.bf16.mxu1 %vm6405_vm0, %v6404_v1 }
 0x231   : > { %v2576_v41 = vpop.f32.mrf.mxu1  ;;  %6060 = vmatpush3.bf16.msra.mxu0 %v6382_v35 }
 0x232   : > { %6080 = vmatpush3.bf16.msra.mxu1 %v6383_v37  ;;  %v5796_v43 = vpop.f32.mrf.mxu0  ;;  %6061 = vmatprep.subr.bf16.mxu0 %v6404_v1 }
 0x233   : > { %v5816_v46 = vpop.f32.mrf.mxu1  ;;  %6081 = vmatprep.subr.bf16.mxu1 %v6404_v1 }
 0x235   : > { %6062 = vmatpush3.bf16.msra.mxu0 %v6384_v42 }
 0x236   : > { %6082 = vmatpush3.bf16.msra.mxu1 %v6385_v44  ;;  %6063 = vmatprep.subr.bf16.mxu0 %v6404_v1 }
 0x237   : > { %6083 = vmatprep.subr.bf16.mxu1 %v6404_v1 }
 0x239   : > { %6064 = vmatpush3.bf16.msra.mxu0 %v6386_v47 }
 0x23a   : > { %6084 = vmatpush3.bf16.msra.mxu1 %v6387_v48  ;;  %6065 = vmatprep.subr.bf16.mxu0 %v6404_v1 }
 0x23b   : > { %6085 = vmatprep.subr.bf16.mxu1 %v6404_v1 }
 0x23d   : > { %6066 = vmatpush3.bf16.msra.mxu0 %v6388_v49 }
 0x23e   : > { %6086 = vmatpush3.bf16.msra.mxu1 %v6389_v50  ;;  %6067 = vmatprep.subr.bf16.mxu0 %v6404_v1 }
 0x23f   : > { %6087 = vmatprep.subr.bf16.mxu1 %v6404_v1 }
 0x241   : > { %6068 = vmatpush3.bf16.msra.mxu0 %v6390_v51 }
 0x242   : > { %6088 = vmatpush3.bf16.msra.mxu1 %v6391_v53  ;;  %6069 = vmatprep.subr.bf16.mxu0 %v6404_v1 }
 0x243   : > { %6089 = vmatprep.subr.bf16.mxu1 %v6404_v1 }
 0x245   : > { %6070 = vmatpush3.bf16.msra.mxu0 %v6392_v55 }
 0x246   : > { %6090 = vmatpush3.bf16.msra.mxu1 %v6393_v56  ;;  %6071 = vmatprep.subr.bf16.mxu0 %v6404_v1 }
 0x247   : > { %6091 = vmatprep.subr.bf16.mxu1 %v6404_v1 }
 0x249   : > { %6072 = vmatpush3.bf16.msra.mxu0 %v6394_v58 }
 0x24a   : > { %6092 = vmatpush3.bf16.msra.mxu1 %v6395_v59 }
 0x24c   : > { %v2680_v63 = vpop.f32.mrf.mxu0  ;;  %6074 = vmatmul.mubr.bf16.vlgmr.msra.gmra.mxu0 %v3884_v61 }
 0x24d   : > { %v2787_v52 = vpop.f32.mrf.mxu1  ;;  %6094 = vmatmul.mubr.bf16.vlgmr.msra.gmra.mxu1 %v3991_v62  ;;  %v2686_v14 = vadd.f32 %v2680_v63, %v7700_v38 }
 0x24e   : > { %v5835_v0 = vpop.f32.mrf.mxu0 }
 0x24f   : > { %v5855_v11 = vpop.f32.mrf.mxu1  ;;  %v2793_v15 = vadd.f32 %v2787_v52, %v2686_v14 }
 0x250   : > { %v2683_v2 = vpop.f32.mrf.mxu0 }
 0x251   : > { %v2790_v3 = vpop.f32.mrf.mxu1 }
 0x252   : > { %v5836_v4 = vpop.f32.mrf.mxu0 }
 0x253   : > { %v5856_v5 = vpop.f32.mrf.mxu1 }
 0x26c   : > { %v2895_v6 = vpop.f32.mrf.mxu0 }
 0x26d   : > { %v3002_v7 = vpop.f32.mrf.mxu1  ;;  %v2901_v16 = vadd.f32 %v2895_v6, %v2793_v15 }
 0x26e   : > { %v5875_v8 = vpop.f32.mrf.mxu0 }
 0x26f   : > { %v5895_v9 = vpop.f32.mrf.mxu1  ;;  %v3008_v17 = vadd.f32 %v3002_v7, %v2901_v16 }
 0x270   : > { %v2898_v1 = vpop.f32.mrf.mxu0 }
 0x271   : > { %v3005_v10 = vpop.f32.mrf.mxu1 }
 0x272   : > { %v5876_v12 = vpop.f32.mrf.mxu0 }
 0x273   : > { %v5896_v13 = vpop.f32.mrf.mxu1 }
 0x28c   : > { %v3109_v18 = vpop.f32.mrf.mxu0 }
 0x28d   : > { %v3115_v19 = vadd.f32 %v3109_v18, %v3008_v17  ;;  %v3253_v20 = vpop.f32.mrf.mxu1 }
 0x28e   : > { %v5915_v21 = vpop.f32.mrf.mxu0 }
 0x28f   : > { %4839 = vst [vmem:[%s7240_s15 + $0x8] sm:$0xf] %v3115_v19  ;;  %v3118_v22 = vsel %vm1155_vm1, %v3115_v19, 0.0  ;;  %v3126_v23 = vmul.f32 %v3115_v19, %v3115_v19  ;;  %v5935_v24 = vpop.f32.mrf.mxu1 }
 0x290   : > { %v3119_v25 = vrot.slane %v3118_v22, 4  ;;  %v3112_v26 = vpop.f32.mrf.mxu0 }
 0x291   : > { %v3127_v27 = vsel %vm1155_vm1, %v3126_v23, 0.0  ;;  %v3256_v28 = vpop.f32.mrf.mxu1 }
 0x292   : > { %v3120_v29 = vadd.f32 %v3119_v25, %v3118_v22  ;;  %v3128_v30 = vrot.slane %v3127_v27, 4  ;;  %v5916_v31 = vpop.f32.mrf.mxu0 }
 0x293   : > { %v5936_v32 = vpop.f32.mrf.mxu1 }
 0x294   : > { %v3121_v33 = vrot.slane %v3120_v29, 2  ;;  %v3129_v34 = vadd.f32 %v3128_v30, %v3127_v27 }
 0x296   : > { %v3122_v35 = vadd.f32 %v3121_v33, %v3120_v29  ;;  %v3130_v36 = vrot.slane %v3129_v34, 2 }
 0x298   : > { %v3123_v37 = vrot.slane %v3122_v35, 1  ;;  %v3131_v38 = vadd.f32 %v3130_v36, %v3129_v34 }
 0x29a   : > { %v3124_v39 = vadd.f32 %v3123_v37, %v3122_v35  ;;  %v3132_v40 = vrot.slane %v3131_v38, 1 }
 0x29c   : > { %v3125_v41 = vadd.f32 %v3124_v39, %v7588_v54  ;;  %v3133_v42 = vadd.f32 %v3132_v40, %v3131_v38 }
 0x29e   : > { %v3134_v43 = vadd.f32 %v3133_v42, %v7595_v57 }
 0x2ac   : > { %v3341_v44 = vpop.f32.mrf.mxu0 }
 0x2ad   : > { %v3342_v46 = vadd.f32 %v3341_v44, %v3253_v20  ;;  %v3447_v47 = vpop.f32.mrf.mxu1 }
 0x2ae   : > { %v5955_v48 = vpop.f32.mrf.mxu0 }
 0x2af   : > { %v3453_v49 = vadd.f32 %v3447_v47, %v3342_v46  ;;  %v5975_v50 = vpop.f32.mrf.mxu1 }
 0x2b0   : > { %v3344_v51 = vpop.f32.mrf.mxu0 }
 0x2b1   : > { %v3450_v53 = vpop.f32.mrf.mxu1 }
 0x2b2   : > { %v5956_v55 = vpop.f32.mrf.mxu0 }
 0x2b3   : > { %v5976_v56 = vpop.f32.mrf.mxu1 }
 0x2cc   : > { %v3554_v58 = vpop.f32.mrf.mxu0 }
 0x2cd   : > { %v3661_v45 = vpop.f32.mrf.mxu1  ;;  %v3560_v6 = vadd.f32 %v3554_v58, %v3453_v49 }
 0x2ce   : > { %v5995_v59 = vpop.f32.mrf.mxu0 }
 0x2cf   : > { %v6015_v60 = vpop.f32.mrf.mxu1  ;;  %v3667_v7 = vadd.f32 %v3661_v45, %v3560_v6 }
 0x2d0   : > { %v3557_v61 = vpop.f32.mrf.mxu0 }
 0x2d1   : > { %v3664_v62 = vpop.f32.mrf.mxu1 }
 0x2d2   : > { %v5996_v54 = vpop.f32.mrf.mxu0 }
 0x2d3   : > { %v6016_v63 = vpop.f32.mrf.mxu1 }
 0x2ec   : > { %v3768_v52 = vpop.f32.mrf.mxu0 }
 0x2ed   : > { %v3876_v57 = vpop.f32.mrf.mxu1  ;;  %v3774_v8 = vadd.f32 %v3768_v52, %v3667_v7 }
 0x2ee   : > { %v6035_v0 = vpop.f32.mrf.mxu0 }
 0x2ef   : > { %v6055_v11 = vpop.f32.mrf.mxu1  ;;  %v3882_v9 = vadd.f32 %v3876_v57, %v3774_v8 }
 0x2f0   : > { %v3771_v2 = vpop.f32.mrf.mxu0 }
 0x2f1   : > { %v3879_v3 = vpop.f32.mrf.mxu1 }
 0x2f2   : > { %v6036_v4 = vpop.f32.mrf.mxu0 }
 0x2f3   : > { %v6056_v5 = vpop.f32.mrf.mxu1 }
 0x30c   : > { %v3983_v1 = vpop.f32.mrf.mxu0 }
 0x30d   : > { %v3989_v10 = vadd.f32 %v3983_v1, %v3882_v9  ;;  %v4090_v12 = vpop.f32.mrf.mxu1 }
 0x30e   : > { %v6075_v13 = vpop.f32.mrf.mxu0 }
 0x30f   : > { %v4096_v14 = vadd.f32 %v4090_v12, %v3989_v10  ;;  %v6095_v15 = vpop.f32.mrf.mxu1 }
 0x310   : > { %v3986_v16 = vpop.f32.mrf.mxu0 }
 0x311   : > { %5049 = vst [vmem:[%s7240_s15 + $0xc] sm:$0xf] %v4096_v14  ;;  %v4099_v17 = vsel %vm1155_vm1, %v4096_v14, 0.0  ;;  %v4107_v18 = vmul.f32 %v4096_v14, %v4096_v14  ;;  %v4093_v19 = vpop.f32.mrf.mxu1 }
 0x312   : > { %v4100_v20 = vrot.slane %v4099_v17, 4  ;;  %v6076_v21 = vpop.f32.mrf.mxu0 }
 0x313   : > { %v4108_v22 = vsel %vm1155_vm1, %v4107_v18, 0.0  ;;  %v6096_v23 = vpop.f32.mrf.mxu1 }
 0x314   : > { %v4101_v24 = vadd.f32 %v4100_v20, %v4099_v17  ;;  %v4109_v25 = vrot.slane %v4108_v22, 4 }
 0x316   : > { %v4102_v26 = vrot.slane %v4101_v24, 2  ;;  %v4110_v27 = vadd.f32 %v4109_v25, %v4108_v22 }
 0x318   : > { %v4103_v28 = vadd.f32 %v4102_v26, %v4101_v24  ;;  %v4111_v29 = vrot.slane %v4110_v27, 2 }
 0x31a   : > { %v4104_v30 = vrot.slane %v4103_v28, 1  ;;  %v4112_v31 = vadd.f32 %v4111_v29, %v4110_v27 }
 0x31c   : > { %v4105_v32 = vadd.f32 %v4104_v30, %v4103_v28  ;;  %v4113_v33 = vrot.slane %v4112_v31, 1 }
 0x31e   : > { %v4106_v34 = vadd.f32 %v4105_v32, %v3125_v41  ;;  %v4114_v35 = vadd.f32 %v4113_v33, %v4112_v31 }
 0x320   : > { %v4115_v36 = vadd.f32 %v4114_v35, %v3134_v43 }
 0x322   : > { %v4117_v37 = vsel %vm4116_vm2, %v4106_v34, %v4115_v36 }
 0x323   : > { %4118 = vst [vmem:[%s181_s4] sm:$0x3] %v4117_v37 }
 0x324 PF: > { %s14_s12 = sadd.s32 1, %s6402_s12  }
 0x325   : > { %p11_p4 = scmp.ge.s32.totalorder %s14_s12, 4  }
 0x327   :  { %13 = sbr.rel (!%p11_p4) target bundleno = 1 (0x1), region = 86 }

// kernel: resnet_forward.36
= control target key start
LH: loop header
LB: loop body
LE: loop exit
PB: predicated region body
PF: predicated region fallthrough
CT: control target
= control target key end

     0   :  { %v73_v7 = vmov 1966171168   ;;  %v33_v9 = vlaneseq  ;;  %s114_s1 = inlined_call_operand.vmem [shape: f32[1,2,128], index: 1, kind: input, shape index: {}]   ;;  %s115_s2 = inlined_call_operand.vmem [shape: f32[1,128], index: 2, kind: input, shape index: {}]   ;;  %s116_s0 = inlined_call_operand.vmem [shape: f32[8,128], index: 0, kind: input, shape index: {}]   ;;  %s117_s3 = inlined_call_operand.vmem [shape: f32[1,128], index: 3, kind: input, shape index: {}]   ;;  %s118_s4 = inlined_call_operand.vmem [shape: f32[8,128], index: 4, kind: output, shape index: {}]  }
   0x1   :  { %v17_v0 = vld [vmem:[%s114_s1] sm:$0x3]  ;;  %v31_v8 = vunpack.c.l.s4 %v73_v7 }
   0x2   :  { %v19_v1 = vmul.f32 0.125, %v17_v0  ;;  %v34_v11 = vshrl.u32 %v33_v9, 7  ;;  %v26_v16 = vld [vmem:[%s115_s2] sm:$0x1] }
   0x3   :  { %v32_v10 = vunpack.c.0.s8 %v31_v8  ;;  %v47_v20 = vld [vmem:[%s117_s3] sm:$0x1] }
   0x4   :  { %v20_v2 = vmul.f32 %v19_v1, %v19_v1  ;;  %v54_v18 = vsub.s32 0, %v34_v11  ;;  %v50_v21 = vld [vmem:[%s116_s0] sm:$0xff] }
   0x5   :  { %v35_v12 = vsub.s32 %v32_v10, %v34_v11 }
   0x6   :  { %v22_v3 = vrot.slane %v20_v2, 7 }
   0x8   :  { %v24_v4 = vsub.f32 %v19_v1, %v22_v3 }
   0xa   :  { %v25_v5 = vmax.f32 %v24_v4, 0.0 }
   0xc   :  { %v27_v6 = vadd.f32 1e-05, %v25_v5 }
   0xe   :  { %71 = vrsqrt.f32 %v27_v6 }
  0x1b   :  { %v72_v13 = vpop.eup %71 }
  0x1c   :  { %v36_v14 = vrot.slane %v72_v13, %v35_v12 }
  0x1e   :  { %v37_v15 = vcombine.high %v36_v14, %v36_v14 }
  0x20   :  { %v44_v17 = vrot.slane %v37_v15, %v35_v12 }
  0x22   :  { %v46_v19 = vmul.f32 %v44_v17, %v26_v16 }
  0x24   :  { %v48_v22 = vmul.f32 %v46_v19, %v19_v1  ;;  %v55_v23 = vrot.slane %v46_v19, %v54_v18 }
  0x26   :  { %v49_v24 = vsub.f32 %v47_v20, %v48_v22  ;;  %v57_v25 = vmul.f32 %v55_v23, %v50_v21 }
  0x28   :  { %v62_v26 = vrot.slane %v49_v24, %v54_v18 }
  0x2a   :  { %v64_v27 = vadd.f32 %v62_v26, %v57_v25 }
  0x2c   :  { %65 = vst [vmem:[%s118_s4] sm:$0xff] %v64_v27 }

// kernel: resnet_forward.34
= control target key start
LH: loop header
LB: loop body
LE: loop exit
PB: predicated region body
PF: predicated region fallthrough
CT: control target
= control target key end

     0   :  { %v74_v7 = vmov 1966171168   ;;  %v33_v9 = vlaneseq  ;;  %s115_s1 = inlined_call_operand.vmem [shape: f32[1,2,128], index: 1, kind: input, shape index: {}]   ;;  %s116_s2 = inlined_call_operand.vmem [shape: f32[1,128], index: 2, kind: input, shape index: {}]   ;;  %s117_s0 = inlined_call_operand.vmem [shape: f32[8,128], index: 0, kind: input, shape index: {}]   ;;  %s118_s3 = inlined_call_operand.vmem [shape: f32[1,128], index: 3, kind: input, shape index: {}]   ;;  %s119_s4 = inlined_call_operand.vmem [shape: f32[8,128], index: 4, kind: output, shape index: {}]  }
   0x1   :  { %v17_v0 = vld [vmem:[%s115_s1] sm:$0x3]  ;;  %v31_v8 = vunpack.c.l.s4 %v74_v7 }
   0x2   :  { %v19_v1 = vmul.f32 0.125, %v17_v0  ;;  %v34_v11 = vshrl.u32 %v33_v9, 7  ;;  %v26_v16 = vld [vmem:[%s116_s2] sm:$0x1] }
   0x3   :  { %v32_v10 = vunpack.c.0.s8 %v31_v8  ;;  %v47_v20 = vld [vmem:[%s118_s3] sm:$0x1] }
   0x4   :  { %v20_v2 = vmul.f32 %v19_v1, %v19_v1  ;;  %v54_v18 = vsub.s32 0, %v34_v11  ;;  %v50_v21 = vld [vmem:[%s117_s0] sm:$0xff] }
   0x5   :  { %v35_v12 = vsub.s32 %v32_v10, %v34_v11 }
   0x6   :  { %v22_v3 = vrot.slane %v20_v2, 7 }
   0x8   :  { %v24_v4 = vsub.f32 %v19_v1, %v22_v3 }
   0xa   :  { %v25_v5 = vmax.f32 %v24_v4, 0.0 }
   0xc   :  { %v27_v6 = vadd.f32 1e-05, %v25_v5 }
   0xe   :  { %72 = vrsqrt.f32 %v27_v6 }
  0x1b   :  { %v73_v13 = vpop.eup %72 }
  0x1c   :  { %v36_v14 = vrot.slane %v73_v13, %v35_v12 }
  0x1e   :  { %v37_v15 = vcombine.high %v36_v14, %v36_v14 }
  0x20   :  { %v44_v17 = vrot.slane %v37_v15, %v35_v12 }
  0x22   :  { %v46_v19 = vmul.f32 %v44_v17, %v26_v16 }
  0x24   :  { %v48_v22 = vmul.f32 %v46_v19, %v19_v1  ;;  %v55_v23 = vrot.slane %v46_v19, %v54_v18 }
  0x26   :  { %v49_v24 = vsub.f32 %v47_v20, %v48_v22  ;;  %v57_v25 = vmul.f32 %v55_v23, %v50_v21 }
  0x28   :  { %v62_v26 = vrot.slane %v49_v24, %v54_v18 }
  0x2a   :  { %v64_v27 = vadd.f32 %v62_v26, %v57_v25 }
  0x2c   :  { %v65_v28 = vmax.f32 %v64_v27, 0.0 }
  0x2e   :  { %66 = vst [vmem:[%s119_s4] sm:$0xff] %v65_v28 }

// kernel: resnet_forward.33
= control target key start
LH: loop header
LB: loop body
LE: loop exit
PB: predicated region body
PF: predicated region fallthrough
CT: control target
= control target key end

     0   :  { %vm1134_vm0 = vmmov 0   ;;  %vm841_vm1 = vcmask 1040384   ;;  %s1392_s1 = inlined_call_operand.vmem [shape: bf16[1152,128], index: 1, kind: input, shape index: {}]   ;;  %s1393_s0 = inlined_call_operand.vmem [shape: bf16[8,1152], index: 0, kind: input, shape index: {}]   ;;  %s1394_s2 = inlined_call_operand.vmem [shape: f32[8,128], index: 2, kind: output, shape index: {0}]   ;;  %s1395_s3 = inlined_call_operand.vmem [shape: f32[1,2,128], index: 3, kind: output, shape index: {1}]  }
   0x1   :  { %v1052_v0 = vld [vmem:[%s1392_s1 + $0x78] sm:$0xff]   ;;  %v1056_v4 = vld [vmem:[%s1392_s1 + $0x70] sm:$0xff]   ;;  %v1060_v8 = vld [vmem:[%s1392_s1 + $0x68] sm:$0xff]  }
   0x2   :  { %v1053_v1 = vld [vmem:[%s1392_s1 + $0xf8] sm:$0xff]   ;;  %933 = vmatprep.subr.bf16.mxu0 %v1052_v0  ;;  %v1057_v5 = vld [vmem:[%s1392_s1 + $0xf0] sm:$0xff]   ;;  %v1061_v9 = vld [vmem:[%s1392_s1 + $0xe8] sm:$0xff]  }
   0x3   :  { %v1054_v2 = vld [vmem:[%s1392_s1 + $0x38] sm:$0xff]   ;;  %955 = vmatprep.subr.bf16.mxu1 %v1053_v1  ;;  %v1058_v6 = vld [vmem:[%s1392_s1 + $0x30] sm:$0xff]   ;;  %v1062_v10 = vld [vmem:[%s1392_s1 + $0x28] sm:$0xff]  }
   0x4   :  { %v1055_v3 = vld [vmem:[%s1392_s1 + $0xb8] sm:$0xff]   ;;  %934 = vmatpush3.bf16.msra.mxu0 %v1054_v2  ;;  %v1059_v7 = vld [vmem:[%s1392_s1 + $0xb0] sm:$0xff]   ;;  %v1063_v11 = vld [vmem:[%s1392_s1 + $0xa8] sm:$0xff]  }
   0x5   :  { %956 = vmatpush3.bf16.msra.mxu1 %v1055_v3  ;;  %935 = vmatprep.subr.bf16.mxu0 %v1056_v4  ;;  %v1064_v12 = vld [vmem:[%s1392_s1 + $0x60] sm:$0xff]   ;;  %v1068_v16 = vld [vmem:[%s1392_s1 + $0x58] sm:$0xff]   ;;  %v1072_v20 = vld [vmem:[%s1392_s1 + $0x50] sm:$0xff]  }
   0x6   :  { %957 = vmatprep.subr.bf16.mxu1 %v1057_v5  ;;  %v1065_v13 = vld [vmem:[%s1392_s1 + $0xe0] sm:$0xff]   ;;  %v1069_v17 = vld [vmem:[%s1392_s1 + $0xd8] sm:$0xff]   ;;  %v1073_v21 = vld [vmem:[%s1392_s1 + $0xd0] sm:$0xff]  }
   0x7   :  { %v1066_v14 = vld [vmem:[%s1392_s1 + $0x20] sm:$0xff]   ;;  %v1070_v18 = vld [vmem:[%s1392_s1 + $0x18] sm:$0xff]   ;;  %v1074_v22 = vld [vmem:[%s1392_s1 + $0x10] sm:$0xff]  }
   0x8   :  { %936 = vmatpush3.bf16.msra.mxu0 %v1058_v6  ;;  %v1067_v15 = vld [vmem:[%s1392_s1 + $0xa0] sm:$0xff]   ;;  %v1071_v19 = vld [vmem:[%s1392_s1 + $0x98] sm:$0xff]   ;;  %v1075_v23 = vld [vmem:[%s1392_s1 + $0x90] sm:$0xff]  }
   0x9   :  { %958 = vmatpush3.bf16.msra.mxu1 %v1059_v7  ;;  %937 = vmatprep.subr.bf16.mxu0 %v1060_v8  ;;  %v1076_v24 = vld [vmem:[%s1392_s1 + $0x48] sm:$0xff]   ;;  %v1080_v28 = vld [vmem:[%s1392_s1 + $0x40] sm:$0xff]   ;;  %v1088_v38 = vld [vmem:[%s1392_s1 + $0x178] sm:$0xff]  }
   0xa   :  { %959 = vmatprep.subr.bf16.mxu1 %v1061_v9  ;;  %v1077_v25 = vld [vmem:[%s1392_s1 + $0xc8] sm:$0xff]   ;;  %v1081_v29 = vld [vmem:[%s1392_s1 + $0xc0] sm:$0xff]   ;;  %v1089_v39 = vld [vmem:[%s1392_s1 + $0x138] sm:$0xff]  }
   0xb   :  { %v1078_v26 = vld [vmem:[%s1392_s1 + $0x8] sm:$0xff]   ;;  %v1082_v30 = vld [vmem:[%s1392_s1] sm:$0xff]   ;;  %v1090_v40 = vld [vmem:[%s1392_s1 + $0x1f8] sm:$0xff]  }
   0xc   :  { %938 = vmatpush3.bf16.msra.mxu0 %v1062_v10  ;;  %v1079_v27 = vld [vmem:[%s1392_s1 + $0x88] sm:$0xff]   ;;  %v1083_v31 = vld [vmem:[%s1392_s1 + $0x80] sm:$0xff]   ;;  %v1091_v41 = vld [vmem:[%s1392_s1 + $0x1b8] sm:$0xff]  }
   0xd   :  { %960 = vmatpush3.bf16.msra.mxu1 %v1063_v11  ;;  %939 = vmatprep.subr.bf16.mxu0 %v1064_v12  ;;  %v14_v32 = vld [vmem:[%s1393_s0] sm:$0xff]  ;;  %v15_v33 = vld [vmem:[%s1393_s0 + $0x8] sm:$0xff]  ;;  %v1092_v42 = vld [vmem:[%s1392_s1 + $0x170] sm:$0xff]  }
   0xe   :  { %961 = vmatprep.subr.bf16.mxu1 %v1065_v13  ;;  %v852_v34 = vcombine.low %v14_v32, %v14_v32  ;;  %v853_v35 = vcombine.high %v14_v32, %v14_v32  ;;  %v854_v36 = vcombine.low %v15_v33, %v15_v33  ;;  %v855_v37 = vcombine.high %v15_v33, %v15_v33  ;;  %v1093_v43 = vld [vmem:[%s1392_s1 + $0x130] sm:$0xff]   ;;  %v1096_v46 = vld [vmem:[%s1392_s1 + $0x168] sm:$0xff]   ;;  %v1100_v50 = vld [vmem:[%s1392_s1 + $0x160] sm:$0xff]  }
   0xf   :  { %v1094_v44 = vld [vmem:[%s1392_s1 + $0x1f0] sm:$0xff]   ;;  %v1097_v47 = vld [vmem:[%s1392_s1 + $0x128] sm:$0xff]   ;;  %v1101_v51 = vld [vmem:[%s1392_s1 + $0x120] sm:$0xff]   ;;  %v1133_v13 = vmov 0.0  }
  0x10   :  { %940 = vmatpush3.bf16.msra.mxu0 %v1066_v14  ;;  %659 = vmatprep.mubr.bf16.mxu0 %v853_v35  ;;  %v1095_v45 = vld [vmem:[%s1392_s1 + $0x1b0] sm:$0xff]   ;;  %v1098_v48 = vld [vmem:[%s1392_s1 + $0x1e8] sm:$0xff]   ;;  %v1102_v52 = vld [vmem:[%s1392_s1 + $0x1e0] sm:$0xff]  }
  0x11   :  { %962 = vmatpush3.bf16.msra.mxu1 %v1067_v15  ;;  %941 = vmatprep.subr.bf16.mxu0 %v1068_v16  ;;  %v1099_v49 = vld [vmem:[%s1392_s1 + $0x1a8] sm:$0xff]   ;;  %v1103_v53 = vld [vmem:[%s1392_s1 + $0x1a0] sm:$0xff]   ;;  %v1104_v54 = vld [vmem:[%s1392_s1 + $0x158] sm:$0xff]  }
  0x12   :  { %963 = vmatprep.subr.bf16.mxu1 %v1069_v17  ;;  %699 = vmatprep.mubr.bf16.mxu1 %v855_v37  ;;  %v1105_v55 = vld [vmem:[%s1392_s1 + $0x118] sm:$0xff]   ;;  %v1108_v58 = vld [vmem:[%s1392_s1 + $0x150] sm:$0xff]   ;;  %v1112_v62 = vld [vmem:[%s1392_s1 + $0x148] sm:$0xff]  }
  0x13   :  { %v1106_v56 = vld [vmem:[%s1392_s1 + $0x1d8] sm:$0xff]   ;;  %v1109_v59 = vld [vmem:[%s1392_s1 + $0x110] sm:$0xff]   ;;  %v1113_v63 = vld [vmem:[%s1392_s1 + $0x108] sm:$0xff]  }
  0x14   :  { %942 = vmatpush3.bf16.msra.mxu0 %v1070_v18  ;;  %v1107_v57 = vld [vmem:[%s1392_s1 + $0x198] sm:$0xff]   ;;  %v1110_v60 = vld [vmem:[%s1392_s1 + $0x1d0] sm:$0xff]   ;;  %v1114_v0 = vld [vmem:[%s1392_s1 + $0x1c8] sm:$0xff]  }
  0x15   :  { %964 = vmatpush3.bf16.msra.mxu1 %v1071_v19  ;;  %943 = vmatprep.subr.bf16.mxu0 %v1072_v20  ;;  %v1111_v61 = vld [vmem:[%s1392_s1 + $0x190] sm:$0xff]   ;;  %v1115_v1 = vld [vmem:[%s1392_s1 + $0x188] sm:$0xff]   ;;  %v1116_v2 = vld [vmem:[%s1392_s1 + $0x140] sm:$0xff]  }
  0x16   :  { %965 = vmatprep.subr.bf16.mxu1 %v1073_v21  ;;  %v1117_v3 = vld [vmem:[%s1392_s1 + $0x100] sm:$0xff]   ;;  %v16_v5 = vld [vmem:[%s1393_s0 + $0x10] sm:$0xff]  ;;  %v17_v9 = vld [vmem:[%s1393_s0 + $0x18] sm:$0xff] }
  0x17   :  { %v1118_v4 = vld [vmem:[%s1392_s1 + $0x1c0] sm:$0xff]   ;;  %v857_v6 = vcombine.high %v16_v5, %v16_v5  ;;  %v856_v8 = vcombine.low %v16_v5, %v16_v5  ;;  %v858_v10 = vcombine.low %v17_v9, %v17_v9  ;;  %v859_v11 = vcombine.high %v17_v9, %v17_v9  ;;  %v1124_v12 = vld [vmem:[%s1392_s1 + $0x238] sm:$0xff]   ;;  %v1125_v14 = vld [vmem:[%s1392_s1 + $0x230] sm:$0xff]  }
  0x18   :  { %944 = vmatpush3.bf16.msra.mxu0 %v1074_v22  ;;  %v1121_v7 = vld [vmem:[%s1392_s1 + $0x180] sm:$0xff]   ;;  %v1126_v15 = vld [vmem:[%s1392_s1 + $0x228] sm:$0xff]   ;;  %v1128_v17 = vld [vmem:[%s1392_s1 + $0x218] sm:$0xff]  }
  0x19   :  { %966 = vmatpush3.bf16.msra.mxu1 %v1075_v23  ;;  %945 = vmatprep.subr.bf16.mxu0 %v1076_v24  ;;  %v1127_v16 = vld [vmem:[%s1392_s1 + $0x220] sm:$0xff]   ;;  %v1129_v18 = vld [vmem:[%s1392_s1 + $0x210] sm:$0xff]   ;;  %v1130_v19 = vld [vmem:[%s1392_s1 + $0x208] sm:$0xff]  }
  0x1a   :  { %967 = vmatprep.subr.bf16.mxu1 %v1077_v25  ;;  %v1131_v20 = vld [vmem:[%s1392_s1 + $0x200] sm:$0xff]  }
  0x1b   :  { %v1132_v21 = vld [vmem:[%s1393_s0 + $0x20] ss:$0 sps:$4 sm:$0xff]  }
  0x1c   :  { %946 = vmatpush3.bf16.msra.mxu0 %v1078_v26 }
  0x1d   :  { %968 = vmatpush3.bf16.msra.mxu1 %v1079_v27  ;;  %947 = vmatprep.subr.bf16.mxu0 %v1080_v28 }
  0x1e   :  { %969 = vmatprep.subr.bf16.mxu1 %v1081_v29 }
  0x20   :  { %948 = vmatpush3.bf16.msra.mxu0 %v1082_v30 }
  0x21   :  { %970 = vmatpush3.bf16.msra.mxu1 %v1083_v31  ;;  %977 = vmatprep.subr.bf16.mxu0 %v1088_v38 }
  0x22   :  { %999 = vmatprep.subr.bf16.mxu1 %v1090_v40 }
  0x23   :  { %660 = vmatmul.mubr.bf16.vlgmr.msra.gmra.mxu0 %v852_v34 }
  0x24   :  { %700 = vmatmul.mubr.bf16.vlgmr.msra.gmra.mxu1 %v854_v36  ;;  %978 = vmatpush3.bf16.msra.mxu0 %v1089_v39 }
  0x25   :  { %1000 = vmatpush3.bf16.msra.mxu1 %v1091_v41  ;;  %979 = vmatprep.subr.bf16.mxu0 %v1092_v42 }
  0x26   :  { %1001 = vmatprep.subr.bf16.mxu1 %v1094_v44  ;;  %739 = vmatprep.mubr.bf16.mxu0 %v857_v6 }
  0x27   :  { %779 = vmatprep.mubr.bf16.mxu1 %v859_v11 }
  0x28   :  { %980 = vmatpush3.bf16.msra.mxu0 %v1093_v43 }
  0x29   :  { %1002 = vmatpush3.bf16.msra.mxu1 %v1095_v45  ;;  %981 = vmatprep.subr.bf16.mxu0 %v1096_v46 }
  0x2a   :  { %1003 = vmatprep.subr.bf16.mxu1 %v1098_v48 }
  0x2c   :  { %982 = vmatpush3.bf16.msra.mxu0 %v1097_v47 }
  0x2d   :  { %1004 = vmatpush3.bf16.msra.mxu1 %v1099_v49  ;;  %983 = vmatprep.subr.bf16.mxu0 %v1100_v50 }
  0x2e   :  { %1005 = vmatprep.subr.bf16.mxu1 %v1102_v52 }
  0x30   :  { %984 = vmatpush3.bf16.msra.mxu0 %v1101_v51 }
  0x31   :  { %1006 = vmatpush3.bf16.msra.mxu1 %v1103_v53  ;;  %985 = vmatprep.subr.bf16.mxu0 %v1104_v54 }
  0x32   :  { %1007 = vmatprep.subr.bf16.mxu1 %v1106_v56 }
  0x34   :  { %986 = vmatpush3.bf16.msra.mxu0 %v1105_v55 }
  0x35   :  { %1008 = vmatpush3.bf16.msra.mxu1 %v1107_v57  ;;  %987 = vmatprep.subr.bf16.mxu0 %v1108_v58 }
  0x36   :  { %1009 = vmatprep.subr.bf16.mxu1 %v1110_v60 }
  0x38   :  { %988 = vmatpush3.bf16.msra.mxu0 %v1109_v59 }
  0x39   :  { %1010 = vmatpush3.bf16.msra.mxu1 %v1111_v61  ;;  %989 = vmatprep.subr.bf16.mxu0 %v1112_v62 }
  0x3a   :  { %1011 = vmatprep.subr.bf16.mxu1 %v1114_v0 }
  0x3c   :  { %990 = vmatpush3.bf16.msra.mxu0 %v1113_v63 }
  0x3d   :  { %1012 = vmatpush3.bf16.msra.mxu1 %v1115_v1  ;;  %991 = vmatprep.subr.bf16.mxu0 %v1116_v2 }
  0x3e   :  { %1013 = vmatprep.subr.bf16.mxu1 %v1118_v4 }
  0x40   :  { %992 = vmatpush3.bf16.msra.mxu0 %v1117_v3 }
  0x41   :  { %1014 = vmatpush3.bf16.msra.mxu1 %v1121_v7  ;;  %1030 = vmatprep.subr.bf16.mxu0 %v1133_v13 }
  0x43   :  { %740 = vmatmul.mubr.bf16.vlgmr.msra.gmra.mxu0 %v856_v8 }
  0x44   :  { %1031 = vmatpush3.bf16.msra.mxu0 %v1124_v12  ;;  %780 = vmatmul.mubr.bf16.vlgmr.msra.gmra.mxu1 %v858_v10 }
  0x45   :  { %1032 = vmatprep.subr.bf16.mxu0 %v1133_v13  ;;  %1046 = vmatprep.mubr.msk.bf16.mxu0 %vm1134_vm0, %v1133_v13 }
  0x48   :  { %1033 = vmatpush3.bf16.msra.mxu0 %v1125_v14 }
  0x49   :  { %1034 = vmatprep.subr.bf16.mxu0 %v1133_v13 }
  0x4c   :  { %1035 = vmatpush3.bf16.msra.mxu0 %v1126_v15 }
  0x4d   :  { %1036 = vmatprep.subr.bf16.mxu0 %v1133_v13 }
  0x50   :  { %1037 = vmatpush3.bf16.msra.mxu0 %v1127_v16 }
  0x51   :  { %1038 = vmatprep.subr.bf16.mxu0 %v1133_v13 }
  0x54   :  { %1039 = vmatpush3.bf16.msra.mxu0 %v1128_v17 }
  0x55   :  { %1040 = vmatprep.subr.bf16.mxu0 %v1133_v13 }
  0x58   :  { %1041 = vmatpush3.bf16.msra.mxu0 %v1129_v18 }
  0x59   :  { %1042 = vmatprep.subr.bf16.mxu0 %v1133_v13 }
  0x5c   :  { %1043 = vmatpush3.bf16.msra.mxu0 %v1130_v19 }
  0x5d   :  { %1044 = vmatprep.subr.bf16.mxu0 %v1133_v13 }
  0x60   :  { %1045 = vmatpush3.bf16.msra.mxu0 %v1131_v20 }
  0x63   :  { %1047 = vmatmul.mubr.bf16.vlgmr.msra.gmra.mxu0 %v1132_v21 }
  0xe3   :  { %v949_v22 = vpop.f32.mrf.mxu0 }
  0xe4   :  { %v971_v23 = vpop.f32.mrf.mxu1 }
  0xe5   :  { %v950_v24 = vpop.f32.mrf.mxu0 }
  0xe6   :  { %v972_v25 = vpop.f32.mrf.mxu1  ;;  %v951_v38 = vadd.f32 %v950_v24, %v949_v22 }
  0xe7   :  { %v952_v26 = vpop.f32.mrf.mxu0  ;;  %v973_v39 = vadd.f32 %v972_v25, %v971_v23 }
  0xe8   :  { %v974_v27 = vpop.f32.mrf.mxu1 }
  0xe9   :  { %v953_v28 = vpop.f32.mrf.mxu0  ;;  %v702_v41 = vadd.f32 %v973_v39, %v951_v38 }
  0xea   :  { %v975_v29 = vpop.f32.mrf.mxu1 }
 0x103   :  { %v993_v30 = vpop.f32.mrf.mxu0 }
 0x104   :  { %v1015_v31 = vpop.f32.mrf.mxu1 }
 0x105   :  { %v994_v32 = vpop.f32.mrf.mxu0 }
 0x106   :  { %v1016_v33 = vpop.f32.mrf.mxu1  ;;  %v995_v40 = vadd.f32 %v994_v32, %v993_v30 }
 0x107   :  { %v996_v34 = vpop.f32.mrf.mxu0  ;;  %v1017_v43 = vadd.f32 %v1016_v33, %v1015_v31 }
 0x108   :  { %v1018_v35 = vpop.f32.mrf.mxu1  ;;  %v742_v42 = vadd.f32 %v995_v40, %v702_v41 }
 0x109   :  { %v997_v36 = vpop.f32.mrf.mxu0 }
 0x10a   :  { %v1019_v37 = vpop.f32.mrf.mxu1  ;;  %v782_v44 = vadd.f32 %v1017_v43, %v742_v42 }
 0x123   :  { %v821_v45 = vpop.f32.mrf.mxu0 }
 0x124   :  { %v822_v46 = vadd.f32 %v821_v45, %v782_v44 }
 0x125   :  { %v1048_v47 = vpop.f32.mrf.mxu0 }
 0x126   :  { %827 = vst [vmem:[%s1394_s2] sm:$0xff] %v822_v46  ;;  %v828_v48 = vrot.slane %v822_v46, 4  ;;  %v834_v49 = vmul.f32 %v822_v46, %v822_v46 }
 0x127   :  { %v824_v50 = vpop.f32.mrf.mxu0 }
 0x128   :  { %v829_v51 = vadd.f32 %v828_v48, %v822_v46  ;;  %v835_v52 = vrot.slane %v834_v49, 4 }
 0x129   :  { %v1049_v53 = vpop.f32.mrf.mxu0 }
 0x12a   :  { %v830_v54 = vrot.slane %v829_v51, 2  ;;  %v836_v55 = vadd.f32 %v835_v52, %v834_v49 }
 0x12c   :  { %v831_v56 = vadd.f32 %v830_v54, %v829_v51  ;;  %v837_v57 = vrot.slane %v836_v55, 2 }
 0x12e   :  { %v832_v58 = vrot.slane %v831_v56, 1  ;;  %v838_v59 = vadd.f32 %v837_v57, %v836_v55 }
 0x130   :  { %v839_v60 = vrot.slane %v838_v59, 1  ;;  %v833_v61 = vadd.f32 %v832_v58, %v831_v56 }
 0x132   :  { %v840_v62 = vadd.f32 %v839_v60, %v838_v59 }
 0x134   :  { %v842_v63 = vsel %vm841_vm1, %v833_v61, %v840_v62 }
 0x135   :  { %843 = vst [vmem:[%s1395_s3] sm:$0x3] %v842_v63 }

// kernel: resnet_forward.38
= control target key start
LH: loop header
LB: loop body
LE: loop exit
PB: predicated region body
PF: predicated region fallthrough
CT: control target
= control target key end

     0   :  { %vm22_vm0 = vcmask 1041408   ;;  %v83_v11 = vmov 1966171168   ;;  %v40_v13 = vlaneseq  ;;  %s135_s1 = inlined_call_operand.vmem [shape: f32[2,2,128], index: 1, kind: input, shape index: {}]   ;;  %s136_s2 = inlined_call_operand.vmem [shape: f32[1,128], index: 2, kind: input, shape index: {}]   ;;  %s137_s0 = inlined_call_operand.vmem [shape: f32[8,128], index: 0, kind: input, shape index: {}]   ;;  %s138_s3 = inlined_call_operand.vmem [shape: f32[1,128], index: 3, kind: input, shape index: {}]   ;;  %s139_s4 = inlined_call_operand.vmem [shape: f32[8,128], index: 4, kind: input, shape index: {}]   ;;  %s140_s5 = inlined_call_operand.vmem [shape: f32[8,128], index: 5, kind: output, shape index: {}]  }
   0x1   :  { %v20_v0 = vld [vmem:[%s135_s1] sm:$0x3]  ;;  %v21_v1 = vld [vmem:[%s135_s1 + $0x2] sm:$0x3]  ;;  %v38_v12 = vunpack.c.l.s4 %v83_v11 }
   0x2   :  { %v23_v2 = vsel %vm22_vm0, %v20_v0, 0.0  ;;  %v24_v3 = vsel %vm22_vm0, %v21_v1, 0.0  ;;  %v41_v15 = vshrl.u32 %v40_v13, 7  ;;  %v33_v20 = vld [vmem:[%s136_s2] sm:$0x1] }
   0x3   :  { %v25_v4 = vadd.f32 %v24_v3, %v23_v2  ;;  %v39_v14 = vunpack.c.0.s8 %v38_v12  ;;  %v54_v24 = vld [vmem:[%s138_s3] sm:$0x1] }
   0x4   :  { %v61_v22 = vsub.s32 0, %v41_v15  ;;  %v57_v25 = vld [vmem:[%s137_s0] sm:$0xff] }
   0x5   :  { %v26_v5 = vmul.f32 0.125, %v25_v4  ;;  %v42_v16 = vsub.s32 %v39_v14, %v41_v15  ;;  %v72_v31 = vld [vmem:[%s139_s4] sm:$0xff] }
   0x7   :  { %v27_v6 = vmul.f32 %v26_v5, %v26_v5 }
   0x9   :  { %v29_v7 = vrot.slane %v27_v6, 7 }
   0xb   :  { %v31_v8 = vsub.f32 %v26_v5, %v29_v7 }
   0xd   :  { %v32_v9 = vmax.f32 %v31_v8, 0.0 }
   0xf   :  { %v34_v10 = vadd.f32 1e-05, %v32_v9 }
  0x11   :  { %81 = vrsqrt.f32 %v34_v10 }
  0x1e   :  { %v82_v17 = vpop.eup %81 }
  0x1f   :  { %v43_v18 = vrot.slane %v82_v17, %v42_v16 }
  0x21   :  { %v44_v19 = vcombine.high %v43_v18, %v43_v18 }
  0x23   :  { %v51_v21 = vrot.slane %v44_v19, %v42_v16 }
  0x25   :  { %v53_v23 = vmul.f32 %v51_v21, %v33_v20 }
  0x27   :  { %v55_v26 = vmul.f32 %v53_v23, %v26_v5  ;;  %v62_v27 = vrot.slane %v53_v23, %v61_v22 }
  0x29   :  { %v56_v28 = vsub.f32 %v54_v24, %v55_v26  ;;  %v64_v29 = vmul.f32 %v62_v27, %v57_v25 }
  0x2b   :  { %v69_v30 = vrot.slane %v56_v28, %v61_v22 }
  0x2d   :  { %v71_v32 = vadd.f32 %v69_v30, %v64_v29 }
  0x2f   :  { %v73_v33 = vadd.f32 %v72_v31, %v71_v32 }
  0x31   :  { %v74_v34 = vmax.f32 %v73_v33, 0.0 }
  0x33   :  { %75 = vst [vmem:[%s140_s5] sm:$0xff] %v74_v34 }

// kernel: resnet_forward.37
= control target key start
LH: loop header
LB: loop body
LE: loop exit
PB: predicated region body
PF: predicated region fallthrough
CT: control target
= control target key end

     0   :  { %s3379_s12 = smov 0   ;;  %s4051_s0 = inlined_call_operand.vmem [shape: f32[2,4,4,128], index: 0, kind: input, shape index: {}]   ;;  %s4052_s1 = inlined_call_operand.vmem [shape: bf16[9,128,128], index: 1, kind: input, shape index: {}]   ;;  %s4053_s2 = inlined_call_operand.vmem [shape: f32[2,2,2,128], index: 2, kind: output, shape index: {0}]   ;;  %s4054_s3 = inlined_call_operand.vmem [shape: f32[2,2,128], index: 3, kind: output, shape index: {1}]  }
   0x1 LB: > { %s2243_s13 = sadd.s32 4294967295, %s3355_s12   ;;  %p2247_p0 = scmp.ge.s32.totalorder %s3355_s12, 1  ;;  %s3355_s12 = sphi %s3379_s12, %s14_s12  }
   0x2   : > { %p140_p1 = scmp.lt.s32.totalorder %s3355_s12, 3 }
   0x4   : > { %p141_p2 = pnand %p2247_p0, %p140_p1 }
   0x5   : > { %p168_p3 = scmp.lt.s32.totalorder (!%p141_p2), %s2243_s13, 1 }
   0x6   : > { %144 = sbr.rel (%p141_p2) target bundleno = 516 (0x204), region = 28 }
   0xb   : > { %v3205_v0 = vld [vmem:[%s4052_s1 + $0x78] sm:$0xff]   ;;  %v3357_v1 = vmov 0.0   ;;  %v3207_v3 = vld [vmem:[%s4052_s1 + $0x70] sm:$0xff]   ;;  %vm3358_vm0 = vmmov 0   ;;  %v3209_v5 = vld [vmem:[%s4052_s1 + $0x68] sm:$0xff]   ;;  %s4056_s13 = smov (!%p168_p3, %s2243_s13), 1 }
   0xc   : > { %2835 = vmatprep.subr.bf16.mxu0 %v3357_v1  ;;  %2855 = vmatprep.subr.bf16.mxu1 %v3357_v1  ;;  %v3206_v2 = vld [vmem:[%s4052_s1 + $0x38] sm:$0xff]   ;;  %v3208_v4 = vld [vmem:[%s4052_s1 + $0x30] sm:$0xff]   ;;  %v3210_v6 = vld [vmem:[%s4052_s1 + $0x28] sm:$0xff]   ;;  %s2671_s11 = sshll.u32 %s4056_s13, 4  ;;  %vm1155_vm1 = vcmask 1041408   ;;  %s2252_s19 = sshll.u32 %s4056_s13, 1 }
   0xd   : > { %2836 = vmatpush3.bf16.msra.mxu0 %v3205_v0  ;;  %2851 = vmatprep.mubr.msk.bf16.mxu0 %vm3358_vm0, %v3357_v1  ;;  %v3211_v7 = vld [vmem:[%s4052_s1 + $0x60] sm:$0xff]   ;;  %v3213_v9 = vld [vmem:[%s4052_s1 + $0x58] sm:$0xff]   ;;  %v3215_v11 = vld [vmem:[%s4052_s1 + $0x50] sm:$0xff]   ;;  %s3456_s20 = scalar_lea.vmem %s4051_s0, %s2671_s11  ;;  %vm2154_vm2 = vcmask 1040384   ;;  %s181_s23 = scalar_lea.vmem %s4054_s3, %s2252_s19 }
   0xe   : > { %2856 = vmatpush3.bf16.msra.mxu1 %v3206_v2  ;;  %2837 = vmatprep.subr.bf16.mxu0 %v3357_v1  ;;  %v3212_v8 = vld [vmem:[%s4052_s1 + $0x20] sm:$0xff]   ;;  %v3214_v10 = vld [vmem:[%s4052_s1 + $0x18] sm:$0xff]   ;;  %v3216_v12 = vld [vmem:[%s4052_s1 + $0x10] sm:$0xff]  }
   0xf   : > { %2857 = vmatprep.subr.bf16.mxu1 %v3357_v1  ;;  %2871 = vmatprep.mubr.msk.bf16.mxu1 %vm3358_vm0, %v3357_v1  ;;  %v3217_v13 = vld [vmem:[%s4052_s1 + $0x48] sm:$0xff]   ;;  %v3219_v15 = vld [vmem:[%s4052_s1 + $0x40] sm:$0xff]   ;;  %v3221_v21 = vld [vmem:[%s4052_s1 + $0xb8] sm:$0xff]  }
  0x10   : > { %v3218_v14 = vld [vmem:[%s4052_s1 + $0x8] sm:$0xff]   ;;  %v3220_v16 = vld [vmem:[%s4052_s1] sm:$0xff]   ;;  %v3222_v22 = vld [vmem:[%s4052_s1 + $0xf8] sm:$0xff]  }
  0x11   : > { %2838 = vmatpush3.bf16.msra.mxu0 %v3207_v3  ;;  %v201_v17 = vld [vmem:[%s3456_s20 + $0x1] sm:$0x3]  ;;  %v3223_v23 = vld [vmem:[%s4052_s1 + $0xb0] sm:$0xff]   ;;  %v3225_v25 = vld [vmem:[%s4052_s1 + $0xa8] sm:$0xff]  }
  0x12   : > { %2858 = vmatpush3.bf16.msra.mxu1 %v3208_v4  ;;  %2839 = vmatprep.subr.bf16.mxu0 %v3357_v1  ;;  %v183_v18 = vld [vmem:[%s3456_s20] sm:$0x3]  ;;  %v202_v19 = vpack.c.bf16 %v201_v17, %v201_v17  ;;  %v3224_v24 = vld [vmem:[%s4052_s1 + $0xf0] sm:$0xff]   ;;  %v3226_v26 = vld [vmem:[%s4052_s1 + $0xe8] sm:$0xff]  }
  0x13   : > { %2859 = vmatprep.subr.bf16.mxu1 %v3357_v1  ;;  %v184_v20 = vpack.c.bf16 %v183_v18, %v183_v18  ;;  %v3227_v27 = vld [vmem:[%s4052_s1 + $0xa0] sm:$0xff]   ;;  %v3229_v29 = vld [vmem:[%s4052_s1 + $0x98] sm:$0xff]   ;;  %v3231_v31 = vld [vmem:[%s4052_s1 + $0x90] sm:$0xff]  }
  0x14   : > { %v3228_v28 = vld [vmem:[%s4052_s1 + $0xe0] sm:$0xff]   ;;  %v3230_v30 = vld [vmem:[%s4052_s1 + $0xd8] sm:$0xff]   ;;  %v3232_v32 = vld [vmem:[%s4052_s1 + $0xd0] sm:$0xff]  }
  0x15   : > { %2840 = vmatpush3.bf16.msra.mxu0 %v3209_v5  ;;  %v3233_v33 = vld [vmem:[%s4052_s1 + $0x88] sm:$0xff]   ;;  %v3235_v35 = vld [vmem:[%s4052_s1 + $0x80] sm:$0xff]   ;;  %v3237_v41 = vld [vmem:[%s4052_s1 + $0x138] sm:$0xff]  }
  0x16   : > { %2860 = vmatpush3.bf16.msra.mxu1 %v3210_v6  ;;  %2841 = vmatprep.subr.bf16.mxu0 %v3357_v1  ;;  %v3234_v34 = vld [vmem:[%s4052_s1 + $0xc8] sm:$0xff]   ;;  %v3236_v36 = vld [vmem:[%s4052_s1 + $0xc0] sm:$0xff]   ;;  %v3238_v42 = vld [vmem:[%s4052_s1 + $0x178] sm:$0xff]  }
  0x17   : > { %2861 = vmatprep.subr.bf16.mxu1 %v3357_v1  ;;  %v396_v37 = vld [vmem:[%s3456_s20 + $0x2] sm:$0x3]  ;;  %v2309_v38 = vld [vmem:[%s3456_s20 + $0x4] sm:$0x3]  ;;  %v3239_v43 = vld [vmem:[%s4052_s1 + $0x130] sm:$0xff]  }
  0x18   : > { %v397_v39 = vpack.c.bf16 %v396_v37, %v396_v37  ;;  %v506_v40 = vpack.c.bf16 %v2309_v38, %v2309_v38  ;;  %v3240_v44 = vld [vmem:[%s4052_s1 + $0x170] sm:$0xff]   ;;  %v3241_v45 = vld [vmem:[%s4052_s1 + $0x128] sm:$0xff]   ;;  %v3243_v47 = vld [vmem:[%s4052_s1 + $0x120] sm:$0xff]  }
  0x19   : > { %2842 = vmatpush3.bf16.msra.mxu0 %v3211_v7  ;;  %v3242_v46 = vld [vmem:[%s4052_s1 + $0x168] sm:$0xff]   ;;  %v3244_v48 = vld [vmem:[%s4052_s1 + $0x160] sm:$0xff]   ;;  %v3245_v49 = vld [vmem:[%s4052_s1 + $0x118] sm:$0xff]  }
  0x1a   : > { %2862 = vmatpush3.bf16.msra.mxu1 %v3212_v8  ;;  %2843 = vmatprep.subr.bf16.mxu0 %v3357_v1  ;;  %v3246_v50 = vld [vmem:[%s4052_s1 + $0x158] sm:$0xff]   ;;  %v3247_v51 = vld [vmem:[%s4052_s1 + $0x110] sm:$0xff]   ;;  %v3249_v53 = vld [vmem:[%s4052_s1 + $0x108] sm:$0xff]  }
  0x1b   : > { %2863 = vmatprep.subr.bf16.mxu1 %v3357_v1  ;;  %v3248_v52 = vld [vmem:[%s4052_s1 + $0x150] sm:$0xff]   ;;  %v3250_v54 = vld [vmem:[%s4052_s1 + $0x148] sm:$0xff]   ;;  %v3251_v55 = vld [vmem:[%s4052_s1 + $0x100] sm:$0xff]  }
  0x1c   : > { %v3252_v56 = vld [vmem:[%s4052_s1 + $0x140] sm:$0xff]   ;;  %v3253_v61 = vld [vmem:[%s4052_s1 + $0x1b8] sm:$0xff]   ;;  %v3255_v63 = vld [vmem:[%s4052_s1 + $0x1b0] sm:$0xff]  }
  0x1d   : > { %2844 = vmatpush3.bf16.msra.mxu0 %v3213_v9  ;;  %v2334_v57 = vld [vmem:[%s3456_s20 + $0x5] sm:$0x3]  ;;  %v3254_v62 = vld [vmem:[%s4052_s1 + $0x1f8] sm:$0xff]   ;;  %v3256_v0 = vld [vmem:[%s4052_s1 + $0x1f0] sm:$0xff]  }
  0x1e   : > { %2864 = vmatpush3.bf16.msra.mxu1 %v3214_v10  ;;  %2845 = vmatprep.subr.bf16.mxu0 %v3357_v1  ;;  %v2359_v58 = vld [vmem:[%s3456_s20 + $0x6] sm:$0x3]  ;;  %v614_v59 = vpack.c.bf16 %v2334_v57, %v2334_v57  ;;  %v3257_v2 = vld [vmem:[%s4052_s1 + $0x1a8] sm:$0xff]   ;;  %v3261_v6 = vld [vmem:[%s4052_s1 + $0x198] sm:$0xff]  }
  0x1f   : > { %2865 = vmatprep.subr.bf16.mxu1 %v3357_v1  ;;  %v722_v60 = vpack.c.bf16 %v2359_v58, %v2359_v58  ;;  %v3258_v3 = vld [vmem:[%s4052_s1 + $0x1e8] sm:$0xff]   ;;  %v3259_v4 = vld [vmem:[%s4052_s1 + $0x1a0] sm:$0xff]   ;;  %v3262_v7 = vld [vmem:[%s4052_s1 + $0x1d8] sm:$0xff]  }
  0x20   : > { %v3260_v5 = vld [vmem:[%s4052_s1 + $0x1e0] sm:$0xff]   ;;  %v3263_v8 = vld [vmem:[%s4052_s1 + $0x190] sm:$0xff]   ;;  %v3265_v10 = vld [vmem:[%s4052_s1 + $0x188] sm:$0xff]  }
  0x21   : > { %2846 = vmatpush3.bf16.msra.mxu0 %v3215_v11  ;;  %v3264_v9 = vld [vmem:[%s4052_s1 + $0x1d0] sm:$0xff]   ;;  %v3266_v11 = vld [vmem:[%s4052_s1 + $0x1c8] sm:$0xff]   ;;  %v3269_v18 = vld [vmem:[%s4052_s1 + $0x238] sm:$0xff]  }
  0x22   : > { %2866 = vmatpush3.bf16.msra.mxu1 %v3216_v12  ;;  %2847 = vmatprep.subr.bf16.mxu0 %v3357_v1  ;;  %v3267_v12 = vld [vmem:[%s4052_s1 + $0x180] sm:$0xff]   ;;  %v3285_v38 = vld [vmem:[%s4052_s1 + $0x38] sm:$0xff]  }
  0x23   : > { %2867 = vmatprep.subr.bf16.mxu1 %v3357_v1  ;;  %v3301_v58 = vld [vmem:[%s4052_s1 + $0xf8] sm:$0xff]  }
  0x25   : > { %2848 = vmatpush3.bf16.msra.mxu0 %v3217_v13  ;;  %v3268_v13 = vld [vmem:[%s4052_s1 + $0x1c0] sm:$0xff]  }
  0x26   : > { %2868 = vmatpush3.bf16.msra.mxu1 %v3218_v14  ;;  %2849 = vmatprep.subr.bf16.mxu0 %v3357_v1  ;;  %v2384_v14 = vld [vmem:[%s3456_s20 + $0x8] sm:$0x3] }
  0x27   : > { %2869 = vmatprep.subr.bf16.mxu1 %v3357_v1 }
  0x29   : > { %2850 = vmatpush3.bf16.msra.mxu0 %v3219_v15  ;;  %v2409_v15 = vld [vmem:[%s3456_s20 + $0x9] sm:$0x3] }
  0x2a   : > { %2870 = vmatpush3.bf16.msra.mxu1 %v3220_v16  ;;  %2875 = vmatprep.subr.bf16.mxu0 %v3357_v1  ;;  %v831_v16 = vpack.c.bf16 %v2384_v14, %v2384_v14  ;;  %v939_v17 = vpack.c.bf16 %v2409_v15, %v2409_v15  ;;  %v3317_v15 = vld [vmem:[%s4052_s1 + $0x178] sm:$0xff]  }
  0x2b   : > { %2895 = vmatprep.subr.bf16.mxu1 %v3357_v1 }
  0x2c   : > { %2852 = vmatmul.mubr.bf16.vlgmr.msra.gmra.mxu0 %v202_v19  ;;  %v3270_v19 = vld [vmem:[%s4052_s1 + $0x78] sm:$0xff]  }
  0x2d   : > { %2872 = vmatmul.mubr.bf16.vlgmr.msra.gmra.mxu1 %v184_v20  ;;  %2876 = vmatpush3.bf16.msra.mxu0 %v3221_v21  ;;  %v3271_v20 = vld [vmem:[%s4052_s1 + $0x230] sm:$0xff]  }
  0x2e   : > { %2896 = vmatpush3.bf16.msra.mxu1 %v3222_v22  ;;  %2877 = vmatprep.subr.bf16.mxu0 %v3357_v1  ;;  %v3272_v21 = vld [vmem:[%s4052_s1 + $0x70] sm:$0xff]   ;;  %v3273_v22 = vld [vmem:[%s4052_s1 + $0x228] sm:$0xff]  }
  0x2f   : > { %2897 = vmatprep.subr.bf16.mxu1 %v3357_v1  ;;  %2891 = vmatprep.mubr.msk.bf16.mxu0 %vm3358_vm0, %v3357_v1 }
  0x30   : > { %2911 = vmatprep.mubr.msk.bf16.mxu1 %vm3358_vm0, %v3357_v1 }
  0x31   : > { %2878 = vmatpush3.bf16.msra.mxu0 %v3223_v23  ;;  %v3274_v23 = vld [vmem:[%s4052_s1 + $0x68] sm:$0xff]  }
  0x32   : > { %2898 = vmatpush3.bf16.msra.mxu1 %v3224_v24  ;;  %2879 = vmatprep.subr.bf16.mxu0 %v3357_v1  ;;  %v3275_v24 = vld [vmem:[%s4052_s1 + $0x220] sm:$0xff]  }
  0x33   : > { %2899 = vmatprep.subr.bf16.mxu1 %v3357_v1 }
  0x35   : > { %2880 = vmatpush3.bf16.msra.mxu0 %v3225_v25  ;;  %v3276_v25 = vld [vmem:[%s4052_s1 + $0x60] sm:$0xff]  }
  0x36   : > { %2900 = vmatpush3.bf16.msra.mxu1 %v3226_v26  ;;  %2881 = vmatprep.subr.bf16.mxu0 %v3357_v1  ;;  %v3277_v26 = vld [vmem:[%s4052_s1 + $0x218] sm:$0xff]  }
  0x37   : > { %2901 = vmatprep.subr.bf16.mxu1 %v3357_v1 }
  0x39   : > { %2882 = vmatpush3.bf16.msra.mxu0 %v3227_v27  ;;  %v3278_v27 = vld [vmem:[%s4052_s1 + $0x58] sm:$0xff]  }
  0x3a   : > { %2902 = vmatpush3.bf16.msra.mxu1 %v3228_v28  ;;  %2883 = vmatprep.subr.bf16.mxu0 %v3357_v1  ;;  %v3279_v28 = vld [vmem:[%s4052_s1 + $0x210] sm:$0xff]  }
  0x3b   : > { %2903 = vmatprep.subr.bf16.mxu1 %v3357_v1 }
  0x3d   : > { %2884 = vmatpush3.bf16.msra.mxu0 %v3229_v29  ;;  %v3280_v29 = vld [vmem:[%s4052_s1 + $0x50] sm:$0xff]  }
  0x3e   : > { %2904 = vmatpush3.bf16.msra.mxu1 %v3230_v30  ;;  %2885 = vmatprep.subr.bf16.mxu0 %v3357_v1  ;;  %v3281_v30 = vld [vmem:[%s4052_s1 + $0x208] sm:$0xff]  }
  0x3f   : > { %2905 = vmatprep.subr.bf16.mxu1 %v3357_v1 }
  0x41   : > { %2886 = vmatpush3.bf16.msra.mxu0 %v3231_v31  ;;  %v3282_v31 = vld [vmem:[%s4052_s1 + $0x48] sm:$0xff]  }
  0x42   : > { %2906 = vmatpush3.bf16.msra.mxu1 %v3232_v32  ;;  %2887 = vmatprep.subr.bf16.mxu0 %v3357_v1  ;;  %v3283_v32 = vld [vmem:[%s4052_s1 + $0x200] sm:$0xff]  }
  0x43   : > { %2907 = vmatprep.subr.bf16.mxu1 %v3357_v1 }
  0x45   : > { %2888 = vmatpush3.bf16.msra.mxu0 %v3233_v33  ;;  %v2434_v33 = vld [vmem:[%s3456_s20 + $0xa] sm:$0x3] }
  0x46   : > { %2908 = vmatpush3.bf16.msra.mxu1 %v3234_v34  ;;  %2889 = vmatprep.subr.bf16.mxu0 %v3357_v1  ;;  %v3284_v34 = vld [vmem:[%s4052_s1 + $0x40] sm:$0xff]  }
  0x47   : > { %2909 = vmatprep.subr.bf16.mxu1 %v3357_v1 }
  0x49   : > { %2890 = vmatpush3.bf16.msra.mxu0 %v3235_v35  ;;  %v2460_v35 = vld [vmem:[%s3456_s20 + $0x5] sm:$0x3] }
  0x4a   : > { %2910 = vmatpush3.bf16.msra.mxu1 %v3236_v36  ;;  %2915 = vmatprep.subr.bf16.mxu0 %v3357_v1  ;;  %v1047_v36 = vpack.c.bf16 %v2434_v33, %v2434_v33  ;;  %v1192_v37 = vpack.c.bf16 %v2460_v35, %v2460_v35  ;;  %v3326_v33 = vld [vmem:[%s4052_s1 + $0x198] sm:$0xff]   ;;  %v3328_v35 = vld [vmem:[%s4052_s1 + $0x190] sm:$0xff]  }
  0x4b   : > { %2935 = vmatprep.subr.bf16.mxu1 %v3357_v1 }
  0x4c   : > { %2892 = vmatmul.mubr.bf16.vlgmr.msra.gmra.mxu0 %v397_v39  ;;  %v3286_v39 = vld [vmem:[%s4052_s1 + $0xb8] sm:$0xff]  }
  0x4d   : > { %2912 = vmatmul.mubr.bf16.vlgmr.msra.gmra.mxu1 %v506_v40  ;;  %2916 = vmatpush3.bf16.msra.mxu0 %v3237_v41  ;;  %v3287_v40 = vld [vmem:[%s4052_s1 + $0x30] sm:$0xff]  }
  0x4e   : > { %2936 = vmatpush3.bf16.msra.mxu1 %v3238_v42  ;;  %2917 = vmatprep.subr.bf16.mxu0 %v3357_v1  ;;  %v3288_v41 = vld [vmem:[%s4052_s1 + $0xb0] sm:$0xff]   ;;  %v3289_v42 = vld [vmem:[%s4052_s1 + $0x28] sm:$0xff]  }
  0x4f   : > { %2937 = vmatprep.subr.bf16.mxu1 %v3357_v1  ;;  %2931 = vmatprep.mubr.msk.bf16.mxu0 %vm3358_vm0, %v3357_v1 }
  0x50   : > { %2951 = vmatprep.mubr.msk.bf16.mxu1 %vm3358_vm0, %v3357_v1 }
  0x51   : > { %2918 = vmatpush3.bf16.msra.mxu0 %v3239_v43  ;;  %v3290_v43 = vld [vmem:[%s4052_s1 + $0xa8] sm:$0xff]  }
  0x52   : > { %2938 = vmatpush3.bf16.msra.mxu1 %v3240_v44  ;;  %2919 = vmatprep.subr.bf16.mxu0 %v3357_v1  ;;  %v3291_v44 = vld [vmem:[%s4052_s1 + $0x20] sm:$0xff]  }
  0x53   : > { %2939 = vmatprep.subr.bf16.mxu1 %v3357_v1 }
  0x55   : > { %2920 = vmatpush3.bf16.msra.mxu0 %v3241_v45  ;;  %v3292_v45 = vld [vmem:[%s4052_s1 + $0xa0] sm:$0xff]  }
  0x56   : > { %2940 = vmatpush3.bf16.msra.mxu1 %v3242_v46  ;;  %2921 = vmatprep.subr.bf16.mxu0 %v3357_v1  ;;  %v3293_v46 = vld [vmem:[%s4052_s1 + $0x18] sm:$0xff]  }
  0x57   : > { %2941 = vmatprep.subr.bf16.mxu1 %v3357_v1 }
  0x59   : > { %2922 = vmatpush3.bf16.msra.mxu0 %v3243_v47  ;;  %v3294_v47 = vld [vmem:[%s4052_s1 + $0x98] sm:$0xff]  }
  0x5a   : > { %2942 = vmatpush3.bf16.msra.mxu1 %v3244_v48  ;;  %2923 = vmatprep.subr.bf16.mxu0 %v3357_v1  ;;  %v3295_v48 = vld [vmem:[%s4052_s1 + $0x10] sm:$0xff]  }
  0x5b   : > { %2943 = vmatprep.subr.bf16.mxu1 %v3357_v1 }
  0x5d   : > { %2924 = vmatpush3.bf16.msra.mxu0 %v3245_v49  ;;  %v3296_v49 = vld [vmem:[%s4052_s1 + $0x90] sm:$0xff]  }
  0x5e   : > { %2944 = vmatpush3.bf16.msra.mxu1 %v3246_v50  ;;  %2925 = vmatprep.subr.bf16.mxu0 %v3357_v1  ;;  %v3297_v50 = vld [vmem:[%s4052_s1 + $0x8] sm:$0xff]  }
  0x5f   : > { %2945 = vmatprep.subr.bf16.mxu1 %v3357_v1 }
  0x61   : > { %2926 = vmatpush3.bf16.msra.mxu0 %v3247_v51  ;;  %v3298_v51 = vld [vmem:[%s4052_s1 + $0x88] sm:$0xff]  }
  0x62   : > { %2946 = vmatpush3.bf16.msra.mxu1 %v3248_v52  ;;  %2927 = vmatprep.subr.bf16.mxu0 %v3357_v1  ;;  %v3299_v52 = vld [vmem:[%s4052_s1] sm:$0xff]  }
  0x63   : > { %2947 = vmatprep.subr.bf16.mxu1 %v3357_v1 }
  0x65   : > { %2928 = vmatpush3.bf16.msra.mxu0 %v3249_v53  ;;  %v2459_v53 = vld [vmem:[%s3456_s20 + $0x4] sm:$0x3] }
  0x66   : > { %2948 = vmatpush3.bf16.msra.mxu1 %v3250_v54  ;;  %2929 = vmatprep.subr.bf16.mxu0 %v3357_v1  ;;  %v3300_v54 = vld [vmem:[%s4052_s1 + $0x80] sm:$0xff]  }
  0x67   : > { %2949 = vmatprep.subr.bf16.mxu1 %v3357_v1 }
  0x69   : > { %2930 = vmatpush3.bf16.msra.mxu0 %v3251_v55  ;;  %v2493_v55 = vld [vmem:[%s3456_s20 + $0x6] sm:$0x3] }
  0x6a   : > { %2950 = vmatpush3.bf16.msra.mxu1 %v3252_v56  ;;  %2955 = vmatprep.subr.bf16.mxu0 %v3357_v1  ;;  %v1174_v56 = vpack.c.bf16 %v2459_v53, %v2459_v53  ;;  %v1386_v57 = vpack.c.bf16 %v2493_v55, %v2493_v55 }
  0x6b   : > { %2975 = vmatprep.subr.bf16.mxu1 %v3357_v1 }
  0x6c   : > { %2932 = vmatmul.mubr.bf16.vlgmr.msra.gmra.mxu0 %v614_v59  ;;  %v3302_v59 = vld [vmem:[%s4052_s1 + $0x138] sm:$0xff]  }
  0x6d   : > { %2952 = vmatmul.mubr.bf16.vlgmr.msra.gmra.mxu1 %v722_v60  ;;  %2956 = vmatpush3.bf16.msra.mxu0 %v3253_v61  ;;  %v3303_v60 = vld [vmem:[%s4052_s1 + $0xf0] sm:$0xff]  }
  0x6e   : > { %2976 = vmatpush3.bf16.msra.mxu1 %v3254_v62  ;;  %2957 = vmatprep.subr.bf16.mxu0 %v3357_v1  ;;  %v3304_v61 = vld [vmem:[%s4052_s1 + $0x130] sm:$0xff]   ;;  %v3305_v62 = vld [vmem:[%s4052_s1 + $0xe8] sm:$0xff]  }
  0x6f   : > { %2977 = vmatprep.subr.bf16.mxu1 %v3357_v1  ;;  %2971 = vmatprep.mubr.msk.bf16.mxu0 %vm3358_vm0, %v3357_v1 }
  0x70   : > { %2991 = vmatprep.mubr.msk.bf16.mxu1 %vm3358_vm0, %v3357_v1 }
  0x71   : > { %2958 = vmatpush3.bf16.msra.mxu0 %v3255_v63  ;;  %v3306_v63 = vld [vmem:[%s4052_s1 + $0x128] sm:$0xff]  }
  0x72   : > { %2978 = vmatpush3.bf16.msra.mxu1 %v3256_v0  ;;  %2959 = vmatprep.subr.bf16.mxu0 %v3357_v1  ;;  %v3307_v0 = vld [vmem:[%s4052_s1 + $0xe0] sm:$0xff]  }
  0x73   : > { %2979 = vmatprep.subr.bf16.mxu1 %v3357_v1 }
  0x75   : > { %2960 = vmatpush3.bf16.msra.mxu0 %v3257_v2  ;;  %v3308_v2 = vld [vmem:[%s4052_s1 + $0x120] sm:$0xff]  }
  0x76   : > { %2980 = vmatpush3.bf16.msra.mxu1 %v3258_v3  ;;  %2961 = vmatprep.subr.bf16.mxu0 %v3357_v1  ;;  %v3309_v3 = vld [vmem:[%s4052_s1 + $0xd8] sm:$0xff]  }
  0x77   : > { %2981 = vmatprep.subr.bf16.mxu1 %v3357_v1 }
  0x79   : > { %2962 = vmatpush3.bf16.msra.mxu0 %v3259_v4  ;;  %v3310_v4 = vld [vmem:[%s4052_s1 + $0x118] sm:$0xff]  }
  0x7a   : > { %2982 = vmatpush3.bf16.msra.mxu1 %v3260_v5  ;;  %2963 = vmatprep.subr.bf16.mxu0 %v3357_v1  ;;  %v3311_v5 = vld [vmem:[%s4052_s1 + $0xd0] sm:$0xff]  }
  0x7b   : > { %2983 = vmatprep.subr.bf16.mxu1 %v3357_v1 }
  0x7d   : > { %2964 = vmatpush3.bf16.msra.mxu0 %v3261_v6  ;;  %v3312_v6 = vld [vmem:[%s4052_s1 + $0x110] sm:$0xff]  }
  0x7e   : > { %2984 = vmatpush3.bf16.msra.mxu1 %v3262_v7  ;;  %2965 = vmatprep.subr.bf16.mxu0 %v3357_v1  ;;  %v3313_v7 = vld [vmem:[%s4052_s1 + $0xc8] sm:$0xff]  }
  0x7f   : > { %2985 = vmatprep.subr.bf16.mxu1 %v3357_v1 }
  0x81   : > { %2966 = vmatpush3.bf16.msra.mxu0 %v3263_v8  ;;  %v3314_v8 = vld [vmem:[%s4052_s1 + $0x108] sm:$0xff]  }
  0x82   : > { %2986 = vmatpush3.bf16.msra.mxu1 %v3264_v9  ;;  %2967 = vmatprep.subr.bf16.mxu0 %v3357_v1  ;;  %v3315_v9 = vld [vmem:[%s4052_s1 + $0xc0] sm:$0xff]  }
  0x83   : > { %2987 = vmatprep.subr.bf16.mxu1 %v3357_v1 }
  0x85   : > { %2968 = vmatpush3.bf16.msra.mxu0 %v3265_v10  ;;  %v2518_v10 = vld [vmem:[%s3456_s20 + $0x8] sm:$0x3] }
  0x86   : > { %2988 = vmatpush3.bf16.msra.mxu1 %v3266_v11  ;;  %2969 = vmatprep.subr.bf16.mxu0 %v3357_v1  ;;  %v3316_v11 = vld [vmem:[%s4052_s1 + $0x100] sm:$0xff]  }
  0x87   : > { %2989 = vmatprep.subr.bf16.mxu1 %v3357_v1 }
  0x89   : > { %2970 = vmatpush3.bf16.msra.mxu0 %v3267_v12  ;;  %v2543_v12 = vld [vmem:[%s3456_s20 + $0x9] sm:$0x3] }
  0x8a   : > { %2990 = vmatpush3.bf16.msra.mxu1 %v3268_v13  ;;  %2995 = vmatprep.subr.bf16.mxu0 %v3357_v1  ;;  %v1493_v13 = vpack.c.bf16 %v2518_v10, %v2518_v10  ;;  %v1600_v14 = vpack.c.bf16 %v2543_v12, %v2543_v12 }
  0x8b   : > { %3015 = vmatprep.subr.bf16.mxu1 %v3357_v1 }
  0x8c   : > { %2972 = vmatmul.mubr.bf16.vlgmr.msra.gmra.mxu0 %v831_v16  ;;  %v3318_v16 = vld [vmem:[%s4052_s1 + $0x1b8] sm:$0xff]  }
  0x8d   : > { %2992 = vmatmul.mubr.bf16.vlgmr.msra.gmra.mxu1 %v939_v17  ;;  %2996 = vmatpush3.bf16.msra.mxu0 %v3269_v18 }
  0x8e   : > { %3016 = vmatpush3.bf16.msra.mxu1 %v3270_v19  ;;  %2997 = vmatprep.subr.bf16.mxu0 %v3357_v1  ;;  %v3319_v19 = vld [vmem:[%s4052_s1 + $0x170] sm:$0xff]  }
  0x8f   : > { %3017 = vmatprep.subr.bf16.mxu1 %v3357_v1  ;;  %3011 = vmatprep.mubr.msk.bf16.mxu0 %vm3358_vm0, %v3357_v1 }
  0x90   : > { %3031 = vmatprep.mubr.msk.bf16.mxu1 %vm3358_vm0, %v3357_v1 }
  0x91   : > { %2998 = vmatpush3.bf16.msra.mxu0 %v3271_v20 }
  0x92   : > { %3018 = vmatpush3.bf16.msra.mxu1 %v3272_v21  ;;  %2999 = vmatprep.subr.bf16.mxu0 %v3357_v1 }
  0x93   : > { %3019 = vmatprep.subr.bf16.mxu1 %v3357_v1 }
  0x95   : > { %3000 = vmatpush3.bf16.msra.mxu0 %v3273_v22  ;;  %v3320_v22 = vld [vmem:[%s4052_s1 + $0x1b0] sm:$0xff]  }
  0x96   : > { %3020 = vmatpush3.bf16.msra.mxu1 %v3274_v23  ;;  %3001 = vmatprep.subr.bf16.mxu0 %v3357_v1 }
  0x97   : > { %3021 = vmatprep.subr.bf16.mxu1 %v3357_v1 }
  0x99   : > { %3002 = vmatpush3.bf16.msra.mxu0 %v3275_v24 }
  0x9a   : > { %3022 = vmatpush3.bf16.msra.mxu1 %v3276_v25  ;;  %3003 = vmatprep.subr.bf16.mxu0 %v3357_v1 }
  0x9b   : > { %3023 = vmatprep.subr.bf16.mxu1 %v3357_v1 }
  0x9d   : > { %3004 = vmatpush3.bf16.msra.mxu0 %v3277_v26  ;;  %v3321_v26 = vld [vmem:[%s4052_s1 + $0x168] sm:$0xff]  }
  0x9e   : > { %3024 = vmatpush3.bf16.msra.mxu1 %v3278_v27  ;;  %3005 = vmatprep.subr.bf16.mxu0 %v3357_v1 }
  0x9f   : > { %3025 = vmatprep.subr.bf16.mxu1 %v3357_v1 }
  0xa1   : > { %3006 = vmatpush3.bf16.msra.mxu0 %v3279_v28  ;;  %v3322_v28 = vld [vmem:[%s4052_s1 + $0x1a8] sm:$0xff]  }
  0xa2   : > { %3026 = vmatpush3.bf16.msra.mxu1 %v3280_v29  ;;  %3007 = vmatprep.subr.bf16.mxu0 %v3357_v1 }
  0xa3   : > { %3027 = vmatprep.subr.bf16.mxu1 %v3357_v1 }
  0xa5   : > { %3008 = vmatpush3.bf16.msra.mxu0 %v3281_v30  ;;  %v3323_v30 = vld [vmem:[%s4052_s1 + $0x160] sm:$0xff]  }
  0xa6   : > { %3028 = vmatpush3.bf16.msra.mxu1 %v3282_v31  ;;  %3009 = vmatprep.subr.bf16.mxu0 %v3357_v1  ;;  %v3324_v31 = vld [vmem:[%s4052_s1 + $0x1a0] sm:$0xff]  }
  0xa7   : > { %3029 = vmatprep.subr.bf16.mxu1 %v3357_v1 }
  0xa9   : > { %3010 = vmatpush3.bf16.msra.mxu0 %v3283_v32  ;;  %v3325_v32 = vld [vmem:[%s4052_s1 + $0x158] sm:$0xff]  }
  0xaa   : > { %3030 = vmatpush3.bf16.msra.mxu1 %v3284_v34  ;;  %3035 = vmatprep.subr.bf16.mxu0 %v3357_v1  ;;  %v3327_v34 = vld [vmem:[%s4052_s1 + $0x150] sm:$0xff]  }
  0xab   : > { %3055 = vmatprep.subr.bf16.mxu1 %v3357_v1 }
  0xac   : > { %3012 = vmatmul.mubr.bf16.vlgmr.msra.gmra.mxu0 %v1047_v36  ;;  %v3329_v36 = vld [vmem:[%s4052_s1 + $0x148] sm:$0xff]  }
  0xad   : > { %3032 = vmatmul.mubr.bf16.vlgmr.msra.gmra.mxu1 %v1192_v37  ;;  %3036 = vmatpush3.bf16.msra.mxu0 %v3285_v38  ;;  %v3330_v37 = vld [vmem:[%s4052_s1 + $0x188] sm:$0xff]   ;;  %v3331_v38 = vld [vmem:[%s4052_s1 + $0x140] sm:$0xff]  }
  0xae   : > { %3056 = vmatpush3.bf16.msra.mxu1 %v3286_v39  ;;  %3037 = vmatprep.subr.bf16.mxu0 %v3357_v1  ;;  %v2568_v39 = vld [vmem:[%s3456_s20 + $0xa] sm:$0x3] }
  0xaf   : > { %3057 = vmatprep.subr.bf16.mxu1 %v3357_v1  ;;  %3051 = vmatprep.mubr.msk.bf16.mxu0 %vm3358_vm0, %v3357_v1 }
  0xb0   : > { %3071 = vmatprep.mubr.msk.bf16.mxu1 %vm3358_vm0, %v3357_v1 }
  0xb1   : > { %3038 = vmatpush3.bf16.msra.mxu0 %v3287_v40  ;;  %v3332_v40 = vld [vmem:[%s4052_s1 + $0x180] sm:$0xff]  }
  0xb2   : > { %3058 = vmatpush3.bf16.msra.mxu1 %v3288_v41  ;;  %3039 = vmatprep.subr.bf16.mxu0 %v3357_v1  ;;  %v2593_v41 = vld [vmem:[%s3456_s20 + $0xc] sm:$0x3] }
  0xb3   : > { %3059 = vmatprep.subr.bf16.mxu1 %v3357_v1 }
  0xb5   : > { %3040 = vmatpush3.bf16.msra.mxu0 %v3289_v42  ;;  %v1707_v42 = vpack.c.bf16 %v2568_v39, %v2568_v39 }
  0xb6   : > { %3060 = vmatpush3.bf16.msra.mxu1 %v3290_v43  ;;  %3041 = vmatprep.subr.bf16.mxu0 %v3357_v1  ;;  %v1815_v43 = vpack.c.bf16 %v2593_v41, %v2593_v41 }
  0xb7   : > { %3061 = vmatprep.subr.bf16.mxu1 %v3357_v1 }
  0xb9   : > { %3042 = vmatpush3.bf16.msra.mxu0 %v3291_v44  ;;  %v3333_v44 = vld [vmem:[%s4052_s1 + $0x1f8] sm:$0xff]  }
  0xba   : > { %3062 = vmatpush3.bf16.msra.mxu1 %v3292_v45  ;;  %3043 = vmatprep.subr.bf16.mxu0 %v3357_v1  ;;  %v3334_v45 = vld [vmem:[%s4052_s1 + $0x238] sm:$0xff]  }
  0xbb   : > { %3063 = vmatprep.subr.bf16.mxu1 %v3357_v1 }
  0xbd   : > { %3044 = vmatpush3.bf16.msra.mxu0 %v3293_v46 }
  0xbe   : > { %3064 = vmatpush3.bf16.msra.mxu1 %v3294_v47  ;;  %3045 = vmatprep.subr.bf16.mxu0 %v3357_v1 }
  0xbf   : > { %3065 = vmatprep.subr.bf16.mxu1 %v3357_v1 }
  0xc1   : > { %3046 = vmatpush3.bf16.msra.mxu0 %v3295_v48 }
  0xc2   : > { %3066 = vmatpush3.bf16.msra.mxu1 %v3296_v49  ;;  %3047 = vmatprep.subr.bf16.mxu0 %v3357_v1  ;;  %v3335_v49 = vld [vmem:[%s4052_s1 + $0x1f0] sm:$0xff]  }
  0xc3   : > { %3067 = vmatprep.subr.bf16.mxu1 %v3357_v1 }
  0xc5   : > { %3048 = vmatpush3.bf16.msra.mxu0 %v3297_v50 }
  0xc6   : > { %3068 = vmatpush3.bf16.msra.mxu1 %v3298_v51  ;;  %3049 = vmatprep.subr.bf16.mxu0 %v3357_v1  ;;  %v3336_v51 = vld [vmem:[%s4052_s1 + $0x230] sm:$0xff]  }
  0xc7   : > { %3069 = vmatprep.subr.bf16.mxu1 %v3357_v1 }
  0xc9   : > { %3050 = vmatpush3.bf16.msra.mxu0 %v3299_v52 }
  0xca   : > { %3070 = vmatpush3.bf16.msra.mxu1 %v3300_v54  ;;  %3075 = vmatprep.subr.bf16.mxu0 %v3357_v1 }
  0xcb   : > { %3095 = vmatprep.subr.bf16.mxu1 %v3357_v1 }
  0xcc   : > { %3052 = vmatmul.mubr.bf16.vlgmr.msra.gmra.mxu0 %v1174_v56  ;;  %v3337_v56 = vld [vmem:[%s4052_s1 + $0x1e8] sm:$0xff]  }
  0xcd   : > { %3072 = vmatmul.mubr.bf16.vlgmr.msra.gmra.mxu1 %v1386_v57  ;;  %3076 = vmatpush3.bf16.msra.mxu0 %v3301_v58  ;;  %v3338_v58 = vld [vmem:[%s4052_s1 + $0x228] sm:$0xff]  }
  0xce   : > { %3096 = vmatpush3.bf16.msra.mxu1 %v3302_v59  ;;  %3077 = vmatprep.subr.bf16.mxu0 %v3357_v1 }
  0xcf   : > { %3097 = vmatprep.subr.bf16.mxu1 %v3357_v1  ;;  %3091 = vmatprep.mubr.msk.bf16.mxu0 %vm3358_vm0, %v3357_v1 }
  0xd0   : > { %3111 = vmatprep.mubr.msk.bf16.mxu1 %vm3358_vm0, %v3357_v1 }
  0xd1   : > { %3078 = vmatpush3.bf16.msra.mxu0 %v3303_v60  ;;  %v3339_v60 = vld [vmem:[%s4052_s1 + $0x1e0] sm:$0xff]  }
  0xd2   : > { %3098 = vmatpush3.bf16.msra.mxu1 %v3304_v61  ;;  %3079 = vmatprep.subr.bf16.mxu0 %v3357_v1  ;;  %v3340_v61 = vld [vmem:[%s4052_s1 + $0x220] sm:$0xff]  }
  0xd3   : > { %3099 = vmatprep.subr.bf16.mxu1 %v3357_v1 }
  0xd5   : > { %3080 = vmatpush3.bf16.msra.mxu0 %v3305_v62  ;;  %v3341_v62 = vld [vmem:[%s4052_s1 + $0x1d8] sm:$0xff]  }
  0xd6   : > { %3100 = vmatpush3.bf16.msra.mxu1 %v3306_v63  ;;  %3081 = vmatprep.subr.bf16.mxu0 %v3357_v1  ;;  %v3342_v63 = vld [vmem:[%s4052_s1 + $0x218] sm:$0xff]  }
  0xd7   : > { %3101 = vmatprep.subr.bf16.mxu1 %v3357_v1 }
  0xd9   : > { %3082 = vmatpush3.bf16.msra.mxu0 %v3307_v0  ;;  %v3343_v0 = vld [vmem:[%s4052_s1 + $0x1d0] sm:$0xff]  }
  0xda   : > { %3102 = vmatpush3.bf16.msra.mxu1 %v3308_v2  ;;  %3083 = vmatprep.subr.bf16.mxu0 %v3357_v1  ;;  %v3344_v2 = vld [vmem:[%s4052_s1 + $0x210] sm:$0xff]  }
  0xdb   : > { %3103 = vmatprep.subr.bf16.mxu1 %v3357_v1 }
  0xdd   : > { %3084 = vmatpush3.bf16.msra.mxu0 %v3309_v3  ;;  %v3345_v3 = vld [vmem:[%s4052_s1 + $0x1c8] sm:$0xff]  }
  0xde   : > { %3104 = vmatpush3.bf16.msra.mxu1 %v3310_v4  ;;  %3085 = vmatprep.subr.bf16.mxu0 %v3357_v1  ;;  %v3346_v4 = vld [vmem:[%s4052_s1 + $0x208] sm:$0xff]  }
  0xdf   : > { %3105 = vmatprep.subr.bf16.mxu1 %v3357_v1 }
  0xe1   : > { %3086 = vmatpush3.bf16.msra.mxu0 %v3311_v5  ;;  %v3347_v5 = vld [vmem:[%s4052_s1 + $0x1c0] sm:$0xff]  }
  0xe2   : > { %3106 = vmatpush3.bf16.msra.mxu1 %v3312_v6  ;;  %3087 = vmatprep.subr.bf16.mxu0 %v3357_v1  ;;  %v2618_v6 = vld [vmem:[%s3456_s20 + $0xd] sm:$0x3] }
  0xe3   : > { %3107 = vmatprep.subr.bf16.mxu1 %v3357_v1 }
  0xe5   : > { %3088 = vmatpush3.bf16.msra.mxu0 %v3313_v7  ;;  %v3348_v7 = vld [vmem:[%s4052_s1 + $0x200] sm:$0xff]  }
  0xe6   : > { %3108 = vmatpush3.bf16.msra.mxu1 %v3314_v8  ;;  %3089 = vmatprep.subr.bf16.mxu0 %v3357_v1  ;;  %v2643_v8 = vld [vmem:[%s3456_s20 + $0xe] sm:$0x3]  ;;  %s2672_s20 = sshll.u32 %s4056_s13, 2 }
  0xe7   : > { %3109 = vmatprep.subr.bf16.mxu1 %v3357_v1  ;;  %v2029_v10 = vpack.c.bf16 %v2643_v8, %v2643_v8  ;;  %s4036_s18 = scalar_lea.vmem %s4053_s2, %s2672_s20 }
  0xe9   : > { %3090 = vmatpush3.bf16.msra.mxu0 %v3315_v9  ;;  %v1922_v9 = vpack.c.bf16 %v2618_v6, %v2618_v6 }
  0xea   : > { %3110 = vmatpush3.bf16.msra.mxu1 %v3316_v11  ;;  %3115 = vmatprep.subr.bf16.mxu0 %v3357_v1 }
  0xeb   : > { %3135 = vmatprep.subr.bf16.mxu1 %v3357_v1 }
  0xec   : > { %v302_v17 = vpop.f32.mrf.mxu0  ;;  %3092 = vmatmul.mubr.bf16.vlgmr.msra.gmra.mxu0 %v1493_v13 }
  0xed   : > { %v390_v18 = vpop.f32.mrf.mxu1  ;;  %3112 = vmatmul.mubr.bf16.vlgmr.msra.gmra.mxu1 %v1600_v14  ;;  %3116 = vmatpush3.bf16.msra.mxu0 %v3317_v15 }
  0xee   : > { %v391_v20 = vadd.f32 %v390_v18, %v302_v17  ;;  %3136 = vmatpush3.bf16.msra.mxu1 %v3318_v16  ;;  %v2853_v21 = vpop.f32.mrf.mxu0  ;;  %3117 = vmatprep.subr.bf16.mxu0 %v3357_v1 }
  0xef   : > { %v2873_v23 = vpop.f32.mrf.mxu1  ;;  %3137 = vmatprep.subr.bf16.mxu1 %v3357_v1  ;;  %3131 = vmatprep.mubr.msk.bf16.mxu0 %vm3358_vm0, %v3357_v1 }
  0xf0   : > { %v305_v24 = vpop.f32.mrf.mxu0  ;;  %3151 = vmatprep.mubr.msk.bf16.mxu1 %vm3358_vm0, %v3357_v1 }
  0xf1   : > { %v393_v25 = vpop.f32.mrf.mxu1  ;;  %3118 = vmatpush3.bf16.msra.mxu0 %v3319_v19 }
  0xf2   : > { %3138 = vmatpush3.bf16.msra.mxu1 %v3320_v22  ;;  %v2854_v27 = vpop.f32.mrf.mxu0  ;;  %3119 = vmatprep.subr.bf16.mxu0 %v3357_v1 }
  0xf3   : > { %v2874_v29 = vpop.f32.mrf.mxu1  ;;  %3139 = vmatprep.subr.bf16.mxu1 %v3357_v1 }
  0xf5   : > { %3120 = vmatpush3.bf16.msra.mxu0 %v3321_v26 }
  0xf6   : > { %3140 = vmatpush3.bf16.msra.mxu1 %v3322_v28  ;;  %3121 = vmatprep.subr.bf16.mxu0 %v3357_v1 }
  0xf7   : > { %3141 = vmatprep.subr.bf16.mxu1 %v3357_v1 }
  0xf9   : > { %3122 = vmatpush3.bf16.msra.mxu0 %v3323_v30 }
  0xfa   : > { %3142 = vmatpush3.bf16.msra.mxu1 %v3324_v31  ;;  %3123 = vmatprep.subr.bf16.mxu0 %v3357_v1 }
  0xfb   : > { %3143 = vmatprep.subr.bf16.mxu1 %v3357_v1 }
  0xfd   : > { %3124 = vmatpush3.bf16.msra.mxu0 %v3325_v32 }
  0xfe   : > { %3144 = vmatpush3.bf16.msra.mxu1 %v3326_v33  ;;  %3125 = vmatprep.subr.bf16.mxu0 %v3357_v1 }
  0xff   : > { %3145 = vmatprep.subr.bf16.mxu1 %v3357_v1 }
 0x101   : > { %3126 = vmatpush3.bf16.msra.mxu0 %v3327_v34 }
 0x102   : > { %3146 = vmatpush3.bf16.msra.mxu1 %v3328_v35  ;;  %3127 = vmatprep.subr.bf16.mxu0 %v3357_v1 }
 0x103   : > { %3147 = vmatprep.subr.bf16.mxu1 %v3357_v1 }
 0x105   : > { %3128 = vmatpush3.bf16.msra.mxu0 %v3329_v36 }
 0x106   : > { %3148 = vmatpush3.bf16.msra.mxu1 %v3330_v37  ;;  %3129 = vmatprep.subr.bf16.mxu0 %v3357_v1 }
 0x107   : > { %3149 = vmatprep.subr.bf16.mxu1 %v3357_v1 }
 0x109   : > { %3130 = vmatpush3.bf16.msra.mxu0 %v3331_v38 }
 0x10a   : > { %3150 = vmatpush3.bf16.msra.mxu1 %v3332_v40  ;;  %3155 = vmatprep.subr.bf16.mxu0 %v3357_v1 }
 0x10b   : > { %3175 = vmatprep.subr.bf16.mxu1 %v3357_v1 }
 0x10c   : > { %v497_v46 = vpop.f32.mrf.mxu0  ;;  %3132 = vmatmul.mubr.bf16.vlgmr.msra.gmra.mxu0 %v1707_v42 }
 0x10d   : > { %v503_v47 = vadd.f32 %v497_v46, %v391_v20  ;;  %v606_v48 = vpop.f32.mrf.mxu1  ;;  %3152 = vmatmul.mubr.bf16.vlgmr.msra.gmra.mxu1 %v1815_v43  ;;  %3156 = vmatpush3.bf16.msra.mxu0 %v3333_v44 }
 0x10e   : > { %3176 = vmatpush3.bf16.msra.mxu1 %v3334_v45  ;;  %v2893_v50 = vpop.f32.mrf.mxu0  ;;  %3157 = vmatprep.subr.bf16.mxu0 %v3357_v1 }
 0x10f   : > { %v3974_v52 = vadd.f32 %v606_v48, %v503_v47  ;;  %v2913_v53 = vpop.f32.mrf.mxu1  ;;  %3177 = vmatprep.subr.bf16.mxu1 %v3357_v1  ;;  %3171 = vmatprep.mubr.msk.bf16.mxu0 %vm3358_vm0, %v3357_v1 }
 0x110   : > { %v500_v54 = vpop.f32.mrf.mxu0  ;;  %3191 = vmatprep.mubr.msk.bf16.mxu1 %vm3358_vm0, %v3357_v1 }
 0x111   : > { %v609_v55 = vpop.f32.mrf.mxu1  ;;  %3158 = vmatpush3.bf16.msra.mxu0 %v3335_v49 }
 0x112   : > { %3178 = vmatpush3.bf16.msra.mxu1 %v3336_v51  ;;  %v2894_v57 = vpop.f32.mrf.mxu0  ;;  %3159 = vmatprep.subr.bf16.mxu0 %v3357_v1 }
 0x113   : > { %v2914_v59 = vpop.f32.mrf.mxu1  ;;  %3179 = vmatprep.subr.bf16.mxu1 %v3357_v1 }
 0x115   : > { %3160 = vmatpush3.bf16.msra.mxu0 %v3337_v56 }
 0x116   : > { %3180 = vmatpush3.bf16.msra.mxu1 %v3338_v58  ;;  %3161 = vmatprep.subr.bf16.mxu0 %v3357_v1 }
 0x117   : > { %3181 = vmatprep.subr.bf16.mxu1 %v3357_v1 }
 0x119   : > { %3162 = vmatpush3.bf16.msra.mxu0 %v3339_v60 }
 0x11a   : > { %3182 = vmatpush3.bf16.msra.mxu1 %v3340_v61  ;;  %3163 = vmatprep.subr.bf16.mxu0 %v3357_v1 }
 0x11b   : > { %3183 = vmatprep.subr.bf16.mxu1 %v3357_v1 }
 0x11d   : > { %3164 = vmatpush3.bf16.msra.mxu0 %v3341_v62 }
 0x11e   : > { %3184 = vmatpush3.bf16.msra.mxu1 %v3342_v63  ;;  %3165 = vmatprep.subr.bf16.mxu0 %v3357_v1 }
 0x11f   : > { %3185 = vmatprep.subr.bf16.mxu1 %v3357_v1 }
 0x121   : > { %3166 = vmatpush3.bf16.msra.mxu0 %v3343_v0 }
 0x122   : > { %3186 = vmatpush3.bf16.msra.mxu1 %v3344_v2  ;;  %3167 = vmatprep.subr.bf16.mxu0 %v3357_v1 }
 0x123   : > { %3187 = vmatprep.subr.bf16.mxu1 %v3357_v1 }
 0x125   : > { %3168 = vmatpush3.bf16.msra.mxu0 %v3345_v3 }
 0x126   : > { %3188 = vmatpush3.bf16.msra.mxu1 %v3346_v4  ;;  %3169 = vmatprep.subr.bf16.mxu0 %v3357_v1 }
 0x127   : > { %3189 = vmatprep.subr.bf16.mxu1 %v3357_v1 }
 0x129   : > { %3170 = vmatpush3.bf16.msra.mxu0 %v3347_v5 }
 0x12a   : > { %3190 = vmatpush3.bf16.msra.mxu1 %v3348_v7 }
 0x12c   : > { %v714_v11 = vpop.f32.mrf.mxu0  ;;  %3172 = vmatmul.mubr.bf16.vlgmr.msra.gmra.mxu0 %v1922_v9 }
 0x12d   : > { %v822_v12 = vpop.f32.mrf.mxu1  ;;  %3192 = vmatmul.mubr.bf16.vlgmr.msra.gmra.mxu1 %v2029_v10  ;;  %v720_v26 = vadd.f32 %v714_v11, %v3974_v52 }
 0x12e   : > { %v2933_v13 = vpop.f32.mrf.mxu0 }
 0x12f   : > { %v2953_v14 = vpop.f32.mrf.mxu1  ;;  %v828_v27 = vadd.f32 %v822_v12, %v720_v26 }
 0x130   : > { %v717_v15 = vpop.f32.mrf.mxu0 }
 0x131   : > { %v825_v16 = vpop.f32.mrf.mxu1 }
 0x132   : > { %v2934_v17 = vpop.f32.mrf.mxu0 }
 0x133   : > { %v2954_v18 = vpop.f32.mrf.mxu1 }
 0x14c   : > { %v931_v19 = vpop.f32.mrf.mxu0 }
 0x14d   : > { %v1039_v20 = vpop.f32.mrf.mxu1  ;;  %v937_v28 = vadd.f32 %v931_v19, %v828_v27 }
 0x14e   : > { %v2973_v21 = vpop.f32.mrf.mxu0 }
 0x14f   : > { %v2993_v22 = vpop.f32.mrf.mxu1  ;;  %v1045_v29 = vadd.f32 %v1039_v20, %v937_v28 }
 0x150   : > { %v934_v1 = vpop.f32.mrf.mxu0 }
 0x151   : > { %v1042_v23 = vpop.f32.mrf.mxu1 }
 0x152   : > { %v2974_v24 = vpop.f32.mrf.mxu0 }
 0x153   : > { %v2994_v25 = vpop.f32.mrf.mxu1 }
 0x16c   : > { %v1147_v30 = vpop.f32.mrf.mxu0 }
 0x16d   : > { %v1153_v31 = vadd.f32 %v1147_v30, %v1045_v29  ;;  %v1291_v32 = vpop.f32.mrf.mxu1 }
 0x16e   : > { %v3013_v33 = vpop.f32.mrf.mxu0 }
 0x16f   : > { %1154 = vst [vmem:[%s4036_s18] sm:$0x3] %v1153_v31  ;;  %v3033_v34 = vpop.f32.mrf.mxu1  ;;  %v1164_v3 = vmul.f32 %v1153_v31, %v1153_v31  ;;  %v1156_v4 = vsel %vm1155_vm1, %v1153_v31, 0.0 }
 0x170   : > { %v1150_v35 = vpop.f32.mrf.mxu0  ;;  %v1157_v8 = vrot.slane %v1156_v4, 4 }
 0x171   : > { %v1294_v36 = vpop.f32.mrf.mxu1  ;;  %v1165_v6 = vsel %vm1155_vm1, %v1164_v3, 0.0 }
 0x172   : > { %v3014_v37 = vpop.f32.mrf.mxu0  ;;  %v1166_v9 = vrot.slane %v1165_v6, 4  ;;  %v1158_v11 = vadd.f32 %v1157_v8, %v1156_v4 }
 0x173   : > { %v3034_v38 = vpop.f32.mrf.mxu1 }
 0x174   : > { %v1167_v15 = vadd.f32 %v1166_v9, %v1165_v6  ;;  %v1159_v19 = vrot.slane %v1158_v11, 2 }
 0x176   : > { %v1168_v23 = vrot.slane %v1167_v15, 2  ;;  %v1160_v28 = vadd.f32 %v1159_v19, %v1158_v11 }
 0x178   : > { %v1169_v31 = vadd.f32 %v1168_v23, %v1167_v15  ;;  %v1161_v34 = vrot.slane %v1160_v28, 1 }
 0x17a   : > { %v1170_v37 = vrot.slane %v1169_v31, 1 }
 0x18c   : > { %v1379_v39 = vpop.f32.mrf.mxu0 }
 0x18d   : > { %v1380_v40 = vadd.f32 %v1379_v39, %v1291_v32  ;;  %v1485_v41 = vpop.f32.mrf.mxu1 }
 0x18e   : > { %v3053_v42 = vpop.f32.mrf.mxu0 }
 0x18f   : > { %v1491_v43 = vadd.f32 %v1485_v41, %v1380_v40  ;;  %v3073_v44 = vpop.f32.mrf.mxu1  ;;  %v1162_v40 = vadd.f32 %v1161_v34, %v1160_v28 }
 0x190   : > { %v1382_v45 = vpop.f32.mrf.mxu0 }
 0x191   : > { %v1488_v46 = vpop.f32.mrf.mxu1 }
 0x192   : > { %v3054_v47 = vpop.f32.mrf.mxu0 }
 0x193   : > { %v3074_v48 = vpop.f32.mrf.mxu1 }
 0x1ac   : > { %v1592_v49 = vpop.f32.mrf.mxu0 }
 0x1ad   : > { %v1699_v50 = vpop.f32.mrf.mxu1  ;;  %v1598_v2 = vadd.f32 %v1592_v49, %v1491_v43  ;;  %v1171_v43 = vadd.f32 %v1170_v37, %v1169_v31 }
 0x1ae   : > { %v3093_v51 = vpop.f32.mrf.mxu0 }
 0x1af   : > { %v3113_v52 = vpop.f32.mrf.mxu1  ;;  %v1705_v5 = vadd.f32 %v1699_v50, %v1598_v2 }
 0x1b0   : > { %v1595_v53 = vpop.f32.mrf.mxu0 }
 0x1b1   : > { %v1702_v54 = vpop.f32.mrf.mxu1 }
 0x1b2   : > { %v3094_v55 = vpop.f32.mrf.mxu0 }
 0x1b3   : > { %v3114_v56 = vpop.f32.mrf.mxu1 }
 0x1cc   : > { %v1806_v57 = vpop.f32.mrf.mxu0 }
 0x1cd   : > { %v1914_v58 = vpop.f32.mrf.mxu1  ;;  %v1812_v7 = vadd.f32 %v1806_v57, %v1705_v5 }
 0x1ce   : > { %v3133_v59 = vpop.f32.mrf.mxu0 }
 0x1cf   : > { %v3153_v60 = vpop.f32.mrf.mxu1  ;;  %v1920_v10 = vadd.f32 %v1914_v58, %v1812_v7 }
 0x1d0   : > { %v1809_v61 = vpop.f32.mrf.mxu0 }
 0x1d1   : > { %v1917_v62 = vpop.f32.mrf.mxu1 }
 0x1d2   : > { %v3134_v63 = vpop.f32.mrf.mxu0 }
 0x1d3   : > { %v3154_v0 = vpop.f32.mrf.mxu1 }
 0x1ec   : > { %v2021_v12 = vpop.f32.mrf.mxu0 }
 0x1ed   : > { %v2027_v13 = vadd.f32 %v2021_v12, %v1920_v10  ;;  %v2128_v14 = vpop.f32.mrf.mxu1 }
 0x1ee   : > { %v3173_v16 = vpop.f32.mrf.mxu0 }
 0x1ef   : > { %v2134_v17 = vadd.f32 %v2128_v14, %v2027_v13  ;;  %v3193_v18 = vpop.f32.mrf.mxu1 }
 0x1f0   : > { %v2024_v20 = vpop.f32.mrf.mxu0 }
 0x1f1   : > { %2668 = vst [vmem:[%s4036_s18 + $0x2] sm:$0x3] %v2134_v17  ;;  %v2137_v21 = vsel %vm1155_vm1, %v2134_v17, 0.0  ;;  %v2145_v22 = vmul.f32 %v2134_v17, %v2134_v17  ;;  %v2131_v1 = vpop.f32.mrf.mxu1 }
 0x1f2   : > { %v2138_v24 = vrot.slane %v2137_v21, 4  ;;  %v3174_v25 = vpop.f32.mrf.mxu0 }
 0x1f3   : > { %v2146_v26 = vsel %vm1155_vm1, %v2145_v22, 0.0  ;;  %v3194_v27 = vpop.f32.mrf.mxu1 }
 0x1f4   : > { %v2139_v29 = vadd.f32 %v2138_v24, %v2137_v21  ;;  %v2147_v30 = vrot.slane %v2146_v26, 4 }
 0x1f6   : > { %v2140_v32 = vrot.slane %v2139_v29, 2  ;;  %v2148_v33 = vadd.f32 %v2147_v30, %v2146_v26 }
 0x1f8   : > { %v2141_v35 = vadd.f32 %v2140_v32, %v2139_v29  ;;  %v2149_v36 = vrot.slane %v2148_v33, 2 }
 0x1fa   : > { %v2142_v38 = vrot.slane %v2141_v35, 1  ;;  %v2150_v39 = vadd.f32 %v2149_v36, %v2148_v33 }
 0x1fc   : > { %v2143_v41 = vadd.f32 %v2142_v38, %v2141_v35  ;;  %v2151_v42 = vrot.slane %v2150_v39, 1 }
 0x1fe   : > { %v2144_v44 = vadd.f32 %v2143_v41, %v1162_v40  ;;  %v2152_v45 = vadd.f32 %v2151_v42, %v2150_v39 }
 0x200   : > { %v2153_v46 = vadd.f32 %v2152_v45, %v1171_v43 }
 0x202   : > { %v2155_v47 = vsel %vm2154_vm2, %v2144_v44, %v2153_v46 }
 0x203   : > { %2156 = vst [vmem:[%s181_s23] sm:$0x3] %v2155_v47 }
 0x204 PF: > { %s14_s12 = sadd.s32 1, %s3355_s12  }
 0x205   : > { %p11_p4 = scmp.ge.s32.totalorder %s14_s12, 4  }
 0x207   :  { %13 = sbr.rel (!%p11_p4) target bundleno = 1 (0x1), region = 82 }

// kernel: resnet_forward.40
= control target key start
LH: loop header
LB: loop body
LE: loop exit
PB: predicated region body
PF: predicated region fallthrough
CT: control target
= control target key end

     0   :  { %vm19_vm0 = vcmask 1041408   ;;  %v78_v11 = vmov 1966171168   ;;  %v37_v13 = vlaneseq  ;;  %s122_s1 = inlined_call_operand.vmem [shape: f32[2,2,128], index: 1, kind: input, shape index: {}]   ;;  %s123_s2 = inlined_call_operand.vmem [shape: f32[1,128], index: 2, kind: input, shape index: {}]   ;;  %s124_s0 = inlined_call_operand.vmem [shape: f32[8,128], index: 0, kind: input, shape index: {}]   ;;  %s125_s3 = inlined_call_operand.vmem [shape: f32[1,128], index: 3, kind: input, shape index: {}]   ;;  %s126_s4 = inlined_call_operand.vmem [shape: f32[8,128], index: 4, kind: output, shape index: {}]  }
   0x1   :  { %v17_v0 = vld [vmem:[%s122_s1] sm:$0x3]  ;;  %v18_v1 = vld [vmem:[%s122_s1 + $0x2] sm:$0x3]  ;;  %v35_v12 = vunpack.c.l.s4 %v78_v11 }
   0x2   :  { %v20_v2 = vsel %vm19_vm0, %v17_v0, 0.0  ;;  %v21_v3 = vsel %vm19_vm0, %v18_v1, 0.0  ;;  %v38_v15 = vshrl.u32 %v37_v13, 7  ;;  %v30_v20 = vld [vmem:[%s123_s2] sm:$0x1] }
   0x3   :  { %v22_v4 = vadd.f32 %v21_v3, %v20_v2  ;;  %v36_v14 = vunpack.c.0.s8 %v35_v12  ;;  %v51_v24 = vld [vmem:[%s125_s3] sm:$0x1] }
   0x4   :  { %v58_v22 = vsub.s32 0, %v38_v15  ;;  %v54_v25 = vld [vmem:[%s124_s0] sm:$0xff] }
   0x5   :  { %v23_v5 = vmul.f32 0.125, %v22_v4  ;;  %v39_v16 = vsub.s32 %v36_v14, %v38_v15 }
   0x7   :  { %v24_v6 = vmul.f32 %v23_v5, %v23_v5 }
   0x9   :  { %v26_v7 = vrot.slane %v24_v6, 7 }
   0xb   :  { %v28_v8 = vsub.f32 %v23_v5, %v26_v7 }
   0xd   :  { %v29_v9 = vmax.f32 %v28_v8, 0.0 }
   0xf   :  { %v31_v10 = vadd.f32 1e-05, %v29_v9 }
  0x11   :  { %76 = vrsqrt.f32 %v31_v10 }
  0x1e   :  { %v77_v17 = vpop.eup %76 }
  0x1f   :  { %v40_v18 = vrot.slane %v77_v17, %v39_v16 }
  0x21   :  { %v41_v19 = vcombine.high %v40_v18, %v40_v18 }
  0x23   :  { %v48_v21 = vrot.slane %v41_v19, %v39_v16 }
  0x25   :  { %v50_v23 = vmul.f32 %v48_v21, %v30_v20 }
  0x27   :  { %v52_v26 = vmul.f32 %v50_v23, %v23_v5  ;;  %v59_v27 = vrot.slane %v50_v23, %v58_v22 }
  0x29   :  { %v53_v28 = vsub.f32 %v51_v24, %v52_v26  ;;  %v61_v29 = vmul.f32 %v59_v27, %v54_v25 }
  0x2b   :  { %v66_v30 = vrot.slane %v53_v28, %v58_v22 }
  0x2d   :  { %v68_v31 = vadd.f32 %v66_v30, %v61_v29 }
  0x2f   :  { %v69_v32 = vmax.f32 %v68_v31, 0.0 }
  0x31   :  { %70 = vst [vmem:[%s126_s4] sm:$0xff] %v69_v32 }

// kernel: resnet_forward.43
= control target key start
LH: loop header
LB: loop body
LE: loop exit
PB: predicated region body
PF: predicated region fallthrough
CT: control target
= control target key end

     0   :  { %vm18_vm0 = vcmask 1043456   ;;  %vm47_vm1 = vcmask 1041409   ;;  %vm50_vm2 = vcmask 1041408   ;;  %vm62_vm3 = vcmask 1024   ;;  %s105_s0 = inlined_call_operand.vmem [shape: f32[2,4,128], index: 0, kind: input, shape index: {}]   ;;  %s106_s2 = inlined_call_operand.<no memory space> [shape: f32[1,1], index: 2, kind: input, shape index: {}]   ;;  %s107_s1 = inlined_call_operand.vmem [shape: f32[1,128], index: 1, kind: input, shape index: {}]   ;;  %s108_s3 = inlined_call_operand.vmem [shape: f32[2,1], index: 3, kind: output, shape index: {}]  }
   0x1   :  { %v16_v0 = vld [vmem:[%s105_s0] sm:$0xf]  ;;  %v17_v1 = vld [vmem:[%s105_s0 + $0x4] sm:$0xf]  ;;  %v8_v2 = vstv %s106_s2 }
   0x2   :  { %v19_v3 = vsel %vm18_vm0, %v16_v0, 0.0  ;;  %v26_v4 = vsel %vm18_vm0, %v17_v1, 0.0  ;;  %9 = vst [vmem:[#allocation2] sm:$0x1] %v8_v2  ;;  %v68_v17 = vld [vmem:[%s107_s1] ss:$0 sm:$0xff] }
   0x3   :  { %v20_v5 = vrot.slane %v19_v3, 4  ;;  %v27_v6 = vrot.slane %v26_v4, 4 }
   0x5   :  { %v21_v7 = vadd.f32 %v20_v5, %v19_v3  ;;  %v28_v8 = vadd.f32 %v27_v6, %v26_v4 }
   0x7   :  { %v22_v9 = vrot.slane %v21_v7, 2  ;;  %v29_v10 = vrot.slane %v28_v8, 2 }
   0x9   :  { %v23_v11 = vadd.f32 %v22_v9, %v21_v7  ;;  %v30_v12 = vadd.f32 %v29_v10, %v28_v8  ;;  %v69_v25 = vld [vmem:[#allocation2] ss:$0 sm:$0xff] }
   0xb   :  { %v24_v13 = vrot.slane %v23_v11, 1  ;;  %v31_v14 = vrot.slane %v30_v12, 1 }
   0xd   :  { %v25_v15 = vadd.f32 %v24_v13, %v23_v11  ;;  %v32_v16 = vadd.f32 %v31_v14, %v30_v12 }
   0xf   :  { %v33_v18 = vmul.f32 0.25, %v25_v15  ;;  %v34_v19 = vmul.f32 0.25, %v32_v16 }
  0x11   :  { %v42_v20 = vmul.f32 %v68_v17, %v33_v18  ;;  %v43_v21 = vmul.f32 %v68_v17, %v34_v19 }
  0x13   :  { %v46_v22 = vrot.slane %v43_v21, 7 }
  0x15   :  { %v48_v23 = vsel %vm47_vm1, %v46_v22, %v42_v20 }
  0x16   :  { %v51_v24 = vsel %vm50_vm2, %v48_v23, 0.0 }
  0x17   :  { %52 = vadd.xlane.f32.xlu0 %v51_v24 }
  0xa0   :  { %v53_v26 = vpop.xlane.xlu0 %52 }
  0xa1   :  { %v61_v27 = vadd.f32 %v69_v25, %v53_v26 }
  0xa3   :  { %63 = vst.msk [vmem:[%s108_s3] sm:$0x3] %vm62_vm3, %v61_v27 }

</bundles_post_ra>
